<compile_context>
chip_gen: v7x
topology: tpu7x:2x2x1
jax: 0.10.0
libtpu: 0.0.40
codegen_flags: <defaults>
</compile_context>

<pallas_src>
import functools

import jax
import jax.numpy as jnp
from jax.experimental import pallas as pl
from jax.experimental.pallas import tpu as pltpu


# ----------------------------------------------------------------------------
# Reduced EfficientNet-B0 style config
# TODO(synk): full timm efficientnet_b0 has 16 MBConv blocks and a 1280-channel
# head; this keeps the identical op structure but reduced depth/width.
# ----------------------------------------------------------------------------
STEM_C = 32
HEAD_C = 128
# (expand_ratio, kernel, stride, out_channels, repeats)
BLOCKS = [
    (1, 3, 1, 16, 1),
    (6, 3, 2, 24, 2),
    (6, 5, 2, 40, 1),
]

VMEM_LIMIT = 32 * 1024 * 1024   # explicit scoped-VMEM headroom (safe on v5e/v6e/v7x)


def _cparams(*semantics):
    return pltpu.CompilerParams(dimension_semantics=tuple(semantics),
                                vmem_limit_bytes=VMEM_LIMIT)


# ----------------------------------------------------------------------------
# Kernel 1: fused matmul + bias + activation (1x1 convs, im2col'd stem conv)
#           (BN scale is pre-folded into the weights host-side.)
# ----------------------------------------------------------------------------
def _matmul_bias_act_kernel(x_ref, w_ref, b_ref, o_ref, *, act):
    # x_ref: [bm, K] bf16, w_ref: [K, N] bf16, b_ref: [1, N] f32, o_ref: [bm, N]
    acc = jnp.dot(x_ref[...], w_ref[...], preferred_element_type=jnp.float32)
    y = acc + b_ref[...]
    if act == "silu":
        y = y * jax.nn.sigmoid(y)
    o_ref[...] = y.astype(o_ref.dtype)


def _choose_bm(M):
    # Large tiles keep the 256-wide v6e/v7x MXU full along M; >=2 grid steps
    # (when M allows) give pipelining and keep both v7x TensorCores busy.
    for bm in (512, 256, 128, 64, 32, 16, 8):
        if M % bm == 0 and M // bm >= 2:
            return bm, M
    if M <= 512:
        return M, M                       # tiny: single full block
    bm = 512                              # large unaligned M: padded tail
    return bm, pl.cdiv(M, bm) * bm


def matmul_bias_act(x, w, bias, act="none", out_dtype=jnp.bfloat16):
    M, K = x.shape
    N = w.shape[1]
    bm, Mp = _choose_bm(M)
    if Mp != M:
        # TODO(synk): a masked tail block would avoid this extra HBM pass; the
        # shapes in this model are always tile-aligned so it never triggers.
        x = jnp.pad(x, ((0, Mp - M), (0, 0)))
    kernel = functools.partial(_matmul_bias_act_kernel, act=act)
    out = pl.pallas_call(
        kernel,
        out_shape=jax.ShapeDtypeStruct((Mp, N), out_dtype),
        grid=(Mp // bm,),
        in_specs=[
            pl.BlockSpec((bm, K), lambda i: (i, 0)),
            pl.BlockSpec((K, N), lambda i: (0, 0)),
            pl.BlockSpec((1, N), lambda i: (0, 0)),
        ],
        out_specs=pl.BlockSpec((bm, N), lambda i: (i, 0)),
        compiler_params=_cparams("parallel"),
    )(x.astype(jnp.bfloat16), w, bias.reshape(1, N).astype(jnp.float32))
    if Mp != M:
        out = out[:M]
    return out


# ----------------------------------------------------------------------------
# Kernel 2: depthwise kxk conv (polyphase, unit-stride taps) + bias + SiLU,
#           row-tiled, with FUSED SE global-average-pool accumulator output.
# ----------------------------------------------------------------------------
def _dwconv_pool_kernel(x_ref, w_ref, b_ref, o_ref, sum_ref, *, k, s):
    # x_ref:   [s*s, Hph, Wph, C] bf16  (polyphase slabs of one padded image)
    # w_ref:   [k*k, 1, 1, C] f32 (BN scale folded in), b_ref: [1, C] f32
    # o_ref:   [1, tho, Wo, C] bf16  (row tile t of the strided output)
    # sum_ref: [1, 1, C] f32   (per-channel sums, accumulated across row tiles)
    _, tho, Wo, C = o_ref.shape
    a_hi = (k - 1) // s
    t = pl.program_id(1)
    row0 = t * tho

    wv = w_ref[...]                      # load weights once (hoisted)
    bv = b_ref[...]

    # Load each polyphase slab once and convert bf16->f32 once
    # (s*s converts instead of k*k per-tap converts).
    slabs = []
    for ph in range(s):
        row_q = []
        for pw in range(s):
            sl = x_ref[pl.ds(ph * s + pw, 1), pl.ds(row0, tho + a_hi), :, :]
            row_q.append(sl[0].astype(jnp.float32))     # (tho+a_hi, Wph, C)
        slabs.append(row_q)

    acc = jnp.zeros((tho, Wo, C), jnp.float32)
    for kh in range(k):
        ph, oh = kh % s, kh // s
        for kw in range(k):
            pw, ow = kw % s, kw // s
            tap = slabs[ph][pw][oh:oh + tho, ow:ow + Wo, :]
            acc = acc + tap * wv[kh * k + kw]            # (1,1,C) broadcast
    y = acc + bv
    y = y * jax.nn.sigmoid(y)            # SiLU

    o_ref[...] = y[None].astype(o_ref.dtype)

    # Fused SE global-average-pool: channel sums accumulated across the row-tile
    # axis (divided by H*W inside the SE/project kernel).
    @pl.when(t == 0)
    def _():
        sum_ref[...] = jnp.zeros(sum_ref.shape, sum_ref.dtype)

    sum_ref[...] += jnp.sum(y, axis=(0, 1))[None, None, :]


def _choose_row_tile(Ho, Wo, Wph, C, s, a_hi, budget=64 * 1024):
    # Largest divisor of Ho whose f32 working set (acc tile + converted slabs)
    # stays small enough to avoid heavy vreg spilling.
    best = 1
    for tho in range(1, Ho + 1):
        if Ho % tho:
            continue
        acc_b = tho * Wo * C * 4
        slab_b = s * s * (tho + a_hi) * Wph * C * 4
        if acc_b + slab_b <= budget:
            best = tho
    return best


def dwconv_silu_pool(x, w, bias, *, k, stride):
    """Depthwise kxk conv ('same' padding) + folded BN bias + SiLU, computed
    directly at the requested stride via a polyphase decomposition, plus a fused
    per-channel global sum (for the SE pool)."""
    N, H, W, C = x.shape
    s = stride
    pad = k // 2
    Ho = (H + 2 * pad - k) // s + 1
    Wo = (W + 2 * pad - k) // s + 1
    a_hi = (k - 1) // s
    Hph, Wph = Ho + a_hi, Wo + a_hi

    # 'same' zero-padding plus any polyphase remainder (extra rows never read).
    xp = jnp.pad(x, ((0, 0),
                     (pad, s * Hph - H - pad),
                     (pad, s * Wph - W - pad),
                     (0, 0)))
    if s == 1:
        xph = xp                                          # [N, Hph, Wph, C]
    else:
        # phase (p, q) slab: xph[n*s*s + p*s + q, m, nn] = xp[n, s*m+p, s*nn+q]
        xph = xp.reshape(N, Hph, s, Wph, s, C)
        xph = jnp.transpose(xph, (0, 2, 4, 1, 3, 5)).reshape(N * s * s, Hph, Wph, C)

    tho = _choose_row_tile(Ho, Wo, Wph, C, s, a_hi)
    kernel = functools.partial(_dwconv_pool_kernel, k=k, s=s)
    # TODO(synk): at real resolutions, row-tile the input with a halo instead of
    # the full-image block (v7x has 64 MiB VMEM); at these shapes it is tiny.
    h, sums = pl.pallas_call(
        kernel,
        out_shape=(jax.ShapeDtypeStruct((N, Ho, Wo, C), jnp.bfloat16),
                   jax.ShapeDtypeStruct((N, 1, C), jnp.float32)),
        grid=(N, Ho // tho),
        in_specs=[
            pl.BlockSpec((s * s, Hph, Wph, C), lambda n, t: (n, 0, 0, 0)),
            pl.BlockSpec((k * k, 1, 1, C), lambda n, t: (0, 0, 0, 0)),
            pl.BlockSpec((1, C), lambda n, t: (0, 0)),
        ],
        out_specs=(pl.BlockSpec((1, tho, Wo, C), lambda n, t: (n, t, 0, 0)),
                   pl.BlockSpec((1, 1, C), lambda n, t: (n, 0, 0))),
        compiler_params=_cparams("parallel", "arbitrary"),
    )(xph, w.reshape(k * k, 1, 1, C).astype(jnp.float32),
      bias.reshape(1, C).astype(jnp.float32))
    return h, sums


# ----------------------------------------------------------------------------
# Kernel 3: fused SE FCs + sigmoid gate + project 1x1 matmul (+bias)(+residual)
# ----------------------------------------------------------------------------
def _se_gate(sum_ref, w1_ref, b1_ref, w2_ref, b2_ref, inv_hw):
    pooled = sum_ref[...][0] * inv_hw                     # (1, Cmid) f32
    r = jnp.dot(pooled.astype(jnp.bfloat16), w1_ref[...],
                preferred_element_type=jnp.float32) + b1_ref[...]
    r = r * jax.nn.sigmoid(r)                             # SiLU
    g = jnp.dot(r.astype(jnp.bfloat16), w2_ref[...],
                preferred_element_type=jnp.float32) + b2_ref[...]
    return jax.nn.sigmoid(g)                              # (1, Cmid) f32


def _se_project_kernel(h_ref, sum_ref, w1_ref, b1_ref, w2_ref, b2_ref,
                       pw_ref, pb_ref, o_ref, *, inv_hw):
    gate = _se_gate(sum_ref, w1_ref, b1_ref, w2_ref, b2_ref, inv_hw)
    hh = h_ref[...][0].astype(jnp.float32) * gate
    acc = jnp.dot(hh.astype(jnp.bfloat16), pw_ref[...],
                  preferred_element_type=jnp.float32) + pb_ref[...]
    o_ref[...] = acc[None].astype(o_ref.dtype)


def _se_project_res_kernel(h_ref, sum_ref, w1_ref, b1_ref, w2_ref, b2_ref,
                           pw_ref, pb_ref, skip_ref, o_ref, *, inv_hw):
    gate = _se_gate(sum_ref, w1_ref, b1_ref, w2_ref, b2_ref, inv_hw)
    hh = h_ref[...][0].astype(jnp.float32) * gate
    acc = jnp.dot(hh.astype(jnp.bfloat16), pw_ref[...],
                  preferred_element_type=jnp.float32) + pb_ref[...]
    acc = acc + skip_ref[...][0].astype(jnp.float32)
    o_ref[...] = acc[None].astype(o_ref.dtype)


def _choose_bs(HW):
    for bs in (512, 256, 128, 64, 32, 16, 8):
        if HW % bs == 0:
            return bs
    return HW


def se_project(h, ch_sums, p, skip):
    N, H, W, Cmid = h.shape
    HW = H * W
    Cout = p["project_w"].shape[1]
    se_c = p["se_reduce_w"].shape[1]
    bs = _choose_bs(HW)
    inv_hw = 1.0 / float(HW)
    h3 = h.reshape(N, HW, Cmid)

    in_specs = [
        pl.BlockSpec((1, bs, Cmid), lambda n, t: (n, t, 0)),
        pl.BlockSpec((1, 1, Cmid), lambda n, t: (n, 0, 0)),
        pl.BlockSpec((Cmid, se_c), lambda n, t: (0, 0)),
        pl.BlockSpec((1, se_c), lambda n, t: (0, 0)),
        pl.BlockSpec((se_c, Cmid), lambda n, t: (0, 0)),
        pl.BlockSpec((1, Cmid), lambda n, t: (0, 0)),
        pl.BlockSpec((Cmid, Cout), lambda n, t: (0, 0)),
        pl.BlockSpec((1, Cout), lambda n, t: (0, 0)),
    ]
    args = [h3, ch_sums,
            p["se_reduce_w"], p["se_reduce_b"].reshape(1, se_c).astype(jnp.float32),
            p["se_expand_w"], p["se_expand_b"].reshape(1, Cmid).astype(jnp.float32),
            p["project_w"], p["project_bias"].reshape(1, Cout).astype(jnp.float32)]
    if skip is not None:
        in_specs.append(pl.BlockSpec((1, bs, Cout), lambda n, t: (n, t, 0)))
        args.append(skip.reshape(N, HW, Cout))
        kernel = functools.partial(_se_project_res_kernel, inv_hw=inv_hw)
    else:
        kernel = functools.partial(_se_project_kernel, inv_hw=inv_hw)

    out = pl.pallas_call(
        kernel,
        out_shape=jax.ShapeDtypeStruct((N, HW, Cout), jnp.bfloat16),
        grid=(N, HW // bs),
        in_specs=in_specs,
        out_specs=pl.BlockSpec((1, bs, Cout), lambda n, t: (n, t, 0)),
        compiler_params=_cparams("parallel", "parallel"),
    )(*args)
    return out.reshape(N, H, W, Cout)


# ----------------------------------------------------------------------------
# Kernel 4: fused head global-avg-pool + classifier matmul (lane-dense output)
# ----------------------------------------------------------------------------
def _pool_fc_kernel(h_ref, w_ref, b_ref, o_ref):
    # h_ref: [1, HW, C] bf16 -> o_ref: [1, 1, NP] f32
    pooled = jnp.mean(h_ref[...][0].astype(jnp.float32), axis=0, keepdims=True)
    acc = jnp.dot(pooled.astype(jnp.bfloat16), w_ref[...],
                  preferred_element_type=jnp.float32) + b_ref[...]
    o_ref[...] = acc[None].astype(o_ref.dtype)


def pool_classify(h, w, b):
    N, H, W, C = h.shape
    NP = w.shape[1]                       # classes padded to a multiple of 128
    h3 = h.reshape(N, H * W, C)
    out = pl.pallas_call(
        _pool_fc_kernel,
        out_shape=jax.ShapeDtypeStruct((N, 1, NP), jnp.float32),
        grid=(N,),
        in_specs=[
            pl.BlockSpec((1, H * W, C), lambda n: (n, 0, 0)),
            pl.BlockSpec((C, NP), lambda n: (0, 0)),
            pl.BlockSpec((1, NP), lambda n: (0, 0)),
        ],
        out_specs=pl.BlockSpec((1, 1, NP), lambda n: (n, 0, 0)),
        compiler_params=_cparams("parallel"),
    )(h3, w, b.reshape(1, NP).astype(jnp.float32))
    return out.reshape(N, NP)


# ----------------------------------------------------------------------------
# Glue (plain JAX): layout, padding, im2col for the stem
# ----------------------------------------------------------------------------
def im2col(x, k, stride, pad):
    # x: [N, H, W, C] -> ([N, Ho, Wo, k*k*C], Ho, Wo)
    N, H, W, C = x.shape
    xp = jnp.pad(x, ((0, 0), (pad, pad), (pad, pad), (0, 0)))
    Ho = (H + 2 * pad - k) // stride + 1
    Wo = (W + 2 * pad - k) // stride + 1
    cols = []
    for kh in range(k):
        for kw in range(k):
            cols.append(
                jax.lax.slice(
                    xp,
                    (0, kh, kw, 0),
                    (N, kh + (Ho - 1) * stride + 1, kw + (Wo - 1) * stride + 1, C),
                    (1, stride, stride, 1),
                )
            )
    return jnp.concatenate(cols, axis=-1), Ho, Wo


def conv1x1(x, w, bias, act):
    N, H, W, C = x.shape
    y = matmul_bias_act(x.reshape(N * H * W, C), w, bias, act=act)
    return y.reshape(N, H, W, -1)


def mbconv(x, p, *, expand, k, stride):
    cin = x.shape[-1]
    h = x
    if expand != 1:
        h = conv1x1(h, p["expand_w"], p["expand_bias"], act="silu")
    # TODO(synk): the expand 1x1 could be fused into the depthwise kernel
    # (expand a halo row slab into VMEM scratch per tile) to drop one HBM round
    # trip of the 6x-channel tensor; kept separate here for robustness.
    h, ch_sums = dwconv_silu_pool(h, p["dw_w"], p["dw_bias"], k=k, stride=stride)
    cout = p["project_w"].shape[1]
    skip = x if (stride == 1 and cin == cout) else None
    # SE FCs + sigmoid gate + project 1x1 + residual fused into one kernel.
    return se_project(h, ch_sums, p, skip)


def forward(params, x_nchw, cfgs, classes):
    # NCHW (PyTorch convention) -> NHWC bf16 for the TPU kernels.
    x = jnp.transpose(x_nchw, (0, 2, 3, 1)).astype(jnp.bfloat16)
    N = x.shape[0]

    # stem: 3x3 stride-2 conv (im2col gather in glue, MAC on the MXU) + BN + SiLU
    # TODO(synk): move the im2col gather into a row-tiled tap kernel so the
    # 9x-channel intermediate never hits HBM (matters at real resolutions).
    cols, Ho, Wo = im2col(x, 3, 2, 1)
    h = matmul_bias_act(
        cols.reshape(N * Ho * Wo, -1),
        params["stem_w"], params["stem_bias"], act="silu",
    ).reshape(N, Ho, Wo, STEM_C)

    for bp, (expand, k, stride, _cout) in zip(params["blocks"], cfgs):
        h = mbconv(h, bp, expand=expand, k=k, stride=stride)

    # head 1x1 conv + BN + SiLU
    h = conv1x1(h, params["head_w"], params["head_bias"], act="silu")
    # global average pool + classifier (fused kernel).
    # TODO(synk): dropout(p=0.2) before the classifier is identity in eval mode.
    logits = pool_classify(h, params["fc_w"], params["fc_b"])
    return logits[:, :classes]


# ----------------------------------------------------------------------------
# Deterministic parameter initialization (BN scales folded into weights)
# ----------------------------------------------------------------------------
def _winit(key, shape, fan_in):
    return jax.random.normal(key, shape, jnp.float32) * (2.0 / fan_in) ** 0.5


def _bn_fold(c):
    # TODO(synk): eval-mode BatchNorm with default init (gamma=1, beta=0, mean=0,
    # var=1), folded into the preceding conv's weights (scale) and a bias.
    gamma = jnp.ones((c,), jnp.float32)
    beta = jnp.zeros((c,), jnp.float32)
    mean = jnp.zeros((c,), jnp.float32)
    var = jnp.ones((c,), jnp.float32)
    scale = gamma * jax.lax.rsqrt(var + 1e-5)
    bias = beta - mean * scale
    return scale, bias


def init_params(key, classes=100):
    keys = jax.random.split(key, 128)
    it = iter(range(128))

    def nk():
        return keys[next(it)]

    cfgs = []
    for expand, k, stride, cout, repeats in BLOCKS:
        for r in range(repeats):
            cfgs.append((expand, k, stride if r == 0 else 1, cout))

    p = {}
    s, b = _bn_fold(STEM_C)
    p["stem_w"] = (_winit(nk(), (3 * 3 * 3, STEM_C), 3 * 3 * 3) * s[None, :]).astype(jnp.bfloat16)
    p["stem_bias"] = b

    blocks = []
    cin = STEM_C
    for expand, k, _stride, cout in cfgs:
        cmid = cin * expand
        se_c = max(1, cin // 4)
        bp = {}
        if expand != 1:
            s, b = _bn_fold(cmid)
            bp["expand_w"] = (_winit(nk(), (cin, cmid), cin) * s[None, :]).astype(jnp.bfloat16)
            bp["expand_bias"] = b
        s, b = _bn_fold(cmid)
        bp["dw_w"] = _winit(nk(), (k, k, cmid), k * k) * s[None, None, :]   # f32 (VPU path)
        bp["dw_bias"] = b
        bp["se_reduce_w"] = _winit(nk(), (cmid, se_c), cmid).astype(jnp.bfloat16)
        bp["se_reduce_b"] = jnp.zeros((se_c,), jnp.float32)
        bp["se_expand_w"] = _winit(nk(), (se_c, cmid), se_c).astype(jnp.bfloat16)
        bp["se_expand_b"] = jnp.zeros((cmid,), jnp.float32)
        s, b = _bn_fold(cout)
        bp["project_w"] = (_winit(nk(), (cmid, cout), cmid) * s[None, :]).astype(jnp.bfloat16)
        bp["project_bias"] = b
        blocks.append(bp)
        cin = cout
    p["blocks"] = blocks

    s, b = _bn_fold(HEAD_C)
    p["head_w"] = (_winit(nk(), (cin, HEAD_C), cin) * s[None, :]).astype(jnp.bfloat16)
    p["head_bias"] = b

    # classifier padded to a lane-dense multiple of 128 classes (sliced after)
    ncp = ((classes + 127) // 128) * 128
    fc_w = _winit(nk(), (HEAD_C, classes), HEAD_C)
    p["fc_w"] = jnp.pad(fc_w, ((0, 0), (0, ncp - classes))).astype(jnp.bfloat16)
    p["fc_b"] = jnp.zeros((ncp,), jnp.float32)
    return p, tuple(cfgs)


# ----------------------------------------------------------------------------
# Main
# ----------------------------------------------------------------------------
if __name__ == "__main__":
    key = jax.random.PRNGKey(0)
    pkey, xkey = jax.random.split(key)

    classes = 100
    params, cfgs = init_params(pkey, classes=classes)
    x = jax.random.normal(xkey, (2, 3, 32, 32), jnp.float32)  # NCHW, like PyTorch

    fwd = jax.jit(functools.partial(forward, cfgs=cfgs, classes=classes))
    logits = fwd(params, x)
    logits = jax.block_until_ready(logits)

    assert logits.shape == (2, classes), logits.shape
    assert bool(jnp.all(jnp.isfinite(logits)))
    print("KERNEL_OK")
</pallas_src>

<mosaic_0001>
module attributes {stable_mosaic.version = 11 : i64} {
  func.func @_matmul_bias_act_kernel(%arg0: i32, %arg1: memref<256x27xbf16, #tpu.memory_space<vmem>>, %arg2: memref<27x32xbf16, #tpu.memory_space<vmem>>, %arg3: memref<1x32xf32, #tpu.memory_space<vmem>>, %arg4: memref<256x32xbf16, #tpu.memory_space<vmem>>) attributes {dimension_semantics = [#tpu.dimension_semantics<parallel>], iteration_bounds = array<i64: 2>, scalar_prefetch = 0 : i64, scratch_operands = 0 : i64, tpu.core_type = #tpu.core_type<tc>, window_params = [{transform_indices = @transform_0, window_bounds = array<i64: 256, 27>}, {pipeline_mode = #tpu.pipeline_mode<synchronous>, transform_indices = @transform_1, window_bounds = array<i64: 27, 32>}, {pipeline_mode = #tpu.pipeline_mode<synchronous>, transform_indices = @transform_2, window_bounds = array<i64: 1, 32>}, {transform_indices = @transform_3, window_bounds = array<i64: 256, 32>}]} {
    %c0 = arith.constant 0 : index
    %c0_0 = arith.constant 0 : index
    %0 = vector.load %arg1[%c0, %c0_0] : memref<256x27xbf16, #tpu.memory_space<vmem>>, vector<256x27xbf16>
    %c0_1 = arith.constant 0 : index
    %c0_2 = arith.constant 0 : index
    %1 = vector.load %arg2[%c0_1, %c0_2] : memref<27x32xbf16, #tpu.memory_space<vmem>>, vector<27x32xbf16>
    %cst = arith.constant dense<0.000000e+00> : vector<256x32xf32>
    %2 = tpu.matmul %0, %1, %cst {dimension_numbers = #tpu.dot_dimension_numbers<[1], [0], [0], [1], [0, 0, 1, 1], [], []>} : vector<256x27xbf16>, vector<27x32xbf16>, vector<256x32xf32> -> vector<256x32xf32>
    %c0_3 = arith.constant 0 : index
    %c0_4 = arith.constant 0 : index
    %3 = vector.load %arg3[%c0_3, %c0_4] : memref<1x32xf32, #tpu.memory_space<vmem>>, vector<1x32xf32>
    %4 = vector.broadcast %3 : vector<1x32xf32> to vector<256x32xf32>
    %5 = arith.addf %2, %4 : vector<256x32xf32>
    %6 = arith.negf %5 : vector<256x32xf32>
    %7 = math.exp %6 : vector<256x32xf32>
    %cst_5 = arith.constant 1.000000e+00 : f32
    %8 = vector.broadcast %cst_5 : f32 to vector<256x32xf32>
    %9 = arith.addf %8, %7 : vector<256x32xf32>
    %10 = arith.divf %8, %9 : vector<256x32xf32>
    %11 = arith.mulf %5, %10 : vector<256x32xf32>
    %12 = arith.truncf %11 : vector<256x32xf32> to vector<256x32xbf16>
    %c0_6 = arith.constant 0 : index
    %c0_7 = arith.constant 0 : index
    %13 = vector.load %arg4[%c0_6, %c0_7] : memref<256x32xbf16, #tpu.memory_space<vmem>>, vector<256x32xbf16>
    tpu.vector_store %arg4[%c0_6, %c0_7], %12 {strides = array<i32>} : memref<256x32xbf16, #tpu.memory_space<vmem>>, vector<256x32xbf16>,
    return
  }
  func.func @transform_0(%arg0: i32) -> (i32, i32) {
    %c0_i32 = arith.constant 0 : i32
    %c0_i32_0 = arith.constant 0 : i32
    return %arg0, %c0_i32 : i32, i32
  }
  func.func @transform_1(%arg0: i32) -> (i32, i32) {
    %c0_i32 = arith.constant 0 : i32
    %c0_i32_0 = arith.constant 0 : i32
    %c0_i32_1 = arith.constant 0 : i32
    return %c0_i32, %c0_i32_0 : i32, i32
  }
  func.func @transform_2(%arg0: i32) -> (i32, i32) {
    %c0_i32 = arith.constant 0 : i32
    %c0_i32_0 = arith.constant 0 : i32
    %c0_i32_1 = arith.constant 0 : i32
    return %c0_i32, %c0_i32_0 : i32, i32
  }
  func.func @transform_3(%arg0: i32) -> (i32, i32) {
    %c0_i32 = arith.constant 0 : i32
    %c0_i32_0 = arith.constant 0 : i32
    return %arg0, %c0_i32 : i32, i32
  }
}

module attributes {stable_mosaic.version = 11 : i64} {
  func.func @_dwconv_pool_kernel(%arg0: i32, %arg1: i32, %arg2: memref<1x18x18x32xbf16, #tpu.memory_space<vmem>>, %arg3: memref<9x1x1x32xf32, #tpu.memory_space<vmem>>, %arg4: memref<1x32xf32, #tpu.memory_space<vmem>>, %arg5: memref<1x8x16x32xbf16, #tpu.memory_space<vmem>>, %arg6: memref<1x1x32xf32, #tpu.memory_space<vmem>>) attributes {dimension_semantics = [#tpu.dimension_semantics<parallel>, #tpu.dimension_semantics<arbitrary>], iteration_bounds = array<i64: 2, 2>, scalar_prefetch = 0 : i64, scratch_operands = 0 : i64, tpu.core_type = #tpu.core_type<tc>, window_params = [{transform_indices = @transform_0, window_bounds = array<i64: 1, 18, 18, 32>}, {pipeline_mode = #tpu.pipeline_mode<synchronous>, transform_indices = @transform_1, window_bounds = array<i64: 9, 1, 1, 32>}, {pipeline_mode = #tpu.pipeline_mode<synchronous>, transform_indices = @transform_2, window_bounds = array<i64: 1, 32>}, {transform_indices = @transform_3, window_bounds = array<i64: 1, 8, 16, 32>}, {transform_indices = @transform_4, window_bounds = array<i64: 1, 1, 32>}]} {
    %c8_i32 = arith.constant 8 : i32
    %0 = arith.muli %arg1, %c8_i32 : i32
    %c0 = arith.constant 0 : index
    %c0_0 = arith.constant 0 : index
    %c0_1 = arith.constant 0 : index
    %c0_2 = arith.constant 0 : index
    %1 = vector.load %arg3[%c0, %c0_0, %c0_1, %c0_2] : memref<9x1x1x32xf32, #tpu.memory_space<vmem>>, vector<9x1x1x32xf32>
    %c0_3 = arith.constant 0 : index
    %c0_4 = arith.constant 0 : index
    %2 = vector.load %arg4[%c0_3, %c0_4] : memref<1x32xf32, #tpu.memory_space<vmem>>, vector<1x32xf32>
    %c0_5 = arith.constant 0 : index
    %3 = arith.index_cast %0 : i32 to index
    %c0_6 = arith.constant 0 : index
    %c0_7 = arith.constant 0 : index
    %4 = vector.load %arg2[%c0_5, %3, %c0_6, %c0_7] : memref<1x18x18x32xbf16, #tpu.memory_space<vmem>>, vector<1x10x18x32xbf16>
    %5 = vector.shape_cast %4 : vector<1x10x18x32xbf16> to vector<10x18x32xbf16>
    %6 = arith.extf %5 : vector<10x18x32xbf16> to vector<10x18x32xf32>
    %cst = arith.constant 0.000000e+00 : f32
    %7 = vector.broadcast %cst : f32 to vector<8x16x32xf32>
    %8 = vector.extract_strided_slice %6 {offsets = [0, 0, 0], sizes = [8, 16, 32], strides = [1, 1, 1]} : vector<10x18x32xf32> to vector<8x16x32xf32>
    %9 = vector.extract_strided_slice %1 {offsets = [0, 0, 0, 0], sizes = [1, 1, 1, 32], strides = [1, 1, 1, 1]} : vector<9x1x1x32xf32> to vector<1x1x1x32xf32>
    %10 = vector.shape_cast %9 : vector<1x1x1x32xf32> to vector<1x1x32xf32>
    %11 = vector.broadcast %10 : vector<1x1x32xf32> to vector<8x16x32xf32>
    %12 = arith.mulf %8, %11 : vector<8x16x32xf32>
    %13 = arith.addf %7, %12 : vector<8x16x32xf32>
    %14 = vector.extract_strided_slice %6 {offsets = [0, 1, 0], sizes = [8, 16, 32], strides = [1, 1, 1]} : vector<10x18x32xf32> to vector<8x16x32xf32>
    %15 = vector.extract_strided_slice %1 {offsets = [1, 0, 0, 0], sizes = [1, 1, 1, 32], strides = [1, 1, 1, 1]} : vector<9x1x1x32xf32> to vector<1x1x1x32xf32>
    %16 = vector.shape_cast %15 : vector<1x1x1x32xf32> to vector<1x1x32xf32>
    %17 = vector.broadcast %16 : vector<1x1x32xf32> to vector<8x16x32xf32>
    %18 = arith.mulf %14, %17 : vector<8x16x32xf32>
    %19 = arith.addf %13, %18 : vector<8x16x32xf32>
    %20 = vector.extract_strided_slice %6 {offsets = [0, 2, 0], sizes = [8, 16, 32], strides = [1, 1, 1]} : vector<10x18x32xf32> to vector<8x16x32xf32>
    %21 = vector.extract_strided_slice %1 {offsets = [2, 0, 0, 0], sizes = [1, 1, 1, 32], strides = [1, 1, 1, 1]} : vector<9x1x1x32xf32> to vector<1x1x1x32xf32>
    %22 = vector.shape_cast %21 : vector<1x1x1x32xf32> to vector<1x1x32xf32>
    %23 = vector.broadcast %22 : vector<1x1x32xf32> to vector<8x16x32xf32>
    %24 = arith.mulf %20, %23 : vector<8x16x32xf32>
    %25 = arith.addf %19, %24 : vector<8x16x32xf32>
    %26 = vector.extract_strided_slice %6 {offsets = [1, 0, 0], sizes = [8, 16, 32], strides = [1, 1, 1]} : vector<10x18x32xf32> to vector<8x16x32xf32>
    %27 = vector.extract_strided_slice %1 {offsets = [3, 0, 0, 0], sizes = [1, 1, 1, 32], strides = [1, 1, 1, 1]} : vector<9x1x1x32xf32> to vector<1x1x1x32xf32>
    %28 = vector.shape_cast %27 : vector<1x1x1x32xf32> to vector<1x1x32xf32>
    %29 = vector.broadcast %28 : vector<1x1x32xf32> to vector<8x16x32xf32>
    %30 = arith.mulf %26, %29 : vector<8x16x32xf32>
    %31 = arith.addf %25, %30 : vector<8x16x32xf32>
    %32 = vector.extract_strided_slice %6 {offsets = [1, 1, 0], sizes = [8, 16, 32], strides = [1, 1, 1]} : vector<10x18x32xf32> to vector<8x16x32xf32>
    %33 = vector.extract_strided_slice %1 {offsets = [4, 0, 0, 0], sizes = [1, 1, 1, 32], strides = [1, 1, 1, 1]} : vector<9x1x1x32xf32> to vector<1x1x1x32xf32>
    %34 = vector.shape_cast %33 : vector<1x1x1x32xf32> to vector<1x1x32xf32>
    %35 = vector.broadcast %34 : vector<1x1x32xf32> to vector<8x16x32xf32>
    %36 = arith.mulf %32, %35 : vector<8x16x32xf32>
    %37 = arith.addf %31, %36 : vector<8x16x32xf32>
    %38 = vector.extract_strided_slice %6 {offsets = [1, 2, 0], sizes = [8, 16, 32], strides = [1, 1, 1]} : vector<10x18x32xf32> to vector<8x16x32xf32>
    %39 = vector.extract_strided_slice %1 {offsets = [5, 0, 0, 0], sizes = [1, 1, 1, 32], strides = [1, 1, 1, 1]} : vector<9x1x1x32xf32> to vector<1x1x1x32xf32>
    %40 = vector.shape_cast %39 : vector<1x1x1x32xf32> to vector<1x1x32xf32>
    %41 = vector.broadcast %40 : vector<1x1x32xf32> to vector<8x16x32xf32>
    %42 = arith.mulf %38, %41 : vector<8x16x32xf32>
    %43 = arith.addf %37, %42 : vector<8x16x32xf32>
    %44 = vector.extract_strided_slice %6 {offsets = [2, 0, 0], sizes = [8, 16, 32], strides = [1, 1, 1]} : vector<10x18x32xf32> to vector<8x16x32xf32>
    %45 = vector.extract_strided_slice %1 {offsets = [6, 0, 0, 0], sizes = [1, 1, 1, 32], strides = [1, 1, 1, 1]} : vector<9x1x1x32xf32> to vector<1x1x1x32xf32>
    %46 = vector.shape_cast %45 : vector<1x1x1x32xf32> to vector<1x1x32xf32>
    %47 = vector.broadcast %46 : vector<1x1x32xf32> to vector<8x16x32xf32>
    %48 = arith.mulf %44, %47 : vector<8x16x32xf32>
    %49 = arith.addf %43, %48 : vector<8x16x32xf32>
    %50 = vector.extract_strided_slice %6 {offsets = [2, 1, 0], sizes = [8, 16, 32], strides = [1, 1, 1]} : vector<10x18x32xf32> to vector<8x16x32xf32>
    %51 = vector.extract_strided_slice %1 {offsets = [7, 0, 0, 0], sizes = [1, 1, 1, 32], strides = [1, 1, 1, 1]} : vector<9x1x1x32xf32> to vector<1x1x1x32xf32>
    %52 = vector.shape_cast %51 : vector<1x1x1x32xf32> to vector<1x1x32xf32>
    %53 = vector.broadcast %52 : vector<1x1x32xf32> to vector<8x16x32xf32>
    %54 = arith.mulf %50, %53 : vector<8x16x32xf32>
    %55 = arith.addf %49, %54 : vector<8x16x32xf32>
    %56 = vector.extract_strided_slice %6 {offsets = [2, 2, 0], sizes = [8, 16, 32], strides = [1, 1, 1]} : vector<10x18x32xf32> to vector<8x16x32xf32>
    %57 = vector.extract_strided_slice %1 {offsets = [8, 0, 0, 0], sizes = [1, 1, 1, 32], strides = [1, 1, 1, 1]} : vector<9x1x1x32xf32> to vector<1x1x1x32xf32>
    %58 = vector.shape_cast %57 : vector<1x1x1x32xf32> to vector<1x1x32xf32>
    %59 = vector.broadcast %58 : vector<1x1x32xf32> to vector<8x16x32xf32>
    %60 = arith.mulf %56, %59 : vector<8x16x32xf32>
    %61 = arith.addf %55, %60 : vector<8x16x32xf32>
    %62 = vector.shape_cast %2 : vector<1x32xf32> to vector<1x1x32xf32>
    %63 = vector.broadcast %62 : vector<1x1x32xf32> to vector<8x16x32xf32>
    %64 = arith.addf %61, %63 : vector<8x16x32xf32>
    %65 = arith.negf %64 : vector<8x16x32xf32>
    %66 = math.exp %65 : vector<8x16x32xf32>
    %cst_8 = arith.constant 1.000000e+00 : f32
    %67 = vector.broadcast %cst_8 : f32 to vector<8x16x32xf32>
    %68 = arith.addf %67, %66 : vector<8x16x32xf32>
    %69 = arith.divf %67, %68 : vector<8x16x32xf32>
    %70 = arith.mulf %64, %69 : vector<8x16x32xf32>
    %71 = vector.shape_cast %70 : vector<8x16x32xf32> to vector<1x8x16x32xf32>
    %72 = arith.truncf %71 : vector<1x8x16x32xf32> to vector<1x8x16x32xbf16>
    %c0_9 = arith.constant 0 : index
    %c0_10 = arith.constant 0 : index
    %c0_11 = arith.constant 0 : index
    %c0_12 = arith.constant 0 : index
    %73 = vector.load %arg5[%c0_9, %c0_10, %c0_11, %c0_12] : memref<1x8x16x32xbf16, #tpu.memory_space<vmem>>, vector<1x8x16x32xbf16>
    tpu.vector_store %arg5[%c0_9, %c0_10, %c0_11, %c0_12], %72 {strides = array<i32>} : memref<1x8x16x32xbf16, #tpu.memory_space<vmem>>, vector<1x8x16x32xbf16>,
    %c0_i32 = arith.constant 0 : i32
    %74 = arith.cmpi eq, %arg1, %c0_i32 : i32
    %75 = arith.extui %74 : i1 to i32
    %c0_i32_13 = arith.constant 0 : i32
    %76 = arith.cmpi ne, %75, %c0_i32_13 : i32
    scf.if %76 {
      %cst_21 = arith.constant 0.000000e+00 : f32
      %82 = vector.broadcast %cst_21 : f32 to vector<1x1x32xf32>
      %c0_22 = arith.constant 0 : index
      %c0_23 = arith.constant 0 : index
      %c0_24 = arith.constant 0 : index
      %83 = vector.load %arg6[%c0_22, %c0_23, %c0_24] : memref<1x1x32xf32, #tpu.memory_space<vmem>>, vector<1x1x32xf32>
      tpu.vector_store %arg6[%c0_22, %c0_23, %c0_24], %82 {strides = array<i32>} : memref<1x1x32xf32, #tpu.memory_space<vmem>>, vector<1x1x32xf32>,
    } else {
    }
    %c0_14 = arith.constant 0 : index
    %c0_15 = arith.constant 0 : index
    %c0_16 = arith.constant 0 : index
    %77 = vector.load %arg6[%c0_14, %c0_15, %c0_16] : memref<1x1x32xf32, #tpu.memory_space<vmem>>, vector<1x1x32xf32>
    %cst_17 = arith.constant dense<0.000000e+00> : vector<32xf32>
    %78 = vector.multi_reduction <add>, %70, %cst_17 [0, 1] : vector<8x16x32xf32> to vector<32xf32>
    %79 = vector.shape_cast %78 : vector<32xf32> to vector<1x1x32xf32>
    %80 = arith.addf %77, %79 : vector<1x1x32xf32>
    %c0_18 = arith.constant 0 : index
    %c0_19 = arith.constant 0 : index
    %c0_20 = arith.constant 0 : index
    %81 = vector.load %arg6[%c0_18, %c0_19, %c0_20] : memref<1x1x32xf32, #tpu.memory_space<vmem>>, vector<1x1x32xf32>
    tpu.vector_store %arg6[%c0_18, %c0_19, %c0_20], %80 {strides = array<i32>} : memref<1x1x32xf32, #tpu.memory_space<vmem>>, vector<1x1x32xf32>,
    return
  }
  func.func @transform_0(%arg0: i32, %arg1: i32) -> (i32, i32, i32, i32) {
    %c0_i32 = arith.constant 0 : i32
    %c0_i32_0 = arith.constant 0 : i32
    %c0_i32_1 = arith.constant 0 : i32
    %c0_i32_2 = arith.constant 0 : i32
    return %arg0, %c0_i32, %c0_i32_0, %c0_i32_1 : i32, i32, i32, i32
  }
  func.func @transform_1(%arg0: i32, %arg1: i32) -> (i32, i32, i32, i32) {
    %c0_i32 = arith.constant 0 : i32
    %c0_i32_0 = arith.constant 0 : i32
    %c0_i32_1 = arith.constant 0 : i32
    %c0_i32_2 = arith.constant 0 : i32
    %c0_i32_3 = arith.constant 0 : i32
    return %c0_i32, %c0_i32_0, %c0_i32_1, %c0_i32_2 : i32, i32, i32, i32
  }
  func.func @transform_2(%arg0: i32, %arg1: i32) -> (i32, i32) {
    %c0_i32 = arith.constant 0 : i32
    %c0_i32_0 = arith.constant 0 : i32
    %c0_i32_1 = arith.constant 0 : i32
    return %c0_i32, %c0_i32_0 : i32, i32
  }
  func.func @transform_3(%arg0: i32, %arg1: i32) -> (i32, i32, i32, i32) {
    %c0_i32 = arith.constant 0 : i32
    %c0_i32_0 = arith.constant 0 : i32
    %c0_i32_1 = arith.constant 0 : i32
    return %arg0, %arg1, %c0_i32, %c0_i32_0 : i32, i32, i32, i32
  }
  func.func @transform_4(%arg0: i32, %arg1: i32) -> (i32, i32, i32) {
    %c0_i32 = arith.constant 0 : i32
    %c0_i32_0 = arith.constant 0 : i32
    %c0_i32_1 = arith.constant 0 : i32
    return %arg0, %c0_i32, %c0_i32_0 : i32, i32, i32
  }
}

module attributes {stable_mosaic.version = 11 : i64} {
  func.func @_se_project_kernel(%arg0: i32, %arg1: i32, %arg2: memref<1x256x32xbf16, #tpu.memory_space<vmem>>, %arg3: memref<1x1x32xf32, #tpu.memory_space<vmem>>, %arg4: memref<32x8xbf16, #tpu.memory_space<vmem>>, %arg5: memref<1x8xf32, #tpu.memory_space<vmem>>, %arg6: memref<8x32xbf16, #tpu.memory_space<vmem>>, %arg7: memref<1x32xf32, #tpu.memory_space<vmem>>, %arg8: memref<32x16xbf16, #tpu.memory_space<vmem>>, %arg9: memref<1x16xf32, #tpu.memory_space<vmem>>, %arg10: memref<1x256x16xbf16, #tpu.memory_space<vmem>>) attributes {dimension_semantics = [#tpu.dimension_semantics<parallel>, #tpu.dimension_semantics<parallel>], iteration_bounds = array<i64: 2, 1>, scalar_prefetch = 0 : i64, scratch_operands = 0 : i64, tpu.core_type = #tpu.core_type<tc>, window_params = [{transform_indices = @transform_0, window_bounds = array<i64: 1, 256, 32>}, {transform_indices = @transform_1, window_bounds = array<i64: 1, 1, 32>}, {pipeline_mode = #tpu.pipeline_mode<synchronous>, transform_indices = @transform_2, window_bounds = array<i64: 32, 8>}, {pipeline_mode = #tpu.pipeline_mode<synchronous>, transform_indices = @transform_3, window_bounds = array<i64: 1, 8>}, {pipeline_mode = #tpu.pipeline_mode<synchronous>, transform_indices = @transform_4, window_bounds = array<i64: 8, 32>}, {pipeline_mode = #tpu.pipeline_mode<synchronous>, transform_indices = @transform_5, window_bounds = array<i64: 1, 32>}, {pipeline_mode = #tpu.pipeline_mode<synchronous>, transform_indices = @transform_6, window_bounds = array<i64: 32, 16>}, {pipeline_mode = #tpu.pipeline_mode<synchronous>, transform_indices = @transform_7, window_bounds = array<i64: 1, 16>}, {transform_indices = @transform_8, window_bounds = array<i64: 1, 256, 16>}]} {
    %c0 = arith.constant 0 : index
    %c0_0 = arith.constant 0 : index
    %c0_1 = arith.constant 0 : index
    %0 = vector.load %arg3[%c0, %c0_0, %c0_1] : memref<1x1x32xf32, #tpu.memory_space<vmem>>, vector<1x1x32xf32>
    %1 = vector.shape_cast %0 : vector<1x1x32xf32> to vector<1x32xf32>
    %cst = arith.constant 3.906250e-03 : f32
    %2 = vector.broadcast %cst : f32 to vector<1x32xf32>
    %3 = arith.mulf %1, %2 : vector<1x32xf32>
    %4 = arith.truncf %3 : vector<1x32xf32> to vector<1x32xbf16>
    %c0_2 = arith.constant 0 : index
    %c0_3 = arith.constant 0 : index
    %5 = vector.load %arg4[%c0_2, %c0_3] : memref<32x8xbf16, #tpu.memory_space<vmem>>, vector<32x8xbf16>
    %cst_4 = arith.constant dense<0.000000e+00> : vector<1x8xf32>
    %6 = tpu.matmul %4, %5, %cst_4 {dimension_numbers = #tpu.dot_dimension_numbers<[1], [0], [0], [1], [0, 0, 1, 1], [], []>} : vector<1x32xbf16>, vector<32x8xbf16>, vector<1x8xf32> -> vector<1x8xf32>
    %c0_5 = arith.constant 0 : index
    %c0_6 = arith.constant 0 : index
    %7 = vector.load %arg5[%c0_5, %c0_6] : memref<1x8xf32, #tpu.memory_space<vmem>>, vector<1x8xf32>
    %8 = arith.addf %6, %7 : vector<1x8xf32>
    %9 = arith.negf %8 : vector<1x8xf32>
    %10 = math.exp %9 : vector<1x8xf32>
    %cst_7 = arith.constant 1.000000e+00 : f32
    %11 = vector.broadcast %cst_7 : f32 to vector<1x8xf32>
    %12 = arith.addf %11, %10 : vector<1x8xf32>
    %13 = arith.divf %11, %12 : vector<1x8xf32>
    %14 = arith.mulf %8, %13 : vector<1x8xf32>
    %15 = arith.truncf %14 : vector<1x8xf32> to vector<1x8xbf16>
    %c0_8 = arith.constant 0 : index
    %c0_9 = arith.constant 0 : index
    %16 = vector.load %arg6[%c0_8, %c0_9] : memref<8x32xbf16, #tpu.memory_space<vmem>>, vector<8x32xbf16>
    %cst_10 = arith.constant dense<0.000000e+00> : vector<1x32xf32>
    %17 = tpu.matmul %15, %16, %cst_10 {dimension_numbers = #tpu.dot_dimension_numbers<[1], [0], [0], [1], [0, 0, 1, 1], [], []>} : vector<1x8xbf16>, vector<8x32xbf16>, vector<1x32xf32> -> vector<1x32xf32>
    %c0_11 = arith.constant 0 : index
    %c0_12 = arith.constant 0 : index
    %18 = vector.load %arg7[%c0_11, %c0_12] : memref<1x32xf32, #tpu.memory_space<vmem>>, vector<1x32xf32>
    %19 = arith.addf %17, %18 : vector<1x32xf32>
    %20 = arith.negf %19 : vector<1x32xf32>
    %21 = math.exp %20 : vector<1x32xf32>
    %cst_13 = arith.constant 1.000000e+00 : f32
    %22 = vector.broadcast %cst_13 : f32 to vector<1x32xf32>
    %23 = arith.addf %22, %21 : vector<1x32xf32>
    %24 = arith.divf %22, %23 : vector<1x32xf32>
    %c0_14 = arith.constant 0 : index
    %c0_15 = arith.constant 0 : index
    %c0_16 = arith.constant 0 : index
    %25 = vector.load %arg2[%c0_14, %c0_15, %c0_16] : memref<1x256x32xbf16, #tpu.memory_space<vmem>>, vector<1x256x32xbf16>
    %26 = vector.shape_cast %25 : vector<1x256x32xbf16> to vector<256x32xbf16>
    %27 = arith.extf %26 : vector<256x32xbf16> to vector<256x32xf32>
    %28 = vector.broadcast %24 : vector<1x32xf32> to vector<256x32xf32>
    %29 = arith.mulf %27, %28 : vector<256x32xf32>
    %30 = arith.truncf %29 : vector<256x32xf32> to vector<256x32xbf16>
    %c0_17 = arith.constant 0 : index
    %c0_18 = arith.constant 0 : index
    %31 = vector.load %arg8[%c0_17, %c0_18] : memref<32x16xbf16, #tpu.memory_space<vmem>>, vector<32x16xbf16>
    %cst_19 = arith.constant dense<0.000000e+00> : vector<256x16xf32>
    %32 = tpu.matmul %30, %31, %cst_19 {dimension_numbers = #tpu.dot_dimension_numbers<[1], [0], [0], [1], [0, 0, 1, 1], [], []>} : vector<256x32xbf16>, vector<32x16xbf16>, vector<256x16xf32> -> vector<256x16xf32>
    %c0_20 = arith.constant 0 : index
    %c0_21 = arith.constant 0 : index
    %33 = vector.load %arg9[%c0_20, %c0_21] : memref<1x16xf32, #tpu.memory_space<vmem>>, vector<1x16xf32>
    %34 = vector.broadcast %33 : vector<1x16xf32> to vector<256x16xf32>
    %35 = arith.addf %32, %34 : vector<256x16xf32>
    %36 = vector.shape_cast %35 : vector<256x16xf32> to vector<1x256x16xf32>
    %37 = arith.truncf %36 : vector<1x256x16xf32> to vector<1x256x16xbf16>
    %c0_22 = arith.constant 0 : index
    %c0_23 = arith.constant 0 : index
    %c0_24 = arith.constant 0 : index
    %38 = vector.load %arg10[%c0_22, %c0_23, %c0_24] : memref<1x256x16xbf16, #tpu.memory_space<vmem>>, vector<1x256x16xbf16>
    tpu.vector_store %arg10[%c0_22, %c0_23, %c0_24], %37 {strides = array<i32>} : memref<1x256x16xbf16, #tpu.memory_space<vmem>>, vector<1x256x16xbf16>,
    return
  }
  func.func @transform_0(%arg0: i32, %arg1: i32) -> (i32, i32, i32) {
    %c0_i32 = arith.constant 0 : i32
    %c0_i32_0 = arith.constant 0 : i32
    return %arg0, %arg1, %c0_i32 : i32, i32, i32
  }
  func.func @transform_1(%arg0: i32, %arg1: i32) -> (i32, i32, i32) {
    %c0_i32 = arith.constant 0 : i32
    %c0_i32_0 = arith.constant 0 : i32
    %c0_i32_1 = arith.constant 0 : i32
    return %arg0, %c0_i32, %c0_i32_0 : i32, i32, i32
  }
  func.func @transform_2(%arg0: i32, %arg1: i32) -> (i32, i32) {
    %c0_i32 = arith.constant 0 : i32
    %c0_i32_0 = arith.constant 0 : i32
    %c0_i32_1 = arith.constant 0 : i32
    return %c0_i32, %c0_i32_0 : i32, i32
  }
  func.func @transform_3(%arg0: i32, %arg1: i32) -> (i32, i32) {
    %c0_i32 = arith.constant 0 : i32
    %c0_i32_0 = arith.constant 0 : i32
    %c0_i32_1 = arith.constant 0 : i32
    return %c0_i32, %c0_i32_0 : i32, i32
  }
  func.func @transform_4(%arg0: i32, %arg1: i32) -> (i32, i32) {
    %c0_i32 = arith.constant 0 : i32
    %c0_i32_0 = arith.constant 0 : i32
    %c0_i32_1 = arith.constant 0 : i32
    return %c0_i32, %c0_i32_0 : i32, i32
  }
  func.func @transform_5(%arg0: i32, %arg1: i32) -> (i32, i32) {
    %c0_i32 = arith.constant 0 : i32
    %c0_i32_0 = arith.constant 0 : i32
    %c0_i32_1 = arith.constant 0 : i32
    return %c0_i32, %c0_i32_0 : i32, i32
  }
  func.func @transform_6(%arg0: i32, %arg1: i32) -> (i32, i32) {
    %c0_i32 = arith.constant 0 : i32
    %c0_i32_0 = arith.constant 0 : i32
    %c0_i32_1 = arith.constant 0 : i32
    return %c0_i32, %c0_i32_0 : i32, i32
  }
  func.func @transform_7(%arg0: i32, %arg1: i32) -> (i32, i32) {
    %c0_i32 = arith.constant 0 : i32
    %c0_i32_0 = arith.constant 0 : i32
    %c0_i32_1 = arith.constant 0 : i32
    return %c0_i32, %c0_i32_0 : i32, i32
  }
  func.func @transform_8(%arg0: i32, %arg1: i32) -> (i32, i32, i32) {
    %c0_i32 = arith.constant 0 : i32
    %c0_i32_0 = arith.constant 0 : i32
    return %arg0, %arg1, %c0_i32 : i32, i32, i32
  }
}

module attributes {stable_mosaic.version = 11 : i64} {
  func.func @_matmul_bias_act_kernel(%arg0: i32, %arg1: memref<256x16xbf16, #tpu.memory_space<vmem>>, %arg2: memref<16x96xbf16, #tpu.memory_space<vmem>>, %arg3: memref<1x96xf32, #tpu.memory_space<vmem>>, %arg4: memref<256x96xbf16, #tpu.memory_space<vmem>>) attributes {dimension_semantics = [#tpu.dimension_semantics<parallel>], iteration_bounds = array<i64: 2>, scalar_prefetch = 0 : i64, scratch_operands = 0 : i64, tpu.core_type = #tpu.core_type<tc>, window_params = [{transform_indices = @transform_0, window_bounds = array<i64: 256, 16>}, {pipeline_mode = #tpu.pipeline_mode<synchronous>, transform_indices = @transform_1, window_bounds = array<i64: 16, 96>}, {pipeline_mode = #tpu.pipeline_mode<synchronous>, transform_indices = @transform_2, window_bounds = array<i64: 1, 96>}, {transform_indices = @transform_3, window_bounds = array<i64: 256, 96>}]} {
    %c0 = arith.constant 0 : index
    %c0_0 = arith.constant 0 : index
    %0 = vector.load %arg1[%c0, %c0_0] : memref<256x16xbf16, #tpu.memory_space<vmem>>, vector<256x16xbf16>
    %c0_1 = arith.constant 0 : index
    %c0_2 = arith.constant 0 : index
    %1 = vector.load %arg2[%c0_1, %c0_2] : memref<16x96xbf16, #tpu.memory_space<vmem>>, vector<16x96xbf16>
    %cst = arith.constant dense<0.000000e+00> : vector<256x96xf32>
    %2 = tpu.matmul %0, %1, %cst {dimension_numbers = #tpu.dot_dimension_numbers<[1], [0], [0], [1], [0, 0, 1, 1], [], []>} : vector<256x16xbf16>, vector<16x96xbf16>, vector<256x96xf32> -> vector<256x96xf32>
    %c0_3 = arith.constant 0 : index
    %c0_4 = arith.constant 0 : index
    %3 = vector.load %arg3[%c0_3, %c0_4] : memref<1x96xf32, #tpu.memory_space<vmem>>, vector<1x96xf32>
    %4 = vector.broadcast %3 : vector<1x96xf32> to vector<256x96xf32>
    %5 = arith.addf %2, %4 : vector<256x96xf32>
    %6 = arith.negf %5 : vector<256x96xf32>
    %7 = math.exp %6 : vector<256x96xf32>
    %cst_5 = arith.constant 1.000000e+00 : f32
    %8 = vector.broadcast %cst_5 : f32 to vector<256x96xf32>
    %9 = arith.addf %8, %7 : vector<256x96xf32>
    %10 = arith.divf %8, %9 : vector<256x96xf32>
    %11 = arith.mulf %5, %10 : vector<256x96xf32>
    %12 = arith.truncf %11 : vector<256x96xf32> to vector<256x96xbf16>
    %c0_6 = arith.constant 0 : index
    %c0_7 = arith.constant 0 : index
    %13 = vector.load %arg4[%c0_6, %c0_7] : memref<256x96xbf16, #tpu.memory_space<vmem>>, vector<256x96xbf16>
    tpu.vector_store %arg4[%c0_6, %c0_7], %12 {strides = array<i32>} : memref<256x96xbf16, #tpu.memory_space<vmem>>, vector<256x96xbf16>,
    return
  }
  func.func @transform_0(%arg0: i32) -> (i32, i32) {
    %c0_i32 = arith.constant 0 : i32
    %c0_i32_0 = arith.constant 0 : i32
    return %arg0, %c0_i32 : i32, i32
  }
  func.func @transform_1(%arg0: i32) -> (i32, i32) {
    %c0_i32 = arith.constant 0 : i32
    %c0_i32_0 = arith.constant 0 : i32
    %c0_i32_1 = arith.constant 0 : i32
    return %c0_i32, %c0_i32_0 : i32, i32
  }
  func.func @transform_2(%arg0: i32) -> (i32, i32) {
    %c0_i32 = arith.constant 0 : i32
    %c0_i32_0 = arith.constant 0 : i32
    %c0_i32_1 = arith.constant 0 : i32
    return %c0_i32, %c0_i32_0 : i32, i32
  }
  func.func @transform_3(%arg0: i32) -> (i32, i32) {
    %c0_i32 = arith.constant 0 : i32
    %c0_i32_0 = arith.constant 0 : i32
    return %arg0, %c0_i32 : i32, i32
  }
}

module attributes {stable_mosaic.version = 11 : i64} {
  func.func @_dwconv_pool_kernel(%arg0: i32, %arg1: i32, %arg2: memref<4x9x9x96xbf16, #tpu.memory_space<vmem>>, %arg3: memref<9x1x1x96xf32, #tpu.memory_space<vmem>>, %arg4: memref<1x96xf32, #tpu.memory_space<vmem>>, %arg5: memref<1x2x8x96xbf16, #tpu.memory_space<vmem>>, %arg6: memref<1x1x96xf32, #tpu.memory_space<vmem>>) attributes {dimension_semantics = [#tpu.dimension_semantics<parallel>, #tpu.dimension_semantics<arbitrary>], iteration_bounds = array<i64: 2, 4>, scalar_prefetch = 0 : i64, scratch_operands = 0 : i64, tpu.core_type = #tpu.core_type<tc>, window_params = [{transform_indices = @transform_0, window_bounds = array<i64: 4, 9, 9, 96>}, {pipeline_mode = #tpu.pipeline_mode<synchronous>, transform_indices = @transform_1, window_bounds = array<i64: 9, 1, 1, 96>}, {pipeline_mode = #tpu.pipeline_mode<synchronous>, transform_indices = @transform_2, window_bounds = array<i64: 1, 96>}, {transform_indices = @transform_3, window_bounds = array<i64: 1, 2, 8, 96>}, {transform_indices = @transform_4, window_bounds = array<i64: 1, 1, 96>}]} {
    %c2_i32 = arith.constant 2 : i32
    %0 = arith.muli %arg1, %c2_i32 : i32
    %c0 = arith.constant 0 : index
    %c0_0 = arith.constant 0 : index
    %c0_1 = arith.constant 0 : index
    %c0_2 = arith.constant 0 : index
    %1 = vector.load %arg3[%c0, %c0_0, %c0_1, %c0_2] : memref<9x1x1x96xf32, #tpu.memory_space<vmem>>, vector<9x1x1x96xf32>
    %c0_3 = arith.constant 0 : index
    %c0_4 = arith.constant 0 : index
    %2 = vector.load %arg4[%c0_3, %c0_4] : memref<1x96xf32, #tpu.memory_space<vmem>>, vector<1x96xf32>
    %c0_5 = arith.constant 0 : index
    %3 = arith.index_cast %0 : i32 to index
    %c0_6 = arith.constant 0 : index
    %c0_7 = arith.constant 0 : index
    %4 = vector.load %arg2[%c0_5, %3, %c0_6, %c0_7] : memref<4x9x9x96xbf16, #tpu.memory_space<vmem>>, vector<1x3x9x96xbf16>
    %5 = vector.shape_cast %4 : vector<1x3x9x96xbf16> to vector<3x9x96xbf16>
    %6 = arith.extf %5 : vector<3x9x96xbf16> to vector<3x9x96xf32>
    %c1 = arith.constant 1 : index
    %7 = arith.index_cast %0 : i32 to index
    %c0_8 = arith.constant 0 : index
    %c0_9 = arith.constant 0 : index
    %8 = vector.load %arg2[%c1, %7, %c0_8, %c0_9] : memref<4x9x9x96xbf16, #tpu.memory_space<vmem>>, vector<1x3x9x96xbf16>
    %9 = vector.shape_cast %8 : vector<1x3x9x96xbf16> to vector<3x9x96xbf16>
    %10 = arith.extf %9 : vector<3x9x96xbf16> to vector<3x9x96xf32>
    %c2 = arith.constant 2 : index
    %11 = arith.index_cast %0 : i32 to index
    %c0_10 = arith.constant 0 : index
    %c0_11 = arith.constant 0 : index
    %12 = vector.load %arg2[%c2, %11, %c0_10, %c0_11] : memref<4x9x9x96xbf16, #tpu.memory_space<vmem>>, vector<1x3x9x96xbf16>
    %13 = vector.shape_cast %12 : vector<1x3x9x96xbf16> to vector<3x9x96xbf16>
    %14 = arith.extf %13 : vector<3x9x96xbf16> to vector<3x9x96xf32>
    %c3 = arith.constant 3 : index
    %15 = arith.index_cast %0 : i32 to index
    %c0_12 = arith.constant 0 : index
    %c0_13 = arith.constant 0 : index
    %16 = vector.load %arg2[%c3, %15, %c0_12, %c0_13] : memref<4x9x9x96xbf16, #tpu.memory_space<vmem>>, vector<1x3x9x96xbf16>
    %17 = vector.shape_cast %16 : vector<1x3x9x96xbf16> to vector<3x9x96xbf16>
    %18 = arith.extf %17 : vector<3x9x96xbf16> to vector<3x9x96xf32>
    %cst = arith.constant 0.000000e+00 : f32
    %19 = vector.broadcast %cst : f32 to vector<2x8x96xf32>
    %20 = vector.extract_strided_slice %6 {offsets = [0, 0, 0], sizes = [2, 8, 96], strides = [1, 1, 1]} : vector<3x9x96xf32> to vector<2x8x96xf32>
    %21 = vector.extract_strided_slice %1 {offsets = [0, 0, 0, 0], sizes = [1, 1, 1, 96], strides = [1, 1, 1, 1]} : vector<9x1x1x96xf32> to vector<1x1x1x96xf32>
    %22 = vector.shape_cast %21 : vector<1x1x1x96xf32> to vector<1x1x96xf32>
    %23 = vector.broadcast %22 : vector<1x1x96xf32> to vector<2x8x96xf32>
    %24 = arith.mulf %20, %23 : vector<2x8x96xf32>
    %25 = arith.addf %19, %24 : vector<2x8x96xf32>
    %26 = vector.extract_strided_slice %10 {offsets = [0, 0, 0], sizes = [2, 8, 96], strides = [1, 1, 1]} : vector<3x9x96xf32> to vector<2x8x96xf32>
    %27 = vector.extract_strided_slice %1 {offsets = [1, 0, 0, 0], sizes = [1, 1, 1, 96], strides = [1, 1, 1, 1]} : vector<9x1x1x96xf32> to vector<1x1x1x96xf32>
    %28 = vector.shape_cast %27 : vector<1x1x1x96xf32> to vector<1x1x96xf32>
    %29 = vector.broadcast %28 : vector<1x1x96xf32> to vector<2x8x96xf32>
    %30 = arith.mulf %26, %29 : vector<2x8x96xf32>
    %31 = arith.addf %25, %30 : vector<2x8x96xf32>
    %32 = vector.extract_strided_slice %6 {offsets = [0, 1, 0], sizes = [2, 8, 96], strides = [1, 1, 1]} : vector<3x9x96xf32> to vector<2x8x96xf32>
    %33 = vector.extract_strided_slice %1 {offsets = [2, 0, 0, 0], sizes = [1, 1, 1, 96], strides = [1, 1, 1, 1]} : vector<9x1x1x96xf32> to vector<1x1x1x96xf32>
    %34 = vector.shape_cast %33 : vector<1x1x1x96xf32> to vector<1x1x96xf32>
    %35 = vector.broadcast %34 : vector<1x1x96xf32> to vector<2x8x96xf32>
    %36 = arith.mulf %32, %35 : vector<2x8x96xf32>
    %37 = arith.addf %31, %36 : vector<2x8x96xf32>
    %38 = vector.extract_strided_slice %14 {offsets = [0, 0, 0], sizes = [2, 8, 96], strides = [1, 1, 1]} : vector<3x9x96xf32> to vector<2x8x96xf32>
    %39 = vector.extract_strided_slice %1 {offsets = [3, 0, 0, 0], sizes = [1, 1, 1, 96], strides = [1, 1, 1, 1]} : vector<9x1x1x96xf32> to vector<1x1x1x96xf32>
    %40 = vector.shape_cast %39 : vector<1x1x1x96xf32> to vector<1x1x96xf32>
    %41 = vector.broadcast %40 : vector<1x1x96xf32> to vector<2x8x96xf32>
    %42 = arith.mulf %38, %41 : vector<2x8x96xf32>
    %43 = arith.addf %37, %42 : vector<2x8x96xf32>
    %44 = vector.extract_strided_slice %18 {offsets = [0, 0, 0], sizes = [2, 8, 96], strides = [1, 1, 1]} : vector<3x9x96xf32> to vector<2x8x96xf32>
    %45 = vector.extract_strided_slice %1 {offsets = [4, 0, 0, 0], sizes = [1, 1, 1, 96], strides = [1, 1, 1, 1]} : vector<9x1x1x96xf32> to vector<1x1x1x96xf32>
    %46 = vector.shape_cast %45 : vector<1x1x1x96xf32> to vector<1x1x96xf32>
    %47 = vector.broadcast %46 : vector<1x1x96xf32> to vector<2x8x96xf32>
    %48 = arith.mulf %44, %47 : vector<2x8x96xf32>
    %49 = arith.addf %43, %48 : vector<2x8x96xf32>
    %50 = vector.extract_strided_slice %14 {offsets = [0, 1, 0], sizes = [2, 8, 96], strides = [1, 1, 1]} : vector<3x9x96xf32> to vector<2x8x96xf32>
    %51 = vector.extract_strided_slice %1 {offsets = [5, 0, 0, 0], sizes = [1, 1, 1, 96], strides = [1, 1, 1, 1]} : vector<9x1x1x96xf32> to vector<1x1x1x96xf32>
    %52 = vector.shape_cast %51 : vector<1x1x1x96xf32> to vector<1x1x96xf32>
    %53 = vector.broadcast %52 : vector<1x1x96xf32> to vector<2x8x96xf32>
    %54 = arith.mulf %50, %53 : vector<2x8x96xf32>
    %55 = arith.addf %49, %54 : vector<2x8x96xf32>
    %56 = vector.extract_strided_slice %6 {offsets = [1, 0, 0], sizes = [2, 8, 96], strides = [1, 1, 1]} : vector<3x9x96xf32> to vector<2x8x96xf32>
    %57 = vector.extract_strided_slice %1 {offsets = [6, 0, 0, 0], sizes = [1, 1, 1, 96], strides = [1, 1, 1, 1]} : vector<9x1x1x96xf32> to vector<1x1x1x96xf32>
    %58 = vector.shape_cast %57 : vector<1x1x1x96xf32> to vector<1x1x96xf32>
    %59 = vector.broadcast %58 : vector<1x1x96xf32> to vector<2x8x96xf32>
    %60 = arith.mulf %56, %59 : vector<2x8x96xf32>
    %61 = arith.addf %55, %60 : vector<2x8x96xf32>
    %62 = vector.extract_strided_slice %10 {offsets = [1, 0, 0], sizes = [2, 8, 96], strides = [1, 1, 1]} : vector<3x9x96xf32> to vector<2x8x96xf32>
    %63 = vector.extract_strided_slice %1 {offsets = [7, 0, 0, 0], sizes = [1, 1, 1, 96], strides = [1, 1, 1, 1]} : vector<9x1x1x96xf32> to vector<1x1x1x96xf32>
    %64 = vector.shape_cast %63 : vector<1x1x1x96xf32> to vector<1x1x96xf32>
    %65 = vector.broadcast %64 : vector<1x1x96xf32> to vector<2x8x96xf32>
    %66 = arith.mulf %62, %65 : vector<2x8x96xf32>
    %67 = arith.addf %61, %66 : vector<2x8x96xf32>
    %68 = vector.extract_strided_slice %6 {offsets = [1, 1, 0], sizes = [2, 8, 96], strides = [1, 1, 1]} : vector<3x9x96xf32> to vector<2x8x96xf32>
    %69 = vector.extract_strided_slice %1 {offsets = [8, 0, 0, 0], sizes = [1, 1, 1, 96], strides = [1, 1, 1, 1]} : vector<9x1x1x96xf32> to vector<1x1x1x96xf32>
    %70 = vector.shape_cast %69 : vector<1x1x1x96xf32> to vector<1x1x96xf32>
    %71 = vector.broadcast %70 : vector<1x1x96xf32> to vector<2x8x96xf32>
    %72 = arith.mulf %68, %71 : vector<2x8x96xf32>
    %73 = arith.addf %67, %72 : vector<2x8x96xf32>
    %74 = vector.shape_cast %2 : vector<1x96xf32> to vector<1x1x96xf32>
    %75 = vector.broadcast %74 : vector<1x1x96xf32> to vector<2x8x96xf32>
    %76 = arith.addf %73, %75 : vector<2x8x96xf32>
    %77 = arith.negf %76 : vector<2x8x96xf32>
    %78 = math.exp %77 : vector<2x8x96xf32>
    %cst_14 = arith.constant 1.000000e+00 : f32
    %79 = vector.broadcast %cst_14 : f32 to vector<2x8x96xf32>
    %80 = arith.addf %79, %78 : vector<2x8x96xf32>
    %81 = arith.divf %79, %80 : vector<2x8x96xf32>
    %82 = arith.mulf %76, %81 : vector<2x8x96xf32>
    %83 = vector.shape_cast %82 : vector<2x8x96xf32> to vector<1x2x8x96xf32>
    %84 = arith.truncf %83 : vector<1x2x8x96xf32> to vector<1x2x8x96xbf16>
    %c0_15 = arith.constant 0 : index
    %c0_16 = arith.constant 0 : index
    %c0_17 = arith.constant 0 : index
    %c0_18 = arith.constant 0 : index
    %85 = vector.load %arg5[%c0_15, %c0_16, %c0_17, %c0_18] : memref<1x2x8x96xbf16, #tpu.memory_space<vmem>>, vector<1x2x8x96xbf16>
    tpu.vector_store %arg5[%c0_15, %c0_16, %c0_17, %c0_18], %84 {strides = array<i32>} : memref<1x2x8x96xbf16, #tpu.memory_space<vmem>>, vector<1x2x8x96xbf16>,
    %c0_i32 = arith.constant 0 : i32
    %86 = arith.cmpi eq, %arg1, %c0_i32 : i32
    %87 = arith.extui %86 : i1 to i32
    %c0_i32_19 = arith.constant 0 : i32
    %88 = arith.cmpi ne, %87, %c0_i32_19 : i32
    scf.if %88 {
      %cst_27 = arith.constant 0.000000e+00 : f32
      %94 = vector.broadcast %cst_27 : f32 to vector<1x1x96xf32>
      %c0_28 = arith.constant 0 : index
      %c0_29 = arith.constant 0 : index
      %c0_30 = arith.constant 0 : index
      %95 = vector.load %arg6[%c0_28, %c0_29, %c0_30] : memref<1x1x96xf32, #tpu.memory_space<vmem>>, vector<1x1x96xf32>
      tpu.vector_store %arg6[%c0_28, %c0_29, %c0_30], %94 {strides = array<i32>} : memref<1x1x96xf32, #tpu.memory_space<vmem>>, vector<1x1x96xf32>,
    } else {
    }
    %c0_20 = arith.constant 0 : index
    %c0_21 = arith.constant 0 : index
    %c0_22 = arith.constant 0 : index
    %89 = vector.load %arg6[%c0_20, %c0_21, %c0_22] : memref<1x1x96xf32, #tpu.memory_space<vmem>>, vector<1x1x96xf32>
    %cst_23 = arith.constant dense<0.000000e+00> : vector<96xf32>
    %90 = vector.multi_reduction <add>, %82, %cst_23 [0, 1] : vector<2x8x96xf32> to vector<96xf32>
    %91 = vector.shape_cast %90 : vector<96xf32> to vector<1x1x96xf32>
    %92 = arith.addf %89, %91 : vector<1x1x96xf32>
    %c0_24 = arith.constant 0 : index
    %c0_25 = arith.constant 0 : index
    %c0_26 = arith.constant 0 : index
    %93 = vector.load %arg6[%c0_24, %c0_25, %c0_26] : memref<1x1x96xf32, #tpu.memory_space<vmem>>, vector<1x1x96xf32>
    tpu.vector_store %arg6[%c0_24, %c0_25, %c0_26], %92 {strides = array<i32>} : memref<1x1x96xf32, #tpu.memory_space<vmem>>, vector<1x1x96xf32>,
    return
  }
  func.func @transform_0(%arg0: i32, %arg1: i32) -> (i32, i32, i32, i32) {
    %c0_i32 = arith.constant 0 : i32
    %c0_i32_0 = arith.constant 0 : i32
    %c0_i32_1 = arith.constant 0 : i32
    %c0_i32_2 = arith.constant 0 : i32
    return %arg0, %c0_i32, %c0_i32_0, %c0_i32_1 : i32, i32, i32, i32
  }
  func.func @transform_1(%arg0: i32, %arg1: i32) -> (i32, i32, i32, i32) {
    %c0_i32 = arith.constant 0 : i32
    %c0_i32_0 = arith.constant 0 : i32
    %c0_i32_1 = arith.constant 0 : i32
    %c0_i32_2 = arith.constant 0 : i32
    %c0_i32_3 = arith.constant 0 : i32
    return %c0_i32, %c0_i32_0, %c0_i32_1, %c0_i32_2 : i32, i32, i32, i32
  }
  func.func @transform_2(%arg0: i32, %arg1: i32) -> (i32, i32) {
    %c0_i32 = arith.constant 0 : i32
    %c0_i32_0 = arith.constant 0 : i32
    %c0_i32_1 = arith.constant 0 : i32
    return %c0_i32, %c0_i32_0 : i32, i32
  }
  func.func @transform_3(%arg0: i32, %arg1: i32) -> (i32, i32, i32, i32) {
    %c0_i32 = arith.constant 0 : i32
    %c0_i32_0 = arith.constant 0 : i32
    %c0_i32_1 = arith.constant 0 : i32
    return %arg0, %arg1, %c0_i32, %c0_i32_0 : i32, i32, i32, i32
  }
  func.func @transform_4(%arg0: i32, %arg1: i32) -> (i32, i32, i32) {
    %c0_i32 = arith.constant 0 : i32
    %c0_i32_0 = arith.constant 0 : i32
    %c0_i32_1 = arith.constant 0 : i32
    return %arg0, %c0_i32, %c0_i32_0 : i32, i32, i32
  }
}

module attributes {stable_mosaic.version = 11 : i64} {
  func.func @_se_project_kernel(%arg0: i32, %arg1: i32, %arg2: memref<1x64x96xbf16, #tpu.memory_space<vmem>>, %arg3: memref<1x1x96xf32, #tpu.memory_space<vmem>>, %arg4: memref<96x4xbf16, #tpu.memory_space<vmem>>, %arg5: memref<1x4xf32, #tpu.memory_space<vmem>>, %arg6: memref<4x96xbf16, #tpu.memory_space<vmem>>, %arg7: memref<1x96xf32, #tpu.memory_space<vmem>>, %arg8: memref<96x24xbf16, #tpu.memory_space<vmem>>, %arg9: memref<1x24xf32, #tpu.memory_space<vmem>>, %arg10: memref<1x64x24xbf16, #tpu.memory_space<vmem>>) attributes {dimension_semantics = [#tpu.dimension_semantics<parallel>, #tpu.dimension_semantics<parallel>], iteration_bounds = array<i64: 2, 1>, scalar_prefetch = 0 : i64, scratch_operands = 0 : i64, tpu.core_type = #tpu.core_type<tc>, window_params = [{transform_indices = @transform_0, window_bounds = array<i64: 1, 64, 96>}, {transform_indices = @transform_1, window_bounds = array<i64: 1, 1, 96>}, {pipeline_mode = #tpu.pipeline_mode<synchronous>, transform_indices = @transform_2, window_bounds = array<i64: 96, 4>}, {pipeline_mode = #tpu.pipeline_mode<synchronous>, transform_indices = @transform_3, window_bounds = array<i64: 1, 4>}, {pipeline_mode = #tpu.pipeline_mode<synchronous>, transform_indices = @transform_4, window_bounds = array<i64: 4, 96>}, {pipeline_mode = #tpu.pipeline_mode<synchronous>, transform_indices = @transform_5, window_bounds = array<i64: 1, 96>}, {pipeline_mode = #tpu.pipeline_mode<synchronous>, transform_indices = @transform_6, window_bounds = array<i64: 96, 24>}, {pipeline_mode = #tpu.pipeline_mode<synchronous>, transform_indices = @transform_7, window_bounds = array<i64: 1, 24>}, {transform_indices = @transform_8, window_bounds = array<i64: 1, 64, 24>}]} {
    %c0 = arith.constant 0 : index
    %c0_0 = arith.constant 0 : index
    %c0_1 = arith.constant 0 : index
    %0 = vector.load %arg3[%c0, %c0_0, %c0_1] : memref<1x1x96xf32, #tpu.memory_space<vmem>>, vector<1x1x96xf32>
    %1 = vector.shape_cast %0 : vector<1x1x96xf32> to vector<1x96xf32>
    %cst = arith.constant 1.562500e-02 : f32
    %2 = vector.broadcast %cst : f32 to vector<1x96xf32>
    %3 = arith.mulf %1, %2 : vector<1x96xf32>
    %4 = arith.truncf %3 : vector<1x96xf32> to vector<1x96xbf16>
    %c0_2 = arith.constant 0 : index
    %c0_3 = arith.constant 0 : index
    %5 = vector.load %arg4[%c0_2, %c0_3] : memref<96x4xbf16, #tpu.memory_space<vmem>>, vector<96x4xbf16>
    %cst_4 = arith.constant dense<0.000000e+00> : vector<1x4xf32>
    %6 = tpu.matmul %4, %5, %cst_4 {dimension_numbers = #tpu.dot_dimension_numbers<[1], [0], [0], [1], [0, 0, 1, 1], [], []>} : vector<1x96xbf16>, vector<96x4xbf16>, vector<1x4xf32> -> vector<1x4xf32>
    %c0_5 = arith.constant 0 : index
    %c0_6 = arith.constant 0 : index
    %7 = vector.load %arg5[%c0_5, %c0_6] : memref<1x4xf32, #tpu.memory_space<vmem>>, vector<1x4xf32>
    %8 = arith.addf %6, %7 : vector<1x4xf32>
    %9 = arith.negf %8 : vector<1x4xf32>
    %10 = math.exp %9 : vector<1x4xf32>
    %cst_7 = arith.constant 1.000000e+00 : f32
    %11 = vector.broadcast %cst_7 : f32 to vector<1x4xf32>
    %12 = arith.addf %11, %10 : vector<1x4xf32>
    %13 = arith.divf %11, %12 : vector<1x4xf32>
    %14 = arith.mulf %8, %13 : vector<1x4xf32>
    %15 = arith.truncf %14 : vector<1x4xf32> to vector<1x4xbf16>
    %c0_8 = arith.constant 0 : index
    %c0_9 = arith.constant 0 : index
    %16 = vector.load %arg6[%c0_8, %c0_9] : memref<4x96xbf16, #tpu.memory_space<vmem>>, vector<4x96xbf16>
    %cst_10 = arith.constant dense<0.000000e+00> : vector<1x96xf32>
    %17 = tpu.matmul %15, %16, %cst_10 {dimension_numbers = #tpu.dot_dimension_numbers<[1], [0], [0], [1], [0, 0, 1, 1], [], []>} : vector<1x4xbf16>, vector<4x96xbf16>, vector<1x96xf32> -> vector<1x96xf32>
    %c0_11 = arith.constant 0 : index
    %c0_12 = arith.constant 0 : index
    %18 = vector.load %arg7[%c0_11, %c0_12] : memref<1x96xf32, #tpu.memory_space<vmem>>, vector<1x96xf32>
    %19 = arith.addf %17, %18 : vector<1x96xf32>
    %20 = arith.negf %19 : vector<1x96xf32>
    %21 = math.exp %20 : vector<1x96xf32>
    %cst_13 = arith.constant 1.000000e+00 : f32
    %22 = vector.broadcast %cst_13 : f32 to vector<1x96xf32>
    %23 = arith.addf %22, %21 : vector<1x96xf32>
    %24 = arith.divf %22, %23 : vector<1x96xf32>
    %c0_14 = arith.constant 0 : index
    %c0_15 = arith.constant 0 : index
    %c0_16 = arith.constant 0 : index
    %25 = vector.load %arg2[%c0_14, %c0_15, %c0_16] : memref<1x64x96xbf16, #tpu.memory_space<vmem>>, vector<1x64x96xbf16>
    %26 = vector.shape_cast %25 : vector<1x64x96xbf16> to vector<64x96xbf16>
    %27 = arith.extf %26 : vector<64x96xbf16> to vector<64x96xf32>
    %28 = vector.broadcast %24 : vector<1x96xf32> to vector<64x96xf32>
    %29 = arith.mulf %27, %28 : vector<64x96xf32>
    %30 = arith.truncf %29 : vector<64x96xf32> to vector<64x96xbf16>
    %c0_17 = arith.constant 0 : index
    %c0_18 = arith.constant 0 : index
    %31 = vector.load %arg8[%c0_17, %c0_18] : memref<96x24xbf16, #tpu.memory_space<vmem>>, vector<96x24xbf16>
    %cst_19 = arith.constant dense<0.000000e+00> : vector<64x24xf32>
    %32 = tpu.matmul %30, %31, %cst_19 {dimension_numbers = #tpu.dot_dimension_numbers<[1], [0], [0], [1], [0, 0, 1, 1], [], []>} : vector<64x96xbf16>, vector<96x24xbf16>, vector<64x24xf32> -> vector<64x24xf32>
    %c0_20 = arith.constant 0 : index
    %c0_21 = arith.constant 0 : index
    %33 = vector.load %arg9[%c0_20, %c0_21] : memref<1x24xf32, #tpu.memory_space<vmem>>, vector<1x24xf32>
    %34 = vector.broadcast %33 : vector<1x24xf32> to vector<64x24xf32>
    %35 = arith.addf %32, %34 : vector<64x24xf32>
    %36 = vector.shape_cast %35 : vector<64x24xf32> to vector<1x64x24xf32>
    %37 = arith.truncf %36 : vector<1x64x24xf32> to vector<1x64x24xbf16>
    %c0_22 = arith.constant 0 : index
    %c0_23 = arith.constant 0 : index
    %c0_24 = arith.constant 0 : index
    %38 = vector.load %arg10[%c0_22, %c0_23, %c0_24] : memref<1x64x24xbf16, #tpu.memory_space<vmem>>, vector<1x64x24xbf16>
    tpu.vector_store %arg10[%c0_22, %c0_23, %c0_24], %37 {strides = array<i32>} : memref<1x64x24xbf16, #tpu.memory_space<vmem>>, vector<1x64x24xbf16>,
    return
  }
  func.func @transform_0(%arg0: i32, %arg1: i32) -> (i32, i32, i32) {
    %c0_i32 = arith.constant 0 : i32
    %c0_i32_0 = arith.constant 0 : i32
    return %arg0, %arg1, %c0_i32 : i32, i32, i32
  }
  func.func @transform_1(%arg0: i32, %arg1: i32) -> (i32, i32, i32) {
    %c0_i32 = arith.constant 0 : i32
    %c0_i32_0 = arith.constant 0 : i32
    %c0_i32_1 = arith.constant 0 : i32
    return %arg0, %c0_i32, %c0_i32_0 : i32, i32, i32
  }
  func.func @transform_2(%arg0: i32, %arg1: i32) -> (i32, i32) {
    %c0_i32 = arith.constant 0 : i32
    %c0_i32_0 = arith.constant 0 : i32
    %c0_i32_1 = arith.constant 0 : i32
    return %c0_i32, %c0_i32_0 : i32, i32
  }
  func.func @transform_3(%arg0: i32, %arg1: i32) -> (i32, i32) {
    %c0_i32 = arith.constant 0 : i32
    %c0_i32_0 = arith.constant 0 : i32
    %c0_i32_1 = arith.constant 0 : i32
    return %c0_i32, %c0_i32_0 : i32, i32
  }
  func.func @transform_4(%arg0: i32, %arg1: i32) -> (i32, i32) {
    %c0_i32 = arith.constant 0 : i32
    %c0_i32_0 = arith.constant 0 : i32
    %c0_i32_1 = arith.constant 0 : i32
    return %c0_i32, %c0_i32_0 : i32, i32
  }
  func.func @transform_5(%arg0: i32, %arg1: i32) -> (i32, i32) {
    %c0_i32 = arith.constant 0 : i32
    %c0_i32_0 = arith.constant 0 : i32
    %c0_i32_1 = arith.constant 0 : i32
    return %c0_i32, %c0_i32_0 : i32, i32
  }
  func.func @transform_6(%arg0: i32, %arg1: i32) -> (i32, i32) {
    %c0_i32 = arith.constant 0 : i32
    %c0_i32_0 = arith.constant 0 : i32
    %c0_i32_1 = arith.constant 0 : i32
    return %c0_i32, %c0_i32_0 : i32, i32
  }
  func.func @transform_7(%arg0: i32, %arg1: i32) -> (i32, i32) {
    %c0_i32 = arith.constant 0 : i32
    %c0_i32_0 = arith.constant 0 : i32
    %c0_i32_1 = arith.constant 0 : i32
    return %c0_i32, %c0_i32_0 : i32, i32
  }
  func.func @transform_8(%arg0: i32, %arg1: i32) -> (i32, i32, i32) {
    %c0_i32 = arith.constant 0 : i32
    %c0_i32_0 = arith.constant 0 : i32
    return %arg0, %arg1, %c0_i32 : i32, i32, i32
  }
}

module attributes {stable_mosaic.version = 11 : i64} {
  func.func @_matmul_bias_act_kernel(%arg0: i32, %arg1: memref<64x24xbf16, #tpu.memory_space<vmem>>, %arg2: memref<24x144xbf16, #tpu.memory_space<vmem>>, %arg3: memref<1x144xf32, #tpu.memory_space<vmem>>, %arg4: memref<64x144xbf16, #tpu.memory_space<vmem>>) attributes {dimension_semantics = [#tpu.dimension_semantics<parallel>], iteration_bounds = array<i64: 2>, scalar_prefetch = 0 : i64, scratch_operands = 0 : i64, tpu.core_type = #tpu.core_type<tc>, window_params = [{transform_indices = @transform_0, window_bounds = array<i64: 64, 24>}, {pipeline_mode = #tpu.pipeline_mode<synchronous>, transform_indices = @transform_1, window_bounds = array<i64: 24, 144>}, {pipeline_mode = #tpu.pipeline_mode<synchronous>, transform_indices = @transform_2, window_bounds = array<i64: 1, 144>}, {transform_indices = @transform_3, window_bounds = array<i64: 64, 144>}]} {
    %c0 = arith.constant 0 : index
    %c0_0 = arith.constant 0 : index
    %0 = vector.load %arg1[%c0, %c0_0] : memref<64x24xbf16, #tpu.memory_space<vmem>>, vector<64x24xbf16>
    %c0_1 = arith.constant 0 : index
    %c0_2 = arith.constant 0 : index
    %1 = vector.load %arg2[%c0_1, %c0_2] : memref<24x144xbf16, #tpu.memory_space<vmem>>, vector<24x144xbf16>
    %cst = arith.constant dense<0.000000e+00> : vector<64x144xf32>
    %2 = tpu.matmul %0, %1, %cst {dimension_numbers = #tpu.dot_dimension_numbers<[1], [0], [0], [1], [0, 0, 1, 1], [], []>} : vector<64x24xbf16>, vector<24x144xbf16>, vector<64x144xf32> -> vector<64x144xf32>
    %c0_3 = arith.constant 0 : index
    %c0_4 = arith.constant 0 : index
    %3 = vector.load %arg3[%c0_3, %c0_4] : memref<1x144xf32, #tpu.memory_space<vmem>>, vector<1x144xf32>
    %4 = vector.broadcast %3 : vector<1x144xf32> to vector<64x144xf32>
    %5 = arith.addf %2, %4 : vector<64x144xf32>
    %6 = arith.negf %5 : vector<64x144xf32>
    %7 = math.exp %6 : vector<64x144xf32>
    %cst_5 = arith.constant 1.000000e+00 : f32
    %8 = vector.broadcast %cst_5 : f32 to vector<64x144xf32>
    %9 = arith.addf %8, %7 : vector<64x144xf32>
    %10 = arith.divf %8, %9 : vector<64x144xf32>
    %11 = arith.mulf %5, %10 : vector<64x144xf32>
    %12 = arith.truncf %11 : vector<64x144xf32> to vector<64x144xbf16>
    %c0_6 = arith.constant 0 : index
    %c0_7 = arith.constant 0 : index
    %13 = vector.load %arg4[%c0_6, %c0_7] : memref<64x144xbf16, #tpu.memory_space<vmem>>, vector<64x144xbf16>
    tpu.vector_store %arg4[%c0_6, %c0_7], %12 {strides = array<i32>} : memref<64x144xbf16, #tpu.memory_space<vmem>>, vector<64x144xbf16>,
    return
  }
  func.func @transform_0(%arg0: i32) -> (i32, i32) {
    %c0_i32 = arith.constant 0 : i32
    %c0_i32_0 = arith.constant 0 : i32
    return %arg0, %c0_i32 : i32, i32
  }
  func.func @transform_1(%arg0: i32) -> (i32, i32) {
    %c0_i32 = arith.constant 0 : i32
    %c0_i32_0 = arith.constant 0 : i32
    %c0_i32_1 = arith.constant 0 : i32
    return %c0_i32, %c0_i32_0 : i32, i32
  }
  func.func @transform_2(%arg0: i32) -> (i32, i32) {
    %c0_i32 = arith.constant 0 : i32
    %c0_i32_0 = arith.constant 0 : i32
    %c0_i32_1 = arith.constant 0 : i32
    return %c0_i32, %c0_i32_0 : i32, i32
  }
  func.func @transform_3(%arg0: i32) -> (i32, i32) {
    %c0_i32 = arith.constant 0 : i32
    %c0_i32_0 = arith.constant 0 : i32
    return %arg0, %c0_i32 : i32, i32
  }
}

module attributes {stable_mosaic.version = 11 : i64} {
  func.func @_dwconv_pool_kernel(%arg0: i32, %arg1: i32, %arg2: memref<1x10x10x144xbf16, #tpu.memory_space<vmem>>, %arg3: memref<9x1x1x144xf32, #tpu.memory_space<vmem>>, %arg4: memref<1x144xf32, #tpu.memory_space<vmem>>, %arg5: memref<1x4x8x144xbf16, #tpu.memory_space<vmem>>, %arg6: memref<1x1x144xf32, #tpu.memory_space<vmem>>) attributes {dimension_semantics = [#tpu.dimension_semantics<parallel>, #tpu.dimension_semantics<arbitrary>], iteration_bounds = array<i64: 2, 2>, scalar_prefetch = 0 : i64, scratch_operands = 0 : i64, tpu.core_type = #tpu.core_type<tc>, window_params = [{transform_indices = @transform_0, window_bounds = array<i64: 1, 10, 10, 144>}, {pipeline_mode = #tpu.pipeline_mode<synchronous>, transform_indices = @transform_1, window_bounds = array<i64: 9, 1, 1, 144>}, {pipeline_mode = #tpu.pipeline_mode<synchronous>, transform_indices = @transform_2, window_bounds = array<i64: 1, 144>}, {transform_indices = @transform_3, window_bounds = array<i64: 1, 4, 8, 144>}, {transform_indices = @transform_4, window_bounds = array<i64: 1, 1, 144>}]} {
    %c4_i32 = arith.constant 4 : i32
    %0 = arith.muli %arg1, %c4_i32 : i32
    %c0 = arith.constant 0 : index
    %c0_0 = arith.constant 0 : index
    %c0_1 = arith.constant 0 : index
    %c0_2 = arith.constant 0 : index
    %1 = vector.load %arg3[%c0, %c0_0, %c0_1, %c0_2] : memref<9x1x1x144xf32, #tpu.memory_space<vmem>>, vector<9x1x1x144xf32>
    %c0_3 = arith.constant 0 : index
    %c0_4 = arith.constant 0 : index
    %2 = vector.load %arg4[%c0_3, %c0_4] : memref<1x144xf32, #tpu.memory_space<vmem>>, vector<1x144xf32>
    %c0_5 = arith.constant 0 : index
    %3 = arith.index_cast %0 : i32 to index
    %c0_6 = arith.constant 0 : index
    %c0_7 = arith.constant 0 : index
    %4 = vector.load %arg2[%c0_5, %3, %c0_6, %c0_7] : memref<1x10x10x144xbf16, #tpu.memory_space<vmem>>, vector<1x6x10x144xbf16>
    %5 = vector.shape_cast %4 : vector<1x6x10x144xbf16> to vector<6x10x144xbf16>
    %6 = arith.extf %5 : vector<6x10x144xbf16> to vector<6x10x144xf32>
    %cst = arith.constant 0.000000e+00 : f32
    %7 = vector.broadcast %cst : f32 to vector<4x8x144xf32>
    %8 = vector.extract_strided_slice %6 {offsets = [0, 0, 0], sizes = [4, 8, 144], strides = [1, 1, 1]} : vector<6x10x144xf32> to vector<4x8x144xf32>
    %9 = vector.extract_strided_slice %1 {offsets = [0, 0, 0, 0], sizes = [1, 1, 1, 144], strides = [1, 1, 1, 1]} : vector<9x1x1x144xf32> to vector<1x1x1x144xf32>
    %10 = vector.shape_cast %9 : vector<1x1x1x144xf32> to vector<1x1x144xf32>
    %11 = vector.broadcast %10 : vector<1x1x144xf32> to vector<4x8x144xf32>
    %12 = arith.mulf %8, %11 : vector<4x8x144xf32>
    %13 = arith.addf %7, %12 : vector<4x8x144xf32>
    %14 = vector.extract_strided_slice %6 {offsets = [0, 1, 0], sizes = [4, 8, 144], strides = [1, 1, 1]} : vector<6x10x144xf32> to vector<4x8x144xf32>
    %15 = vector.extract_strided_slice %1 {offsets = [1, 0, 0, 0], sizes = [1, 1, 1, 144], strides = [1, 1, 1, 1]} : vector<9x1x1x144xf32> to vector<1x1x1x144xf32>
    %16 = vector.shape_cast %15 : vector<1x1x1x144xf32> to vector<1x1x144xf32>
    %17 = vector.broadcast %16 : vector<1x1x144xf32> to vector<4x8x144xf32>
    %18 = arith.mulf %14, %17 : vector<4x8x144xf32>
    %19 = arith.addf %13, %18 : vector<4x8x144xf32>
    %20 = vector.extract_strided_slice %6 {offsets = [0, 2, 0], sizes = [4, 8, 144], strides = [1, 1, 1]} : vector<6x10x144xf32> to vector<4x8x144xf32>
    %21 = vector.extract_strided_slice %1 {offsets = [2, 0, 0, 0], sizes = [1, 1, 1, 144], strides = [1, 1, 1, 1]} : vector<9x1x1x144xf32> to vector<1x1x1x144xf32>
    %22 = vector.shape_cast %21 : vector<1x1x1x144xf32> to vector<1x1x144xf32>
    %23 = vector.broadcast %22 : vector<1x1x144xf32> to vector<4x8x144xf32>
    %24 = arith.mulf %20, %23 : vector<4x8x144xf32>
    %25 = arith.addf %19, %24 : vector<4x8x144xf32>
    %26 = vector.extract_strided_slice %6 {offsets = [1, 0, 0], sizes = [4, 8, 144], strides = [1, 1, 1]} : vector<6x10x144xf32> to vector<4x8x144xf32>
    %27 = vector.extract_strided_slice %1 {offsets = [3, 0, 0, 0], sizes = [1, 1, 1, 144], strides = [1, 1, 1, 1]} : vector<9x1x1x144xf32> to vector<1x1x1x144xf32>
    %28 = vector.shape_cast %27 : vector<1x1x1x144xf32> to vector<1x1x144xf32>
    %29 = vector.broadcast %28 : vector<1x1x144xf32> to vector<4x8x144xf32>
    %30 = arith.mulf %26, %29 : vector<4x8x144xf32>
    %31 = arith.addf %25, %30 : vector<4x8x144xf32>
    %32 = vector.extract_strided_slice %6 {offsets = [1, 1, 0], sizes = [4, 8, 144], strides = [1, 1, 1]} : vector<6x10x144xf32> to vector<4x8x144xf32>
    %33 = vector.extract_strided_slice %1 {offsets = [4, 0, 0, 0], sizes = [1, 1, 1, 144], strides = [1, 1, 1, 1]} : vector<9x1x1x144xf32> to vector<1x1x1x144xf32>
    %34 = vector.shape_cast %33 : vector<1x1x1x144xf32> to vector<1x1x144xf32>
    %35 = vector.broadcast %34 : vector<1x1x144xf32> to vector<4x8x144xf32>
    %36 = arith.mulf %32, %35 : vector<4x8x144xf32>
    %37 = arith.addf %31, %36 : vector<4x8x144xf32>
    %38 = vector.extract_strided_slice %6 {offsets = [1, 2, 0], sizes = [4, 8, 144], strides = [1, 1, 1]} : vector<6x10x144xf32> to vector<4x8x144xf32>
    %39 = vector.extract_strided_slice %1 {offsets = [5, 0, 0, 0], sizes = [1, 1, 1, 144], strides = [1, 1, 1, 1]} : vector<9x1x1x144xf32> to vector<1x1x1x144xf32>
    %40 = vector.shape_cast %39 : vector<1x1x1x144xf32> to vector<1x1x144xf32>
    %41 = vector.broadcast %40 : vector<1x1x144xf32> to vector<4x8x144xf32>
    %42 = arith.mulf %38, %41 : vector<4x8x144xf32>
    %43 = arith.addf %37, %42 : vector<4x8x144xf32>
    %44 = vector.extract_strided_slice %6 {offsets = [2, 0, 0], sizes = [4, 8, 144], strides = [1, 1, 1]} : vector<6x10x144xf32> to vector<4x8x144xf32>
    %45 = vector.extract_strided_slice %1 {offsets = [6, 0, 0, 0], sizes = [1, 1, 1, 144], strides = [1, 1, 1, 1]} : vector<9x1x1x144xf32> to vector<1x1x1x144xf32>
    %46 = vector.shape_cast %45 : vector<1x1x1x144xf32> to vector<1x1x144xf32>
    %47 = vector.broadcast %46 : vector<1x1x144xf32> to vector<4x8x144xf32>
    %48 = arith.mulf %44, %47 : vector<4x8x144xf32>
    %49 = arith.addf %43, %48 : vector<4x8x144xf32>
    %50 = vector.extract_strided_slice %6 {offsets = [2, 1, 0], sizes = [4, 8, 144], strides = [1, 1, 1]} : vector<6x10x144xf32> to vector<4x8x144xf32>
    %51 = vector.extract_strided_slice %1 {offsets = [7, 0, 0, 0], sizes = [1, 1, 1, 144], strides = [1, 1, 1, 1]} : vector<9x1x1x144xf32> to vector<1x1x1x144xf32>
    %52 = vector.shape_cast %51 : vector<1x1x1x144xf32> to vector<1x1x144xf32>
    %53 = vector.broadcast %52 : vector<1x1x144xf32> to vector<4x8x144xf32>
    %54 = arith.mulf %50, %53 : vector<4x8x144xf32>
    %55 = arith.addf %49, %54 : vector<4x8x144xf32>
    %56 = vector.extract_strided_slice %6 {offsets = [2, 2, 0], sizes = [4, 8, 144], strides = [1, 1, 1]} : vector<6x10x144xf32> to vector<4x8x144xf32>
    %57 = vector.extract_strided_slice %1 {offsets = [8, 0, 0, 0], sizes = [1, 1, 1, 144], strides = [1, 1, 1, 1]} : vector<9x1x1x144xf32> to vector<1x1x1x144xf32>
    %58 = vector.shape_cast %57 : vector<1x1x1x144xf32> to vector<1x1x144xf32>
    %59 = vector.broadcast %58 : vector<1x1x144xf32> to vector<4x8x144xf32>
    %60 = arith.mulf %56, %59 : vector<4x8x144xf32>
    %61 = arith.addf %55, %60 : vector<4x8x144xf32>
    %62 = vector.shape_cast %2 : vector<1x144xf32> to vector<1x1x144xf32>
    %63 = vector.broadcast %62 : vector<1x1x144xf32> to vector<4x8x144xf32>
    %64 = arith.addf %61, %63 : vector<4x8x144xf32>
    %65 = arith.negf %64 : vector<4x8x144xf32>
    %66 = math.exp %65 : vector<4x8x144xf32>
    %cst_8 = arith.constant 1.000000e+00 : f32
    %67 = vector.broadcast %cst_8 : f32 to vector<4x8x144xf32>
    %68 = arith.addf %67, %66 : vector<4x8x144xf32>
    %69 = arith.divf %67, %68 : vector<4x8x144xf32>
    %70 = arith.mulf %64, %69 : vector<4x8x144xf32>
    %71 = vector.shape_cast %70 : vector<4x8x144xf32> to vector<1x4x8x144xf32>
    %72 = arith.truncf %71 : vector<1x4x8x144xf32> to vector<1x4x8x144xbf16>
    %c0_9 = arith.constant 0 : index
    %c0_10 = arith.constant 0 : index
    %c0_11 = arith.constant 0 : index
    %c0_12 = arith.constant 0 : index
    %73 = vector.load %arg5[%c0_9, %c0_10, %c0_11, %c0_12] : memref<1x4x8x144xbf16, #tpu.memory_space<vmem>>, vector<1x4x8x144xbf16>
    tpu.vector_store %arg5[%c0_9, %c0_10, %c0_11, %c0_12], %72 {strides = array<i32>} : memref<1x4x8x144xbf16, #tpu.memory_space<vmem>>, vector<1x4x8x144xbf16>,
    %c0_i32 = arith.constant 0 : i32
    %74 = arith.cmpi eq, %arg1, %c0_i32 : i32
    %75 = arith.extui %74 : i1 to i32
    %c0_i32_13 = arith.constant 0 : i32
    %76 = arith.cmpi ne, %75, %c0_i32_13 : i32
    scf.if %76 {
      %cst_21 = arith.constant 0.000000e+00 : f32
      %82 = vector.broadcast %cst_21 : f32 to vector<1x1x144xf32>
      %c0_22 = arith.constant 0 : index
      %c0_23 = arith.constant 0 : index
      %c0_24 = arith.constant 0 : index
      %83 = vector.load %arg6[%c0_22, %c0_23, %c0_24] : memref<1x1x144xf32, #tpu.memory_space<vmem>>, vector<1x1x144xf32>
      tpu.vector_store %arg6[%c0_22, %c0_23, %c0_24], %82 {strides = array<i32>} : memref<1x1x144xf32, #tpu.memory_space<vmem>>, vector<1x1x144xf32>,
    } else {
    }
    %c0_14 = arith.constant 0 : index
    %c0_15 = arith.constant 0 : index
    %c0_16 = arith.constant 0 : index
    %77 = vector.load %arg6[%c0_14, %c0_15, %c0_16] : memref<1x1x144xf32, #tpu.memory_space<vmem>>, vector<1x1x144xf32>
    %cst_17 = arith.constant dense<0.000000e+00> : vector<144xf32>
    %78 = vector.multi_reduction <add>, %70, %cst_17 [0, 1] : vector<4x8x144xf32> to vector<144xf32>
    %79 = vector.shape_cast %78 : vector<144xf32> to vector<1x1x144xf32>
    %80 = arith.addf %77, %79 : vector<1x1x144xf32>
    %c0_18 = arith.constant 0 : index
    %c0_19 = arith.constant 0 : index
    %c0_20 = arith.constant 0 : index
    %81 = vector.load %arg6[%c0_18, %c0_19, %c0_20] : memref<1x1x144xf32, #tpu.memory_space<vmem>>, vector<1x1x144xf32>
    tpu.vector_store %arg6[%c0_18, %c0_19, %c0_20], %80 {strides = array<i32>} : memref<1x1x144xf32, #tpu.memory_space<vmem>>, vector<1x1x144xf32>,
    return
  }
  func.func @transform_0(%arg0: i32, %arg1: i32) -> (i32, i32, i32, i32) {
    %c0_i32 = arith.constant 0 : i32
    %c0_i32_0 = arith.constant 0 : i32
    %c0_i32_1 = arith.constant 0 : i32
    %c0_i32_2 = arith.constant 0 : i32
    return %arg0, %c0_i32, %c0_i32_0, %c0_i32_1 : i32, i32, i32, i32
  }
  func.func @transform_1(%arg0: i32, %arg1: i32) -> (i32, i32, i32, i32) {
    %c0_i32 = arith.constant 0 : i32
    %c0_i32_0 = arith.constant 0 : i32
    %c0_i32_1 = arith.constant 0 : i32
    %c0_i32_2 = arith.constant 0 : i32
    %c0_i32_3 = arith.constant 0 : i32
    return %c0_i32, %c0_i32_0, %c0_i32_1, %c0_i32_2 : i32, i32, i32, i32
  }
  func.func @transform_2(%arg0: i32, %arg1: i32) -> (i32, i32) {
    %c0_i32 = arith.constant 0 : i32
    %c0_i32_0 = arith.constant 0 : i32
    %c0_i32_1 = arith.constant 0 : i32
    return %c0_i32, %c0_i32_0 : i32, i32
  }
  func.func @transform_3(%arg0: i32, %arg1: i32) -> (i32, i32, i32, i32) {
    %c0_i32 = arith.constant 0 : i32
    %c0_i32_0 = arith.constant 0 : i32
    %c0_i32_1 = arith.constant 0 : i32
    return %arg0, %arg1, %c0_i32, %c0_i32_0 : i32, i32, i32, i32
  }
  func.func @transform_4(%arg0: i32, %arg1: i32) -> (i32, i32, i32) {
    %c0_i32 = arith.constant 0 : i32
    %c0_i32_0 = arith.constant 0 : i32
    %c0_i32_1 = arith.constant 0 : i32
    return %arg0, %c0_i32, %c0_i32_0 : i32, i32, i32
  }
}

module attributes {stable_mosaic.version = 11 : i64} {
  func.func @_se_project_res_kernel(%arg0: i32, %arg1: i32, %arg2: memref<1x64x144xbf16, #tpu.memory_space<vmem>>, %arg3: memref<1x1x144xf32, #tpu.memory_space<vmem>>, %arg4: memref<144x6xbf16, #tpu.memory_space<vmem>>, %arg5: memref<1x6xf32, #tpu.memory_space<vmem>>, %arg6: memref<6x144xbf16, #tpu.memory_space<vmem>>, %arg7: memref<1x144xf32, #tpu.memory_space<vmem>>, %arg8: memref<144x24xbf16, #tpu.memory_space<vmem>>, %arg9: memref<1x24xf32, #tpu.memory_space<vmem>>, %arg10: memref<1x64x24xbf16, #tpu.memory_space<vmem>>, %arg11: memref<1x64x24xbf16, #tpu.memory_space<vmem>>) attributes {dimension_semantics = [#tpu.dimension_semantics<parallel>, #tpu.dimension_semantics<parallel>], iteration_bounds = array<i64: 2, 1>, scalar_prefetch = 0 : i64, scratch_operands = 0 : i64, tpu.core_type = #tpu.core_type<tc>, window_params = [{transform_indices = @transform_0, window_bounds = array<i64: 1, 64, 144>}, {transform_indices = @transform_1, window_bounds = array<i64: 1, 1, 144>}, {pipeline_mode = #tpu.pipeline_mode<synchronous>, transform_indices = @transform_2, window_bounds = array<i64: 144, 6>}, {pipeline_mode = #tpu.pipeline_mode<synchronous>, transform_indices = @transform_3, window_bounds = array<i64: 1, 6>}, {pipeline_mode = #tpu.pipeline_mode<synchronous>, transform_indices = @transform_4, window_bounds = array<i64: 6, 144>}, {pipeline_mode = #tpu.pipeline_mode<synchronous>, transform_indices = @transform_5, window_bounds = array<i64: 1, 144>}, {pipeline_mode = #tpu.pipeline_mode<synchronous>, transform_indices = @transform_6, window_bounds = array<i64: 144, 24>}, {pipeline_mode = #tpu.pipeline_mode<synchronous>, transform_indices = @transform_7, window_bounds = array<i64: 1, 24>}, {transform_indices = @transform_8, window_bounds = array<i64: 1, 64, 24>}, {transform_indices = @transform_9, window_bounds = array<i64: 1, 64, 24>}]} {
    %c0 = arith.constant 0 : index
    %c0_0 = arith.constant 0 : index
    %c0_1 = arith.constant 0 : index
    %0 = vector.load %arg3[%c0, %c0_0, %c0_1] : memref<1x1x144xf32, #tpu.memory_space<vmem>>, vector<1x1x144xf32>
    %1 = vector.shape_cast %0 : vector<1x1x144xf32> to vector<1x144xf32>
    %cst = arith.constant 1.562500e-02 : f32
    %2 = vector.broadcast %cst : f32 to vector<1x144xf32>
    %3 = arith.mulf %1, %2 : vector<1x144xf32>
    %4 = arith.truncf %3 : vector<1x144xf32> to vector<1x144xbf16>
    %c0_2 = arith.constant 0 : index
    %c0_3 = arith.constant 0 : index
    %5 = vector.load %arg4[%c0_2, %c0_3] : memref<144x6xbf16, #tpu.memory_space<vmem>>, vector<144x6xbf16>
    %cst_4 = arith.constant dense<0.000000e+00> : vector<1x6xf32>
    %6 = tpu.matmul %4, %5, %cst_4 {dimension_numbers = #tpu.dot_dimension_numbers<[1], [0], [0], [1], [0, 0, 1, 1], [], []>} : vector<1x144xbf16>, vector<144x6xbf16>, vector<1x6xf32> -> vector<1x6xf32>
    %c0_5 = arith.constant 0 : index
    %c0_6 = arith.constant 0 : index
    %7 = vector.load %arg5[%c0_5, %c0_6] : memref<1x6xf32, #tpu.memory_space<vmem>>, vector<1x6xf32>
    %8 = arith.addf %6, %7 : vector<1x6xf32>
    %9 = arith.negf %8 : vector<1x6xf32>
    %10 = math.exp %9 : vector<1x6xf32>
    %cst_7 = arith.constant 1.000000e+00 : f32
    %11 = vector.broadcast %cst_7 : f32 to vector<1x6xf32>
    %12 = arith.addf %11, %10 : vector<1x6xf32>
    %13 = arith.divf %11, %12 : vector<1x6xf32>
    %14 = arith.mulf %8, %13 : vector<1x6xf32>
    %15 = arith.truncf %14 : vector<1x6xf32> to vector<1x6xbf16>
    %c0_8 = arith.constant 0 : index
    %c0_9 = arith.constant 0 : index
    %16 = vector.load %arg6[%c0_8, %c0_9] : memref<6x144xbf16, #tpu.memory_space<vmem>>, vector<6x144xbf16>
    %cst_10 = arith.constant dense<0.000000e+00> : vector<1x144xf32>
    %17 = tpu.matmul %15, %16, %cst_10 {dimension_numbers = #tpu.dot_dimension_numbers<[1], [0], [0], [1], [0, 0, 1, 1], [], []>} : vector<1x6xbf16>, vector<6x144xbf16>, vector<1x144xf32> -> vector<1x144xf32>
    %c0_11 = arith.constant 0 : index
    %c0_12 = arith.constant 0 : index
    %18 = vector.load %arg7[%c0_11, %c0_12] : memref<1x144xf32, #tpu.memory_space<vmem>>, vector<1x144xf32>
    %19 = arith.addf %17, %18 : vector<1x144xf32>
    %20 = arith.negf %19 : vector<1x144xf32>
    %21 = math.exp %20 : vector<1x144xf32>
    %cst_13 = arith.constant 1.000000e+00 : f32
    %22 = vector.broadcast %cst_13 : f32 to vector<1x144xf32>
    %23 = arith.addf %22, %21 : vector<1x144xf32>
    %24 = arith.divf %22, %23 : vector<1x144xf32>
    %c0_14 = arith.constant 0 : index
    %c0_15 = arith.constant 0 : index
    %c0_16 = arith.constant 0 : index
    %25 = vector.load %arg2[%c0_14, %c0_15, %c0_16] : memref<1x64x144xbf16, #tpu.memory_space<vmem>>, vector<1x64x144xbf16>
    %26 = vector.shape_cast %25 : vector<1x64x144xbf16> to vector<64x144xbf16>
    %27 = arith.extf %26 : vector<64x144xbf16> to vector<64x144xf32>
    %28 = vector.broadcast %24 : vector<1x144xf32> to vector<64x144xf32>
    %29 = arith.mulf %27, %28 : vector<64x144xf32>
    %30 = arith.truncf %29 : vector<64x144xf32> to vector<64x144xbf16>
    %c0_17 = arith.constant 0 : index
    %c0_18 = arith.constant 0 : index
    %31 = vector.load %arg8[%c0_17, %c0_18] : memref<144x24xbf16, #tpu.memory_space<vmem>>, vector<144x24xbf16>
    %cst_19 = arith.constant dense<0.000000e+00> : vector<64x24xf32>
    %32 = tpu.matmul %30, %31, %cst_19 {dimension_numbers = #tpu.dot_dimension_numbers<[1], [0], [0], [1], [0, 0, 1, 1], [], []>} : vector<64x144xbf16>, vector<144x24xbf16>, vector<64x24xf32> -> vector<64x24xf32>
    %c0_20 = arith.constant 0 : index
    %c0_21 = arith.constant 0 : index
    %33 = vector.load %arg9[%c0_20, %c0_21] : memref<1x24xf32, #tpu.memory_space<vmem>>, vector<1x24xf32>
    %34 = vector.broadcast %33 : vector<1x24xf32> to vector<64x24xf32>
    %35 = arith.addf %32, %34 : vector<64x24xf32>
    %c0_22 = arith.constant 0 : index
    %c0_23 = arith.constant 0 : index
    %c0_24 = arith.constant 0 : index
    %36 = vector.load %arg10[%c0_22, %c0_23, %c0_24] : memref<1x64x24xbf16, #tpu.memory_space<vmem>>, vector<1x64x24xbf16>
    %37 = vector.shape_cast %36 : vector<1x64x24xbf16> to vector<64x24xbf16>
    %38 = arith.extf %37 : vector<64x24xbf16> to vector<64x24xf32>
    %39 = arith.addf %35, %38 : vector<64x24xf32>
    %40 = vector.shape_cast %39 : vector<64x24xf32> to vector<1x64x24xf32>
    %41 = arith.truncf %40 : vector<1x64x24xf32> to vector<1x64x24xbf16>
    %c0_25 = arith.constant 0 : index
    %c0_26 = arith.constant 0 : index
    %c0_27 = arith.constant 0 : index
    %42 = vector.load %arg11[%c0_25, %c0_26, %c0_27] : memref<1x64x24xbf16, #tpu.memory_space<vmem>>, vector<1x64x24xbf16>
    tpu.vector_store %arg11[%c0_25, %c0_26, %c0_27], %41 {strides = array<i32>} : memref<1x64x24xbf16, #tpu.memory_space<vmem>>, vector<1x64x24xbf16>,
    return
  }
  func.func @transform_0(%arg0: i32, %arg1: i32) -> (i32, i32, i32) {
    %c0_i32 = arith.constant 0 : i32
    %c0_i32_0 = arith.constant 0 : i32
    return %arg0, %arg1, %c0_i32 : i32, i32, i32
  }
  func.func @transform_1(%arg0: i32, %arg1: i32) -> (i32, i32, i32) {
    %c0_i32 = arith.constant 0 : i32
    %c0_i32_0 = arith.constant 0 : i32
    %c0_i32_1 = arith.constant 0 : i32
    return %arg0, %c0_i32, %c0_i32_0 : i32, i32, i32
  }
  func.func @transform_2(%arg0: i32, %arg1: i32) -> (i32, i32) {
    %c0_i32 = arith.constant 0 : i32
    %c0_i32_0 = arith.constant 0 : i32
    %c0_i32_1 = arith.constant 0 : i32
    return %c0_i32, %c0_i32_0 : i32, i32
  }
  func.func @transform_3(%arg0: i32, %arg1: i32) -> (i32, i32) {
    %c0_i32 = arith.constant 0 : i32
    %c0_i32_0 = arith.constant 0 : i32
    %c0_i32_1 = arith.constant 0 : i32
    return %c0_i32, %c0_i32_0 : i32, i32
  }
  func.func @transform_4(%arg0: i32, %arg1: i32) -> (i32, i32) {
    %c0_i32 = arith.constant 0 : i32
    %c0_i32_0 = arith.constant 0 : i32
    %c0_i32_1 = arith.constant 0 : i32
    return %c0_i32, %c0_i32_0 : i32, i32
  }
  func.func @transform_5(%arg0: i32, %arg1: i32) -> (i32, i32) {
    %c0_i32 = arith.constant 0 : i32
    %c0_i32_0 = arith.constant 0 : i32
    %c0_i32_1 = arith.constant 0 : i32
    return %c0_i32, %c0_i32_0 : i32, i32
  }
  func.func @transform_6(%arg0: i32, %arg1: i32) -> (i32, i32) {
    %c0_i32 = arith.constant 0 : i32
    %c0_i32_0 = arith.constant 0 : i32
    %c0_i32_1 = arith.constant 0 : i32
    return %c0_i32, %c0_i32_0 : i32, i32
  }
  func.func @transform_7(%arg0: i32, %arg1: i32) -> (i32, i32) {
    %c0_i32 = arith.constant 0 : i32
    %c0_i32_0 = arith.constant 0 : i32
    %c0_i32_1 = arith.constant 0 : i32
    return %c0_i32, %c0_i32_0 : i32, i32
  }
  func.func @transform_8(%arg0: i32, %arg1: i32) -> (i32, i32, i32) {
    %c0_i32 = arith.constant 0 : i32
    %c0_i32_0 = arith.constant 0 : i32
    return %arg0, %arg1, %c0_i32 : i32, i32, i32
  }
  func.func @transform_9(%arg0: i32, %arg1: i32) -> (i32, i32, i32) {
    %c0_i32 = arith.constant 0 : i32
    %c0_i32_0 = arith.constant 0 : i32
    return %arg0, %arg1, %c0_i32 : i32, i32, i32
  }
}

module attributes {stable_mosaic.version = 11 : i64} {
  func.func @_dwconv_pool_kernel(%arg0: i32, %arg1: i32, %arg2: memref<4x6x6x144xbf16, #tpu.memory_space<vmem>>, %arg3: memref<25x1x1x144xf32, #tpu.memory_space<vmem>>, %arg4: memref<1x144xf32, #tpu.memory_space<vmem>>, %arg5: memref<1x2x4x144xbf16, #tpu.memory_space<vmem>>, %arg6: memref<1x1x144xf32, #tpu.memory_space<vmem>>) attributes {dimension_semantics = [#tpu.dimension_semantics<parallel>, #tpu.dimension_semantics<arbitrary>], iteration_bounds = array<i64: 2, 2>, scalar_prefetch = 0 : i64, scratch_operands = 0 : i64, tpu.core_type = #tpu.core_type<tc>, window_params = [{transform_indices = @transform_0, window_bounds = array<i64: 4, 6, 6, 144>}, {pipeline_mode = #tpu.pipeline_mode<synchronous>, transform_indices = @transform_1, window_bounds = array<i64: 25, 1, 1, 144>}, {pipeline_mode = #tpu.pipeline_mode<synchronous>, transform_indices = @transform_2, window_bounds = array<i64: 1, 144>}, {transform_indices = @transform_3, window_bounds = array<i64: 1, 2, 4, 144>}, {transform_indices = @transform_4, window_bounds = array<i64: 1, 1, 144>}]} {
    %c2_i32 = arith.constant 2 : i32
    %0 = arith.muli %arg1, %c2_i32 : i32
    %c0 = arith.constant 0 : index
    %c0_0 = arith.constant 0 : index
    %c0_1 = arith.constant 0 : index
    %c0_2 = arith.constant 0 : index
    %1 = vector.load %arg3[%c0, %c0_0, %c0_1, %c0_2] : memref<25x1x1x144xf32, #tpu.memory_space<vmem>>, vector<25x1x1x144xf32>
    %c0_3 = arith.constant 0 : index
    %c0_4 = arith.constant 0 : index
    %2 = vector.load %arg4[%c0_3, %c0_4] : memref<1x144xf32, #tpu.memory_space<vmem>>, vector<1x144xf32>
    %c0_5 = arith.constant 0 : index
    %3 = arith.index_cast %0 : i32 to index
    %c0_6 = arith.constant 0 : index
    %c0_7 = arith.constant 0 : index
    %4 = vector.load %arg2[%c0_5, %3, %c0_6, %c0_7] : memref<4x6x6x144xbf16, #tpu.memory_space<vmem>>, vector<1x4x6x144xbf16>
    %5 = vector.shape_cast %4 : vector<1x4x6x144xbf16> to vector<4x6x144xbf16>
    %6 = arith.extf %5 : vector<4x6x144xbf16> to vector<4x6x144xf32>
    %c1 = arith.constant 1 : index
    %7 = arith.index_cast %0 : i32 to index
    %c0_8 = arith.constant 0 : index
    %c0_9 = arith.constant 0 : index
    %8 = vector.load %arg2[%c1, %7, %c0_8, %c0_9] : memref<4x6x6x144xbf16, #tpu.memory_space<vmem>>, vector<1x4x6x144xbf16>
    %9 = vector.shape_cast %8 : vector<1x4x6x144xbf16> to vector<4x6x144xbf16>
    %10 = arith.extf %9 : vector<4x6x144xbf16> to vector<4x6x144xf32>
    %c2 = arith.constant 2 : index
    %11 = arith.index_cast %0 : i32 to index
    %c0_10 = arith.constant 0 : index
    %c0_11 = arith.constant 0 : index
    %12 = vector.load %arg2[%c2, %11, %c0_10, %c0_11] : memref<4x6x6x144xbf16, #tpu.memory_space<vmem>>, vector<1x4x6x144xbf16>
    %13 = vector.shape_cast %12 : vector<1x4x6x144xbf16> to vector<4x6x144xbf16>
    %14 = arith.extf %13 : vector<4x6x144xbf16> to vector<4x6x144xf32>
    %c3 = arith.constant 3 : index
    %15 = arith.index_cast %0 : i32 to index
    %c0_12 = arith.constant 0 : index
    %c0_13 = arith.constant 0 : index
    %16 = vector.load %arg2[%c3, %15, %c0_12, %c0_13] : memref<4x6x6x144xbf16, #tpu.memory_space<vmem>>, vector<1x4x6x144xbf16>
    %17 = vector.shape_cast %16 : vector<1x4x6x144xbf16> to vector<4x6x144xbf16>
    %18 = arith.extf %17 : vector<4x6x144xbf16> to vector<4x6x144xf32>
    %cst = arith.constant 0.000000e+00 : f32
    %19 = vector.broadcast %cst : f32 to vector<2x4x144xf32>
    %20 = vector.extract_strided_slice %6 {offsets = [0, 0, 0], sizes = [2, 4, 144], strides = [1, 1, 1]} : vector<4x6x144xf32> to vector<2x4x144xf32>
    %21 = vector.extract_strided_slice %1 {offsets = [0, 0, 0, 0], sizes = [1, 1, 1, 144], strides = [1, 1, 1, 1]} : vector<25x1x1x144xf32> to vector<1x1x1x144xf32>
    %22 = vector.shape_cast %21 : vector<1x1x1x144xf32> to vector<1x1x144xf32>
    %23 = vector.broadcast %22 : vector<1x1x144xf32> to vector<2x4x144xf32>
    %24 = arith.mulf %20, %23 : vector<2x4x144xf32>
    %25 = arith.addf %19, %24 : vector<2x4x144xf32>
    %26 = vector.extract_strided_slice %10 {offsets = [0, 0, 0], sizes = [2, 4, 144], strides = [1, 1, 1]} : vector<4x6x144xf32> to vector<2x4x144xf32>
    %27 = vector.extract_strided_slice %1 {offsets = [1, 0, 0, 0], sizes = [1, 1, 1, 144], strides = [1, 1, 1, 1]} : vector<25x1x1x144xf32> to vector<1x1x1x144xf32>
    %28 = vector.shape_cast %27 : vector<1x1x1x144xf32> to vector<1x1x144xf32>
    %29 = vector.broadcast %28 : vector<1x1x144xf32> to vector<2x4x144xf32>
    %30 = arith.mulf %26, %29 : vector<2x4x144xf32>
    %31 = arith.addf %25, %30 : vector<2x4x144xf32>
    %32 = vector.extract_strided_slice %6 {offsets = [0, 1, 0], sizes = [2, 4, 144], strides = [1, 1, 1]} : vector<4x6x144xf32> to vector<2x4x144xf32>
    %33 = vector.extract_strided_slice %1 {offsets = [2, 0, 0, 0], sizes = [1, 1, 1, 144], strides = [1, 1, 1, 1]} : vector<25x1x1x144xf32> to vector<1x1x1x144xf32>
    %34 = vector.shape_cast %33 : vector<1x1x1x144xf32> to vector<1x1x144xf32>
    %35 = vector.broadcast %34 : vector<1x1x144xf32> to vector<2x4x144xf32>
    %36 = arith.mulf %32, %35 : vector<2x4x144xf32>
    %37 = arith.addf %31, %36 : vector<2x4x144xf32>
    %38 = vector.extract_strided_slice %10 {offsets = [0, 1, 0], sizes = [2, 4, 144], strides = [1, 1, 1]} : vector<4x6x144xf32> to vector<2x4x144xf32>
    %39 = vector.extract_strided_slice %1 {offsets = [3, 0, 0, 0], sizes = [1, 1, 1, 144], strides = [1, 1, 1, 1]} : vector<25x1x1x144xf32> to vector<1x1x1x144xf32>
    %40 = vector.shape_cast %39 : vector<1x1x1x144xf32> to vector<1x1x144xf32>
    %41 = vector.broadcast %40 : vector<1x1x144xf32> to vector<2x4x144xf32>
    %42 = arith.mulf %38, %41 : vector<2x4x144xf32>
    %43 = arith.addf %37, %42 : vector<2x4x144xf32>
    %44 = vector.extract_strided_slice %6 {offsets = [0, 2, 0], sizes = [2, 4, 144], strides = [1, 1, 1]} : vector<4x6x144xf32> to vector<2x4x144xf32>
    %45 = vector.extract_strided_slice %1 {offsets = [4, 0, 0, 0], sizes = [1, 1, 1, 144], strides = [1, 1, 1, 1]} : vector<25x1x1x144xf32> to vector<1x1x1x144xf32>
    %46 = vector.shape_cast %45 : vector<1x1x1x144xf32> to vector<1x1x144xf32>
    %47 = vector.broadcast %46 : vector<1x1x144xf32> to vector<2x4x144xf32>
    %48 = arith.mulf %44, %47 : vector<2x4x144xf32>
    %49 = arith.addf %43, %48 : vector<2x4x144xf32>
    %50 = vector.extract_strided_slice %14 {offsets = [0, 0, 0], sizes = [2, 4, 144], strides = [1, 1, 1]} : vector<4x6x144xf32> to vector<2x4x144xf32>
    %51 = vector.extract_strided_slice %1 {offsets = [5, 0, 0, 0], sizes = [1, 1, 1, 144], strides = [1, 1, 1, 1]} : vector<25x1x1x144xf32> to vector<1x1x1x144xf32>
    %52 = vector.shape_cast %51 : vector<1x1x1x144xf32> to vector<1x1x144xf32>
    %53 = vector.broadcast %52 : vector<1x1x144xf32> to vector<2x4x144xf32>
    %54 = arith.mulf %50, %53 : vector<2x4x144xf32>
    %55 = arith.addf %49, %54 : vector<2x4x144xf32>
    %56 = vector.extract_strided_slice %18 {offsets = [0, 0, 0], sizes = [2, 4, 144], strides = [1, 1, 1]} : vector<4x6x144xf32> to vector<2x4x144xf32>
    %57 = vector.extract_strided_slice %1 {offsets = [6, 0, 0, 0], sizes = [1, 1, 1, 144], strides = [1, 1, 1, 1]} : vector<25x1x1x144xf32> to vector<1x1x1x144xf32>
    %58 = vector.shape_cast %57 : vector<1x1x1x144xf32> to vector<1x1x144xf32>
    %59 = vector.broadcast %58 : vector<1x1x144xf32> to vector<2x4x144xf32>
    %60 = arith.mulf %56, %59 : vector<2x4x144xf32>
    %61 = arith.addf %55, %60 : vector<2x4x144xf32>
    %62 = vector.extract_strided_slice %14 {offsets = [0, 1, 0], sizes = [2, 4, 144], strides = [1, 1, 1]} : vector<4x6x144xf32> to vector<2x4x144xf32>
    %63 = vector.extract_strided_slice %1 {offsets = [7, 0, 0, 0], sizes = [1, 1, 1, 144], strides = [1, 1, 1, 1]} : vector<25x1x1x144xf32> to vector<1x1x1x144xf32>
    %64 = vector.shape_cast %63 : vector<1x1x1x144xf32> to vector<1x1x144xf32>
    %65 = vector.broadcast %64 : vector<1x1x144xf32> to vector<2x4x144xf32>
    %66 = arith.mulf %62, %65 : vector<2x4x144xf32>
    %67 = arith.addf %61, %66 : vector<2x4x144xf32>
    %68 = vector.extract_strided_slice %18 {offsets = [0, 1, 0], sizes = [2, 4, 144], strides = [1, 1, 1]} : vector<4x6x144xf32> to vector<2x4x144xf32>
    %69 = vector.extract_strided_slice %1 {offsets = [8, 0, 0, 0], sizes = [1, 1, 1, 144], strides = [1, 1, 1, 1]} : vector<25x1x1x144xf32> to vector<1x1x1x144xf32>
    %70 = vector.shape_cast %69 : vector<1x1x1x144xf32> to vector<1x1x144xf32>
    %71 = vector.broadcast %70 : vector<1x1x144xf32> to vector<2x4x144xf32>
    %72 = arith.mulf %68, %71 : vector<2x4x144xf32>
    %73 = arith.addf %67, %72 : vector<2x4x144xf32>
    %74 = vector.extract_strided_slice %14 {offsets = [0, 2, 0], sizes = [2, 4, 144], strides = [1, 1, 1]} : vector<4x6x144xf32> to vector<2x4x144xf32>
    %75 = vector.extract_strided_slice %1 {offsets = [9, 0, 0, 0], sizes = [1, 1, 1, 144], strides = [1, 1, 1, 1]} : vector<25x1x1x144xf32> to vector<1x1x1x144xf32>
    %76 = vector.shape_cast %75 : vector<1x1x1x144xf32> to vector<1x1x144xf32>
    %77 = vector.broadcast %76 : vector<1x1x144xf32> to vector<2x4x144xf32>
    %78 = arith.mulf %74, %77 : vector<2x4x144xf32>
    %79 = arith.addf %73, %78 : vector<2x4x144xf32>
    %80 = vector.extract_strided_slice %6 {offsets = [1, 0, 0], sizes = [2, 4, 144], strides = [1, 1, 1]} : vector<4x6x144xf32> to vector<2x4x144xf32>
    %81 = vector.extract_strided_slice %1 {offsets = [10, 0, 0, 0], sizes = [1, 1, 1, 144], strides = [1, 1, 1, 1]} : vector<25x1x1x144xf32> to vector<1x1x1x144xf32>
    %82 = vector.shape_cast %81 : vector<1x1x1x144xf32> to vector<1x1x144xf32>
    %83 = vector.broadcast %82 : vector<1x1x144xf32> to vector<2x4x144xf32>
    %84 = arith.mulf %80, %83 : vector<2x4x144xf32>
    %85 = arith.addf %79, %84 : vector<2x4x144xf32>
    %86 = vector.extract_strided_slice %10 {offsets = [1, 0, 0], sizes = [2, 4, 144], strides = [1, 1, 1]} : vector<4x6x144xf32> to vector<2x4x144xf32>
    %87 = vector.extract_strided_slice %1 {offsets = [11, 0, 0, 0], sizes = [1, 1, 1, 144], strides = [1, 1, 1, 1]} : vector<25x1x1x144xf32> to vector<1x1x1x144xf32>
    %88 = vector.shape_cast %87 : vector<1x1x1x144xf32> to vector<1x1x144xf32>
    %89 = vector.broadcast %88 : vector<1x1x144xf32> to vector<2x4x144xf32>
    %90 = arith.mulf %86, %89 : vector<2x4x144xf32>
    %91 = arith.addf %85, %90 : vector<2x4x144xf32>
    %92 = vector.extract_strided_slice %6 {offsets = [1, 1, 0], sizes = [2, 4, 144], strides = [1, 1, 1]} : vector<4x6x144xf32> to vector<2x4x144xf32>
    %93 = vector.extract_strided_slice %1 {offsets = [12, 0, 0, 0], sizes = [1, 1, 1, 144], strides = [1, 1, 1, 1]} : vector<25x1x1x144xf32> to vector<1x1x1x144xf32>
    %94 = vector.shape_cast %93 : vector<1x1x1x144xf32> to vector<1x1x144xf32>
    %95 = vector.broadcast %94 : vector<1x1x144xf32> to vector<2x4x144xf32>
    %96 = arith.mulf %92, %95 : vector<2x4x144xf32>
    %97 = arith.addf %91, %96 : vector<2x4x144xf32>
    %98 = vector.extract_strided_slice %10 {offsets = [1, 1, 0], sizes = [2, 4, 144], strides = [1, 1, 1]} : vector<4x6x144xf32> to vector<2x4x144xf32>
    %99 = vector.extract_strided_slice %1 {offsets = [13, 0, 0, 0], sizes = [1, 1, 1, 144], strides = [1, 1, 1, 1]} : vector<25x1x1x144xf32> to vector<1x1x1x144xf32>
    %100 = vector.shape_cast %99 : vector<1x1x1x144xf32> to vector<1x1x144xf32>
    %101 = vector.broadcast %100 : vector<1x1x144xf32> to vector<2x4x144xf32>
    %102 = arith.mulf %98, %101 : vector<2x4x144xf32>
    %103 = arith.addf %97, %102 : vector<2x4x144xf32>
    %104 = vector.extract_strided_slice %6 {offsets = [1, 2, 0], sizes = [2, 4, 144], strides = [1, 1, 1]} : vector<4x6x144xf32> to vector<2x4x144xf32>
    %105 = vector.extract_strided_slice %1 {offsets = [14, 0, 0, 0], sizes = [1, 1, 1, 144], strides = [1, 1, 1, 1]} : vector<25x1x1x144xf32> to vector<1x1x1x144xf32>
    %106 = vector.shape_cast %105 : vector<1x1x1x144xf32> to vector<1x1x144xf32>
    %107 = vector.broadcast %106 : vector<1x1x144xf32> to vector<2x4x144xf32>
    %108 = arith.mulf %104, %107 : vector<2x4x144xf32>
    %109 = arith.addf %103, %108 : vector<2x4x144xf32>
    %110 = vector.extract_strided_slice %14 {offsets = [1, 0, 0], sizes = [2, 4, 144], strides = [1, 1, 1]} : vector<4x6x144xf32> to vector<2x4x144xf32>
    %111 = vector.extract_strided_slice %1 {offsets = [15, 0, 0, 0], sizes = [1, 1, 1, 144], strides = [1, 1, 1, 1]} : vector<25x1x1x144xf32> to vector<1x1x1x144xf32>
    %112 = vector.shape_cast %111 : vector<1x1x1x144xf32> to vector<1x1x144xf32>
    %113 = vector.broadcast %112 : vector<1x1x144xf32> to vector<2x4x144xf32>
    %114 = arith.mulf %110, %113 : vector<2x4x144xf32>
    %115 = arith.addf %109, %114 : vector<2x4x144xf32>
    %116 = vector.extract_strided_slice %18 {offsets = [1, 0, 0], sizes = [2, 4, 144], strides = [1, 1, 1]} : vector<4x6x144xf32> to vector<2x4x144xf32>
    %117 = vector.extract_strided_slice %1 {offsets = [16, 0, 0, 0], sizes = [1, 1, 1, 144], strides = [1, 1, 1, 1]} : vector<25x1x1x144xf32> to vector<1x1x1x144xf32>
    %118 = vector.shape_cast %117 : vector<1x1x1x144xf32> to vector<1x1x144xf32>
    %119 = vector.broadcast %118 : vector<1x1x144xf32> to vector<2x4x144xf32>
    %120 = arith.mulf %116, %119 : vector<2x4x144xf32>
    %121 = arith.addf %115, %120 : vector<2x4x144xf32>
    %122 = vector.extract_strided_slice %14 {offsets = [1, 1, 0], sizes = [2, 4, 144], strides = [1, 1, 1]} : vector<4x6x144xf32> to vector<2x4x144xf32>
    %123 = vector.extract_strided_slice %1 {offsets = [17, 0, 0, 0], sizes = [1, 1, 1, 144], strides = [1, 1, 1, 1]} : vector<25x1x1x144xf32> to vector<1x1x1x144xf32>
    %124 = vector.shape_cast %123 : vector<1x1x1x144xf32> to vector<1x1x144xf32>
    %125 = vector.broadcast %124 : vector<1x1x144xf32> to vector<2x4x144xf32>
    %126 = arith.mulf %122, %125 : vector<2x4x144xf32>
    %127 = arith.addf %121, %126 : vector<2x4x144xf32>
    %128 = vector.extract_strided_slice %18 {offsets = [1, 1, 0], sizes = [2, 4, 144], strides = [1, 1, 1]} : vector<4x6x144xf32> to vector<2x4x144xf32>
    %129 = vector.extract_strided_slice %1 {offsets = [18, 0, 0, 0], sizes = [1, 1, 1, 144], strides = [1, 1, 1, 1]} : vector<25x1x1x144xf32> to vector<1x1x1x144xf32>
    %130 = vector.shape_cast %129 : vector<1x1x1x144xf32> to vector<1x1x144xf32>
    %131 = vector.broadcast %130 : vector<1x1x144xf32> to vector<2x4x144xf32>
    %132 = arith.mulf %128, %131 : vector<2x4x144xf32>
    %133 = arith.addf %127, %132 : vector<2x4x144xf32>
    %134 = vector.extract_strided_slice %14 {offsets = [1, 2, 0], sizes = [2, 4, 144], strides = [1, 1, 1]} : vector<4x6x144xf32> to vector<2x4x144xf32>
    %135 = vector.extract_strided_slice %1 {offsets = [19, 0, 0, 0], sizes = [1, 1, 1, 144], strides = [1, 1, 1, 1]} : vector<25x1x1x144xf32> to vector<1x1x1x144xf32>
    %136 = vector.shape_cast %135 : vector<1x1x1x144xf32> to vector<1x1x144xf32>
    %137 = vector.broadcast %136 : vector<1x1x144xf32> to vector<2x4x144xf32>
    %138 = arith.mulf %134, %137 : vector<2x4x144xf32>
    %139 = arith.addf %133, %138 : vector<2x4x144xf32>
    %140 = vector.extract_strided_slice %6 {offsets = [2, 0, 0], sizes = [2, 4, 144], strides = [1, 1, 1]} : vector<4x6x144xf32> to vector<2x4x144xf32>
    %141 = vector.extract_strided_slice %1 {offsets = [20, 0, 0, 0], sizes = [1, 1, 1, 144], strides = [1, 1, 1, 1]} : vector<25x1x1x144xf32> to vector<1x1x1x144xf32>
    %142 = vector.shape_cast %141 : vector<1x1x1x144xf32> to vector<1x1x144xf32>
    %143 = vector.broadcast %142 : vector<1x1x144xf32> to vector<2x4x144xf32>
    %144 = arith.mulf %140, %143 : vector<2x4x144xf32>
    %145 = arith.addf %139, %144 : vector<2x4x144xf32>
    %146 = vector.extract_strided_slice %10 {offsets = [2, 0, 0], sizes = [2, 4, 144], strides = [1, 1, 1]} : vector<4x6x144xf32> to vector<2x4x144xf32>
    %147 = vector.extract_strided_slice %1 {offsets = [21, 0, 0, 0], sizes = [1, 1, 1, 144], strides = [1, 1, 1, 1]} : vector<25x1x1x144xf32> to vector<1x1x1x144xf32>
    %148 = vector.shape_cast %147 : vector<1x1x1x144xf32> to vector<1x1x144xf32>
    %149 = vector.broadcast %148 : vector<1x1x144xf32> to vector<2x4x144xf32>
    %150 = arith.mulf %146, %149 : vector<2x4x144xf32>
    %151 = arith.addf %145, %150 : vector<2x4x144xf32>
    %152 = vector.extract_strided_slice %6 {offsets = [2, 1, 0], sizes = [2, 4, 144], strides = [1, 1, 1]} : vector<4x6x144xf32> to vector<2x4x144xf32>
    %153 = vector.extract_strided_slice %1 {offsets = [22, 0, 0, 0], sizes = [1, 1, 1, 144], strides = [1, 1, 1, 1]} : vector<25x1x1x144xf32> to vector<1x1x1x144xf32>
    %154 = vector.shape_cast %153 : vector<1x1x1x144xf32> to vector<1x1x144xf32>
    %155 = vector.broadcast %154 : vector<1x1x144xf32> to vector<2x4x144xf32>
    %156 = arith.mulf %152, %155 : vector<2x4x144xf32>
    %157 = arith.addf %151, %156 : vector<2x4x144xf32>
    %158 = vector.extract_strided_slice %10 {offsets = [2, 1, 0], sizes = [2, 4, 144], strides = [1, 1, 1]} : vector<4x6x144xf32> to vector<2x4x144xf32>
    %159 = vector.extract_strided_slice %1 {offsets = [23, 0, 0, 0], sizes = [1, 1, 1, 144], strides = [1, 1, 1, 1]} : vector<25x1x1x144xf32> to vector<1x1x1x144xf32>
    %160 = vector.shape_cast %159 : vector<1x1x1x144xf32> to vector<1x1x144xf32>
    %161 = vector.broadcast %160 : vector<1x1x144xf32> to vector<2x4x144xf32>
    %162 = arith.mulf %158, %161 : vector<2x4x144xf32>
    %163 = arith.addf %157, %162 : vector<2x4x144xf32>
    %164 = vector.extract_strided_slice %6 {offsets = [2, 2, 0], sizes = [2, 4, 144], strides = [1, 1, 1]} : vector<4x6x144xf32> to vector<2x4x144xf32>
    %165 = vector.extract_strided_slice %1 {offsets = [24, 0, 0, 0], sizes = [1, 1, 1, 144], strides = [1, 1, 1, 1]} : vector<25x1x1x144xf32> to vector<1x1x1x144xf32>
    %166 = vector.shape_cast %165 : vector<1x1x1x144xf32> to vector<1x1x144xf32>
    %167 = vector.broadcast %166 : vector<1x1x144xf32> to vector<2x4x144xf32>
    %168 = arith.mulf %164, %167 : vector<2x4x144xf32>
    %169 = arith.addf %163, %168 : vector<2x4x144xf32>
    %170 = vector.shape_cast %2 : vector<1x144xf32> to vector<1x1x144xf32>
    %171 = vector.broadcast %170 : vector<1x1x144xf32> to vector<2x4x144xf32>
    %172 = arith.addf %169, %171 : vector<2x4x144xf32>
    %173 = arith.negf %172 : vector<2x4x144xf32>
    %174 = math.exp %173 : vector<2x4x144xf32>
    %cst_14 = arith.constant 1.000000e+00 : f32
    %175 = vector.broadcast %cst_14 : f32 to vector<2x4x144xf32>
    %176 = arith.addf %175, %174 : vector<2x4x144xf32>
    %177 = arith.divf %175, %176 : vector<2x4x144xf32>
    %178 = arith.mulf %172, %177 : vector<2x4x144xf32>
    %179 = vector.shape_cast %178 : vector<2x4x144xf32> to vector<1x2x4x144xf32>
    %180 = arith.truncf %179 : vector<1x2x4x144xf32> to vector<1x2x4x144xbf16>
    %c0_15 = arith.constant 0 : index
    %c0_16 = arith.constant 0 : index
    %c0_17 = arith.constant 0 : index
    %c0_18 = arith.constant 0 : index
    %181 = vector.load %arg5[%c0_15, %c0_16, %c0_17, %c0_18] : memref<1x2x4x144xbf16, #tpu.memory_space<vmem>>, vector<1x2x4x144xbf16>
    tpu.vector_store %arg5[%c0_15, %c0_16, %c0_17, %c0_18], %180 {strides = array<i32>} : memref<1x2x4x144xbf16, #tpu.memory_space<vmem>>, vector<1x2x4x144xbf16>,
    %c0_i32 = arith.constant 0 : i32
    %182 = arith.cmpi eq, %arg1, %c0_i32 : i32
    %183 = arith.extui %182 : i1 to i32
    %c0_i32_19 = arith.constant 0 : i32
    %184 = arith.cmpi ne, %183, %c0_i32_19 : i32
    scf.if %184 {
      %cst_27 = arith.constant 0.000000e+00 : f32
      %190 = vector.broadcast %cst_27 : f32 to vector<1x1x144xf32>
      %c0_28 = arith.constant 0 : index
      %c0_29 = arith.constant 0 : index
      %c0_30 = arith.constant 0 : index
      %191 = vector.load %arg6[%c0_28, %c0_29, %c0_30] : memref<1x1x144xf32, #tpu.memory_space<vmem>>, vector<1x1x144xf32>
      tpu.vector_store %arg6[%c0_28, %c0_29, %c0_30], %190 {strides = array<i32>} : memref<1x1x144xf32, #tpu.memory_space<vmem>>, vector<1x1x144xf32>,
    } else {
    }
    %c0_20 = arith.constant 0 : index
    %c0_21 = arith.constant 0 : index
    %c0_22 = arith.constant 0 : index
    %185 = vector.load %arg6[%c0_20, %c0_21, %c0_22] : memref<1x1x144xf32, #tpu.memory_space<vmem>>, vector<1x1x144xf32>
    %cst_23 = arith.constant dense<0.000000e+00> : vector<144xf32>
    %186 = vector.multi_reduction <add>, %178, %cst_23 [0, 1] : vector<2x4x144xf32> to vector<144xf32>
    %187 = vector.shape_cast %186 : vector<144xf32> to vector<1x1x144xf32>
    %188 = arith.addf %185, %187 : vector<1x1x144xf32>
    %c0_24 = arith.constant 0 : index
    %c0_25 = arith.constant 0 : index
    %c0_26 = arith.constant 0 : index
    %189 = vector.load %arg6[%c0_24, %c0_25, %c0_26] : memref<1x1x144xf32, #tpu.memory_space<vmem>>, vector<1x1x144xf32>
    tpu.vector_store %arg6[%c0_24, %c0_25, %c0_26], %188 {strides = array<i32>} : memref<1x1x144xf32, #tpu.memory_space<vmem>>, vector<1x1x144xf32>,
    return
  }
  func.func @transform_0(%arg0: i32, %arg1: i32) -> (i32, i32, i32, i32) {
    %c0_i32 = arith.constant 0 : i32
    %c0_i32_0 = arith.constant 0 : i32
    %c0_i32_1 = arith.constant 0 : i32
    %c0_i32_2 = arith.constant 0 : i32
    return %arg0, %c0_i32, %c0_i32_0, %c0_i32_1 : i32, i32, i32, i32
  }
  func.func @transform_1(%arg0: i32, %arg1: i32) -> (i32, i32, i32, i32) {
    %c0_i32 = arith.constant 0 : i32
    %c0_i32_0 = arith.constant 0 : i32
    %c0_i32_1 = arith.constant 0 : i32
    %c0_i32_2 = arith.constant 0 : i32
    %c0_i32_3 = arith.constant 0 : i32
    return %c0_i32, %c0_i32_0, %c0_i32_1, %c0_i32_2 : i32, i32, i32, i32
  }
  func.func @transform_2(%arg0: i32, %arg1: i32) -> (i32, i32) {
    %c0_i32 = arith.constant 0 : i32
    %c0_i32_0 = arith.constant 0 : i32
    %c0_i32_1 = arith.constant 0 : i32
    return %c0_i32, %c0_i32_0 : i32, i32
  }
  func.func @transform_3(%arg0: i32, %arg1: i32) -> (i32, i32, i32, i32) {
    %c0_i32 = arith.constant 0 : i32
    %c0_i32_0 = arith.constant 0 : i32
    %c0_i32_1 = arith.constant 0 : i32
    return %arg0, %arg1, %c0_i32, %c0_i32_0 : i32, i32, i32, i32
  }
  func.func @transform_4(%arg0: i32, %arg1: i32) -> (i32, i32, i32) {
    %c0_i32 = arith.constant 0 : i32
    %c0_i32_0 = arith.constant 0 : i32
    %c0_i32_1 = arith.constant 0 : i32
    return %arg0, %c0_i32, %c0_i32_0 : i32, i32, i32
  }
}

module attributes {stable_mosaic.version = 11 : i64} {
  func.func @_se_project_kernel(%arg0: i32, %arg1: i32, %arg2: memref<1x16x144xbf16, #tpu.memory_space<vmem>>, %arg3: memref<1x1x144xf32, #tpu.memory_space<vmem>>, %arg4: memref<144x6xbf16, #tpu.memory_space<vmem>>, %arg5: memref<1x6xf32, #tpu.memory_space<vmem>>, %arg6: memref<6x144xbf16, #tpu.memory_space<vmem>>, %arg7: memref<1x144xf32, #tpu.memory_space<vmem>>, %arg8: memref<144x40xbf16, #tpu.memory_space<vmem>>, %arg9: memref<1x40xf32, #tpu.memory_space<vmem>>, %arg10: memref<1x16x40xbf16, #tpu.memory_space<vmem>>) attributes {dimension_semantics = [#tpu.dimension_semantics<parallel>, #tpu.dimension_semantics<parallel>], iteration_bounds = array<i64: 2, 1>, scalar_prefetch = 0 : i64, scratch_operands = 0 : i64, tpu.core_type = #tpu.core_type<tc>, window_params = [{transform_indices = @transform_0, window_bounds = array<i64: 1, 16, 144>}, {transform_indices = @transform_1, window_bounds = array<i64: 1, 1, 144>}, {pipeline_mode = #tpu.pipeline_mode<synchronous>, transform_indices = @transform_2, window_bounds = array<i64: 144, 6>}, {pipeline_mode = #tpu.pipeline_mode<synchronous>, transform_indices = @transform_3, window_bounds = array<i64: 1, 6>}, {pipeline_mode = #tpu.pipeline_mode<synchronous>, transform_indices = @transform_4, window_bounds = array<i64: 6, 144>}, {pipeline_mode = #tpu.pipeline_mode<synchronous>, transform_indices = @transform_5, window_bounds = array<i64: 1, 144>}, {pipeline_mode = #tpu.pipeline_mode<synchronous>, transform_indices = @transform_6, window_bounds = array<i64: 144, 40>}, {pipeline_mode = #tpu.pipeline_mode<synchronous>, transform_indices = @transform_7, window_bounds = array<i64: 1, 40>}, {transform_indices = @transform_8, window_bounds = array<i64: 1, 16, 40>}]} {
    %c0 = arith.constant 0 : index
    %c0_0 = arith.constant 0 : index
    %c0_1 = arith.constant 0 : index
    %0 = vector.load %arg3[%c0, %c0_0, %c0_1] : memref<1x1x144xf32, #tpu.memory_space<vmem>>, vector<1x1x144xf32>
    %1 = vector.shape_cast %0 : vector<1x1x144xf32> to vector<1x144xf32>
    %cst = arith.constant 6.250000e-02 : f32
    %2 = vector.broadcast %cst : f32 to vector<1x144xf32>
    %3 = arith.mulf %1, %2 : vector<1x144xf32>
    %4 = arith.truncf %3 : vector<1x144xf32> to vector<1x144xbf16>
    %c0_2 = arith.constant 0 : index
    %c0_3 = arith.constant 0 : index
    %5 = vector.load %arg4[%c0_2, %c0_3] : memref<144x6xbf16, #tpu.memory_space<vmem>>, vector<144x6xbf16>
    %cst_4 = arith.constant dense<0.000000e+00> : vector<1x6xf32>
    %6 = tpu.matmul %4, %5, %cst_4 {dimension_numbers = #tpu.dot_dimension_numbers<[1], [0], [0], [1], [0, 0, 1, 1], [], []>} : vector<1x144xbf16>, vector<144x6xbf16>, vector<1x6xf32> -> vector<1x6xf32>
    %c0_5 = arith.constant 0 : index
    %c0_6 = arith.constant 0 : index
    %7 = vector.load %arg5[%c0_5, %c0_6] : memref<1x6xf32, #tpu.memory_space<vmem>>, vector<1x6xf32>
    %8 = arith.addf %6, %7 : vector<1x6xf32>
    %9 = arith.negf %8 : vector<1x6xf32>
    %10 = math.exp %9 : vector<1x6xf32>
    %cst_7 = arith.constant 1.000000e+00 : f32
    %11 = vector.broadcast %cst_7 : f32 to vector<1x6xf32>
    %12 = arith.addf %11, %10 : vector<1x6xf32>
    %13 = arith.divf %11, %12 : vector<1x6xf32>
    %14 = arith.mulf %8, %13 : vector<1x6xf32>
    %15 = arith.truncf %14 : vector<1x6xf32> to vector<1x6xbf16>
    %c0_8 = arith.constant 0 : index
    %c0_9 = arith.constant 0 : index
    %16 = vector.load %arg6[%c0_8, %c0_9] : memref<6x144xbf16, #tpu.memory_space<vmem>>, vector<6x144xbf16>
    %cst_10 = arith.constant dense<0.000000e+00> : vector<1x144xf32>
    %17 = tpu.matmul %15, %16, %cst_10 {dimension_numbers = #tpu.dot_dimension_numbers<[1], [0], [0], [1], [0, 0, 1, 1], [], []>} : vector<1x6xbf16>, vector<6x144xbf16>, vector<1x144xf32> -> vector<1x144xf32>
    %c0_11 = arith.constant 0 : index
    %c0_12 = arith.constant 0 : index
    %18 = vector.load %arg7[%c0_11, %c0_12] : memref<1x144xf32, #tpu.memory_space<vmem>>, vector<1x144xf32>
    %19 = arith.addf %17, %18 : vector<1x144xf32>
    %20 = arith.negf %19 : vector<1x144xf32>
    %21 = math.exp %20 : vector<1x144xf32>
    %cst_13 = arith.constant 1.000000e+00 : f32
    %22 = vector.broadcast %cst_13 : f32 to vector<1x144xf32>
    %23 = arith.addf %22, %21 : vector<1x144xf32>
    %24 = arith.divf %22, %23 : vector<1x144xf32>
    %c0_14 = arith.constant 0 : index
    %c0_15 = arith.constant 0 : index
    %c0_16 = arith.constant 0 : index
    %25 = vector.load %arg2[%c0_14, %c0_15, %c0_16] : memref<1x16x144xbf16, #tpu.memory_space<vmem>>, vector<1x16x144xbf16>
    %26 = vector.shape_cast %25 : vector<1x16x144xbf16> to vector<16x144xbf16>
    %27 = arith.extf %26 : vector<16x144xbf16> to vector<16x144xf32>
    %28 = vector.broadcast %24 : vector<1x144xf32> to vector<16x144xf32>
    %29 = arith.mulf %27, %28 : vector<16x144xf32>
    %30 = arith.truncf %29 : vector<16x144xf32> to vector<16x144xbf16>
    %c0_17 = arith.constant 0 : index
    %c0_18 = arith.constant 0 : index
    %31 = vector.load %arg8[%c0_17, %c0_18] : memref<144x40xbf16, #tpu.memory_space<vmem>>, vector<144x40xbf16>
    %cst_19 = arith.constant dense<0.000000e+00> : vector<16x40xf32>
    %32 = tpu.matmul %30, %31, %cst_19 {dimension_numbers = #tpu.dot_dimension_numbers<[1], [0], [0], [1], [0, 0, 1, 1], [], []>} : vector<16x144xbf16>, vector<144x40xbf16>, vector<16x40xf32> -> vector<16x40xf32>
    %c0_20 = arith.constant 0 : index
    %c0_21 = arith.constant 0 : index
    %33 = vector.load %arg9[%c0_20, %c0_21] : memref<1x40xf32, #tpu.memory_space<vmem>>, vector<1x40xf32>
    %34 = vector.broadcast %33 : vector<1x40xf32> to vector<16x40xf32>
    %35 = arith.addf %32, %34 : vector<16x40xf32>
    %36 = vector.shape_cast %35 : vector<16x40xf32> to vector<1x16x40xf32>
    %37 = arith.truncf %36 : vector<1x16x40xf32> to vector<1x16x40xbf16>
    %c0_22 = arith.constant 0 : index
    %c0_23 = arith.constant 0 : index
    %c0_24 = arith.constant 0 : index
    %38 = vector.load %arg10[%c0_22, %c0_23, %c0_24] : memref<1x16x40xbf16, #tpu.memory_space<vmem>>, vector<1x16x40xbf16>
    tpu.vector_store %arg10[%c0_22, %c0_23, %c0_24], %37 {strides = array<i32>} : memref<1x16x40xbf16, #tpu.memory_space<vmem>>, vector<1x16x40xbf16>,
    return
  }
  func.func @transform_0(%arg0: i32, %arg1: i32) -> (i32, i32, i32) {
    %c0_i32 = arith.constant 0 : i32
    %c0_i32_0 = arith.constant 0 : i32
    return %arg0, %arg1, %c0_i32 : i32, i32, i32
  }
  func.func @transform_1(%arg0: i32, %arg1: i32) -> (i32, i32, i32) {
    %c0_i32 = arith.constant 0 : i32
    %c0_i32_0 = arith.constant 0 : i32
    %c0_i32_1 = arith.constant 0 : i32
    return %arg0, %c0_i32, %c0_i32_0 : i32, i32, i32
  }
  func.func @transform_2(%arg0: i32, %arg1: i32) -> (i32, i32) {
    %c0_i32 = arith.constant 0 : i32
    %c0_i32_0 = arith.constant 0 : i32
    %c0_i32_1 = arith.constant 0 : i32
    return %c0_i32, %c0_i32_0 : i32, i32
  }
  func.func @transform_3(%arg0: i32, %arg1: i32) -> (i32, i32) {
    %c0_i32 = arith.constant 0 : i32
    %c0_i32_0 = arith.constant 0 : i32
    %c0_i32_1 = arith.constant 0 : i32
    return %c0_i32, %c0_i32_0 : i32, i32
  }
  func.func @transform_4(%arg0: i32, %arg1: i32) -> (i32, i32) {
    %c0_i32 = arith.constant 0 : i32
    %c0_i32_0 = arith.constant 0 : i32
    %c0_i32_1 = arith.constant 0 : i32
    return %c0_i32, %c0_i32_0 : i32, i32
  }
  func.func @transform_5(%arg0: i32, %arg1: i32) -> (i32, i32) {
    %c0_i32 = arith.constant 0 : i32
    %c0_i32_0 = arith.constant 0 : i32
    %c0_i32_1 = arith.constant 0 : i32
    return %c0_i32, %c0_i32_0 : i32, i32
  }
  func.func @transform_6(%arg0: i32, %arg1: i32) -> (i32, i32) {
    %c0_i32 = arith.constant 0 : i32
    %c0_i32_0 = arith.constant 0 : i32
    %c0_i32_1 = arith.constant 0 : i32
    return %c0_i32, %c0_i32_0 : i32, i32
  }
  func.func @transform_7(%arg0: i32, %arg1: i32) -> (i32, i32) {
    %c0_i32 = arith.constant 0 : i32
    %c0_i32_0 = arith.constant 0 : i32
    %c0_i32_1 = arith.constant 0 : i32
    return %c0_i32, %c0_i32_0 : i32, i32
  }
  func.func @transform_8(%arg0: i32, %arg1: i32) -> (i32, i32, i32) {
    %c0_i32 = arith.constant 0 : i32
    %c0_i32_0 = arith.constant 0 : i32
    return %arg0, %arg1, %c0_i32 : i32, i32, i32
  }
}

module attributes {stable_mosaic.version = 11 : i64} {
  func.func @_matmul_bias_act_kernel(%arg0: i32, %arg1: memref<16x40xbf16, #tpu.memory_space<vmem>>, %arg2: memref<40x128xbf16, #tpu.memory_space<vmem>>, %arg3: memref<1x128xf32, #tpu.memory_space<vmem>>, %arg4: memref<16x128xbf16, #tpu.memory_space<vmem>>) attributes {dimension_semantics = [#tpu.dimension_semantics<parallel>], iteration_bounds = array<i64: 2>, scalar_prefetch = 0 : i64, scratch_operands = 0 : i64, tpu.core_type = #tpu.core_type<tc>, window_params = [{transform_indices = @transform_0, window_bounds = array<i64: 16, 40>}, {pipeline_mode = #tpu.pipeline_mode<synchronous>, transform_indices = @transform_1, window_bounds = array<i64: 40, 128>}, {pipeline_mode = #tpu.pipeline_mode<synchronous>, transform_indices = @transform_2, window_bounds = array<i64: 1, 128>}, {transform_indices = @transform_3, window_bounds = array<i64: 16, 128>}]} {
    %c0 = arith.constant 0 : index
    %c0_0 = arith.constant 0 : index
    %0 = vector.load %arg1[%c0, %c0_0] : memref<16x40xbf16, #tpu.memory_space<vmem>>, vector<16x40xbf16>
    %c0_1 = arith.constant 0 : index
    %c0_2 = arith.constant 0 : index
    %1 = vector.load %arg2[%c0_1, %c0_2] : memref<40x128xbf16, #tpu.memory_space<vmem>>, vector<40x128xbf16>
    %cst = arith.constant dense<0.000000e+00> : vector<16x128xf32>
    %2 = tpu.matmul %0, %1, %cst {dimension_numbers = #tpu.dot_dimension_numbers<[1], [0], [0], [1], [0, 0, 1, 1], [], []>} : vector<16x40xbf16>, vector<40x128xbf16>, vector<16x128xf32> -> vector<16x128xf32>
    %c0_3 = arith.constant 0 : index
    %c0_4 = arith.constant 0 : index
    %3 = vector.load %arg3[%c0_3, %c0_4] : memref<1x128xf32, #tpu.memory_space<vmem>>, vector<1x128xf32>
    %4 = vector.broadcast %3 : vector<1x128xf32> to vector<16x128xf32>
    %5 = arith.addf %2, %4 : vector<16x128xf32>
    %6 = arith.negf %5 : vector<16x128xf32>
    %7 = math.exp %6 : vector<16x128xf32>
    %cst_5 = arith.constant 1.000000e+00 : f32
    %8 = vector.broadcast %cst_5 : f32 to vector<16x128xf32>
    %9 = arith.addf %8, %7 : vector<16x128xf32>
    %10 = arith.divf %8, %9 : vector<16x128xf32>
    %11 = arith.mulf %5, %10 : vector<16x128xf32>
    %12 = arith.truncf %11 : vector<16x128xf32> to vector<16x128xbf16>
    %c0_6 = arith.constant 0 : index
    %c0_7 = arith.constant 0 : index
    %13 = vector.load %arg4[%c0_6, %c0_7] : memref<16x128xbf16, #tpu.memory_space<vmem>>, vector<16x128xbf16>
    tpu.vector_store %arg4[%c0_6, %c0_7], %12 {strides = array<i32>} : memref<16x128xbf16, #tpu.memory_space<vmem>>, vector<16x128xbf16>,
    return
  }
  func.func @transform_0(%arg0: i32) -> (i32, i32) {
    %c0_i32 = arith.constant 0 : i32
    %c0_i32_0 = arith.constant 0 : i32
    return %arg0, %c0_i32 : i32, i32
  }
  func.func @transform_1(%arg0: i32) -> (i32, i32) {
    %c0_i32 = arith.constant 0 : i32
    %c0_i32_0 = arith.constant 0 : i32
    %c0_i32_1 = arith.constant 0 : i32
    return %c0_i32, %c0_i32_0 : i32, i32
  }
  func.func @transform_2(%arg0: i32) -> (i32, i32) {
    %c0_i32 = arith.constant 0 : i32
    %c0_i32_0 = arith.constant 0 : i32
    %c0_i32_1 = arith.constant 0 : i32
    return %c0_i32, %c0_i32_0 : i32, i32
  }
  func.func @transform_3(%arg0: i32) -> (i32, i32) {
    %c0_i32 = arith.constant 0 : i32
    %c0_i32_0 = arith.constant 0 : i32
    return %arg0, %c0_i32 : i32, i32
  }
}

module attributes {stable_mosaic.version = 11 : i64} {
  func.func @_pool_fc_kernel(%arg0: i32, %arg1: memref<1x16x128xbf16, #tpu.memory_space<vmem>>, %arg2: memref<128x128xbf16, #tpu.memory_space<vmem>>, %arg3: memref<1x128xf32, #tpu.memory_space<vmem>>, %arg4: memref<1x1x128xf32, #tpu.memory_space<vmem>>) attributes {dimension_semantics = [#tpu.dimension_semantics<parallel>], iteration_bounds = array<i64: 2>, scalar_prefetch = 0 : i64, scratch_operands = 0 : i64, tpu.core_type = #tpu.core_type<tc>, window_params = [{transform_indices = @transform_0, window_bounds = array<i64: 1, 16, 128>}, {pipeline_mode = #tpu.pipeline_mode<synchronous>, transform_indices = @transform_1, window_bounds = array<i64: 128, 128>}, {pipeline_mode = #tpu.pipeline_mode<synchronous>, transform_indices = @transform_2, window_bounds = array<i64: 1, 128>}, {transform_indices = @transform_3, window_bounds = array<i64: 1, 1, 128>}]} {
    %c0 = arith.constant 0 : index
    %c0_0 = arith.constant 0 : index
    %c0_1 = arith.constant 0 : index
    %0 = vector.load %arg1[%c0, %c0_0, %c0_1] : memref<1x16x128xbf16, #tpu.memory_space<vmem>>, vector<1x16x128xbf16>
    %1 = vector.shape_cast %0 : vector<1x16x128xbf16> to vector<16x128xbf16>
    %2 = arith.extf %1 : vector<16x128xbf16> to vector<16x128xf32>
    %cst = arith.constant dense<0.000000e+00> : vector<128xf32>
    %3 = vector.multi_reduction <add>, %2, %cst [0] : vector<16x128xf32> to vector<128xf32>
    %4 = vector.shape_cast %3 : vector<128xf32> to vector<1x128xf32>
    %cst_2 = arith.constant 1.600000e+01 : f32
    %5 = vector.broadcast %cst_2 : f32 to vector<1x128xf32>
    %6 = arith.divf %4, %5 : vector<1x128xf32>
    %7 = arith.truncf %6 : vector<1x128xf32> to vector<1x128xbf16>
    %c0_3 = arith.constant 0 : index
    %c0_4 = arith.constant 0 : index
    %8 = vector.load %arg2[%c0_3, %c0_4] : memref<128x128xbf16, #tpu.memory_space<vmem>>, vector<128x128xbf16>
    %cst_5 = arith.constant dense<0.000000e+00> : vector<1x128xf32>
    %9 = tpu.matmul %7, %8, %cst_5 {dimension_numbers = #tpu.dot_dimension_numbers<[1], [0], [0], [1], [0, 0, 1, 1], [], []>} : vector<1x128xbf16>, vector<128x128xbf16>, vector<1x128xf32> -> vector<1x128xf32>
    %c0_6 = arith.constant 0 : index
    %c0_7 = arith.constant 0 : index
    %10 = vector.load %arg3[%c0_6, %c0_7] : memref<1x128xf32, #tpu.memory_space<vmem>>, vector<1x128xf32>
    %11 = arith.addf %9, %10 : vector<1x128xf32>
    %12 = vector.shape_cast %11 : vector<1x128xf32> to vector<1x1x128xf32>
    %c0_8 = arith.constant 0 : index
    %c0_9 = arith.constant 0 : index
    %c0_10 = arith.constant 0 : index
    %13 = vector.load %arg4[%c0_8, %c0_9, %c0_10] : memref<1x1x128xf32, #tpu.memory_space<vmem>>, vector<1x1x128xf32>
    tpu.vector_store %arg4[%c0_8, %c0_9, %c0_10], %12 {strides = array<i32>} : memref<1x1x128xf32, #tpu.memory_space<vmem>>, vector<1x1x128xf32>,
    return
  }
  func.func @transform_0(%arg0: i32) -> (i32, i32, i32) {
    %c0_i32 = arith.constant 0 : i32
    %c0_i32_0 = arith.constant 0 : i32
    %c0_i32_1 = arith.constant 0 : i32
    return %arg0, %c0_i32, %c0_i32_0 : i32, i32, i32
  }
  func.func @transform_1(%arg0: i32) -> (i32, i32) {
    %c0_i32 = arith.constant 0 : i32
    %c0_i32_0 = arith.constant 0 : i32
    %c0_i32_1 = arith.constant 0 : i32
    return %c0_i32, %c0_i32_0 : i32, i32
  }
  func.func @transform_2(%arg0: i32) -> (i32, i32) {
    %c0_i32 = arith.constant 0 : i32
    %c0_i32_0 = arith.constant 0 : i32
    %c0_i32_1 = arith.constant 0 : i32
    return %c0_i32, %c0_i32_0 : i32, i32
  }
  func.func @transform_3(%arg0: i32) -> (i32, i32, i32) {
    %c0_i32 = arith.constant 0 : i32
    %c0_i32_0 = arith.constant 0 : i32
    %c0_i32_1 = arith.constant 0 : i32
    return %arg0, %c0_i32, %c0_i32_0 : i32, i32, i32
  }
}

</mosaic_0001>

<bundles_post_ra>
// kernel: forward.14
= control target key start
LH: loop header
LB: loop body
LE: loop exit
PB: predicated region body
PF: predicated region fallthrough
CT: control target
= control target key end

     0   :  { %s1351_s12 = smov 0   ;;  %s1667_s0 = inlined_call_operand.vmem [shape: bf16[512,27], index: 0, kind: input, shape index: {}]   ;;  %s1668_s1 = inlined_call_operand.vmem [shape: bf16[27,32], index: 1, kind: input, shape index: {}]   ;;  %s1669_s2 = inlined_call_operand.vmem [shape: f32[1,32], index: 2, kind: input, shape index: {}]   ;;  %s1670_s3 = inlined_call_operand.vmem [shape: bf16[512,32], index: 3, kind: output, shape index: {}]  }
   0x1 LB: > { %s967_s13 = sadd.s32 4294967295, %s1328_s12   ;;  %p971_p0 = scmp.ge.s32.totalorder %s1328_s12, 1  ;;  %s1328_s12 = sphi %s1351_s12, %s13_s12  }
   0x2   : > { %p138_p1 = scmp.lt.s32.totalorder %s1328_s12, 3 }
   0x4   : > { %p139_p2 = pnand %p971_p0, %p138_p1 }
   0x5   : > { %v1176_v0 = vld [vmem:[%s1668_s1] sm:$0xff] (!%p139_p2)   ;;  %vm358_vm0 = vcmask (!%p139_p2), 1044480   ;;  %v1177_v1 = vld [vmem:[%s1668_s1 + $0x8] sm:$0x3f] (!%p139_p2)   ;;  %vm359_vm1 = vcmask (!%p139_p2), 1045504   ;;  %s972_s18 = sshll.u32 (!%p139_p2), %s967_s13, 5 }
   0x6   : > { %142 = sbr.rel (%p139_p2) target bundleno = 322 (0x142), region = 32  ;;  %1127 = vmatprep.subr.bf16.mxu0 (!%p139_p2), %v1176_v0  ;;  %1163 = vmatprep.subr.bf16.mxu1 (!%p139_p2), %v1176_v0  ;;  %v1330_v2 = vmov (!%p139_p2), 65535   ;;  %p163_p3 = scmp.lt.s32.totalorder (!%p139_p2), %s972_s18, 63  ;;  %vm309_vm2 = vcmask (!%p139_p2), 220160   ;;  %v1410_v22 = vld [vmem:[%s1669_s2] ss:$0 sm:$0xff] (!%p139_p2) }
   0x7   : > { %1128 = vmatpush3.bf16.msra.mxu0 (!%p139_p2), %v1176_v0  ;;  %1165 = vmatpush3.bf16.msra.mxu1 (!%p139_p2), %v1176_v0  ;;  %v360_v3 = vsel (!%p139_p2), %vm358_vm0, 4294967295, %v1330_v2  ;;  %vm878_vm3 = vcmask (!%p139_p2), 257024  }
   0x8   : > { %v361_v4 = vsel (!%p139_p2), %vm359_vm1, %v360_v3, 0 }
   0x9   : > { %v363_v5 = vand.u32 (!%p139_p2), %v1177_v1, %v361_v4 }
   0xb   : > { %1129 = vmatprep.subr.bf16.mxu0 (!%p139_p2), %v363_v5  ;;  %1164 = vmatprep.subr.bf16.mxu1 (!%p139_p2), %v363_v5 }
   0xc   : > { %1130 = vmatpush3.bf16.msra.mxu0 (!%p139_p2), %v363_v5  ;;  %1166 = vmatpush3.bf16.msra.mxu1 (!%p139_p2), %v363_v5 }
   0xd   : > { %s1672_s18 = smov (!%p163_p3, %s972_s18), 63 }
   0xe   : > { %s973_s19 = sshll.u32 %s1672_s18, 2 }
   0xf   : > { %s1373_s22 = scalar_lea.vmem %s1667_s0, %s973_s19  ;;  %s1517_s27 = scalar_lea.vmem %s1670_s3, %s973_s19 }
  0x10   : > { %v1178_v6 = vld [vmem:[%s1373_s22] sm:$0xff]   ;;  %v1180_v8 = vld [vmem:[%s1373_s22 + $0x8] sm:$0xff]   ;;  %v1182_v10 = vld [vmem:[%s1373_s22 + $0x10] sm:$0xff]  }
  0x11   : > { %v1179_v7 = vld [vmem:[%s1373_s22 + $0x40] sm:$0xff]   ;;  %1131 = vmatprep.mubr.msk.bf16.mxu0 %vm309_vm2, %v1178_v6  ;;  %v1181_v9 = vld [vmem:[%s1373_s22 + $0x48] sm:$0xff]   ;;  %v1183_v11 = vld [vmem:[%s1373_s22 + $0x50] sm:$0xff]  }
  0x12   : > { %1147 = vmatprep.mubr.msk.bf16.mxu1 %vm309_vm2, %v1179_v7  ;;  %1132 = vmatmul.mubr.msk.bf16.vlgmr.msra.gmra.mrb[0].mxu0 %vm309_vm2, %v1180_v8  ;;  %v1184_v12 = vld [vmem:[%s1373_s22 + $0x18] sm:$0xff]   ;;  %v1186_v14 = vld [vmem:[%s1373_s22 + $0x20] sm:$0xff]   ;;  %v1188_v16 = vld [vmem:[%s1373_s22 + $0x28] sm:$0xff]  }
  0x13   : > { %1148 = vmatmul.mubr.msk.bf16.vlgmr.msra.gmra.mrb[0].mxu1 %vm309_vm2, %v1181_v9  ;;  %1135 = vmatprep.mubr.msk.bf16.mxu0 %vm309_vm2, %v1182_v10  ;;  %v1185_v13 = vld [vmem:[%s1373_s22 + $0x58] sm:$0xff]   ;;  %v1187_v15 = vld [vmem:[%s1373_s22 + $0x60] sm:$0xff]   ;;  %v1189_v17 = vld [vmem:[%s1373_s22 + $0x68] sm:$0xff]  }
  0x14   : > { %1151 = vmatprep.mubr.msk.bf16.mxu1 %vm309_vm2, %v1183_v11  ;;  %v1190_v18 = vld [vmem:[%s1373_s22 + $0x30] sm:$0xff]   ;;  %v1192_v20 = vld [vmem:[%s1373_s22 + $0x38] sm:$0xff]  }
  0x15   : > { %v1191_v19 = vld [vmem:[%s1373_s22 + $0x70] sm:$0xff]   ;;  %v1193_v21 = vld [vmem:[%s1373_s22 + $0x78] sm:$0xff]  }
  0x1a   : > { %1136 = vmatmul.mubr.msk.bf16.gmra.mrb[4].mxu0 %vm309_vm2, %v1184_v12 }
  0x1b   : > { %1152 = vmatmul.mubr.msk.bf16.gmra.mrb[4].mxu1 %vm309_vm2, %v1185_v13  ;;  %1139 = vmatprep.mubr.msk.bf16.mxu0 %vm309_vm2, %v1186_v14 }
  0x1c   : > { %1155 = vmatprep.mubr.msk.bf16.mxu1 %vm309_vm2, %v1187_v15 }
  0x22   : > { %1140 = vmatmul.mubr.msk.bf16.gmra.mrb[8].mxu0 %vm309_vm2, %v1188_v16 }
  0x23   : > { %1156 = vmatmul.mubr.msk.bf16.gmra.mrb[8].mxu1 %vm309_vm2, %v1189_v17  ;;  %1143 = vmatprep.mubr.msk.bf16.mxu0 %vm309_vm2, %v1190_v18 }
  0x24   : > { %1159 = vmatprep.mubr.msk.bf16.mxu1 %vm309_vm2, %v1191_v19 }
  0x2a   : > { %1144 = vmatmul.mubr.msk.bf16.gmra.mrb[12].mxu0 %vm309_vm2, %v1192_v20 }
  0x2b   : > { %1160 = vmatmul.mubr.msk.bf16.gmra.mrb[12].mxu1 %vm309_vm2, %v1193_v21 }
  0xe5   : > { %v1133_v23 = vpop.f32.mrb[0].mxu0 }
  0xe6   : > { %v1413_v24 = vadd.f32 %v1133_v23, %v1410_v22  ;;  %v1149_v25 = vpop.f32.mrb[0].mxu1  ;;  %v399_v26 = vpop.f32.mrb[1].mxu0 }
  0xe7   : > { %v1416_v27 = vadd.f32 %v1149_v25, %v1410_v22  ;;  %v1419_v28 = vadd.f32 %v1410_v22, %v399_v26  ;;  %v463_v29 = vpop.f32.mrb[1].mxu1  ;;  %v1134_v30 = vpop.f32.mrb[2].mxu0 }
  0xe8   : > { %v1013_v31 = vmul.f32 -1.442695, %v1413_v24  ;;  %v1423_v32 = vadd.f32 %v1410_v22, %v463_v29  ;;  %v1426_v33 = vadd.f32 %v1134_v30, %v1410_v22  ;;  %v1150_v34 = vpop.f32.mrb[2].mxu1  ;;  %v402_v35 = vpop.f32.mrb[3].mxu0 }
  0xe9   : > { %v1029_v36 = vmul.f32 -1.442695, %v1416_v27  ;;  %v1011_v37 = vmul.f32 -1.442695, %v1419_v28  ;;  %v1431_v38 = vadd.f32 %v1150_v34, %v1410_v22  ;;  %v1434_v39 = vadd.f32 %v1410_v22, %v402_v35  ;;  %v466_v40 = vpop.f32.mrb[3].mxu1 }
  0xea   : > { %1194 = vpow2.f32 %v1013_v31  ;;  %v1027_v41 = vmul.f32 -1.442695, %v1423_v32  ;;  %v1014_v42 = vmul.f32 -1.442695, %v1426_v33  ;;  %v1439_v43 = vadd.f32 %v1410_v22, %v466_v40 }
  0xeb   : > { %1196 = vpow2.f32 %v1029_v36  ;;  %v1030_v44 = vmul.f32 -1.442695, %v1431_v38  ;;  %v1012_v45 = vmul.f32 -1.442695, %v1434_v39 }
  0xec   : > { %1198 = vpow2.f32 %v1011_v37  ;;  %v1028_v46 = vmul.f32 -1.442695, %v1439_v43 }
  0xed   : > { %1200 = vpow2.f32 %v1027_v41  ;;  %v1137_v47 = vpop.f32.mrb[4].mxu0 }
  0xee   : > { %1202 = vpow2.f32 %v1014_v42  ;;  %v1445_v48 = vadd.f32 %v1137_v47, %v1410_v22  ;;  %v1153_v49 = vpop.f32.mrb[4].mxu1  ;;  %v415_v50 = vpop.f32.mrb[5].mxu0 }
  0xef   : > { %1204 = vpow2.f32 %v1030_v44  ;;  %v1448_v51 = vadd.f32 %v1153_v49, %v1410_v22  ;;  %v1451_v52 = vadd.f32 %v1410_v22, %v415_v50  ;;  %v479_v53 = vpop.f32.mrb[5].mxu1  ;;  %v1138_v54 = vpop.f32.mrb[6].mxu0 }
  0xf0   : > { %1206 = vpow2.f32 %v1012_v45  ;;  %v1017_v55 = vmul.f32 -1.442695, %v1445_v48  ;;  %v1455_v56 = vadd.f32 %v1410_v22, %v479_v53  ;;  %v1458_v57 = vadd.f32 %v1138_v54, %v1410_v22  ;;  %v1154_v58 = vpop.f32.mrb[6].mxu1  ;;  %v418_v59 = vpop.f32.mrb[7].mxu0 }
  0xf1   : > { %1208 = vpow2.f32 %v1028_v46  ;;  %v1033_v60 = vmul.f32 -1.442695, %v1448_v51  ;;  %v1015_v61 = vmul.f32 -1.442695, %v1451_v52  ;;  %v482_v62 = vpop.f32.mrb[7].mxu1  ;;  %v1467_v23 = vadd.f32 %v1154_v58, %v1410_v22 }
  0xf2   : > { %1210 = vpow2.f32 %v1017_v55  ;;  %v1031_v63 = vmul.f32 -1.442695, %v1455_v56  ;;  %v1018_v0 = vmul.f32 -1.442695, %v1458_v57  ;;  %v1470_v29 = vadd.f32 %v1410_v22, %v418_v59 }
  0xf3   : > { %1212 = vpow2.f32 %v1033_v60  ;;  %v1473_v34 = vadd.f32 %v1410_v22, %v482_v62  ;;  %v1034_v45 = vmul.f32 -1.442695, %v1467_v23 }
  0xf4   : > { %v1195_v1 = vpop.eup %1194  ;;  %1214 = vpow2.f32 %v1015_v61  ;;  %v1016_v54 = vmul.f32 -1.442695, %v1470_v29 }
  0xf5   : > { %v1197_v2 = vpop.eup %1196  ;;  %v624_v3 = vadd.f32 1.0, %v1195_v1  ;;  %1216 = vpow2.f32 %v1031_v63  ;;  %v1141_v4 = vpop.f32.mrb[8].mxu0  ;;  %v1032_v62 = vmul.f32 -1.442695, %v1473_v34 }
  0xf6   : > { %v1199_v5 = vpop.eup %1198  ;;  %v640_v6 = vadd.f32 1.0, %v1197_v2  ;;  %1218 = vpow2.f32 %v1018_v0  ;;  %v1157_v7 = vpop.f32.mrb[8].mxu1  ;;  %v1476_v37 = vadd.f32 %v1141_v4, %v1410_v22 }
  0xf7   : > { %v431_v8 = vpop.f32.mrb[9].mxu0  ;;  %v1201_v9 = vpop.eup %1200  ;;  %1220 = vrcp.f32 %v624_v3  ;;  %v622_v10 = vadd.f32 1.0, %v1199_v5  ;;  %v1479_v40 = vadd.f32 %v1157_v7, %v1410_v22 }
  0xf8   : > { %v495_v11 = vpop.f32.mrb[9].mxu1  ;;  %v1142_v12 = vpop.f32.mrb[10].mxu0  ;;  %1222 = vrcp.f32 %v640_v6  ;;  %v638_v14 = vadd.f32 1.0, %v1201_v9  ;;  %v1483_v46 = vadd.f32 %v1410_v22, %v431_v8  ;;  %v1021_v4 = vmul.f32 -1.442695, %v1476_v37 }
  0xf9   : > { %v1203_v13 = vpop.eup %1202  ;;  %v1158_v15 = vpop.f32.mrb[10].mxu1  ;;  %1224 = vrcp.f32 %v622_v10  ;;  %v1489_v55 = vadd.f32 %v1410_v22, %v495_v11  ;;  %v1497_v63 = vadd.f32 %v1142_v12, %v1410_v22  ;;  %v1037_v5 = vmul.f32 -1.442695, %v1479_v40 }
  0xfa   : > { %v434_v16 = vpop.f32.mrb[11].mxu0  ;;  %v1205_v17 = vpop.eup %1204  ;;  %v625_v18 = vadd.f32 1.0, %v1203_v13  ;;  %1226 = vrcp.f32 %v638_v14  ;;  %v1019_v9 = vmul.f32 -1.442695, %v1483_v46  ;;  %v1510_v10 = vadd.f32 %v1158_v15, %v1410_v22 }
  0xfb   : > { %v1464_v19 = vpop.f32.mrb[11].mxu1  ;;  %v1207_v20 = vpop.eup %1206  ;;  %v641_v21 = vadd.f32 1.0, %v1205_v17  ;;  %v1035_v13 = vmul.f32 -1.442695, %v1489_v55 }
  0xfc   : > { %v1209_v25 = vpop.eup %1208  ;;  %1228 = vrcp.f32 %v625_v18  ;;  %v623_v26 = vadd.f32 1.0, %v1207_v20  ;;  %v1022_v18 = vmul.f32 -1.442695, %v1497_v63 }
  0xfd   : > { %v1211_v30 = vpop.eup %1210  ;;  %1230 = vrcp.f32 %v641_v21  ;;  %v639_v31 = vadd.f32 1.0, %v1209_v25  ;;  %v1145_v41 = vpop.f32.mrb[12].mxu0 }
  0xfe   : > { %v1213_v35 = vpop.eup %1212  ;;  %1232 = vrcp.f32 %v623_v26  ;;  %v628_v36 = vadd.f32 1.0, %v1211_v30  ;;  %v1161_v47 = vpop.f32.mrb[12].mxu1 }
  0xff   : > { %v1215_v42 = vpop.eup %1214  ;;  %1234 = vrcp.f32 %v639_v31  ;;  %v644_v44 = vadd.f32 1.0, %v1213_v35  ;;  %v1485_v49 = vpop.f32.mrb[13].mxu0 }
 0x100   : > { %v1217_v50 = vpop.eup %1216  ;;  %1236 = vrcp.f32 %v628_v36  ;;  %v626_v53 = vadd.f32 1.0, %v1215_v42  ;;  %v1491_v58 = vpop.f32.mrb[13].mxu1 }
 0x101   : > { %v1493_v59 = vpop.f32.mrb[14].mxu0  ;;  %v1219_v60 = vpop.eup %1218  ;;  %1238 = vrcp.f32 %v644_v44  ;;  %v642_v61 = vadd.f32 1.0, %v1217_v50  ;;  %v1545_v44 = vadd.f32 %v1161_v47, %v1410_v22 }
 0x102   : > { %v1499_v0 = vpop.f32.mrb[14].mxu1  ;;  %v1501_v1 = vpop.f32.mrb[15].mxu0  ;;  %1240 = vrcp.f32 %v626_v53  ;;  %v629_v3 = vadd.f32 1.0, %v1219_v60 }
 0x103   : > { %v1221_v2 = vpop.eup %1220  ;;  %v1505_v6 = vpop.f32.mrb[15].mxu1  ;;  %1242 = vrcp.f32 %v642_v61 }
 0x104   : > { %v1223_v7 = vpop.eup %1222  ;;  %v720_v8 = vmul.f32 %v1221_v2, %v1413_v24  ;;  %1244 = vrcp.f32 %v629_v3  ;;  %v1522_v24 = vadd.f32 %v1410_v22, %v434_v16 }
 0x105   : > { %v1225_v11 = vpop.eup %1224  ;;  %v736_v12 = vmul.f32 %v1223_v7, %v1416_v27  ;;  %1246 = vpow2.f32 %v1034_v45  ;;  %v1529_v27 = vadd.f32 %v1410_v22, %v1464_v19  ;;  %v1539_v19 = vadd.f32 %v1145_v41, %v1410_v22 }
 0x106   : > { %v1227_v14 = vpop.eup %1226  ;;  %v1079_v17 = vpack.c.bf16 %v720_v8, %v720_v8  ;;  %v718_v15 = vmul.f32 %v1225_v11, %v1419_v28  ;;  %1248 = vpow2.f32 %v1016_v54  ;;  %v1038_v28 = vmul.f32 -1.442695, %v1510_v10 }
 0x107   : > { %v1229_v20 = vpop.eup %1228  ;;  %v1095_v21 = vpack.c.bf16 %v736_v12, %v736_v12  ;;  %v734_v25 = vmul.f32 %v1227_v14, %v1423_v32  ;;  %1250 = vpow2.f32 %v1032_v62  ;;  %v1020_v41 = vmul.f32 -1.442695, %v1522_v24 }
 0x108   : > { %v1231_v16 = vpop.eup %1230  ;;  %881 = vst.msk [vmem:[%s1517_s27 + $0x8] sm:$0xf] %vm878_vm3, %v1079_v17  ;;  %v1077_v26 = vpack.c.bf16 %v718_v15, %v718_v15  ;;  %v721_v30 = vmul.f32 %v1229_v20, %v1426_v33  ;;  %1252 = vpow2.f32 %v1021_v4  ;;  %v1036_v47 = vmul.f32 -1.442695, %v1529_v27 }
 0x109   : > { %v1233_v31 = vpop.eup %1232  ;;  %897 = vst.msk [vmem:[%s1517_s27 + $0x48] sm:$0xf] %vm878_vm3, %v1095_v21  ;;  %v1093_v32 = vpack.c.bf16 %v734_v25, %v734_v25  ;;  %v737_v35 = vmul.f32 %v1231_v16, %v1431_v38  ;;  %1254 = vpow2.f32 %v1037_v5  ;;  %v1025_v62 = vmul.f32 -1.442695, %v1539_v19 }
 0x10a   : > { %v1235_v36 = vpop.eup %1234  ;;  %879 = vst.msk [vmem:[%s1517_s27] sm:$0xf] %vm878_vm3, %v1077_v26  ;;  %v1080_v42 = vpack.c.bf16 %v721_v30, %v721_v30  ;;  %v719_v33 = vmul.f32 %v1233_v31, %v1434_v39  ;;  %1256 = vpow2.f32 %v1019_v9  ;;  %v1041_v4 = vmul.f32 -1.442695, %v1545_v44 }
 0x10b   : > { %v1237_v45 = vpop.eup %1236  ;;  %895 = vst.msk [vmem:[%s1517_s27 + $0x40] sm:$0xf] %vm878_vm3, %v1093_v32  ;;  %v1096_v38 = vpack.c.bf16 %v737_v35, %v737_v35  ;;  %v735_v50 = vmul.f32 %v1235_v36, %v1439_v43  ;;  %1258 = vpow2.f32 %v1035_v13  ;;  %v1579_v35 = vadd.f32 %v1410_v22, %v1485_v49 }
 0x10c   : > { %v1239_v53 = vpop.eup %1238  ;;  %882 = vst.msk [vmem:[%s1517_s27 + $0xc] sm:$0xf] %vm878_vm3, %v1080_v42  ;;  %v1078_v54 = vpack.c.bf16 %v719_v33, %v719_v33  ;;  %v724_v39 = vmul.f32 %v1237_v45, %v1445_v48  ;;  %1260 = vpow2.f32 %v1022_v18  ;;  %v1583_v33 = vadd.f32 %v1410_v22, %v1491_v58 }
 0x10d   : > { %v1241_v60 = vpop.eup %1240  ;;  %898 = vst.msk [vmem:[%s1517_s27 + $0x4c] sm:$0xf] %vm878_vm3, %v1096_v38  ;;  %v1094_v61 = vpack.c.bf16 %v735_v50, %v735_v50  ;;  %v740_v43 = vmul.f32 %v1239_v53, %v1448_v51  ;;  %1262 = vpow2.f32 %v1038_v28  ;;  %v1587_v50 = vadd.f32 %v1493_v59, %v1410_v22 }
 0x10e   : > { %v1243_v2 = vpop.eup %1242  ;;  %880 = vst.msk [vmem:[%s1517_s27 + $0x4] sm:$0xf] %vm878_vm3, %v1078_v54  ;;  %v1083_v3 = vpack.c.bf16 %v724_v39, %v724_v39  ;;  %v722_v48 = vmul.f32 %v1241_v60, %v1451_v52  ;;  %1264 = vpow2.f32 %v1020_v41  ;;  %v1591_v49 = vadd.f32 %v1499_v0, %v1410_v22 }
 0x10f   : > { %v1245_v5 = vpop.eup %1244  ;;  %896 = vst.msk [vmem:[%s1517_s27 + $0x44] sm:$0xf] %vm878_vm3, %v1094_v61  ;;  %v1099_v7 = vpack.c.bf16 %v740_v43, %v740_v43  ;;  %v738_v51 = vmul.f32 %v1243_v2, %v1455_v56  ;;  %1266 = vpow2.f32 %v1036_v47  ;;  %v1023_v58 = vmul.f32 -1.442695, %v1579_v35 }
 0x110   : > { %v1247_v8 = vpop.eup %1246  ;;  %885 = vst.msk [vmem:[%s1517_s27 + $0x18] sm:$0xf] %vm878_vm3, %v1083_v3  ;;  %v1081_v9 = vpack.c.bf16 %v722_v48, %v722_v48  ;;  %v725_v11 = vmul.f32 %v1245_v5, %v1458_v57  ;;  %1268 = vpow2.f32 %v1025_v62  ;;  %v1596_v47 = vadd.f32 %v1410_v22, %v1501_v1 }
 0x111   : > { %v1249_v52 = vpop.eup %1248  ;;  %901 = vst.msk [vmem:[%s1517_s27 + $0x58] sm:$0xf] %vm878_vm3, %v1099_v7  ;;  %v1097_v12 = vpack.c.bf16 %v738_v51, %v738_v51  ;;  %v645_v13 = vadd.f32 1.0, %v1247_v8  ;;  %1270 = vpow2.f32 %v1041_v4  ;;  %v1039_v61 = vmul.f32 -1.442695, %v1583_v33 }
 0x112   : > { %v1251_v14 = vpop.eup %1250  ;;  %883 = vst.msk [vmem:[%s1517_s27 + $0x10] sm:$0xf] %vm878_vm3, %v1081_v9  ;;  %v1084_v56 = vpack.c.bf16 %v725_v11, %v725_v11  ;;  %v627_v17 = vadd.f32 1.0, %v1249_v52  ;;  %v1601_v43 = vadd.f32 %v1410_v22, %v1505_v6  ;;  %v1026_v2 = vmul.f32 -1.442695, %v1587_v50 }
 0x113   : > { %v1253_v15 = vpop.eup %1252  ;;  %899 = vst.msk [vmem:[%s1517_s27 + $0x50] sm:$0xf] %vm878_vm3, %v1097_v12  ;;  %1272 = vrcp.f32 %v645_v13  ;;  %v643_v18 = vadd.f32 1.0, %v1251_v14  ;;  %v1042_v48 = vmul.f32 -1.442695, %v1591_v49 }
 0x114   : > { %v1255_v57 = vpop.eup %1254  ;;  %886 = vst.msk [vmem:[%s1517_s27 + $0x1c] sm:$0xf] %vm878_vm3, %v1084_v56  ;;  %1274 = vrcp.f32 %v627_v17  ;;  %v632_v20 = vadd.f32 1.0, %v1253_v15  ;;  %v1024_v22 = vmul.f32 -1.442695, %v1596_v47 }
 0x115   : > { %v1257_v21 = vpop.eup %1256  ;;  %1276 = vrcp.f32 %v643_v18  ;;  %v648_v25 = vadd.f32 1.0, %v1255_v57  ;;  %v1040_v8 = vmul.f32 -1.442695, %v1601_v43 }
 0x116   : > { %v1259_v16 = vpop.eup %1258  ;;  %1278 = vrcp.f32 %v632_v20  ;;  %v630_v26 = vadd.f32 1.0, %v1257_v21 }
 0x117   : > { %v1261_v30 = vpop.eup %1260  ;;  %1280 = vrcp.f32 %v648_v25  ;;  %v646_v28 = vadd.f32 1.0, %v1259_v16 }
 0x118   : > { %v1263_v31 = vpop.eup %1262  ;;  %1282 = vrcp.f32 %v630_v26  ;;  %v633_v32 = vadd.f32 1.0, %v1261_v30 }
 0x119   : > { %v1265_v36 = vpop.eup %1264  ;;  %1284 = vrcp.f32 %v646_v28  ;;  %v649_v42 = vadd.f32 1.0, %v1263_v31 }
 0x11a   : > { %v1267_v45 = vpop.eup %1266  ;;  %1286 = vrcp.f32 %v633_v32  ;;  %v631_v38 = vadd.f32 1.0, %v1265_v36 }
 0x11b   : > { %v1269_v41 = vpop.eup %1268  ;;  %1288 = vrcp.f32 %v649_v42  ;;  %v647_v53 = vadd.f32 1.0, %v1267_v45 }
 0x11c   : > { %v1271_v54 = vpop.eup %1270  ;;  %1290 = vrcp.f32 %v631_v38  ;;  %v636_v39 = vadd.f32 1.0, %v1269_v41 }
 0x11d   : > { %v1273_v60 = vpop.eup %1272  ;;  %1292 = vrcp.f32 %v647_v53  ;;  %v652_v59 = vadd.f32 1.0, %v1271_v54 }
 0x11e   : > { %v1275_v0 = vpop.eup %1274  ;;  %v741_v62 = vmul.f32 %v1273_v60, %v1467_v23  ;;  %1294 = vrcp.f32 %v636_v39 }
 0x11f   : > { %v1277_v3 = vpop.eup %1276  ;;  %v723_v1 = vmul.f32 %v1275_v0, %v1470_v29  ;;  %1296 = vrcp.f32 %v652_v59 }
 0x120   : > { %v1279_v4 = vpop.eup %1278  ;;  %v1100_v5 = vpack.c.bf16 %v741_v62, %v741_v62  ;;  %v739_v7 = vmul.f32 %v1277_v3, %v1473_v34  ;;  %1298 = vpow2.f32 %v1023_v58 }
 0x121   : > { %v1281_v6 = vpop.eup %1280  ;;  %v1082_v23 = vpack.c.bf16 %v723_v1, %v723_v1  ;;  %v728_v51 = vmul.f32 %v1279_v4, %v1476_v37  ;;  %1300 = vpow2.f32 %v1039_v61 }
 0x122   : > { %v1283_v29 = vpop.eup %1282  ;;  %902 = vst.msk [vmem:[%s1517_s27 + $0x5c] sm:$0xf] %vm878_vm3, %v1100_v5  ;;  %v1098_v9 = vpack.c.bf16 %v739_v7, %v739_v7  ;;  %v744_v11 = vmul.f32 %v1281_v6, %v1479_v40  ;;  %1302 = vpow2.f32 %v1026_v2 }
 0x123   : > { %v1285_v34 = vpop.eup %1284  ;;  %884 = vst.msk [vmem:[%s1517_s27 + $0x14] sm:$0xf] %vm878_vm3, %v1082_v23  ;;  %v1087_v52 = vpack.c.bf16 %v728_v51, %v728_v51  ;;  %v726_v12 = vmul.f32 %v1283_v29, %v1483_v46  ;;  %1304 = vpow2.f32 %v1042_v48 }
 0x124   : > { %v1287_v37 = vpop.eup %1286  ;;  %900 = vst.msk [vmem:[%s1517_s27 + $0x54] sm:$0xf] %vm878_vm3, %v1098_v9  ;;  %v1103_v13 = vpack.c.bf16 %v744_v11, %v744_v11  ;;  %v742_v14 = vmul.f32 %v1285_v34, %v1489_v55  ;;  %1306 = vpow2.f32 %v1024_v22 }
 0x125   : > { %v1289_v56 = vpop.eup %1288  ;;  %889 = vst.msk [vmem:[%s1517_s27 + $0x28] sm:$0xf] %vm878_vm3, %v1087_v52  ;;  %v1085_v40 = vpack.c.bf16 %v726_v12, %v726_v12  ;;  %v729_v17 = vmul.f32 %v1287_v37, %v1497_v63  ;;  %1308 = vpow2.f32 %v1040_v8 }
 0x126   : > { %v1291_v15 = vpop.eup %1290  ;;  %905 = vst.msk [vmem:[%s1517_s27 + $0x68] sm:$0xf] %vm878_vm3, %v1103_v13  ;;  %v1101_v46 = vpack.c.bf16 %v742_v14, %v742_v14  ;;  %v745_v18 = vmul.f32 %v1289_v56, %v1510_v10 }
 0x127   : > { %v1293_v57 = vpop.eup %1292  ;;  %887 = vst.msk [vmem:[%s1517_s27 + $0x20] sm:$0xf] %vm878_vm3, %v1085_v40  ;;  %v1088_v55 = vpack.c.bf16 %v729_v17, %v729_v17  ;;  %v727_v20 = vmul.f32 %v1291_v15, %v1522_v24 }
 0x128   : > { %v1295_v21 = vpop.eup %1294  ;;  %903 = vst.msk [vmem:[%s1517_s27 + $0x60] sm:$0xf] %vm878_vm3, %v1101_v46  ;;  %v1104_v63 = vpack.c.bf16 %v745_v18, %v745_v18  ;;  %v743_v25 = vmul.f32 %v1293_v57, %v1529_v27 }
 0x129   : > { %v1297_v16 = vpop.eup %1296  ;;  %890 = vst.msk [vmem:[%s1517_s27 + $0x2c] sm:$0xf] %vm878_vm3, %v1088_v55  ;;  %v1086_v26 = vpack.c.bf16 %v727_v20, %v727_v20  ;;  %v732_v10 = vmul.f32 %v1295_v21, %v1539_v19 }
 0x12a   : > { %v1299_v30 = vpop.eup %1298  ;;  %906 = vst.msk [vmem:[%s1517_s27 + $0x6c] sm:$0xf] %vm878_vm3, %v1104_v63  ;;  %v1102_v28 = vpack.c.bf16 %v743_v25, %v743_v25  ;;  %v748_v24 = vmul.f32 %v1297_v16, %v1545_v44 }
 0x12b   : > { %v1301_v31 = vpop.eup %1300  ;;  %888 = vst.msk [vmem:[%s1517_s27 + $0x24] sm:$0xf] %vm878_vm3, %v1086_v26  ;;  %v1091_v32 = vpack.c.bf16 %v732_v10, %v732_v10  ;;  %v634_v36 = vadd.f32 1.0, %v1299_v30 }
 0x12c   : > { %v1303_v27 = vpop.eup %1302  ;;  %904 = vst.msk [vmem:[%s1517_s27 + $0x64] sm:$0xf] %vm878_vm3, %v1102_v28  ;;  %v1107_v42 = vpack.c.bf16 %v748_v24, %v748_v24  ;;  %v650_v45 = vadd.f32 1.0, %v1301_v31 }
 0x12d   : > { %v1305_v38 = vpop.eup %1304  ;;  %893 = vst.msk [vmem:[%s1517_s27 + $0x38] sm:$0xf] %vm878_vm3, %v1091_v32  ;;  %1310 = vrcp.f32 %v634_v36  ;;  %v637_v19 = vadd.f32 1.0, %v1303_v27 }
 0x12e   : > { %v1307_v41 = vpop.eup %1306  ;;  %909 = vst.msk [vmem:[%s1517_s27 + $0x78] sm:$0xf] %vm878_vm3, %v1107_v42  ;;  %1312 = vrcp.f32 %v650_v45  ;;  %v653_v44 = vadd.f32 1.0, %v1305_v38 }
 0x12f   : > { %v1309_v53 = vpop.eup %1308  ;;  %1314 = vrcp.f32 %v637_v19  ;;  %v635_v54 = vadd.f32 1.0, %v1307_v41 }
 0x130   : > { %1316 = vrcp.f32 %v653_v44  ;;  %v651_v39 = vadd.f32 1.0, %v1309_v53 }
 0x131   : > { %1318 = vrcp.f32 %v635_v54 }
 0x132   : > { %1320 = vrcp.f32 %v651_v39 }
 0x137   : > { %v1311_v58 = vpop.eup %1310 }
 0x138   : > { %v1313_v60 = vpop.eup %1312  ;;  %v730_v59 = vmul.f32 %v1311_v58, %v1579_v35 }
 0x139   : > { %v1315_v61 = vpop.eup %1314  ;;  %v746_v0 = vmul.f32 %v1313_v60, %v1583_v33 }
 0x13a   : > { %v1317_v62 = vpop.eup %1316  ;;  %v1089_v2 = vpack.c.bf16 %v730_v59, %v730_v59  ;;  %v733_v3 = vmul.f32 %v1315_v61, %v1587_v50 }
 0x13b   : > { %v1319_v1 = vpop.eup %1318  ;;  %v1105_v48 = vpack.c.bf16 %v746_v0, %v746_v0  ;;  %v749_v4 = vmul.f32 %v1317_v62, %v1591_v49 }
 0x13c   : > { %v1321_v5 = vpop.eup %1320  ;;  %891 = vst.msk [vmem:[%s1517_s27 + $0x30] sm:$0xf] %vm878_vm3, %v1089_v2  ;;  %v1092_v7 = vpack.c.bf16 %v733_v3, %v733_v3  ;;  %v731_v35 = vmul.f32 %v1319_v1, %v1596_v47 }
 0x13d   : > { %907 = vst.msk [vmem:[%s1517_s27 + $0x70] sm:$0xf] %vm878_vm3, %v1105_v48  ;;  %v1108_v33 = vpack.c.bf16 %v749_v4, %v749_v4  ;;  %v747_v22 = vmul.f32 %v1321_v5, %v1601_v43 }
 0x13e   : > { %894 = vst.msk [vmem:[%s1517_s27 + $0x3c] sm:$0xf] %vm878_vm3, %v1092_v7  ;;  %v1090_v6 = vpack.c.bf16 %v731_v35, %v731_v35 }
 0x13f   : > { %910 = vst.msk [vmem:[%s1517_s27 + $0x7c] sm:$0xf] %vm878_vm3, %v1108_v33  ;;  %v1106_v50 = vpack.c.bf16 %v747_v22, %v747_v22 }
 0x140   : > { %892 = vst.msk [vmem:[%s1517_s27 + $0x34] sm:$0xf] %vm878_vm3, %v1090_v6 }
 0x141   : > { %908 = vst.msk [vmem:[%s1517_s27 + $0x74] sm:$0xf] %vm878_vm3, %v1106_v50 }
 0x142 PF: > { %s13_s12 = sadd.s32 1, %s1328_s12  }
 0x143   : > { %p10_p4 = scmp.ge.s32.totalorder %s13_s12, 4  }
 0x145   :  { %12 = sbr.rel (!%p10_p4) target bundleno = 1 (0x1), region = 62 }

// kernel: forward.15
= control target key start
LH: loop header
LB: loop body
LE: loop exit
PB: predicated region body
PF: predicated region fallthrough
CT: control target
= control target key end

     0   :  { %s1839_s15 = smov 0   ;;  %s1841_s16 = smov 0   ;;  %s2854_s0 = inlined_call_operand.vmem [shape: bf16[2,18,18,32], index: 0, kind: input, shape index: {}]   ;;  %s2855_s1 = inlined_call_operand.vmem [shape: f32[9,1,1,32], index: 1, kind: input, shape index: {}]   ;;  %s2856_s2 = inlined_call_operand.vmem [shape: f32[1,32], index: 2, kind: input, shape index: {}]   ;;  %s2857_s3 = inlined_call_operand.vmem [shape: bf16[2,16,16,32], index: 3, kind: output, shape index: {0}]   ;;  %s2858_s4 = inlined_call_operand.vmem [shape: f32[2,1,32], index: 4, kind: output, shape index: {1}]  }
   0x1   :  { %s1843_s17 = smov 0   ;;  %s1845_s18 = smov 0  }
   0x2   :  { %s1847_s19 = smov 0  }
   0x3 LB: > { %s24_s20 = sadd.s32 1, %s1803_s17  ;;  %s27_s21 = sadd.s32 1, %s1807_s18  ;;  %s1811_s19 = sphi %s1847_s19, %s15_s19   ;;  %s1807_s18 = sphi %s1845_s18, %s2863_s18   ;;  %s1803_s17 = sphi %s1843_s17, %s2862_s17   ;;  %s1799_s16 = sphi %s1841_s16, %s2861_s16   ;;  %s1795_s15 = sphi %s1839_s15, %s2860_s15  }
   0x4   : > { %p25_p0 = scmp.ge.s32.totalorder %s24_s20, 2  ;;  %p1562_p1 = scmp.ge.s32.totalorder %s1811_s19, 1 }
   0x5   : > { %p179_p2 = scmp.lt.s32.totalorder %s1811_s19, 5 }
   0x6   : > { %s2865_s20 = smov (%p25_p0, %s24_s20), 0  ;;  %s2867_s21 = smov (!%p25_p0, %s27_s21), %s1807_s18 }
   0x7   : > { %p180_p3 = pnand %p1562_p1, %p179_p2  ;;  %p29_p4 = scmp.ge.s32.totalorder %s2867_s21, 2 }
   0x8   : > { %p213_p5 = scmp.lt.s32.totalorder (!%p180_p3), %s1799_s16, 1  ;;  %s1616_s22 = smul.u32 (!%p180_p3), 96, %s1795_s15  ;;  %v1887_v0 = vld [vmem:[%s2855_s1] ss:$0 sm:$0xff] (!%p180_p3)  ;;  %v1892_v1 = vld [vmem:[%s2855_s1 + $0x1] ss:$0 sm:$0xff] (!%p180_p3) }
   0x9   : > { %s2869_s21 = smov (%p29_p4, %s2867_s21), 0  ;;  %183 = sbr.rel (%p180_p3) target bundleno = 282 (0x11a), region = 32 }
   0xa   : > { %v1897_v2 = vld [vmem:[%s2855_s1 + $0x2] ss:$0 sm:$0xff] (!%p180_p3)  ;;  %v1902_v3 = vld [vmem:[%s2855_s1 + $0x3] ss:$0 sm:$0xff] (!%p180_p3)  ;;  %vm398_vm0 = vcmask (!%p180_p3), 1046528   ;;  %vm525_vm1 = vcmask (!%p180_p3), 1045504  }
   0xb   : > { %v1912_v7 = vld [vmem:[%s2855_s1 + $0x4] ss:$0 sm:$0xff] (!%p180_p3)  ;;  %v1923_v14 = vld [vmem:[%s2855_s1 + $0x5] ss:$0 sm:$0xff] (!%p180_p3)  ;;  %v1938_v23 = vld [vmem:[%s2855_s1 + $0x6] ss:$0 sm:$0xff] (!%p180_p3) }
   0xc   : > { %v1943_v24 = vld [vmem:[%s2855_s1 + $0x7] ss:$0 sm:$0xff] (!%p180_p3)  ;;  %v1957_v33 = vld [vmem:[%s2855_s1 + $0x8] ss:$0 sm:$0xff] (!%p180_p3)  ;;  %s1564_s7 = sshll.u32 (!%p180_p3), %s1795_s15, 3  ;;  %vm1376_vm2 = vcmask (!%p180_p3), 257024  }
   0xd   : > { %p2086_p6 = scmp.lt.s32.totalorder (!%p180_p3), %s1564_s7, 15  ;;  %p1613_p7 = scmp.ne.s32.totalorder (!%p180_p3), %s1795_s15, 0 }
  0x10   : > { %s2871_s16 = smov (!%p213_p5, %s1799_s16), 1  ;;  %s2873_s7 = smov (!%p2086_p6, %s1564_s7), 15 }
  0x11   : > { %s1657_s23 = smul.u32 216, %s2871_s16  ;;  %s1879_s26 = scalar_lea.vmem %s2858_s4, %s2871_s16  ;;  %vm1397_vm3 = vcmask (!%p1613_p7), 253952  }
  0x12   : > { %s1565_s9 = sshll.u32 %s2873_s7, 1  ;;  %s1566_s10 = sshll.u32 %s2871_s16, 5 }
  0x13   : > { %s217_s29 = scalar_lea.vmem %s2854_s0, %s1657_s23  ;;  %s2151_s16 = sadd.s32 %s1566_s10, %s1565_s9 }
  0x14   : > { %s1904_s12 = scalar_lea.vmem %s217_s29, %s1616_s22  ;;  %s1567_s11 = sshll.u32 %s2151_s16, 2 }
  0x15   : > { %v1634_v4 = vld [vmem:[%s1904_s12] sm:$0xff]   ;;  %v249_v5 = vld [vmem:[%s1904_s12 + $0xc] sm:$0xff]   ;;  %v1653_v6 = vld [vmem:[%s1904_s12 + $0x18] sm:$0xff]   ;;  %s2185_s22 = scalar_lea.vmem %s2857_s3, %s1567_s11 }
  0x16   : > { %v1635_v8 = vunpack.c.l.bf16 %v1634_v4  ;;  %v1636_v9 = vunpack.c.h.bf16 %v1634_v4  ;;  %v1914_v10 = vunpack.c.l.bf16 %v1653_v6  ;;  %v1916_v11 = vunpack.c.h.bf16 %v1653_v6  ;;  %v248_v12 = vld [vmem:[%s1904_s12 + $0x8] sm:$0x1]  ;;  %v251_v13 = vld [vmem:[%s1904_s12 + $0x14] sm:$0x1]  ;;  %v254_v42 = vld [vmem:[%s1904_s12 + $0x20] sm:$0x1] }
  0x17   : > { %v1925_v15 = vunpack.c.l.bf16 %v249_v5  ;;  %v1927_v16 = vunpack.c.h.bf16 %v249_v5  ;;  %v278_v17 = vunpack.c.l.bf16 %v248_v12  ;;  %v1929_v18 = vunpack.c.l.bf16 %v251_v13 }
  0x18   : > { %v312_v19 = vmul.f32 %v1635_v8, %v1887_v0  ;;  %v350_v20 = vmul.f32 %v1635_v8, %v1892_v1  ;;  %v351_v21 = vmul.f32 %v1636_v9, %v1892_v1  ;;  %v477_v22 = vmul.f32 %v1635_v8, %v1897_v2 }
  0x19   : > { %v478_v25 = vmul.f32 %v1636_v9, %v1897_v2  ;;  %v604_v26 = vmul.f32 %v1902_v3, %v1925_v15  ;;  %v642_v27 = vmul.f32 %v1912_v7, %v1925_v15  ;;  %v643_v28 = vmul.f32 %v1912_v7, %v1927_v16 }
  0x1a   : > { %v399_v29 = vrot.slane %v350_v20, 1  ;;  %v400_v30 = vrot.slane %v351_v21, 1  ;;  %v526_v31 = vrot.slane %v477_v22, 2  ;;  %v768_v32 = vmul.f32 %v1923_v14, %v1925_v15 }
  0x1b   : > { %v527_v34 = vrot.slane %v478_v25, 2  ;;  %v690_v35 = vrot.slane %v642_v27, 1  ;;  %v691_v36 = vrot.slane %v643_v28, 1  ;;  %v769_v37 = vmul.f32 %v1923_v14, %v1927_v16 }
  0x1c   : > { %v401_v38 = vsel %vm398_vm0, %v399_v29, %v400_v30  ;;  %v816_v39 = vrot.slane %v768_v32, 2  ;;  %v894_v40 = vmul.f32 %v1914_v10, %v1938_v23  ;;  %v932_v41 = vmul.f32 %v1914_v10, %v1943_v24 }
  0x1d   : > { %v455_v43 = vadd.f32 %v401_v38, %v312_v19  ;;  %v528_v44 = vsel %vm525_vm1, %v526_v31, %v527_v34  ;;  %v692_v45 = vsel %vm398_vm0, %v690_v35, %v691_v36  ;;  %v817_v46 = vrot.slane %v769_v37, 2 }
  0x1e   : > { %v933_v47 = vmul.f32 %v1916_v11, %v1943_v24  ;;  %v980_v48 = vrot.slane %v932_v41, 1  ;;  %v1058_v49 = vmul.f32 %v1914_v10, %v1957_v33  ;;  %v1059_v50 = vmul.f32 %v1916_v11, %v1957_v33 }
  0x1f   : > { %v582_v51 = vadd.f32 %v528_v44, %v455_v43  ;;  %v818_v52 = vsel %vm525_vm1, %v816_v39, %v817_v46  ;;  %v1976_v53 = vunpack.c.l.bf16 %v254_v42  ;;  %v313_v54 = vmul.f32 %v1636_v9, %v1887_v0 }
  0x20   : > { %v981_v55 = vrot.slane %v933_v47, 1  ;;  %v1106_v56 = vrot.slane %v1058_v49, 2  ;;  %v1107_v57 = vrot.slane %v1059_v50, 2  ;;  %v352_v58 = vmul.f32 %v1892_v1, %v278_v17 }
  0x21   : > { %v620_v59 = vadd.f32 %v604_v26, %v582_v51  ;;  %v479_v60 = vmul.f32 %v1897_v2, %v278_v17  ;;  %v605_v61 = vmul.f32 %v1902_v3, %v1927_v16  ;;  %v644_v62 = vmul.f32 %v1912_v7, %v1929_v18  ;;  %v255_v17 = vld [vmem:[%s1904_s12 + $0x24] sm:$0xff]  }
  0x22   : > { %v982_v63 = vsel %vm398_vm0, %v980_v48, %v981_v55  ;;  %v1108_v4 = vsel %vm525_vm1, %v1106_v56, %v1107_v57  ;;  %v402_v5 = vrot.slane %v352_v58, 1  ;;  %v770_v6 = vmul.f32 %v1923_v14, %v1929_v18 }
  0x23   : > { %v746_v8 = vadd.f32 %v692_v45, %v620_v59  ;;  %v529_v9 = vrot.slane %v479_v60, 2  ;;  %v693_v12 = vrot.slane %v644_v62, 1  ;;  %v895_v13 = vmul.f32 %v1916_v11, %v1938_v23 }
  0x24   : > { %v403_v19 = vsel %vm398_vm0, %v400_v30, %v402_v5  ;;  %v819_v20 = vrot.slane %v770_v6, 2  ;;  %v934_v21 = vmul.f32 %v1943_v24, %v1976_v53  ;;  %v1060_v22 = vmul.f32 %v1957_v33, %v1976_v53 }
  0x25   : > { %v872_v25 = vadd.f32 %v818_v52, %v746_v8  ;;  %v456_v26 = vadd.f32 %v403_v19, %v313_v54  ;;  %v530_v27 = vsel %vm525_vm1, %v527_v34, %v529_v9  ;;  %v694_v28 = vsel %vm398_vm0, %v691_v36, %v693_v12 }
  0x26   : > { %v820_v29 = vsel %vm525_vm1, %v817_v46, %v819_v20  ;;  %v983_v31 = vrot.slane %v934_v21, 1  ;;  %v1109_v32 = vrot.slane %v1060_v22, 2  ;;  %v2000_v35 = vunpack.c.l.bf16 %v255_v17  ;;  %v2023_v46 = vld [vmem:[%s2856_s2] ss:$0 sm:$0xff] }
  0x27   : > { %v910_v30 = vadd.f32 %v894_v40, %v872_v25  ;;  %v583_v37 = vadd.f32 %v530_v27, %v456_v26  ;;  %v2002_v38 = vunpack.c.h.bf16 %v255_v17  ;;  %v314_v39 = vmul.f32 %v1887_v0, %v1925_v15  ;;  %v257_v25 = vld [vmem:[%s1904_s12 + $0x2c] sm:$0x1] }
  0x28   : > { %v984_v41 = vsel %vm398_vm0, %v981_v55, %v983_v31  ;;  %v1110_v42 = vsel %vm525_vm1, %v1107_v57, %v1109_v32  ;;  %v353_v34 = vmul.f32 %v1892_v1, %v1925_v15  ;;  %v2012_v36 = vmul.f32 %v1892_v1, %v1927_v16 }
  0x29   : > { %v1036_v43 = vadd.f32 %v982_v63, %v910_v30  ;;  %v621_v44 = vadd.f32 %v605_v61, %v583_v37  ;;  %v480_v40 = vmul.f32 %v1897_v2, %v1925_v15  ;;  %v2018_v45 = vmul.f32 %v1897_v2, %v1927_v16 }
  0x2a   : > { %v404_v47 = vrot.slane %v353_v34, 1  ;;  %v405_v48 = vrot.slane %v2012_v36, 1  ;;  %v606_v49 = vmul.f32 %v1914_v10, %v1902_v3  ;;  %v645_v50 = vmul.f32 %v1914_v10, %v1912_v7 }
  0x2b   : > { %v1162_v51 = vadd.f32 %v1108_v4, %v1036_v43  ;;  %v747_v15 = vadd.f32 %v694_v28, %v621_v44  ;;  %v531_v52 = vrot.slane %v480_v40, 2  ;;  %v532_v54 = vrot.slane %v2018_v45, 2 }
  0x2c   : > { %v406_v55 = vsel %vm398_vm0, %v404_v47, %v405_v48  ;;  %v646_v56 = vmul.f32 %v1916_v11, %v1912_v7  ;;  %v695_v57 = vrot.slane %v645_v50, 1  ;;  %v771_v58 = vmul.f32 %v1914_v10, %v1923_v14 }
  0x2d   : > { %v2037_v59 = vadd.f32 %v2023_v46, %v1162_v51  ;;  %v873_v60 = vadd.f32 %v820_v29, %v747_v15  ;;  %v457_v61 = vadd.f32 %v406_v55, %v314_v39  ;;  %v533_v62 = vsel %vm525_vm1, %v531_v52, %v532_v54 }
  0x2e   : > { %v696_v63 = vrot.slane %v646_v56, 1  ;;  %v772_v4 = vmul.f32 %v1916_v11, %v1923_v14  ;;  %v821_v5 = vrot.slane %v771_v58, 2  ;;  %v896_v6 = vmul.f32 %v1938_v23, %v2000_v35  ;;  %v1654_v56 = vld [vmem:[%s1904_s12 + $0x30] sm:$0xff]  }
  0x2f   : > { %v1581_v8 = vmul.f32 -1.442695, %v2037_v59  ;;  %v911_v9 = vadd.f32 %v895_v13, %v873_v60  ;;  %v584_v12 = vadd.f32 %v533_v62, %v457_v61  ;;  %v935_v17 = vmul.f32 %v1943_v24, %v2000_v35 }
  0x30   : > { %v697_v19 = vsel %vm398_vm0, %v695_v57, %v696_v63  ;;  %v822_v20 = vrot.slane %v772_v4, 2  ;;  %v936_v21 = vmul.f32 %v1943_v24, %v2002_v38  ;;  %v1061_v22 = vmul.f32 %v1957_v33, %v2000_v35 }
  0x31   : > { %1699 = vpow2.f32 %v1581_v8  ;;  %v1037_v26 = vadd.f32 %v984_v41, %v911_v9  ;;  %v622_v27 = vadd.f32 %v606_v49, %v584_v12  ;;  %v985_v28 = vrot.slane %v935_v17, 1 }
  0x32   : > { %v823_v13 = vsel %vm525_vm1, %v821_v5, %v822_v20  ;;  %v986_v29 = vrot.slane %v936_v21, 1  ;;  %v1062_v31 = vmul.f32 %v1957_v33, %v2002_v38  ;;  %v1111_v32 = vrot.slane %v1061_v22, 2 }
  0x33   : > { %v1163_v30 = vadd.f32 %v1110_v42, %v1037_v26  ;;  %v748_v37 = vadd.f32 %v697_v19, %v622_v27  ;;  %v2056_v39 = vunpack.c.l.bf16 %v257_v25  ;;  %v315_v34 = vmul.f32 %v1887_v0, %v1927_v16 }
  0x34   : > { %v987_v36 = vsel %vm398_vm0, %v985_v28, %v986_v29  ;;  %v1112_v41 = vrot.slane %v1062_v31, 2  ;;  %v355_v43 = vmul.f32 %v1892_v1, %v1929_v18  ;;  %v482_v44 = vmul.f32 %v1897_v2, %v1929_v18 }
  0x35   : > { %v2066_v40 = vadd.f32 %v2023_v46, %v1163_v30  ;;  %v874_v42 = vadd.f32 %v823_v13, %v748_v37  ;;  %v607_v45 = vmul.f32 %v1916_v11, %v1902_v3  ;;  %v647_v16 = vmul.f32 %v1912_v7, %v1976_v53 }
  0x36   : > { %v1113_v47 = vsel %vm525_vm1, %v1111_v32, %v1112_v41  ;;  %v407_v49 = vrot.slane %v355_v43, 1  ;;  %v534_v50 = vrot.slane %v482_v44, 2  ;;  %v773_v51 = vmul.f32 %v1923_v14, %v1976_v53 }
  0x37   : > { %v1582_v18 = vmul.f32 -1.442695, %v2066_v40  ;;  %v912_v15 = vadd.f32 %v896_v6, %v874_v42  ;;  %v698_v52 = vrot.slane %v647_v16, 1  ;;  %v897_v55 = vmul.f32 %v1938_v23, %v2002_v38 }
  0x38   : > { %v408_v57 = vsel %vm398_vm0, %v405_v48, %v407_v49  ;;  %v535_v58 = vsel %vm525_vm1, %v532_v54, %v534_v50  ;;  %v824_v60 = vrot.slane %v773_v51, 2  ;;  %v937_v61 = vmul.f32 %v1943_v24, %v2056_v39 }
  0x39   : > { %1701 = vpow2.f32 %v1582_v18  ;;  %v1038_v62 = vadd.f32 %v987_v36, %v912_v15  ;;  %v458_v4 = vadd.f32 %v408_v57, %v315_v34  ;;  %v699_v5 = vsel %vm398_vm0, %v696_v63, %v698_v52 }
  0x3a   : > { %v825_v48 = vsel %vm525_vm1, %v822_v20, %v824_v60  ;;  %v988_v6 = vrot.slane %v937_v61, 1  ;;  %v1063_v54 = vmul.f32 %v1957_v33, %v2056_v39  ;;  %v2094_v8 = vunpack.c.l.bf16 %v1654_v56 }
  0x3b   : > { %v1700_v9 = vpop.eup %1699  ;;  %v1164_v12 = vadd.f32 %v1113_v47, %v1038_v62  ;;  %v585_v17 = vadd.f32 %v535_v58, %v458_v4  ;;  %v2096_v19 = vunpack.c.h.bf16 %v1654_v56  ;;  %v316_v21 = vmul.f32 %v1914_v10, %v1887_v0 }
  0x3c   : > { %v1248_v22 = vadd.f32 1.0, %v1700_v9  ;;  %v989_v25 = vsel %vm398_vm0, %v986_v29, %v988_v6  ;;  %v1114_v63 = vrot.slane %v1063_v54, 2  ;;  %v356_v20 = vmul.f32 %v1914_v10, %v1892_v1  ;;  %v260_v6 = vld [vmem:[%s1904_s12 + $0x38] sm:$0x1] }
  0x3d   : > { %v2110_v26 = vadd.f32 %v2023_v46, %v1164_v12  ;;  %v623_v27 = vadd.f32 %v607_v45, %v585_v17  ;;  %v2114_v28 = vmul.f32 %v1916_v11, %v1892_v1  ;;  %v483_v13 = vmul.f32 %v1914_v10, %v1897_v2 }
  0x3e   : > { %1703 = vrcp.f32 %v1248_v22  ;;  %v1115_v29 = vsel %vm525_vm1, %v1112_v41, %v1114_v63  ;;  %v409_v31 = vrot.slane %v356_v20, 1  ;;  %v2121_v32 = vmul.f32 %v1916_v11, %v1897_v2 }
  0x3f   : > { %v1583_v30 = vmul.f32 -1.442695, %v2110_v26  ;;  %v749_v37 = vadd.f32 %v699_v5, %v623_v27  ;;  %v410_v34 = vrot.slane %v2114_v28, 1  ;;  %v536_v36 = vrot.slane %v483_v13, 2 }
  0x40   : > { %v537_v43 = vrot.slane %v2121_v32, 2  ;;  %v608_v44 = vmul.f32 %v1902_v3, %v2000_v35  ;;  %v648_v10 = vmul.f32 %v1912_v7, %v2000_v35  ;;  %v2132_v41 = vmul.f32 %v1912_v7, %v2002_v38 }
  0x41   : > { %1705 = vpow2.f32 %v1583_v30  ;;  %v875_v42 = vadd.f32 %v825_v48, %v749_v37  ;;  %v411_v45 = vsel %vm398_vm0, %v409_v31, %v410_v34  ;;  %v774_v16 = vmul.f32 %v1923_v14, %v2000_v35 }
  0x42   : > { %v459_v47 = vadd.f32 %v411_v45, %v316_v21  ;;  %v538_v49 = vsel %vm525_vm1, %v536_v36, %v537_v43  ;;  %v700_v50 = vrot.slane %v648_v10, 1  ;;  %v701_v51 = vrot.slane %v2132_v41, 1 }
  0x43   : > { %v1702_v18 = vpop.eup %1701  ;;  %v913_v15 = vadd.f32 %v897_v55, %v875_v42  ;;  %v2147_v52 = vmul.f32 %v1923_v14, %v2002_v38  ;;  %v826_v56 = vrot.slane %v774_v16, 2  ;;  %v898_v57 = vmul.f32 %v2094_v8, %v1938_v23 }
  0x44   : > { %v1249_v58 = vadd.f32 1.0, %v1702_v18  ;;  %v586_v60 = vadd.f32 %v538_v49, %v459_v47  ;;  %v702_v61 = vsel %vm398_vm0, %v700_v50, %v701_v51  ;;  %v938_v62 = vmul.f32 %v2094_v8, %v1943_v24 }
  0x45   : > { %v1039_v4 = vadd.f32 %v989_v25, %v913_v15  ;;  %v827_v55 = vrot.slane %v2147_v52, 2  ;;  %v2159_v5 = vmul.f32 %v2096_v19, %v1943_v24  ;;  %v1064_v48 = vmul.f32 %v2094_v8, %v1957_v33 }
  0x46   : > { %1707 = vrcp.f32 %v1249_v58  ;;  %v624_v54 = vadd.f32 %v608_v44, %v586_v60  ;;  %v990_v9 = vrot.slane %v938_v62, 1  ;;  %v1065_v12 = vmul.f32 %v2096_v19, %v1957_v33  ;;  %v261_v58 = vld [vmem:[%s1904_s12 + $0x3c] sm:$0xff]  }
  0x47   : > { %v1165_v17 = vadd.f32 %v1115_v29, %v1039_v4  ;;  %v828_v21 = vsel %vm525_vm1, %v826_v56, %v827_v55  ;;  %v991_v22 = vrot.slane %v2159_v5, 1  ;;  %v1116_v25 = vrot.slane %v1064_v48, 2 }
  0x48   : > { %v1704_v63 = vpop.eup %1703  ;;  %v750_v20 = vadd.f32 %v702_v61, %v624_v54  ;;  %v1117_v27 = vrot.slane %v1065_v12, 2  ;;  %v2169_v13 = vunpack.c.l.bf16 %v260_v6  ;;  %v317_v31 = vmul.f32 %v1916_v11, %v1887_v0 }
  0x49   : > { %v2174_v30 = vmul.f32 %v1704_v63, %v2037_v59  ;;  %v2177_v37 = vadd.f32 %v2023_v46, %v1165_v17  ;;  %v992_v29 = vsel %vm398_vm0, %v990_v9, %v991_v22  ;;  %v358_v36 = vmul.f32 %v1892_v1, %v1976_v53 }
  0x4a   : > { %v876_v44 = vadd.f32 %v828_v21, %v750_v20  ;;  %v1118_v11 = vsel %vm525_vm1, %v1116_v25, %v1117_v27  ;;  %v485_v59 = vmul.f32 %v1897_v2, %v1976_v53  ;;  %v609_v10 = vmul.f32 %v1902_v3, %v2002_v38 }
  0x4b   : > { %v1706_v41 = vpop.eup %1705  ;;  %v1617_v42 = vpack.c.bf16 %v2174_v30, %v2174_v30  ;;  %v1584_v45 = vmul.f32 -1.442695, %v2177_v37  ;;  %v412_v16 = vrot.slane %v358_v36, 1  ;;  %v650_v47 = vmul.f32 %v1912_v7, %v2056_v39 }
  0x4c   : > { %v1250_v49 = vadd.f32 1.0, %v1706_v41  ;;  %v914_v50 = vadd.f32 %v898_v57, %v876_v44  ;;  %v539_v18 = vrot.slane %v485_v59, 2  ;;  %v776_v53 = vmul.f32 %v1923_v14, %v2056_v39 }
  0x4d   : > { %1377 = vst.msk [vmem:[%s2185_s22] sm:$0xf] %vm1376_vm2, %v1617_v42  ;;  %1709 = vpow2.f32 %v1584_v45  ;;  %v413_v15 = vsel %vm398_vm0, %v410_v34, %v412_v16  ;;  %v703_v52 = vrot.slane %v650_v47, 1  ;;  %v899_v56 = vmul.f32 %v2096_v19, %v1938_v23 }
  0x4e   : > { %1711 = vrcp.f32 %v1250_v49  ;;  %v1040_v60 = vadd.f32 %v992_v29, %v914_v50  ;;  %v460_v61 = vadd.f32 %v413_v15, %v317_v31  ;;  %v540_v57 = vsel %vm525_vm1, %v537_v43, %v539_v18 }
  0x4f   : > { %v704_v62 = vsel %vm398_vm0, %v701_v51, %v703_v52  ;;  %v829_v4 = vrot.slane %v776_v53, 2  ;;  %v940_v28 = vmul.f32 %v1943_v24, %v2169_v13  ;;  %v1066_v34 = vmul.f32 %v1957_v33, %v2169_v13 }
  0x50   : > { %v1708_v5 = vpop.eup %1707  ;;  %v1166_v48 = vadd.f32 %v1118_v11, %v1040_v60  ;;  %v587_v6 = vadd.f32 %v540_v57, %v460_v61  ;;  %v2215_v54 = vunpack.c.l.bf16 %v261_v58  ;;  %v2217_v9 = vunpack.c.h.bf16 %v261_v58 }
  0x51   : > { %v2220_v32 = vmul.f32 %v1708_v5, %v2066_v40  ;;  %v830_v43 = vsel %vm525_vm1, %v827_v55, %v829_v4  ;;  %v993_v51 = vrot.slane %v940_v28, 1  ;;  %v1119_v12 = vrot.slane %v1066_v34, 2  ;;  %v263_v5 = vld [vmem:[%s1904_s12 + $0x44] sm:$0x1] }
  0x52   : > { %v2224_v17 = vadd.f32 %v2023_v46, %v1166_v48  ;;  %v625_v21 = vadd.f32 %v609_v10, %v587_v6  ;;  %v318_v25 = vmul.f32 %v1887_v0, %v2000_v35  ;;  %v359_v63 = vmul.f32 %v1892_v1, %v2000_v35 }
  0x53   : > { %v1618_v20 = vpack.c.bf16 %v2220_v32, %v2220_v32  ;;  %v994_v40 = vsel %vm398_vm0, %v991_v22, %v993_v51  ;;  %v1120_v31 = vsel %vm525_vm1, %v1117_v27, %v1119_v12  ;;  %v2236_v55 = vmul.f32 %v1892_v1, %v2002_v38 }
  0x54   : > { %v1585_v29 = vmul.f32 -1.442695, %v2224_v17  ;;  %v751_v36 = vadd.f32 %v704_v62, %v625_v21  ;;  %v414_v44 = vrot.slane %v359_v63, 1  ;;  %v486_v11 = vmul.f32 %v1897_v2, %v2000_v35 }
  0x55   : > { %1378 = vst.msk [vmem:[%s2185_s22 + $0x4] sm:$0xf] %vm1376_vm2, %v1618_v20  ;;  %v415_v59 = vrot.slane %v2236_v55, 1  ;;  %v2246_v22 = vmul.f32 %v1897_v2, %v2002_v38  ;;  %v610_v27 = vmul.f32 %v2094_v8, %v1902_v3  ;;  %v651_v10 = vmul.f32 %v2094_v8, %v1912_v7 }
  0x56   : > { %1713 = vpow2.f32 %v1585_v29  ;;  %v877_v41 = vadd.f32 %v830_v43, %v751_v36  ;;  %v541_v42 = vrot.slane %v486_v11, 2  ;;  %v2254_v35 = vmul.f32 %v2096_v19, %v1912_v7 }
  0x57   : > { %v1710_v45 = vpop.eup %1709  ;;  %v416_v16 = vsel %vm398_vm0, %v414_v44, %v415_v59  ;;  %v542_v47 = vrot.slane %v2246_v22, 2  ;;  %v705_v49 = vrot.slane %v651_v10, 1  ;;  %v777_v50 = vmul.f32 %v2094_v8, %v1923_v14 }
  0x58   : > { %v1712_v18 = vpop.eup %1711  ;;  %v1251_v53 = vadd.f32 1.0, %v1710_v45  ;;  %v915_v15 = vadd.f32 %v899_v56, %v877_v41  ;;  %v461_v52 = vadd.f32 %v416_v16, %v318_v25  ;;  %v706_v58 = vrot.slane %v2254_v35, 1 }
  0x59   : > { %v2264_v60 = vmul.f32 %v1712_v18, %v2110_v26  ;;  %v543_v61 = vsel %vm525_vm1, %v541_v42, %v542_v47  ;;  %v778_v57 = vmul.f32 %v2096_v19, %v1923_v14  ;;  %v831_v62 = vrot.slane %v777_v50, 2 }
  0x5a   : > { %1715 = vrcp.f32 %v1251_v53  ;;  %v1041_v4 = vadd.f32 %v994_v40, %v915_v15  ;;  %v588_v28 = vadd.f32 %v543_v61, %v461_v52  ;;  %v707_v34 = vsel %vm398_vm0, %v705_v49, %v706_v58  ;;  %v1655_v52 = vld [vmem:[%s1904_s12 + $0x48] sm:$0xff]  }
  0x5b   : > { %v1619_v56 = vpack.c.bf16 %v2264_v60, %v2264_v60  ;;  %v832_v48 = vrot.slane %v778_v57, 2  ;;  %v900_v26 = vmul.f32 %v1938_v23, %v2215_v54  ;;  %v941_v6 = vmul.f32 %v1943_v24, %v2215_v54 }
  0x5c   : > { %v1167_v43 = vadd.f32 %v1120_v31, %v1041_v4  ;;  %v626_v51 = vadd.f32 %v610_v27, %v588_v28  ;;  %v942_v12 = vmul.f32 %v1943_v24, %v2217_v9  ;;  %v1067_v21 = vmul.f32 %v1957_v33, %v2215_v54 }
  0x5d   : > { %1379 = vst.msk [vmem:[%s2185_s22 + $0x8] sm:$0xf] %vm1376_vm2, %v1619_v56  ;;  %v833_v25 = vsel %vm525_vm1, %v831_v62, %v832_v48  ;;  %v995_v63 = vrot.slane %v941_v6, 1  ;;  %v1068_v20 = vmul.f32 %v1957_v33, %v2217_v9  ;;  %v2286_v40 = vunpack.c.l.bf16 %v263_v5 }
  0x5e   : > { %v2289_v29 = vadd.f32 %v2023_v46, %v1167_v43  ;;  %v752_v31 = vadd.f32 %v707_v34, %v626_v51  ;;  %v996_v36 = vrot.slane %v942_v12, 1  ;;  %v1121_v44 = vrot.slane %v1067_v21, 2 }
  0x5f   : > { %v1122_v11 = vrot.slane %v1068_v20, 2  ;;  %v319_v22 = vmul.f32 %v1887_v0, %v2002_v38  ;;  %v361_v27 = vmul.f32 %v1892_v1, %v2056_v39  ;;  %v488_v10 = vmul.f32 %v1897_v2, %v2056_v39 }
  0x60   : > { %v1714_v41 = vpop.eup %1713  ;;  %v1586_v42 = vmul.f32 -1.442695, %v2289_v29  ;;  %v878_v35 = vadd.f32 %v833_v25, %v752_v31  ;;  %v997_v45 = vsel %vm398_vm0, %v995_v63, %v996_v36  ;;  %v611_v16 = vmul.f32 %v2096_v19, %v1902_v3 }
  0x61   : > { %v1252_v49 = vadd.f32 1.0, %v1714_v41  ;;  %v1123_v50 = vsel %vm525_vm1, %v1121_v44, %v1122_v11  ;;  %v417_v38 = vrot.slane %v361_v27, 1  ;;  %v544_v18 = vrot.slane %v488_v10, 2 }
  0x62   : > { %1717 = vpow2.f32 %v1586_v42  ;;  %v916_v53 = vadd.f32 %v900_v26, %v878_v35  ;;  %v653_v15 = vmul.f32 %v1912_v7, %v2169_v13  ;;  %v779_v39 = vmul.f32 %v1923_v14, %v2169_v13 }
  0x63   : > { %1719 = vrcp.f32 %v1252_v49  ;;  %v418_v61 = vsel %vm398_vm0, %v415_v59, %v417_v38  ;;  %v545_v57 = vsel %vm525_vm1, %v542_v47, %v544_v18  ;;  %v901_v62 = vmul.f32 %v1938_v23, %v2217_v9 }
  0x64   : > { %v1716_v4 = vpop.eup %1715  ;;  %v1042_v28 = vadd.f32 %v997_v45, %v916_v53  ;;  %v462_v34 = vadd.f32 %v418_v61, %v319_v22  ;;  %v708_v5 = vrot.slane %v653_v15, 1  ;;  %v834_v56 = vrot.slane %v779_v39, 2 }
  0x65   : > { %v2314_v26 = vmul.f32 %v1716_v4, %v2177_v37  ;;  %v943_v6 = vmul.f32 %v1943_v24, %v2286_v40  ;;  %v1069_v55 = vmul.f32 %v1957_v33, %v2286_v40  ;;  %v2320_v59 = vunpack.c.l.bf16 %v1655_v52 }
  0x66   : > { %v1168_v47 = vadd.f32 %v1123_v50, %v1042_v28  ;;  %v589_v43 = vadd.f32 %v545_v57, %v462_v34  ;;  %v709_v51 = vsel %vm398_vm0, %v706_v58, %v708_v5  ;;  %v835_v12 = vsel %vm525_vm1, %v832_v48, %v834_v56 }
  0x67   : > { %v1620_v21 = vpack.c.bf16 %v2314_v26, %v2314_v26  ;;  %v998_v37 = vrot.slane %v943_v6, 1  ;;  %v1124_v25 = vrot.slane %v1069_v55, 2  ;;  %v2326_v63 = vunpack.c.h.bf16 %v1655_v52 }
  0x68   : > { %v2329_v20 = vadd.f32 %v2023_v46, %v1168_v47  ;;  %v627_v31 = vadd.f32 %v611_v16, %v589_v43  ;;  %v320_v44 = vmul.f32 %v2094_v8, %v1887_v0  ;;  %v362_v22 = vmul.f32 %v2094_v8, %v1892_v1 }
  0x69   : > { %1380 = vst.msk [vmem:[%s2185_s22 + $0xc] sm:$0xf] %vm1376_vm2, %v1620_v21  ;;  %v999_v58 = vsel %vm398_vm0, %v996_v36, %v998_v37  ;;  %v1125_v48 = vsel %vm525_vm1, %v1122_v11, %v1124_v25  ;;  %v2341_v27 = vmul.f32 %v2096_v19, %v1892_v1  ;;  %v489_v10 = vmul.f32 %v2094_v8, %v1897_v2 }
  0x6a   : > { %v1587_v41 = vmul.f32 -1.442695, %v2329_v20  ;;  %v753_v42 = vadd.f32 %v709_v51, %v627_v31  ;;  %v419_v35 = vrot.slane %v362_v22, 1  ;;  %v2348_v45 = vmul.f32 %v2096_v19, %v1897_v2 }
  0x6b   : > { %v420_v16 = vrot.slane %v2341_v27, 1  ;;  %v546_v36 = vrot.slane %v489_v10, 2  ;;  %v612_v11 = vmul.f32 %v1902_v3, %v2215_v54  ;;  %v654_v49 = vmul.f32 %v1912_v7, %v2215_v54 }
  0x6c   : > { %v1718_v50 = vpop.eup %1717  ;;  %1721 = vpow2.f32 %v1587_v41  ;;  %v879_v8 = vadd.f32 %v835_v12, %v753_v42  ;;  %v547_v38 = vrot.slane %v2348_v45, 2  ;;  %v2358_v18 = vmul.f32 %v1912_v7, %v2217_v9 }
  0x6d   : > { %v1720_v53 = vpop.eup %1719  ;;  %v1253_v15 = vadd.f32 1.0, %v1718_v50  ;;  %v421_v39 = vsel %vm398_vm0, %v419_v35, %v420_v16  ;;  %v710_v52 = vrot.slane %v654_v49, 1  ;;  %v780_v61 = vmul.f32 %v1923_v14, %v2215_v54 }
  0x6e   : > { %v2366_v57 = vmul.f32 %v1720_v53, %v2224_v17  ;;  %v917_v4 = vadd.f32 %v901_v62, %v879_v8  ;;  %v463_v28 = vadd.f32 %v421_v39, %v320_v44  ;;  %v548_v34 = vsel %vm525_vm1, %v546_v36, %v547_v38  ;;  %v266_v62 = vld [vmem:[%s1904_s12 + $0x50] sm:$0x1] }
  0x6f   : > { %1723 = vrcp.f32 %v1253_v15  ;;  %v711_v5 = vrot.slane %v2358_v18, 1  ;;  %v781_v56 = vmul.f32 %v1923_v14, %v2217_v9  ;;  %v836_v6 = vrot.slane %v780_v61, 2 }
  0x70   : > { %v1621_v55 = vpack.c.bf16 %v2366_v57, %v2366_v57  ;;  %v1043_v47 = vadd.f32 %v999_v58, %v917_v4  ;;  %v590_v43 = vadd.f32 %v548_v34, %v463_v28  ;;  %v902_v17 = vmul.f32 %v2320_v59, %v1938_v23 }
  0x71   : > { %v712_v51 = vsel %vm398_vm0, %v710_v52, %v711_v5  ;;  %v837_v12 = vrot.slane %v781_v56, 2  ;;  %v944_v21 = vmul.f32 %v2320_v59, %v1943_v24  ;;  %v945_v37 = vmul.f32 %v2326_v63, %v1943_v24 }
  0x72   : > { %1381 = vst.msk [vmem:[%s2185_s22 + $0x10] sm:$0xf] %vm1376_vm2, %v1621_v55  ;;  %v1169_v25 = vadd.f32 %v1125_v48, %v1043_v47  ;;  %v628_v31 = vadd.f32 %v612_v11, %v590_v43  ;;  %v1070_v44 = vmul.f32 %v2320_v59, %v1957_v33  ;;  %v1071_v22 = vmul.f32 %v2326_v63, %v1957_v33 }
  0x73   : > { %v838_v58 = vsel %vm525_vm1, %v836_v6, %v837_v12  ;;  %v1000_v10 = vrot.slane %v944_v21, 1  ;;  %v1001_v41 = vrot.slane %v945_v37, 1  ;;  %v2389_v42 = vunpack.c.l.bf16 %v266_v62  ;;  %v267_v6 = vld [vmem:[%s1904_s12 + $0x54] sm:$0xff]  }
  0x74   : > { %v2392_v35 = vadd.f32 %v2023_v46, %v1169_v25  ;;  %v754_v45 = vadd.f32 %v712_v51, %v628_v31  ;;  %v1126_v36 = vrot.slane %v1070_v44, 2  ;;  %v1127_v49 = vrot.slane %v1071_v22, 2 }
  0x75   : > { %v1002_v48 = vsel %vm398_vm0, %v1000_v10, %v1001_v41  ;;  %v321_v11 = vmul.f32 %v2096_v19, %v1887_v0  ;;  %v364_v50 = vmul.f32 %v1892_v1, %v2169_v13  ;;  %v491_v8 = vmul.f32 %v1897_v2, %v2169_v13 }
  0x76   : > { %v1722_v18 = vpop.eup %1721  ;;  %v1588_v53 = vmul.f32 -1.442695, %v2392_v35  ;;  %v880_v15 = vadd.f32 %v838_v58, %v754_v45  ;;  %v1128_v39 = vsel %vm525_vm1, %v1126_v36, %v1127_v49  ;;  %v613_v52 = vmul.f32 %v1902_v3, %v2217_v9 }
  0x77   : > { %v1254_v61 = vadd.f32 1.0, %v1722_v18  ;;  %v422_v4 = vrot.slane %v364_v50, 1  ;;  %v549_v28 = vrot.slane %v491_v8, 2  ;;  %v656_v19 = vmul.f32 %v1912_v7, %v2286_v40 }
  0x78   : > { %1725 = vpow2.f32 %v1588_v53  ;;  %v918_v34 = vadd.f32 %v902_v17, %v880_v15  ;;  %v782_v13 = vmul.f32 %v1923_v14, %v2286_v40  ;;  %v903_v56 = vmul.f32 %v2326_v63, %v1938_v23 }
  0x79   : > { %v1724_v55 = vpop.eup %1723  ;;  %1727 = vrcp.f32 %v1254_v61  ;;  %v423_v47 = vsel %vm398_vm0, %v420_v16, %v422_v4  ;;  %v550_v43 = vsel %vm525_vm1, %v547_v38, %v549_v28  ;;  %v713_v62 = vrot.slane %v656_v19, 1 }
  0x7a   : > { %v2417_v51 = vmul.f32 %v1724_v55, %v2289_v29  ;;  %v1044_v17 = vadd.f32 %v1002_v48, %v918_v34  ;;  %v464_v21 = vadd.f32 %v423_v47, %v321_v11  ;;  %v839_v37 = vrot.slane %v782_v13, 2 }
  0x7b   : > { %v714_v25 = vsel %vm398_vm0, %v711_v5, %v713_v62  ;;  %v946_v31 = vmul.f32 %v1943_v24, %v2389_v42  ;;  %v1072_v27 = vmul.f32 %v1957_v33, %v2389_v42  ;;  %v2424_v44 = vunpack.c.l.bf16 %v267_v6 }
  0x7c   : > { %v1622_v16 = vpack.c.bf16 %v2417_v51, %v2417_v51  ;;  %v1170_v38 = vadd.f32 %v1128_v39, %v1044_v17  ;;  %v591_v29 = vadd.f32 %v550_v43, %v464_v21  ;;  %v840_v22 = vsel %vm525_vm1, %v837_v12, %v839_v37  ;;  %v269_v37 = vld [vmem:[%s1904_s12 + $0x5c] sm:$0x1] }
  0x7d   : > { %v1003_v58 = vrot.slane %v946_v31, 1  ;;  %v1129_v10 = vrot.slane %v1072_v27, 2  ;;  %v2429_v45 = vunpack.c.h.bf16 %v267_v6  ;;  %v322_v5 = vmul.f32 %v1887_v0, %v2215_v54 }
  0x7e   : > { %1382 = vst.msk [vmem:[%s2185_s22 + $0x14] sm:$0xf] %vm1376_vm2, %v1622_v16  ;;  %v2436_v36 = vadd.f32 %v2023_v46, %v1170_v38  ;;  %v629_v48 = vadd.f32 %v613_v52, %v591_v29  ;;  %v365_v11 = vmul.f32 %v1892_v1, %v2215_v54  ;;  %v2442_v50 = vmul.f32 %v1892_v1, %v2217_v9 }
  0x7f   : > { %v1004_v12 = vsel %vm398_vm0, %v1001_v41, %v1003_v58  ;;  %v1130_v8 = vsel %vm525_vm1, %v1127_v49, %v1129_v10  ;;  %v492_v0 = vmul.f32 %v1897_v2, %v2215_v54  ;;  %v2450_v18 = vmul.f32 %v1897_v2, %v2217_v9 }
  0x80   : > { %v1589_v53 = vmul.f32 -1.442695, %v2436_v36  ;;  %v755_v15 = vadd.f32 %v714_v25, %v629_v48  ;;  %v424_v39 = vrot.slane %v365_v11, 1  ;;  %v425_v52 = vrot.slane %v2442_v50, 1 }
  0x81   : > { %v551_v61 = vrot.slane %v492_v0, 2  ;;  %v552_v1 = vrot.slane %v2450_v18, 2  ;;  %v614_v41 = vmul.f32 %v2320_v59, %v1902_v3  ;;  %v657_v49 = vmul.f32 %v2320_v59, %v1912_v7  ;;  %v2511_v0 = vld [vmem:[%s2855_s1] ss:$0 sm:$0xff]  ;;  %v2581_v18 = vld [vmem:[%s2855_s1 + $0x8] ss:$0 sm:$0xff] }
  0x82   : > { %v1726_v54 = vpop.eup %1725  ;;  %1729 = vpow2.f32 %v1589_v53  ;;  %v881_v4 = vadd.f32 %v840_v22, %v755_v15  ;;  %v426_v2 = vsel %vm398_vm0, %v424_v39, %v425_v52  ;;  %v2464_v28 = vmul.f32 %v2326_v63, %v1912_v7  ;;  %v2519_v39 = vld [vmem:[%s2855_s1 + $0x1] ss:$0 sm:$0xff] }
  0x83   : > { %v1728_v19 = vpop.eup %1727  ;;  %v1255_v34 = vadd.f32 1.0, %v1726_v54  ;;  %v465_v13 = vadd.f32 %v426_v2, %v322_v5  ;;  %v553_v3 = vsel %vm525_vm1, %v551_v61, %v552_v1  ;;  %v715_v6 = vrot.slane %v657_v49, 1  ;;  %v2535_v2 = vld [vmem:[%s2855_s1 + $0x3] ss:$0 sm:$0xff] }
  0x84   : > { %v2470_v55 = vmul.f32 %v1728_v19, %v2329_v20  ;;  %v919_v47 = vadd.f32 %v903_v56, %v881_v4  ;;  %v716_v43 = vrot.slane %v2464_v28, 1  ;;  %v783_v62 = vmul.f32 %v2320_v59, %v1923_v14  ;;  %v2542_v19 = vld [vmem:[%s2855_s1 + $0x4] ss:$0 sm:$0xff] }
  0x85   : > { %1731 = vrcp.f32 %v1255_v34  ;;  %v592_v7 = vadd.f32 %v553_v3, %v465_v13  ;;  %v2477_v17 = vmul.f32 %v2326_v63, %v1923_v14  ;;  %v904_v21 = vmul.f32 %v1938_v23, %v2424_v44 }
  0x86   : > { %v1623_v20 = vpack.c.bf16 %v2470_v55, %v2470_v55  ;;  %v1045_v56 = vadd.f32 %v1004_v12, %v919_v47  ;;  %v717_v25 = vsel %vm398_vm0, %v715_v6, %v716_v43  ;;  %v841_v31 = vrot.slane %v783_v62, 2  ;;  %v2549_v62 = vld [vmem:[%s2855_s1 + $0x5] ss:$0 sm:$0xff] }
  0x87   : > { %v630_v27 = vadd.f32 %v614_v41, %v592_v7  ;;  %v842_v16 = vrot.slane %v2477_v17, 2  ;;  %v947_v38 = vmul.f32 %v1943_v24, %v2424_v44  ;;  %v2490_v14 = vmul.f32 %v1943_v24, %v2429_v45  ;;  %v2526_v41 = vld [vmem:[%s2855_s1 + $0x2] ss:$0 sm:$0xff]  ;;  %v2556_v17 = vld [vmem:[%s2855_s1 + $0x6] ss:$0 sm:$0xff] }
  0x88   : > { %1383 = vst.msk [vmem:[%s2185_s22 + $0x18] sm:$0xf] %vm1376_vm2, %v1623_v20  ;;  %v1171_v23 = vadd.f32 %v1130_v8, %v1045_v56  ;;  %v1073_v29 = vmul.f32 %v1957_v33, %v2424_v44  ;;  %v2498_v22 = vmul.f32 %v1957_v33, %v2429_v45  ;;  %v2500_v58 = vunpack.c.l.bf16 %v269_v37  ;;  %v1656_v37 = vld [vmem:[%s1904_s12 + $0x60] sm:$0xff]  }
  0x89   : > { %v756_v10 = vadd.f32 %v717_v25, %v630_v27  ;;  %v843_v5 = vsel %vm525_vm1, %v841_v31, %v842_v16  ;;  %v1005_v48 = vrot.slane %v947_v38, 1  ;;  %v1006_v11 = vrot.slane %v2490_v14, 1 }
  0x8a   : > { %v2505_v24 = vadd.f32 %v2023_v46, %v1171_v23  ;;  %v1131_v12 = vrot.slane %v1073_v29, 2  ;;  %v1132_v8 = vrot.slane %v2498_v22, 2  ;;  %v323_v33 = vmul.f32 %v2511_v0, %v2217_v9  ;;  %v2574_v22 = vld [vmem:[%s2855_s1 + $0x7] ss:$0 sm:$0xff] }
  0x8b   : > { %v882_v53 = vadd.f32 %v843_v5, %v756_v10  ;;  %v1007_v15 = vsel %vm398_vm0, %v1005_v48, %v1006_v11  ;;  %v367_v61 = vmul.f32 %v2519_v39, %v2286_v40  ;;  %v494_v49 = vmul.f32 %v2526_v41, %v2286_v40 }
  0x8c   : > { %v1730_v9 = vpop.eup %1729  ;;  %v1590_v54 = vmul.f32 -1.442695, %v2505_v24  ;;  %v1133_v4 = vsel %vm525_vm1, %v1131_v12, %v1132_v8  ;;  %v615_v28 = vmul.f32 %v2535_v2, %v2326_v63  ;;  %v659_v40 = vmul.f32 %v2542_v19, %v2389_v42 }
  0x8d   : > { %v1256_v34 = vadd.f32 1.0, %v1730_v9  ;;  %v920_v13 = vadd.f32 %v904_v21, %v882_v53  ;;  %v427_v3 = vrot.slane %v367_v61, 1  ;;  %v554_v6 = vrot.slane %v494_v49, 2 }
  0x8e   : > { %1733 = vpow2.f32 %v1590_v54  ;;  %v718_v47 = vrot.slane %v659_v40, 1  ;;  %v785_v7 = vmul.f32 %v2549_v62, %v2389_v42  ;;  %v905_v21 = vmul.f32 %v2556_v17, %v2429_v45 }
  0x8f   : > { %v1732_v20 = vpop.eup %1731  ;;  %1735 = vrcp.f32 %v1256_v34  ;;  %v1046_v56 = vadd.f32 %v1007_v15, %v920_v13  ;;  %v428_v25 = vsel %vm398_vm0, %v425_v52, %v427_v3  ;;  %v555_v31 = vsel %vm525_vm1, %v552_v1, %v554_v6 }
  0x90   : > { %v2568_v27 = vmul.f32 %v1732_v20, %v2392_v35  ;;  %v466_v38 = vadd.f32 %v428_v25, %v323_v33  ;;  %v719_v14 = vsel %vm398_vm0, %v716_v43, %v718_v47  ;;  %v844_v23 = vrot.slane %v785_v7, 2 }
  0x91   : > { %v1172_v29 = vadd.f32 %v1133_v4, %v1046_v56  ;;  %v949_v50 = vmul.f32 %v2574_v22, %v2500_v58  ;;  %v1075_v35 = vmul.f32 %v2581_v18, %v2500_v58  ;;  %v2585_v52 = vunpack.c.l.bf16 %v1656_v37 }
  0x92   : > { %v1624_v1 = vpack.c.bf16 %v2568_v27, %v2568_v27  ;;  %v593_v43 = vadd.f32 %v555_v31, %v466_v38  ;;  %v845_v10 = vsel %vm525_vm1, %v842_v16, %v844_v23  ;;  %v2590_v5 = vunpack.c.h.bf16 %v1656_v37 }
  0x93   : > { %v2593_v48 = vadd.f32 %v2023_v46, %v1172_v29  ;;  %v1008_v12 = vrot.slane %v949_v50, 1  ;;  %v1134_v33 = vrot.slane %v1075_v35, 2  ;;  %v324_v53 = vmul.f32 %v2511_v0, %v2320_v59 }
  0x94   : > { %1384 = vst.msk [vmem:[%s2185_s22 + $0x1c] sm:$0xf] %vm1376_vm2, %v1624_v1  ;;  %v631_v15 = vadd.f32 %v615_v28, %v593_v43  ;;  %v368_v61 = vmul.f32 %v2519_v39, %v2320_v59  ;;  %v2603_v49 = vmul.f32 %v2519_v39, %v2326_v63  ;;  %v495_v16 = vmul.f32 %v2526_v41, %v2320_v59 }
  0x95   : > { %v1591_v46 = vmul.f32 -1.442695, %v2593_v48  ;;  %v1009_v9 = vsel %vm398_vm0, %v1006_v11, %v1008_v12  ;;  %v1135_v54 = vsel %vm525_vm1, %v1132_v8, %v1134_v33  ;;  %v2612_v4 = vmul.f32 %v2526_v41, %v2326_v63 }
  0x96   : > { %v757_v28 = vadd.f32 %v719_v14, %v631_v15  ;;  %v429_v40 = vrot.slane %v368_v61, 1  ;;  %v430_v34 = vrot.slane %v2603_v49, 1  ;;  %v556_v13 = vrot.slane %v495_v16, 2 }
  0x97   : > { %1737 = vpow2.f32 %v1591_v46  ;;  %v557_v3 = vrot.slane %v2612_v4, 2  ;;  %v616_v59 = vmul.f32 %v2535_v2, %v2424_v44  ;;  %v660_v11 = vmul.f32 %v2542_v19, %v2424_v44 }
  0x98   : > { %v1734_v6 = vpop.eup %1733  ;;  %v883_v8 = vadd.f32 %v845_v10, %v757_v28  ;;  %v431_v47 = vsel %vm398_vm0, %v429_v40, %v430_v34  ;;  %v2623_v7 = vmul.f32 %v2542_v19, %v2429_v45  ;;  %v786_v37 = vmul.f32 %v2549_v62, %v2424_v44  ;;  %v272_v10 = vld [vmem:[%s1904_s12 + $0x68] sm:$0x1] }
  0x99   : > { %v1736_v20 = vpop.eup %1735  ;;  %v1257_v56 = vadd.f32 1.0, %v1734_v6  ;;  %v467_v25 = vadd.f32 %v431_v47, %v324_v53  ;;  %v558_v31 = vsel %vm525_vm1, %v556_v13, %v557_v3  ;;  %v720_v38 = vrot.slane %v660_v11, 1  ;;  %v2661_v6 = vld [vmem:[%s2856_s2] ss:$0 sm:$0xff] }
  0x9a   : > { %v2631_v14 = vmul.f32 %v1736_v20, %v2436_v36  ;;  %v921_v23 = vadd.f32 %v905_v21, %v883_v8  ;;  %v721_v29 = vrot.slane %v2623_v7, 1  ;;  %v2636_v50 = vmul.f32 %v2549_v62, %v2429_v45 }
  0x9b   : > { %1739 = vrcp.f32 %v1257_v56  ;;  %v594_v35 = vadd.f32 %v558_v31, %v467_v25  ;;  %v846_v1 = vrot.slane %v786_v37, 2  ;;  %v906_v43 = vmul.f32 %v2556_v17, %v2585_v52 }
  0x9c   : > { %v1625_v12 = vpack.c.bf16 %v2631_v14, %v2631_v14  ;;  %v1047_v36 = vadd.f32 %v1009_v9, %v921_v23  ;;  %v722_v21 = vsel %vm398_vm0, %v720_v38, %v721_v29  ;;  %v847_v33 = vrot.slane %v2636_v50, 2 }
  0x9d   : > { %v632_v53 = vadd.f32 %v616_v59, %v594_v35  ;;  %v950_v15 = vmul.f32 %v2574_v22, %v2585_v52  ;;  %v951_v61 = vmul.f32 %v2574_v22, %v2590_v5  ;;  %v1076_v49 = vmul.f32 %v2581_v18, %v2585_v52 }
  0x9e   : > { %1385 = vst.msk [vmem:[%s2185_s22 + $0x20] sm:$0xf] %vm1376_vm2, %v1625_v12  ;;  %v1173_v16 = vadd.f32 %v1135_v54, %v1047_v36  ;;  %v848_v46 = vsel %vm525_vm1, %v846_v1, %v847_v33  ;;  %v1077_v9 = vmul.f32 %v2581_v18, %v2590_v5  ;;  %v2656_v28 = vunpack.c.l.bf16 %v272_v10 }
  0x9f   : > { %v758_v40 = vadd.f32 %v722_v21, %v632_v53  ;;  %v1010_v13 = vrot.slane %v950_v15, 1  ;;  %v1011_v59 = vrot.slane %v951_v61, 1  ;;  %v1136_v11 = vrot.slane %v1076_v49, 2  ;;  %v273_v53 = vld [vmem:[%s1904_s12 + $0x6c] sm:$0xff]  }
  0xa0   : > { %v2664_v8 = vadd.f32 %v2661_v6, %v1173_v16  ;;  %v1137_v54 = vrot.slane %v1077_v9, 2  ;;  %v325_v47 = vmul.f32 %v2511_v0, %v2326_v63  ;;  %v370_v7 = vmul.f32 %v2519_v39, %v2389_v42 }
  0xa1   : > { %v1738_v37 = vpop.eup %1737  ;;  %v884_v20 = vadd.f32 %v848_v46, %v758_v40  ;;  %v1012_v56 = vsel %vm398_vm0, %v1010_v13, %v1011_v59  ;;  %v497_v25 = vmul.f32 %v2526_v41, %v2389_v42  ;;  %v617_v31 = vmul.f32 %v2535_v2, %v2429_v45 }
  0xa2   : > { %v1258_v38 = vadd.f32 1.0, %v1738_v37  ;;  %v1592_v23 = vmul.f32 -1.442695, %v2664_v8  ;;  %v1138_v50 = vsel %vm525_vm1, %v1136_v11, %v1137_v54  ;;  %v432_v63 = vrot.slane %v370_v7, 1 }
  0xa3   : > { %v922_v35 = vadd.f32 %v906_v43, %v884_v20  ;;  %v559_v1 = vrot.slane %v497_v25, 2  ;;  %v662_v10 = vmul.f32 %v2542_v19, %v2500_v58  ;;  %v788_v12 = vmul.f32 %v2549_v62, %v2500_v58 }
  0xa4   : > { %1741 = vrcp.f32 %v1258_v38  ;;  %v433_v42 = vsel %vm398_vm0, %v430_v34, %v432_v63  ;;  %v907_v36 = vmul.f32 %v2556_v17, %v2590_v5  ;;  %v952_v21 = vmul.f32 %v2574_v22, %v2656_v28 }
  0xa5   : > { %v1740_v15 = vpop.eup %1739  ;;  %1743 = vpow2.f32 %v1592_v23  ;;  %v1048_v43 = vadd.f32 %v1012_v56, %v922_v35  ;;  %v468_v61 = vadd.f32 %v433_v42, %v325_v47  ;;  %v560_v49 = vsel %vm525_vm1, %v557_v3, %v559_v1 }
  0xa6   : > { %v2691_v16 = vmul.f32 %v1740_v15, %v2505_v24  ;;  %v723_v34 = vrot.slane %v662_v10, 1  ;;  %v849_v46 = vrot.slane %v788_v12, 2  ;;  %v1013_v9 = vrot.slane %v952_v21, 1 }
  0xa7   : > { %v1174_v40 = vadd.f32 %v1138_v50, %v1048_v43  ;;  %v595_v13 = vadd.f32 %v560_v49, %v468_v61  ;;  %v1078_v11 = vmul.f32 %v2581_v18, %v2656_v28  ;;  %v303_v7 = vunpack.c.l.bf16 %v273_v53 }
  0xa8   : > { %v1626_v47 = vpack.c.bf16 %v2691_v16, %v2691_v16  ;;  %v724_v4 = vsel %vm398_vm0, %v721_v29, %v723_v34  ;;  %v850_v3 = vsel %vm525_vm1, %v847_v33, %v849_v46  ;;  %v1014_v24 = vsel %vm398_vm0, %v1011_v59, %v1013_v9 }
  0xa9   : > { %v2701_v37 = vadd.f32 %v2661_v6, %v1174_v40  ;;  %v633_v20 = vadd.f32 %v617_v31, %v595_v13  ;;  %v1139_v56 = vrot.slane %v1078_v11, 2  ;;  %v2703_v25 = vunpack.c.h.bf16 %v273_v53 }
  0xaa   : > { %1386 = vst.msk [vmem:[%s2185_s22 + $0x24] sm:$0xf] %vm1376_vm2, %v1626_v47  ;;  %v326_v38 = vmul.f32 %v2511_v0, %v2424_v44  ;;  %v371_v23 = vmul.f32 %v2519_v39, %v2424_v44  ;;  %v2713_v29 = vmul.f32 %v2519_v39, %v2429_v45  ;;  %v498_v33 = vmul.f32 %v2526_v41, %v2424_v44 }
  0xab   : > { %v1593_v59 = vmul.f32 -1.442695, %v2701_v37  ;;  %v759_v31 = vadd.f32 %v724_v4, %v633_v20  ;;  %v1140_v50 = vsel %vm525_vm1, %v1137_v54, %v1139_v56  ;;  %v2721_v63 = vmul.f32 %v2526_v41, %v2429_v45 }
  0xac   : > { %v434_v35 = vrot.slane %v371_v23, 1  ;;  %v435_v1 = vrot.slane %v2713_v29, 1  ;;  %v561_v10 = vrot.slane %v498_v33, 2  ;;  %v618_v12 = vmul.f32 %v2535_v2, %v2585_v52 }
  0xad   : > { %1745 = vpow2.f32 %v1593_v59  ;;  %v885_v42 = vadd.f32 %v850_v3, %v759_v31  ;;  %v562_v44 = vrot.slane %v2721_v63, 2  ;;  %v663_v21 = vmul.f32 %v2542_v19, %v2585_v52  ;;  %v275_v63 = vld [vmem:[%s1904_s12 + $0x74] sm:$0x1] }
  0xae   : > { %v1742_v53 = vpop.eup %1741  ;;  %v436_v54 = vsel %vm398_vm0, %v434_v35, %v435_v1  ;;  %v2732_v15 = vmul.f32 %v2542_v19, %v2590_v5  ;;  %v789_v43 = vmul.f32 %v2549_v62, %v2585_v52  ;;  %v2738_v61 = vmul.f32 %v2549_v62, %v2590_v5 }
  0xaf   : > { %v1744_v49 = vpop.eup %1743  ;;  %v2741_v34 = vmul.f32 %v1742_v53, %v2593_v48  ;;  %v923_v46 = vadd.f32 %v907_v36, %v885_v42  ;;  %v469_v9 = vadd.f32 %v436_v54, %v326_v38  ;;  %v563_v40 = vsel %vm525_vm1, %v561_v10, %v562_v44 }
  0xb0   : > { %v1259_v13 = vadd.f32 1.0, %v1744_v49  ;;  %v725_v11 = vrot.slane %v663_v21, 1  ;;  %v726_v47 = vrot.slane %v2732_v15, 1  ;;  %v851_v4 = vrot.slane %v789_v43, 2 }
  0xb1   : > { %v1627_v52 = vpack.c.bf16 %v2741_v34, %v2741_v34  ;;  %v1049_v3 = vadd.f32 %v1014_v24, %v923_v46  ;;  %v596_v20 = vadd.f32 %v563_v40, %v469_v9  ;;  %v852_v56 = vrot.slane %v2738_v61, 2 }
  0xb2   : > { %1747 = vrcp.f32 %v1259_v13  ;;  %v727_v48 = vsel %vm398_vm0, %v725_v11, %v726_v47  ;;  %v953_v36 = vmul.f32 %v2574_v22, %v303_v7  ;;  %v954_v29 = vmul.f32 %v2574_v22, %v2703_v25 }
  0xb3   : > { %1387 = vst.msk [vmem:[%s2185_s22 + $0x28] sm:$0xf] %vm1376_vm2, %v1627_v52  ;;  %v1175_v38 = vadd.f32 %v1140_v50, %v1049_v3  ;;  %v634_v23 = vadd.f32 %v618_v12, %v596_v20  ;;  %v853_v33 = vsel %vm525_vm1, %v851_v4, %v852_v56  ;;  %v1079_v24 = vmul.f32 %v2581_v18, %v303_v7 }
  0xb4   : > { %v1015_v59 = vrot.slane %v953_v36, 1  ;;  %v1080_v31 = vmul.f32 %v2581_v18, %v2703_v25  ;;  %v908_v42 = vmul.f32 %v2556_v17, %v303_v7  ;;  %v1016_v50 = vrot.slane %v954_v29, 1 }
  0xb5   : > { %v2760_v35 = vadd.f32 %v2661_v6, %v1175_v38  ;;  %v760_v10 = vadd.f32 %v727_v48, %v634_v23  ;;  %v1141_v12 = vrot.slane %v1079_v24, 2  ;;  %v373_v53 = vmul.f32 %v2519_v39, %v2500_v58 }
  0xb6   : > { %v1142_v21 = vrot.slane %v1080_v31, 2  ;;  %v500_v54 = vmul.f32 %v2526_v41, %v2500_v58  ;;  %v305_v49 = vunpack.c.l.bf16 %v275_v63  ;;  %v327_v46 = vmul.f32 %v2511_v0, %v2429_v45 }
  0xb7   : > { %v1746_v15 = vpop.eup %1745  ;;  %v1594_v43 = vmul.f32 -1.442695, %v2760_v35  ;;  %v886_v61 = vadd.f32 %v853_v33, %v760_v10  ;;  %v1017_v7 = vsel %vm398_vm0, %v1015_v59, %v1016_v50  ;;  %v437_v40 = vrot.slane %v373_v53, 1 }
  0xb8   : > { %v1260_v9 = vadd.f32 1.0, %v1746_v15  ;;  %v564_v13 = vrot.slane %v500_v54, 2  ;;  %v665_v39 = vmul.f32 %v2542_v19, %v2656_v28  ;;  %v791_v58 = vmul.f32 %v2549_v62, %v2656_v28 }
  0xb9   : > { %1749 = vpow2.f32 %v1594_v43  ;;  %v924_v11 = vadd.f32 %v908_v42, %v886_v61  ;;  %v1143_v41 = vsel %vm525_vm1, %v1141_v12, %v1142_v21  ;;  %v438_v4 = vsel %vm398_vm0, %v435_v1, %v437_v40 }
  0xba   : > { %1751 = vrcp.f32 %v1260_v9  ;;  %v565_v45 = vsel %vm525_vm1, %v562_v44, %v564_v13  ;;  %v470_v52 = vadd.f32 %v438_v4, %v327_v46  ;;  %v619_v3 = vmul.f32 %v2535_v2, %v2590_v5 }
  0xbb   : > { %v1050_v0 = vadd.f32 %v1017_v7, %v924_v11  ;;  %v728_v20 = vrot.slane %v665_v39, 1  ;;  %v854_v36 = vrot.slane %v791_v58, 2  ;;  %v955_v19 = vmul.f32 %v2574_v22, %v305_v49 }
  0xbc   : > { %v1748_v48 = vpop.eup %1747  ;;  %v597_v38 = vadd.f32 %v565_v45, %v470_v52  ;;  %v1081_v44 = vmul.f32 %v2581_v18, %v305_v49  ;;  %v909_v59 = vmul.f32 %v2556_v17, %v2703_v25 }
  0xbd   : > { %v2782_v62 = vmul.f32 %v1748_v48, %v2664_v8  ;;  %v1176_v28 = vadd.f32 %v1143_v41, %v1050_v0  ;;  %v729_v1 = vsel %vm398_vm0, %v726_v47, %v728_v20  ;;  %v855_v5 = vsel %vm525_vm1, %v852_v56, %v854_v36 }
  0xbe   : > { %v635_v2 = vadd.f32 %v619_v3, %v597_v38  ;;  %v1018_v33 = vrot.slane %v955_v19, 1  ;;  %v1144_v47 = vrot.slane %v1081_v44, 2 }
  0xbf   : > { %v1628_v23 = vpack.c.bf16 %v2782_v62, %v2782_v62  ;;  %v1198_v29 = vadd.f32 %v2661_v6, %v1176_v28 }
  0xc0   : > { %v761_v8 = vadd.f32 %v729_v1, %v635_v2  ;;  %v1019_v10 = vsel %vm398_vm0, %v1016_v50, %v1018_v33  ;;  %v1145_v12 = vsel %vm525_vm1, %v1142_v21, %v1144_v47 }
  0xc1   : > { %1388 = vst.msk [vmem:[%s2185_s22 + $0x2c] sm:$0xf] %vm1376_vm2, %v1628_v23  ;;  %v1595_v22 = vmul.f32 -1.442695, %v1198_v29 }
  0xc2   : > { %v887_v18 = vadd.f32 %v855_v5, %v761_v8 }
  0xc3   : > { %v1750_v24 = vpop.eup %1749  ;;  %1753 = vpow2.f32 %v1595_v22 }
  0xc4   : > { %v1752_v31 = vpop.eup %1751  ;;  %v1261_v63 = vadd.f32 1.0, %v1750_v24  ;;  %v925_v56 = vadd.f32 %v909_v59, %v887_v18 }
  0xc5   : > { %v1308_v42 = vmul.f32 %v1752_v31, %v2701_v37 }
  0xc6   : > { %1755 = vrcp.f32 %v1261_v63  ;;  %v1051_v54 = vadd.f32 %v1019_v10, %v925_v56 }
  0xc7   : > { %v1629_v53 = vpack.c.bf16 %v1308_v42, %v1308_v42 }
  0xc8   : > { %v1177_v17 = vadd.f32 %v1145_v12, %v1051_v54 }
  0xc9   : > { %1389 = vst.msk [vmem:[%s2185_s22 + $0x30] sm:$0xf] %vm1376_vm2, %v1629_v53 }
  0xca   : > { %v1199_v25 = vadd.f32 %v2661_v6, %v1177_v17 }
  0xcc   : > { %v1596_v43 = vmul.f32 -1.442695, %v1199_v25 }
  0xcd   : > { %v1754_v15 = vpop.eup %1753 }
  0xce   : > { %v1262_v61 = vadd.f32 1.0, %v1754_v15  ;;  %1757 = vpow2.f32 %v1596_v43 }
  0xd0   : > { %v1756_v50 = vpop.eup %1755  ;;  %1759 = vrcp.f32 %v1262_v61 }
  0xd1   : > { %v1309_v37 = vmul.f32 %v1756_v50, %v2760_v35  ;;  %v1813_v35 = vmov (!%p1613_p7), 0.0  }
  0xd2   : > { %1398 = vst.msk [vmem:[%s1879_s26] sm:$0x1] (!%p1613_p7), %vm1397_vm3, %v1813_v35 }
  0xd3   : > { %v1630_v49 = vpack.c.bf16 %v1309_v37, %v1309_v37 }
  0xd5   : > { %1390 = vst.msk [vmem:[%s2185_s22 + $0x34] sm:$0xf] %vm1376_vm2, %v1630_v49 }
  0xd8   : > { %v1758_v21 = vpop.eup %1757 }
  0xd9   : > { %v1263_v9 = vadd.f32 1.0, %v1758_v21 }
  0xda   : > { %v1760_v46 = vpop.eup %1759 }
  0xdb   : > { %v1310_v7 = vmul.f32 %v1760_v46, %v1198_v29  ;;  %1761 = vrcp.f32 %v1263_v9 }
  0xdd   : > { %v1631_v40 = vpack.c.bf16 %v1310_v7, %v1310_v7 }
  0xdf   : > { %1391 = vst.msk [vmem:[%s2185_s22 + $0x38] sm:$0xf] %vm1376_vm2, %v1631_v40 }
  0xe4   : > { %1396 = sbr.rel (%p1613_p7) target bundleno = 235 (0xeb), region = 36 }
  0xe5   : > { %v1762_v6 = vpop.eup %1761 }
  0xe6   : > { %v1311_v13 = vmul.f32 %v1762_v6, %v1199_v25 }
  0xe8   : > { %v1632_v11 = vpack.c.bf16 %v1311_v13, %v1311_v13 }
  0xea   : > { %1392 = vst.msk [vmem:[%s2185_s22 + $0x3c] sm:$0xf] %vm1376_vm2, %v1632_v11 }
  0xeb PF: > { %vm1400_vm4 = vcmask 261120   ;;  %v1399_v47 = vld [vmem:[%s1879_s26] sm:$0x1]  ;;  %vm1439_vm5 = vcmask 253952  }
  0xec   : > { %v1401_v39 = vsel %vm1400_vm4, %v2174_v30, 0.0  ;;  %v1402_v58 = vsel %vm1400_vm4, %v2220_v32, 0.0  ;;  %v1404_v41 = vsel %vm1400_vm4, %v2264_v60, 0.0  ;;  %v1406_v45 = vsel %vm1400_vm4, %v2314_v26, 0.0 }
  0xed   : > { %v1403_v4 = vadd.f32 %v1402_v58, %v1401_v39  ;;  %v1408_v52 = vsel %vm1400_vm4, %v2366_v57, 0.0  ;;  %v1410_v20 = vsel %vm1400_vm4, %v2417_v51, 0.0  ;;  %v1412_v30 = vsel %vm1400_vm4, %v2470_v55, 0.0 }
  0xee   : > { %v1414_v60 = vsel %vm1400_vm4, %v2568_v27, 0.0  ;;  %v1416_v26 = vsel %vm1400_vm4, %v2631_v14, 0.0  ;;  %v1418_v57 = vsel %vm1400_vm4, %v2691_v16, 0.0  ;;  %v1420_v51 = vsel %vm1400_vm4, %v2741_v34, 0.0 }
  0xef   : > { %v1405_v0 = vadd.f32 %v1404_v41, %v1403_v4  ;;  %v1422_v55 = vsel %vm1400_vm4, %v2782_v62, 0.0  ;;  %v1424_v27 = vsel %vm1400_vm4, %v1308_v42, 0.0  ;;  %v1426_v23 = vsel %vm1400_vm4, %v1309_v37, 0.0 }
  0xf0   : > { %v1428_v29 = vsel %vm1400_vm4, %v1310_v7, 0.0  ;;  %v1430_v2 = vsel %vm1400_vm4, %v1311_v13, 0.0 }
  0xf1   : > { %v1407_v3 = vadd.f32 %v1406_v45, %v1405_v0 }
  0xf3   : > { %v1409_v48 = vadd.f32 %v1408_v52, %v1407_v3 }
  0xf5   : > { %v1411_v32 = vadd.f32 %v1410_v20, %v1409_v48 }
  0xf7   : > { %v1413_v36 = vadd.f32 %v1412_v30, %v1411_v32 }
  0xf9   : > { %v1415_v19 = vadd.f32 %v1414_v60, %v1413_v36 }
  0xfb   : > { %v1417_v28 = vadd.f32 %v1416_v26, %v1415_v19 }
  0xfd   : > { %v1419_v38 = vadd.f32 %v1418_v57, %v1417_v28 }
  0xff   : > { %v1421_v1 = vadd.f32 %v1420_v51, %v1419_v38 }
 0x101   : > { %v1423_v44 = vadd.f32 %v1422_v55, %v1421_v1 }
 0x103   : > { %v1425_v14 = vadd.f32 %v1424_v27, %v1423_v44 }
 0x105   : > { %v1427_v16 = vadd.f32 %v1426_v23, %v1425_v14 }
 0x107   : > { %v1429_v5 = vadd.f32 %v1428_v29, %v1427_v16 }
 0x109   : > { %v1431_v34 = vadd.f32 %v1430_v2, %v1429_v5 }
 0x10b   : > { %v1432_v33 = vrot.slane %v1431_v34, 4 }
 0x10d   : > { %v1433_v22 = vadd.f32 %v1432_v33, %v1431_v34 }
 0x10f   : > { %v1434_v8 = vrot.slane %v1433_v22, 2 }
 0x111   : > { %v1435_v62 = vadd.f32 %v1434_v8, %v1433_v22 }
 0x113   : > { %v1436_v59 = vrot.slane %v1435_v62, 1 }
 0x115   : > { %v1437_v24 = vadd.f32 %v1436_v59, %v1435_v62 }
 0x117   : > { %v1438_v18 = vadd.f32 %v1437_v24, %v1399_v47 }
 0x119   : > { %1440 = vst.msk [vmem:[%s1879_s26] sm:$0x1] %vm1439_vm5, %v1438_v18 }
 0x11a PF: > { %s15_s19 = sadd.s32 1, %s1811_s19   ;;  %s2860_s15 = smov %s1803_s17 }
 0x11b   : > { %p12_p8 = scmp.ge.s32.totalorder %s15_s19, 6   ;;  %s2861_s16 = smov %s1807_s18 }
 0x11c   : > { %s2862_s17 = smov %s2865_s20  ;;  %s2863_s18 = smov %s2869_s21 }
 0x11d   :  { %14 = sbr.rel (!%p12_p8) target bundleno = 3 (0x3), region = 79 }

// kernel: forward.16
= control target key start
LH: loop header
LB: loop body
LE: loop exit
PB: predicated region body
PF: predicated region fallthrough
CT: control target
= control target key end

     0   :  { %s1460_s27 = smov 0   ;;  %s1462_s28 = smov 0   ;;  %s1695_s0 = inlined_call_operand.vmem [shape: bf16[2,256,32], index: 0, kind: input, shape index: {}]   ;;  %s1696_s1 = inlined_call_operand.vmem [shape: f32[2,1,32], index: 1, kind: input, shape index: {}]   ;;  %s1697_s2 = inlined_call_operand.vmem [shape: bf16[32,8], index: 2, kind: input, shape index: {}]   ;;  %s1698_s3 = inlined_call_operand.vmem [shape: f32[1,8], index: 3, kind: input, shape index: {}]   ;;  %s1699_s4 = inlined_call_operand.vmem [shape: bf16[8,32], index: 4, kind: input, shape index: {}]   ;;  %s1700_s5 = inlined_call_operand.vmem [shape: f32[1,32], index: 5, kind: input, shape index: {}]   ;;  %s1701_s6 = inlined_call_operand.vmem [shape: bf16[32,16], index: 6, kind: input, shape index: {}]   ;;  %s1702_s7 = inlined_call_operand.vmem [shape: f32[1,16], index: 7, kind: input, shape index: {}]   ;;  %s1703_s8 = inlined_call_operand.vmem [shape: bf16[2,256,16], index: 8, kind: output, shape index: {}]  }
   0x1   :  { %s1464_s29 = smov 0  }
   0x2 LB: > { %s30_s30 = sadd.s32 1, %s1407_s28  ;;  %p1097_p0 = scmp.ge.s32.totalorder %s1411_s29, 1  ;;  %s1411_s29 = sphi %s1464_s29, %s18_s29   ;;  %s1407_s28 = sphi %s1462_s28, %s1705_s28   ;;  %s1403_s27 = sphi %s1460_s27, %s1704_s27  }
   0x3   : > { %p32_p1 = scmp.ge.s32.totalorder %s30_s30, 2  ;;  %p291_p2 = scmp.lt.s32.totalorder %s1411_s29, 3 }
   0x5   : > { %s1707_s30 = smov (%p32_p1, %s30_s30), 0  ;;  %p292_p3 = pnand %p1097_p0, %p291_p2 }
   0x6   : > { %v1377_v0 = vld [vmem:[%s1697_s2] sm:$0xff] (!%p292_p3)   ;;  %v1413_v1 = vmov (!%p292_p3), 0.0   ;;  %v1378_v2 = vld [vmem:[%s1697_s2 + $0x8] sm:$0xff] (!%p292_p3)   ;;  %vm1414_vm0 = vmmov (!%p292_p3), 0   ;;  %p337_p4 = scmp.lt.s32.totalorder (!%p292_p3), %s1403_s27, 1  ;;  %vm380_vm1 = vcmask (!%p292_p3), 261120   ;;  %v552_v30 = vlaneseq (!%p292_p3) }
   0x7   : > { %295 = sbr.rel (%p292_p3) target bundleno = 764 (0x2fc), region = 52  ;;  %1297 = vmatprep.subr.bf16.mxu0 (!%p292_p3), %v1413_v1  ;;  %1301 = vmatprep.mubr.msk.bf16.mxu0 (!%p292_p3), %vm1414_vm0, %v1413_v1  ;;  %v432_v6 = vld [vmem:[%s1699_s4] sm:$0xf] (!%p292_p3)  ;;  %vm438_vm2 = vcmask (!%p292_p3), 1043456   ;;  %vm434_vm3 = vcmask (!%p292_p3), 64512   ;;  %v1380_v21 = vld [vmem:[%s1701_s6 + $0x8] sm:$0xff] (!%p292_p3)  }
   0x8   : > { %1298 = vmatpush3.bf16.msra.mxu0 (!%p292_p3), %v1377_v0  ;;  %v440_v7 = vsel (!%p292_p3), %vm438_vm2, %v432_v6, 0  ;;  %v367_v8 = vld [vmem:[%s1698_s3] sm:$0x1] (!%p292_p3)  ;;  %v553_v32 = vshrl.u32 (!%p292_p3), %v552_v30, 7  ;;  %vm964_vm4 = vcmask (!%p292_p3), 125952  }
   0x9   : > { %1299 = vmatprep.subr.bf16.mxu0 (!%p292_p3), %v1413_v1  ;;  %v1379_v20 = vld [vmem:[%s1701_s6] sm:$0xff] (!%p292_p3)  }
   0xa   : > { %1347 = vmatprep.subr.bf16.mxu1 (!%p292_p3), %v1379_v20  ;;  %v433_v22 = vld [vmem:[%s1700_s5] sm:$0x1] (!%p292_p3)  ;;  %v554_v39 = vsub.s32 (!%p292_p3), 0, %v553_v32 }
   0xb   : > { %1349 = vmatpush3.bf16.msra.mxu1 (!%p292_p3), %v1379_v20 }
   0xc   : > { %1300 = vmatpush3.bf16.msra.mxu0 (!%p292_p3), %v1378_v2  ;;  %1348 = vmatprep.subr.bf16.mxu1 (!%p292_p3), %v1380_v21 }
   0xd   : > { %1305 = vmatprep.subr.bf16.mxu0 (!%p292_p3), %v1413_v1 }
   0xe   : > { %s1709_s27 = smov (!%p337_p4, %s1403_s27), 1 }
   0xf   : > { %s348_s15 = scalar_lea.vmem %s1696_s1, %s1709_s27  ;;  %1350 = vmatpush3.bf16.msra.mxu1 %v1380_v21  ;;  %s1161_s26 = sshll.u32 %s1709_s27, 7 }
  0x10   : > { %v360_v3 = vld [vmem:[%s348_s15] sm:$0x1]  ;;  %s1512_s11 = scalar_lea.vmem %s1695_s0, %s1161_s26  ;;  %s1590_s16 = scalar_lea.vmem %s1703_s8, %s1161_s26 }
  0x11   : > { %v361_v4 = vmul.f32 0.00390625, %v360_v3  ;;  %v1196_v33 = vld [vmem:[%s1512_s11] sm:$0xff]   ;;  %v1264_v34 = vld [vmem:[%s1512_s11 + $0x30] sm:$0xff]   ;;  %v1259_v35 = vld [vmem:[%s1512_s11 + $0x8] sm:$0xff]  }
  0x12   : > { %v1265_v36 = vld [vmem:[%s1512_s11 + $0x38] sm:$0xff]   ;;  %v1260_v37 = vld [vmem:[%s1512_s11 + $0x10] sm:$0xff]   ;;  %v1266_v38 = vld [vmem:[%s1512_s11 + $0x40] sm:$0xff]   ;;  %v1197_v40 = vunpack.c.l.bf16 %v1196_v33  ;;  %v1198_v41 = vunpack.c.h.bf16 %v1196_v33  ;;  %v1221_v42 = vunpack.c.l.bf16 %v1264_v34  ;;  %v1222_v45 = vunpack.c.h.bf16 %v1264_v34 }
  0x13   : > { %v362_v5 = vpack.c.bf16 %v361_v4, %v361_v4  ;;  %v1261_v43 = vld [vmem:[%s1512_s11 + $0x18] sm:$0xff]   ;;  %v1522_v44 = vld [vmem:[%s1512_s11 + $0x48] sm:$0xff]   ;;  %v1201_v46 = vunpack.c.l.bf16 %v1259_v35  ;;  %v1202_v47 = vunpack.c.h.bf16 %v1259_v35  ;;  %v1225_v48 = vunpack.c.l.bf16 %v1265_v36  ;;  %v1525_v49 = vld [vmem:[%s1512_s11 + $0x20] sm:$0xff]  }
  0x14   : > { %v1528_v50 = vld [vmem:[%s1512_s11 + $0x50] sm:$0xff]   ;;  %v1226_v51 = vunpack.c.h.bf16 %v1265_v36  ;;  %v1205_v52 = vunpack.c.l.bf16 %v1260_v37  ;;  %v1206_v53 = vunpack.c.h.bf16 %v1260_v37  ;;  %v1229_v54 = vunpack.c.l.bf16 %v1266_v38  ;;  %v1531_v55 = vld [vmem:[%s1512_s11 + $0x28] sm:$0xff]   ;;  %v1534_v56 = vld [vmem:[%s1512_s11 + $0x58] sm:$0xff]  }
  0x15   : > { %1302 = vmatmul.mubr.msk.bf16.vlgmr.msra.gmra.mrb[0].mxu0 %vm380_vm1, %v362_v5  ;;  %v1230_v57 = vunpack.c.h.bf16 %v1266_v38  ;;  %v1209_v58 = vunpack.c.l.bf16 %v1261_v43  ;;  %v1210_v59 = vunpack.c.h.bf16 %v1261_v43  ;;  %v1233_v60 = vunpack.c.l.bf16 %v1522_v44  ;;  %v1538_v61 = vld [vmem:[%s1512_s11 + $0x60] sm:$0xff]   ;;  %v1545_v2 = vld [vmem:[%s1512_s11 + $0x68] sm:$0xff]   ;;  %v1548_v3 = vld [vmem:[%s1512_s11 + $0x70] sm:$0xff]  }
  0x16   : > { %1307 = vmatprep.mubr.msk.bf16.mxu0 %vm1414_vm0, %v1413_v1  ;;  %1306 = vmatpush3.bf16.msra.mxu0 %v440_v7  ;;  %v1234_v62 = vunpack.c.h.bf16 %v1522_v44  ;;  %v1213_v63 = vunpack.c.l.bf16 %v1525_v49  ;;  %v1214_v0 = vunpack.c.h.bf16 %v1525_v49  ;;  %v1237_v1 = vunpack.c.l.bf16 %v1528_v50 }
  0x17   : > { %1311 = vmatprep.subr.bf16.mxu0 %v1379_v20  ;;  %v1238_v5 = vunpack.c.h.bf16 %v1528_v50  ;;  %v1217_v6 = vunpack.c.l.bf16 %v1531_v55  ;;  %v1218_v7 = vunpack.c.h.bf16 %v1531_v55 }
  0xe8   : > { %v418_v9 = vpop.f32.mrb[0].mxu0 }
  0xe9   : > { %v419_v10 = vadd.f32 %v418_v9, %v367_v8  ;;  %v1303_v11 = vpop.f32.mrb[1].mxu0  ;;  %v1241_v8 = vunpack.c.l.bf16 %v1534_v56 }
  0xea   : > { %v421_v12 = vpop.f32.mrb[2].mxu0  ;;  %v1245_v11 = vunpack.c.l.bf16 %v1538_v61 }
  0xeb   : > { %v1105_v13 = vmul.f32 -1.442695, %v419_v10  ;;  %v1304_v14 = vpop.f32.mrb[3].mxu0  ;;  %v1246_v12 = vunpack.c.h.bf16 %v1538_v61 }
  0xec   : > { %v1250_v14 = vunpack.c.h.bf16 %v1545_v2 }
  0xed   : > { %1381 = vpow2.f32 %v1105_v13  ;;  %v1249_v13 = vunpack.c.l.bf16 %v1545_v2 }
  0xf7   : > { %v1382_v15 = vpop.eup %1381 }
  0xf8   : > { %v427_v16 = vadd.f32 1.0, %v1382_v15  ;;  %v1253_v15 = vunpack.c.l.bf16 %v1548_v3 }
  0xfa   : > { %1383 = vrcp.f32 %v427_v16  ;;  %v1254_v16 = vunpack.c.h.bf16 %v1548_v3 }
 0x104   : > { %v1384_v17 = vpop.eup %1383 }
 0x105   : > { %v430_v18 = vmul.f32 %v1384_v17, %v419_v10  ;;  %v1242_v10 = vunpack.c.h.bf16 %v1534_v56 }
 0x107   : > { %v431_v19 = vpack.c.bf16 %v430_v18, %v430_v18 }
 0x109   : > { %1308 = vmatmul.mubr.msk.bf16.vlgmr.msra.gmra.mrb[4].mxu0 %vm434_vm3, %v431_v19 }
 0x10a   : > { %1312 = vmatpush3.bf16.msra.mxu0 %v1379_v20 }
 0x10b   : > { %1313 = vmatprep.subr.bf16.mxu0 %v1380_v21 }
 0x10e   : > { %1314 = vmatpush3.bf16.msra.mxu0 %v1380_v21 }
 0x1dc   : > { %v476_v23 = vpop.f32.mrb[4].mxu0 }
 0x1dd   : > { %v477_v24 = vadd.f32 %v476_v23, %v433_v22  ;;  %v1309_v25 = vpop.f32.mrb[5].mxu0 }
 0x1de   : > { %v479_v26 = vpop.f32.mrb[6].mxu0  ;;  %v1273_v25 = vld [vmem:[%s1512_s11 + $0x78] sm:$0xff]  }
 0x1df   : > { %v1107_v27 = vmul.f32 -1.442695, %v477_v24  ;;  %v1310_v28 = vpop.f32.mrb[7].mxu0  ;;  %v1257_v37 = vunpack.c.l.bf16 %v1273_v25 }
 0x1e1   : > { %1385 = vpow2.f32 %v1107_v27 }
 0x1eb   : > { %v1386_v29 = vpop.eup %1385 }
 0x1ec   : > { %v485_v31 = vadd.f32 1.0, %v1386_v29 }
 0x1ee   : > { %1387 = vrcp.f32 %v485_v31 }
 0x1f8   : > { %v1388_v4 = vpop.eup %1387 }
 0x1f9   : > { %v555_v9 = vrot.slane %v1388_v4, %v554_v39  ;;  %v1581_v4 = vld [vmem:[%s1702_s7] ss:$0 sm:$0xff] }
 0x1fb   : > { %v556_v17 = vmul.f32 %v1197_v40, %v555_v9  ;;  %v557_v18 = vmul.f32 %v1198_v41, %v555_v9  ;;  %v568_v19 = vmul.f32 %v1221_v42, %v555_v9  ;;  %v569_v20 = vmul.f32 %v1222_v45, %v555_v9 }
 0x1fc   : > { %v558_v21 = vmul.f32 %v1201_v46, %v555_v9  ;;  %v559_v22 = vmul.f32 %v1202_v47, %v555_v9  ;;  %v570_v23 = vmul.f32 %v1225_v48, %v555_v9  ;;  %v571_v24 = vmul.f32 %v1226_v51, %v555_v9 }
 0x1fd   : > { %v588_v26 = vpack.c.bf16 %v557_v18, %v556_v17  ;;  %v594_v27 = vpack.c.bf16 %v569_v20, %v568_v19  ;;  %v560_v28 = vmul.f32 %v1205_v52, %v555_v9  ;;  %v561_v29 = vmul.f32 %v1206_v53, %v555_v9 }
 0x1fe   : > { %v589_v30 = vpack.c.bf16 %v559_v22, %v558_v21  ;;  %v595_v31 = vpack.c.bf16 %v571_v24, %v570_v23  ;;  %v572_v32 = vmul.f32 %v1229_v54, %v555_v9  ;;  %v573_v33 = vmul.f32 %v1230_v57, %v555_v9 }
 0x1ff   : > { %1315 = vmatprep.mubr.msk.bf16.mxu0 %vm380_vm1, %v588_v26  ;;  %1327 = vmatprep.mubr.msk.bf16.mxu1 %vm380_vm1, %v594_v27  ;;  %v590_v34 = vpack.c.bf16 %v561_v29, %v560_v28  ;;  %v562_v35 = vmul.f32 %v1209_v58, %v555_v9  ;;  %v563_v36 = vmul.f32 %v1210_v59, %v555_v9  ;;  %v1258_v41 = vunpack.c.h.bf16 %v1273_v25 }
 0x200   : > { %1316 = vmatmul.mubr.msk.bf16.vlgmr.msra.gmra.mrb[8].mxu0 %vm380_vm1, %v589_v30  ;;  %1328 = vmatmul.mubr.msk.bf16.vlgmr.msra.gmra.mrb[0].mxu1 %vm380_vm1, %v595_v31  ;;  %v596_v38 = vpack.c.bf16 %v573_v33, %v572_v32  ;;  %v574_v39 = vmul.f32 %v1233_v60, %v555_v9  ;;  %v575_v40 = vmul.f32 %v1234_v62, %v555_v9 }
 0x201   : > { %1319 = vmatprep.mubr.msk.bf16.mxu0 %vm380_vm1, %v590_v34  ;;  %v591_v42 = vpack.c.bf16 %v563_v36, %v562_v35  ;;  %v564_v43 = vmul.f32 %v1213_v63, %v555_v9  ;;  %v565_v44 = vmul.f32 %v1214_v0, %v555_v9  ;;  %v576_v45 = vmul.f32 %v1237_v1, %v555_v9 }
 0x202   : > { %1331 = vmatprep.mubr.msk.bf16.mxu1 %vm380_vm1, %v596_v38  ;;  %v597_v46 = vpack.c.bf16 %v575_v40, %v574_v39  ;;  %v577_v47 = vmul.f32 %v1238_v5, %v555_v9  ;;  %v566_v48 = vmul.f32 %v1217_v6, %v555_v9  ;;  %v567_v49 = vmul.f32 %v1218_v7, %v555_v9 }
 0x203   : > { %v592_v50 = vpack.c.bf16 %v565_v44, %v564_v43  ;;  %v578_v51 = vmul.f32 %v1241_v8, %v555_v9  ;;  %v579_v52 = vmul.f32 %v1242_v10, %v555_v9  ;;  %v580_v53 = vmul.f32 %v1245_v11, %v555_v9 }
 0x204   : > { %v598_v54 = vpack.c.bf16 %v577_v47, %v576_v45  ;;  %v593_v55 = vpack.c.bf16 %v567_v49, %v566_v48  ;;  %v581_v56 = vmul.f32 %v1246_v12, %v555_v9  ;;  %v582_v57 = vmul.f32 %v1249_v13, %v555_v9 }
 0x205   : > { %v599_v58 = vpack.c.bf16 %v579_v52, %v578_v51  ;;  %v583_v59 = vmul.f32 %v1250_v14, %v555_v9  ;;  %v584_v60 = vmul.f32 %v1253_v15, %v555_v9  ;;  %v585_v61 = vmul.f32 %v1254_v16, %v555_v9 }
 0x206   : > { %v600_v62 = vpack.c.bf16 %v581_v56, %v580_v53  ;;  %v586_v63 = vmul.f32 %v1257_v37, %v555_v9  ;;  %v587_v0 = vmul.f32 %v1258_v41, %v555_v9 }
 0x207   : > { %v601_v1 = vpack.c.bf16 %v583_v59, %v582_v57  ;;  %v602_v2 = vpack.c.bf16 %v585_v61, %v584_v60 }
 0x208   : > { %1320 = vmatmul.mubr.msk.bf16.gmra.mrb[12].mxu0 %vm380_vm1, %v591_v42  ;;  %1332 = vmatmul.mubr.msk.bf16.gmra.mrb[4].mxu1 %vm380_vm1, %v597_v46  ;;  %v603_v3 = vpack.c.bf16 %v587_v0, %v586_v63 }
 0x209   : > { %1323 = vmatprep.mubr.msk.bf16.mxu0 %vm380_vm1, %v592_v50  ;;  %1335 = vmatprep.mubr.msk.bf16.mxu1 %vm380_vm1, %v598_v54 }
 0x210   : > { %1324 = vmatmul.mubr.msk.bf16.gmra.mrb[16].mxu0 %vm380_vm1, %v593_v55  ;;  %1336 = vmatmul.mubr.msk.bf16.gmra.mrb[8].mxu1 %vm380_vm1, %v599_v58 }
 0x211   : > { %1339 = vmatprep.mubr.msk.bf16.mxu1 %vm380_vm1, %v600_v62 }
 0x218   : > { %1340 = vmatmul.mubr.msk.bf16.gmra.mrb[12].mxu1 %vm380_vm1, %v601_v1 }
 0x219   : > { %1343 = vmatprep.mubr.msk.bf16.mxu1 %vm380_vm1, %v602_v2 }
 0x220   : > { %1344 = vmatmul.mubr.msk.bf16.gmra.mrb[16].mxu1 %vm380_vm1, %v603_v3 }
 0x2d3   : > { %v1317_v5 = vpop.f32.mrb[8].mxu0  ;;  %v1329_v6 = vpop.f32.mrb[0].mxu1 }
 0x2d4   : > { %v718_v7 = vadd.f32 %v1317_v5, %v1581_v4  ;;  %v766_v8 = vadd.f32 %v1329_v6, %v1581_v4  ;;  %v709_v9 = vpop.f32.mrb[9].mxu0  ;;  %v757_v10 = vpop.f32.mrb[1].mxu1 }
 0x2d5   : > { %v710_v11 = vadd.f32 %v1581_v4, %v709_v9  ;;  %v758_v12 = vadd.f32 %v1581_v4, %v757_v10  ;;  %v1318_v13 = vpop.f32.mrb[10].mxu0  ;;  %v1330_v14 = vpop.f32.mrb[2].mxu1 }
 0x2d6   : > { %v1165_v15 = vpack.c.bf16 %v718_v7, %v718_v7  ;;  %v1177_v16 = vpack.c.bf16 %v766_v8, %v766_v8  ;;  %v721_v17 = vadd.f32 %v1318_v13, %v1581_v4  ;;  %v769_v18 = vadd.f32 %v1330_v14, %v1581_v4  ;;  %v712_v19 = vpop.f32.mrb[11].mxu0  ;;  %v760_v20 = vpop.f32.mrb[3].mxu1 }
 0x2d7   : > { %v1163_v21 = vpack.c.bf16 %v710_v11, %v710_v11  ;;  %v1175_v22 = vpack.c.bf16 %v758_v12, %v758_v12  ;;  %v713_v23 = vadd.f32 %v1581_v4, %v712_v19  ;;  %v761_v24 = vadd.f32 %v1581_v4, %v760_v20 }
 0x2d8   : > { %967 = vst.msk [vmem:[%s1590_s16 + $0x8] sm:$0xf] %vm964_vm4, %v1165_v15  ;;  %979 = vst.msk [vmem:[%s1590_s16 + $0x38] sm:$0xf] %vm964_vm4, %v1177_v16  ;;  %v1166_v25 = vpack.c.bf16 %v721_v17, %v721_v17  ;;  %v1178_v26 = vpack.c.bf16 %v769_v18, %v769_v18 }
 0x2d9   : > { %965 = vst.msk [vmem:[%s1590_s16] sm:$0xf] %vm964_vm4, %v1163_v21  ;;  %977 = vst.msk [vmem:[%s1590_s16 + $0x30] sm:$0xf] %vm964_vm4, %v1175_v22  ;;  %v1164_v27 = vpack.c.bf16 %v713_v23, %v713_v23  ;;  %v1176_v28 = vpack.c.bf16 %v761_v24, %v761_v24 }
 0x2da   : > { %968 = vst.msk [vmem:[%s1590_s16 + $0xc] sm:$0xf] %vm964_vm4, %v1166_v25  ;;  %980 = vst.msk [vmem:[%s1590_s16 + $0x3c] sm:$0xf] %vm964_vm4, %v1178_v26 }
 0x2db   : > { %966 = vst.msk [vmem:[%s1590_s16 + $0x4] sm:$0xf] %vm964_vm4, %v1164_v27  ;;  %978 = vst.msk [vmem:[%s1590_s16 + $0x34] sm:$0xf] %vm964_vm4, %v1176_v28  ;;  %v1321_v29 = vpop.f32.mrb[12].mxu0  ;;  %v1333_v30 = vpop.f32.mrb[4].mxu1 }
 0x2dc   : > { %v734_v31 = vadd.f32 %v1321_v29, %v1581_v4  ;;  %v782_v32 = vadd.f32 %v1333_v30, %v1581_v4  ;;  %v725_v33 = vpop.f32.mrb[13].mxu0  ;;  %v773_v34 = vpop.f32.mrb[5].mxu1 }
 0x2dd   : > { %v726_v35 = vadd.f32 %v1581_v4, %v725_v33  ;;  %v774_v36 = vadd.f32 %v1581_v4, %v773_v34  ;;  %v1322_v37 = vpop.f32.mrb[14].mxu0  ;;  %v1334_v38 = vpop.f32.mrb[6].mxu1 }
 0x2de   : > { %v1169_v39 = vpack.c.bf16 %v734_v31, %v734_v31  ;;  %v1181_v40 = vpack.c.bf16 %v782_v32, %v782_v32  ;;  %v737_v41 = vadd.f32 %v1322_v37, %v1581_v4  ;;  %v785_v42 = vadd.f32 %v1334_v38, %v1581_v4  ;;  %v728_v43 = vpop.f32.mrb[15].mxu0  ;;  %v776_v44 = vpop.f32.mrb[7].mxu1 }
 0x2df   : > { %v1167_v45 = vpack.c.bf16 %v726_v35, %v726_v35  ;;  %v1179_v46 = vpack.c.bf16 %v774_v36, %v774_v36  ;;  %v729_v47 = vadd.f32 %v1581_v4, %v728_v43  ;;  %v777_v48 = vadd.f32 %v1581_v4, %v776_v44 }
 0x2e0   : > { %971 = vst.msk [vmem:[%s1590_s16 + $0x18] sm:$0xf] %vm964_vm4, %v1169_v39  ;;  %983 = vst.msk [vmem:[%s1590_s16 + $0x48] sm:$0xf] %vm964_vm4, %v1181_v40  ;;  %v1170_v49 = vpack.c.bf16 %v737_v41, %v737_v41  ;;  %v1182_v50 = vpack.c.bf16 %v785_v42, %v785_v42 }
 0x2e1   : > { %969 = vst.msk [vmem:[%s1590_s16 + $0x10] sm:$0xf] %vm964_vm4, %v1167_v45  ;;  %981 = vst.msk [vmem:[%s1590_s16 + $0x40] sm:$0xf] %vm964_vm4, %v1179_v46  ;;  %v1168_v51 = vpack.c.bf16 %v729_v47, %v729_v47  ;;  %v1180_v52 = vpack.c.bf16 %v777_v48, %v777_v48 }
 0x2e2   : > { %972 = vst.msk [vmem:[%s1590_s16 + $0x1c] sm:$0xf] %vm964_vm4, %v1170_v49  ;;  %984 = vst.msk [vmem:[%s1590_s16 + $0x4c] sm:$0xf] %vm964_vm4, %v1182_v50 }
 0x2e3   : > { %970 = vst.msk [vmem:[%s1590_s16 + $0x14] sm:$0xf] %vm964_vm4, %v1168_v51  ;;  %982 = vst.msk [vmem:[%s1590_s16 + $0x44] sm:$0xf] %vm964_vm4, %v1180_v52  ;;  %v1325_v53 = vpop.f32.mrb[16].mxu0  ;;  %v1337_v54 = vpop.f32.mrb[8].mxu1 }
 0x2e4   : > { %v750_v55 = vadd.f32 %v1325_v53, %v1581_v4  ;;  %v798_v56 = vadd.f32 %v1337_v54, %v1581_v4  ;;  %v741_v57 = vpop.f32.mrb[17].mxu0  ;;  %v789_v58 = vpop.f32.mrb[9].mxu1 }
 0x2e5   : > { %v742_v59 = vadd.f32 %v1581_v4, %v741_v57  ;;  %v790_v60 = vadd.f32 %v1581_v4, %v789_v58  ;;  %v1326_v61 = vpop.f32.mrb[18].mxu0  ;;  %v1338_v62 = vpop.f32.mrb[10].mxu1 }
 0x2e6   : > { %v1173_v63 = vpack.c.bf16 %v750_v55, %v750_v55  ;;  %v1185_v0 = vpack.c.bf16 %v798_v56, %v798_v56  ;;  %v753_v1 = vadd.f32 %v1326_v61, %v1581_v4  ;;  %v801_v2 = vadd.f32 %v1338_v62, %v1581_v4  ;;  %v744_v3 = vpop.f32.mrb[19].mxu0  ;;  %v792_v5 = vpop.f32.mrb[11].mxu1 }
 0x2e7   : > { %v1171_v6 = vpack.c.bf16 %v742_v59, %v742_v59  ;;  %v1183_v7 = vpack.c.bf16 %v790_v60, %v790_v60  ;;  %v745_v8 = vadd.f32 %v1581_v4, %v744_v3  ;;  %v793_v9 = vadd.f32 %v1581_v4, %v792_v5 }
 0x2e8   : > { %975 = vst.msk [vmem:[%s1590_s16 + $0x28] sm:$0xf] %vm964_vm4, %v1173_v63  ;;  %987 = vst.msk [vmem:[%s1590_s16 + $0x58] sm:$0xf] %vm964_vm4, %v1185_v0  ;;  %v1174_v10 = vpack.c.bf16 %v753_v1, %v753_v1  ;;  %v1186_v11 = vpack.c.bf16 %v801_v2, %v801_v2 }
 0x2e9   : > { %973 = vst.msk [vmem:[%s1590_s16 + $0x20] sm:$0xf] %vm964_vm4, %v1171_v6  ;;  %985 = vst.msk [vmem:[%s1590_s16 + $0x50] sm:$0xf] %vm964_vm4, %v1183_v7  ;;  %v1172_v12 = vpack.c.bf16 %v745_v8, %v745_v8  ;;  %v1184_v13 = vpack.c.bf16 %v793_v9, %v793_v9 }
 0x2ea   : > { %976 = vst.msk [vmem:[%s1590_s16 + $0x2c] sm:$0xf] %vm964_vm4, %v1174_v10  ;;  %988 = vst.msk [vmem:[%s1590_s16 + $0x5c] sm:$0xf] %vm964_vm4, %v1186_v11 }
 0x2eb   : > { %974 = vst.msk [vmem:[%s1590_s16 + $0x24] sm:$0xf] %vm964_vm4, %v1172_v12  ;;  %986 = vst.msk [vmem:[%s1590_s16 + $0x54] sm:$0xf] %vm964_vm4, %v1184_v13  ;;  %v1341_v14 = vpop.f32.mrb[12].mxu1 }
 0x2ec   : > { %v814_v15 = vadd.f32 %v1341_v14, %v1581_v4  ;;  %v805_v16 = vpop.f32.mrb[13].mxu1 }
 0x2ed   : > { %v806_v17 = vadd.f32 %v1581_v4, %v805_v16  ;;  %v1342_v18 = vpop.f32.mrb[14].mxu1 }
 0x2ee   : > { %v1189_v19 = vpack.c.bf16 %v814_v15, %v814_v15  ;;  %v817_v20 = vadd.f32 %v1342_v18, %v1581_v4  ;;  %v808_v21 = vpop.f32.mrb[15].mxu1 }
 0x2ef   : > { %v1187_v22 = vpack.c.bf16 %v806_v17, %v806_v17  ;;  %v809_v23 = vadd.f32 %v1581_v4, %v808_v21 }
 0x2f0   : > { %991 = vst.msk [vmem:[%s1590_s16 + $0x68] sm:$0xf] %vm964_vm4, %v1189_v19  ;;  %v1190_v24 = vpack.c.bf16 %v817_v20, %v817_v20 }
 0x2f1   : > { %989 = vst.msk [vmem:[%s1590_s16 + $0x60] sm:$0xf] %vm964_vm4, %v1187_v22  ;;  %v1188_v25 = vpack.c.bf16 %v809_v23, %v809_v23 }
 0x2f2   : > { %992 = vst.msk [vmem:[%s1590_s16 + $0x6c] sm:$0xf] %vm964_vm4, %v1190_v24 }
 0x2f3   : > { %990 = vst.msk [vmem:[%s1590_s16 + $0x64] sm:$0xf] %vm964_vm4, %v1188_v25  ;;  %v1345_v26 = vpop.f32.mrb[16].mxu1 }
 0x2f4   : > { %v830_v27 = vadd.f32 %v1345_v26, %v1581_v4  ;;  %v821_v28 = vpop.f32.mrb[17].mxu1 }
 0x2f5   : > { %v822_v29 = vadd.f32 %v1581_v4, %v821_v28  ;;  %v1346_v30 = vpop.f32.mrb[18].mxu1 }
 0x2f6   : > { %v1193_v31 = vpack.c.bf16 %v830_v27, %v830_v27  ;;  %v833_v32 = vadd.f32 %v1346_v30, %v1581_v4  ;;  %v824_v33 = vpop.f32.mrb[19].mxu1 }
 0x2f7   : > { %v1191_v34 = vpack.c.bf16 %v822_v29, %v822_v29  ;;  %v825_v35 = vadd.f32 %v1581_v4, %v824_v33 }
 0x2f8   : > { %995 = vst.msk [vmem:[%s1590_s16 + $0x78] sm:$0xf] %vm964_vm4, %v1193_v31  ;;  %v1194_v36 = vpack.c.bf16 %v833_v32, %v833_v32 }
 0x2f9   : > { %993 = vst.msk [vmem:[%s1590_s16 + $0x70] sm:$0xf] %vm964_vm4, %v1191_v34  ;;  %v1192_v37 = vpack.c.bf16 %v825_v35, %v825_v35 }
 0x2fa   : > { %996 = vst.msk [vmem:[%s1590_s16 + $0x7c] sm:$0xf] %vm964_vm4, %v1194_v36 }
 0x2fb   : > { %994 = vst.msk [vmem:[%s1590_s16 + $0x74] sm:$0xf] %vm964_vm4, %v1192_v37 }
 0x2fc PF: > { %s18_s29 = sadd.s32 1, %s1411_s29   ;;  %s1704_s27 = smov %s1407_s28 }
 0x2fd   : > { %p15_p5 = scmp.ge.s32.totalorder %s18_s29, 4   ;;  %s1705_s28 = smov %s1707_s30 }
 0x2ff   :  { %17 = sbr.rel (!%p15_p5) target bundleno = 2 (0x2), region = 85 }

// kernel: forward.17
= control target key start
LH: loop header
LB: loop body
LE: loop exit
PB: predicated region body
PF: predicated region fallthrough
CT: control target
= control target key end

     0   :  { %s1328_s12 = smov 0   ;;  %s1641_s0 = inlined_call_operand.vmem [shape: bf16[512,16], index: 0, kind: input, shape index: {}]   ;;  %s1642_s1 = inlined_call_operand.vmem [shape: bf16[16,96], index: 1, kind: input, shape index: {}]   ;;  %s1643_s2 = inlined_call_operand.vmem [shape: f32[1,96], index: 2, kind: input, shape index: {}]   ;;  %s1644_s3 = inlined_call_operand.vmem [shape: bf16[512,96], index: 3, kind: output, shape index: {}]  }
   0x1 LB: > { %s953_s13 = sadd.s32 4294967295, %s1306_s12   ;;  %p957_p0 = scmp.ge.s32.totalorder %s1306_s12, 1  ;;  %s1306_s12 = sphi %s1328_s12, %s13_s12  }
   0x2   : > { %p138_p1 = scmp.lt.s32.totalorder %s1306_s12, 3 }
   0x4   : > { %p139_p2 = pnand %p957_p0, %p138_p1 }
   0x5   : > { %v1155_v0 = vld [vmem:[%s1642_s1] sm:$0xff] (!%p139_p2)   ;;  %s958_s16 = sshll.u32 (!%p139_p2), %s953_s13, 5  ;;  %vm302_vm0 = vcmask (!%p139_p2), 130048   ;;  %vm864_vm1 = vcmask (!%p139_p2), 781312  }
   0x6   : > { %142 = sbr.rel (%p139_p2) target bundleno = 322 (0x142), region = 32  ;;  %p163_p3 = scmp.lt.s32.totalorder (!%p139_p2), %s958_s16, 63  ;;  %1111 = vmatprep.subr.bf16.mxu0 (!%p139_p2), %v1155_v0  ;;  %1145 = vmatprep.subr.bf16.mxu1 (!%p139_p2), %v1155_v0  ;;  %v1384_v17 = vld [vmem:[%s1643_s2] ss:$0 sm:$0xff] (!%p139_p2) }
   0x7   : > { %1112 = vmatpush3.bf16.msra.mxu0 (!%p139_p2), %v1155_v0  ;;  %1146 = vmatpush3.bf16.msra.mxu1 (!%p139_p2), %v1155_v0 }
   0xd   : > { %s1646_s16 = smov (!%p163_p3, %s958_s16), 63 }
   0xe   : > { %s959_s17 = sshll.u32 %s1646_s16, 2 }
   0xf   : > { %s1347_s20 = scalar_lea.vmem %s1641_s0, %s959_s17  ;;  %s1491_s25 = scalar_lea.vmem %s1644_s3, %s959_s17 }
  0x10   : > { %v1156_v1 = vld [vmem:[%s1347_s20] sm:$0xff]   ;;  %v1158_v3 = vld [vmem:[%s1347_s20 + $0x8] sm:$0xff]   ;;  %v1160_v5 = vld [vmem:[%s1347_s20 + $0x10] sm:$0xff]  }
  0x11   : > { %v1157_v2 = vld [vmem:[%s1347_s20 + $0x40] sm:$0xff]   ;;  %1113 = vmatprep.mubr.msk.bf16.mxu0 %vm302_vm0, %v1156_v1  ;;  %v1159_v4 = vld [vmem:[%s1347_s20 + $0x48] sm:$0xff]   ;;  %v1161_v6 = vld [vmem:[%s1347_s20 + $0x50] sm:$0xff]  }
  0x12   : > { %1129 = vmatprep.mubr.msk.bf16.mxu1 %vm302_vm0, %v1157_v2  ;;  %1114 = vmatmul.mubr.msk.bf16.vlgmr.msra.gmra.mrb[0].mxu0 %vm302_vm0, %v1158_v3  ;;  %v1162_v7 = vld [vmem:[%s1347_s20 + $0x18] sm:$0xff]   ;;  %v1164_v9 = vld [vmem:[%s1347_s20 + $0x20] sm:$0xff]   ;;  %v1166_v11 = vld [vmem:[%s1347_s20 + $0x28] sm:$0xff]  }
  0x13   : > { %1130 = vmatmul.mubr.msk.bf16.vlgmr.msra.gmra.mrb[0].mxu1 %vm302_vm0, %v1159_v4  ;;  %1117 = vmatprep.mubr.msk.bf16.mxu0 %vm302_vm0, %v1160_v5  ;;  %v1163_v8 = vld [vmem:[%s1347_s20 + $0x58] sm:$0xff]   ;;  %v1165_v10 = vld [vmem:[%s1347_s20 + $0x60] sm:$0xff]   ;;  %v1167_v12 = vld [vmem:[%s1347_s20 + $0x68] sm:$0xff]  }
  0x14   : > { %1133 = vmatprep.mubr.msk.bf16.mxu1 %vm302_vm0, %v1161_v6  ;;  %v1168_v13 = vld [vmem:[%s1347_s20 + $0x30] sm:$0xff]   ;;  %v1170_v15 = vld [vmem:[%s1347_s20 + $0x38] sm:$0xff]  }
  0x15   : > { %v1169_v14 = vld [vmem:[%s1347_s20 + $0x70] sm:$0xff]   ;;  %v1171_v16 = vld [vmem:[%s1347_s20 + $0x78] sm:$0xff]  }
  0x1a   : > { %1118 = vmatmul.mubr.msk.bf16.gmra.mrb[4].mxu0 %vm302_vm0, %v1162_v7 }
  0x1b   : > { %1134 = vmatmul.mubr.msk.bf16.gmra.mrb[4].mxu1 %vm302_vm0, %v1163_v8  ;;  %1121 = vmatprep.mubr.msk.bf16.mxu0 %vm302_vm0, %v1164_v9 }
  0x1c   : > { %1137 = vmatprep.mubr.msk.bf16.mxu1 %vm302_vm0, %v1165_v10 }
  0x22   : > { %1122 = vmatmul.mubr.msk.bf16.gmra.mrb[8].mxu0 %vm302_vm0, %v1166_v11 }
  0x23   : > { %1138 = vmatmul.mubr.msk.bf16.gmra.mrb[8].mxu1 %vm302_vm0, %v1167_v12  ;;  %1125 = vmatprep.mubr.msk.bf16.mxu0 %vm302_vm0, %v1168_v13 }
  0x24   : > { %1141 = vmatprep.mubr.msk.bf16.mxu1 %vm302_vm0, %v1169_v14 }
  0x2a   : > { %1126 = vmatmul.mubr.msk.bf16.gmra.mrb[12].mxu0 %vm302_vm0, %v1170_v15 }
  0x2b   : > { %1142 = vmatmul.mubr.msk.bf16.gmra.mrb[12].mxu1 %vm302_vm0, %v1171_v16 }
  0xe5   : > { %v1115_v18 = vpop.f32.mrb[0].mxu0 }
  0xe6   : > { %v1387_v19 = vadd.f32 %v1115_v18, %v1384_v17  ;;  %v1131_v20 = vpop.f32.mrb[0].mxu1  ;;  %v385_v21 = vpop.f32.mrb[1].mxu0 }
  0xe7   : > { %v1390_v22 = vadd.f32 %v1131_v20, %v1384_v17  ;;  %v1393_v23 = vadd.f32 %v1384_v17, %v385_v21  ;;  %v449_v24 = vpop.f32.mrb[1].mxu1  ;;  %v1116_v25 = vpop.f32.mrb[2].mxu0 }
  0xe8   : > { %v998_v26 = vmul.f32 -1.442695, %v1387_v19  ;;  %v1397_v27 = vadd.f32 %v1384_v17, %v449_v24  ;;  %v1400_v28 = vadd.f32 %v1116_v25, %v1384_v17  ;;  %v1132_v29 = vpop.f32.mrb[2].mxu1  ;;  %v388_v30 = vpop.f32.mrb[3].mxu0 }
  0xe9   : > { %v1014_v31 = vmul.f32 -1.442695, %v1390_v22  ;;  %v996_v32 = vmul.f32 -1.442695, %v1393_v23  ;;  %v1405_v33 = vadd.f32 %v1132_v29, %v1384_v17  ;;  %v1408_v34 = vadd.f32 %v1384_v17, %v388_v30  ;;  %v452_v35 = vpop.f32.mrb[3].mxu1 }
  0xea   : > { %1172 = vpow2.f32 %v998_v26  ;;  %v1012_v36 = vmul.f32 -1.442695, %v1397_v27  ;;  %v999_v37 = vmul.f32 -1.442695, %v1400_v28  ;;  %v1413_v38 = vadd.f32 %v1384_v17, %v452_v35 }
  0xeb   : > { %1174 = vpow2.f32 %v1014_v31  ;;  %v1015_v39 = vmul.f32 -1.442695, %v1405_v33  ;;  %v997_v40 = vmul.f32 -1.442695, %v1408_v34 }
  0xec   : > { %1176 = vpow2.f32 %v996_v32  ;;  %v1013_v41 = vmul.f32 -1.442695, %v1413_v38 }
  0xed   : > { %1178 = vpow2.f32 %v1012_v36  ;;  %v1119_v42 = vpop.f32.mrb[4].mxu0 }
  0xee   : > { %1180 = vpow2.f32 %v999_v37  ;;  %v1419_v43 = vadd.f32 %v1119_v42, %v1384_v17  ;;  %v1135_v44 = vpop.f32.mrb[4].mxu1  ;;  %v401_v45 = vpop.f32.mrb[5].mxu0 }
  0xef   : > { %1182 = vpow2.f32 %v1015_v39  ;;  %v1422_v46 = vadd.f32 %v1135_v44, %v1384_v17  ;;  %v1425_v47 = vadd.f32 %v1384_v17, %v401_v45  ;;  %v465_v48 = vpop.f32.mrb[5].mxu1  ;;  %v1120_v49 = vpop.f32.mrb[6].mxu0 }
  0xf0   : > { %1184 = vpow2.f32 %v997_v40  ;;  %v1002_v50 = vmul.f32 -1.442695, %v1419_v43  ;;  %v1429_v51 = vadd.f32 %v1384_v17, %v465_v48  ;;  %v1432_v52 = vadd.f32 %v1120_v49, %v1384_v17  ;;  %v1136_v53 = vpop.f32.mrb[6].mxu1  ;;  %v404_v54 = vpop.f32.mrb[7].mxu0 }
  0xf1   : > { %1186 = vpow2.f32 %v1013_v41  ;;  %v1018_v55 = vmul.f32 -1.442695, %v1422_v46  ;;  %v1000_v56 = vmul.f32 -1.442695, %v1425_v47  ;;  %v468_v57 = vpop.f32.mrb[7].mxu1  ;;  %v1441_v18 = vadd.f32 %v1136_v53, %v1384_v17 }
  0xf2   : > { %1188 = vpow2.f32 %v1002_v50  ;;  %v1016_v58 = vmul.f32 -1.442695, %v1429_v51  ;;  %v1003_v59 = vmul.f32 -1.442695, %v1432_v52  ;;  %v1444_v24 = vadd.f32 %v1384_v17, %v404_v54 }
  0xf3   : > { %1190 = vpow2.f32 %v1018_v55  ;;  %v1447_v29 = vadd.f32 %v1384_v17, %v468_v57  ;;  %v1019_v40 = vmul.f32 -1.442695, %v1441_v18 }
  0xf4   : > { %v1173_v60 = vpop.eup %1172  ;;  %1192 = vpow2.f32 %v1000_v56  ;;  %v1001_v49 = vmul.f32 -1.442695, %v1444_v24 }
  0xf5   : > { %v1175_v61 = vpop.eup %1174  ;;  %v610_v62 = vadd.f32 1.0, %v1173_v60  ;;  %1194 = vpow2.f32 %v1016_v58  ;;  %v1123_v63 = vpop.f32.mrb[8].mxu0  ;;  %v1017_v57 = vmul.f32 -1.442695, %v1447_v29 }
  0xf6   : > { %v1177_v0 = vpop.eup %1176  ;;  %v626_v1 = vadd.f32 1.0, %v1175_v61  ;;  %1196 = vpow2.f32 %v1003_v59  ;;  %v1139_v2 = vpop.f32.mrb[8].mxu1  ;;  %v1450_v32 = vadd.f32 %v1123_v63, %v1384_v17 }
  0xf7   : > { %v417_v3 = vpop.f32.mrb[9].mxu0  ;;  %v1179_v4 = vpop.eup %1178  ;;  %1198 = vrcp.f32 %v610_v62  ;;  %v608_v5 = vadd.f32 1.0, %v1177_v0  ;;  %v1453_v35 = vadd.f32 %v1139_v2, %v1384_v17 }
  0xf8   : > { %v481_v6 = vpop.f32.mrb[9].mxu1  ;;  %v1124_v7 = vpop.f32.mrb[10].mxu0  ;;  %1200 = vrcp.f32 %v626_v1  ;;  %v624_v9 = vadd.f32 1.0, %v1179_v4  ;;  %v1457_v41 = vadd.f32 %v1384_v17, %v417_v3  ;;  %v1006_v63 = vmul.f32 -1.442695, %v1450_v32 }
  0xf9   : > { %v1181_v8 = vpop.eup %1180  ;;  %v1140_v10 = vpop.f32.mrb[10].mxu1  ;;  %1202 = vrcp.f32 %v608_v5  ;;  %v1463_v50 = vadd.f32 %v1384_v17, %v481_v6  ;;  %v1471_v58 = vadd.f32 %v1124_v7, %v1384_v17  ;;  %v1022_v0 = vmul.f32 -1.442695, %v1453_v35 }
  0xfa   : > { %v420_v11 = vpop.f32.mrb[11].mxu0  ;;  %v1183_v12 = vpop.eup %1182  ;;  %v611_v13 = vadd.f32 1.0, %v1181_v8  ;;  %1204 = vrcp.f32 %v624_v9  ;;  %v1004_v4 = vmul.f32 -1.442695, %v1457_v41  ;;  %v1484_v5 = vadd.f32 %v1140_v10, %v1384_v17 }
  0xfb   : > { %v1438_v14 = vpop.f32.mrb[11].mxu1  ;;  %v1185_v15 = vpop.eup %1184  ;;  %v627_v16 = vadd.f32 1.0, %v1183_v12  ;;  %v1020_v8 = vmul.f32 -1.442695, %v1463_v50 }
  0xfc   : > { %v1187_v20 = vpop.eup %1186  ;;  %1206 = vrcp.f32 %v611_v13  ;;  %v609_v21 = vadd.f32 1.0, %v1185_v15  ;;  %v1007_v13 = vmul.f32 -1.442695, %v1471_v58 }
  0xfd   : > { %v1189_v25 = vpop.eup %1188  ;;  %1208 = vrcp.f32 %v627_v16  ;;  %v625_v26 = vadd.f32 1.0, %v1187_v20  ;;  %v1127_v36 = vpop.f32.mrb[12].mxu0 }
  0xfe   : > { %v1191_v30 = vpop.eup %1190  ;;  %1210 = vrcp.f32 %v609_v21  ;;  %v614_v31 = vadd.f32 1.0, %v1189_v25  ;;  %v1143_v42 = vpop.f32.mrb[12].mxu1 }
  0xff   : > { %v1193_v37 = vpop.eup %1192  ;;  %1212 = vrcp.f32 %v625_v26  ;;  %v630_v39 = vadd.f32 1.0, %v1191_v30  ;;  %v1459_v44 = vpop.f32.mrb[13].mxu0 }
 0x100   : > { %v1195_v45 = vpop.eup %1194  ;;  %1214 = vrcp.f32 %v614_v31  ;;  %v612_v48 = vadd.f32 1.0, %v1193_v37  ;;  %v1465_v53 = vpop.f32.mrb[13].mxu1 }
 0x101   : > { %v1467_v54 = vpop.f32.mrb[14].mxu0  ;;  %v1197_v55 = vpop.eup %1196  ;;  %1216 = vrcp.f32 %v630_v39  ;;  %v628_v56 = vadd.f32 1.0, %v1195_v45  ;;  %v1519_v39 = vadd.f32 %v1143_v42, %v1384_v17 }
 0x102   : > { %v1473_v59 = vpop.f32.mrb[14].mxu1  ;;  %v1475_v60 = vpop.f32.mrb[15].mxu0  ;;  %1218 = vrcp.f32 %v612_v48  ;;  %v615_v62 = vadd.f32 1.0, %v1197_v55 }
 0x103   : > { %v1199_v61 = vpop.eup %1198  ;;  %v1479_v1 = vpop.f32.mrb[15].mxu1  ;;  %1220 = vrcp.f32 %v628_v56 }
 0x104   : > { %v1201_v2 = vpop.eup %1200  ;;  %v706_v3 = vmul.f32 %v1199_v61, %v1387_v19  ;;  %1222 = vrcp.f32 %v615_v62  ;;  %v1496_v19 = vadd.f32 %v1384_v17, %v420_v11 }
 0x105   : > { %v1203_v6 = vpop.eup %1202  ;;  %v722_v7 = vmul.f32 %v1201_v2, %v1390_v22  ;;  %1224 = vpow2.f32 %v1019_v40  ;;  %v1503_v22 = vadd.f32 %v1384_v17, %v1438_v14  ;;  %v1513_v14 = vadd.f32 %v1127_v36, %v1384_v17 }
 0x106   : > { %v1205_v9 = vpop.eup %1204  ;;  %v1064_v12 = vpack.c.bf16 %v706_v3, %v706_v3  ;;  %v704_v10 = vmul.f32 %v1203_v6, %v1393_v23  ;;  %1226 = vpow2.f32 %v1001_v49  ;;  %v1023_v23 = vmul.f32 -1.442695, %v1484_v5 }
 0x107   : > { %v1207_v15 = vpop.eup %1206  ;;  %v1080_v16 = vpack.c.bf16 %v722_v7, %v722_v7  ;;  %v720_v20 = vmul.f32 %v1205_v9, %v1397_v27  ;;  %1228 = vpow2.f32 %v1017_v57  ;;  %v1005_v36 = vmul.f32 -1.442695, %v1496_v19 }
 0x108   : > { %v1209_v11 = vpop.eup %1208  ;;  %867 = vst.msk [vmem:[%s1491_s25 + $0x8] sm:$0xf] %vm864_vm1, %v1064_v12  ;;  %v1062_v21 = vpack.c.bf16 %v704_v10, %v704_v10  ;;  %v707_v25 = vmul.f32 %v1207_v15, %v1400_v28  ;;  %1230 = vpow2.f32 %v1006_v63  ;;  %v1021_v42 = vmul.f32 -1.442695, %v1503_v22 }
 0x109   : > { %v1211_v26 = vpop.eup %1210  ;;  %883 = vst.msk [vmem:[%s1491_s25 + $0x48] sm:$0xf] %vm864_vm1, %v1080_v16  ;;  %v1078_v27 = vpack.c.bf16 %v720_v20, %v720_v20  ;;  %v723_v30 = vmul.f32 %v1209_v11, %v1405_v33  ;;  %1232 = vpow2.f32 %v1022_v0  ;;  %v1010_v57 = vmul.f32 -1.442695, %v1513_v14 }
 0x10a   : > { %v1213_v31 = vpop.eup %1212  ;;  %865 = vst.msk [vmem:[%s1491_s25] sm:$0xf] %vm864_vm1, %v1062_v21  ;;  %v1065_v37 = vpack.c.bf16 %v707_v25, %v707_v25  ;;  %v705_v28 = vmul.f32 %v1211_v26, %v1408_v34  ;;  %1234 = vpow2.f32 %v1004_v4  ;;  %v1026_v63 = vmul.f32 -1.442695, %v1519_v39 }
 0x10b   : > { %v1215_v40 = vpop.eup %1214  ;;  %881 = vst.msk [vmem:[%s1491_s25 + $0x40] sm:$0xf] %vm864_vm1, %v1078_v27  ;;  %v1081_v33 = vpack.c.bf16 %v723_v30, %v723_v30  ;;  %v721_v45 = vmul.f32 %v1213_v31, %v1413_v38  ;;  %1236 = vpow2.f32 %v1020_v8  ;;  %v1553_v30 = vadd.f32 %v1384_v17, %v1459_v44 }
 0x10c   : > { %v1217_v48 = vpop.eup %1216  ;;  %868 = vst.msk [vmem:[%s1491_s25 + $0xc] sm:$0xf] %vm864_vm1, %v1065_v37  ;;  %v1063_v49 = vpack.c.bf16 %v705_v28, %v705_v28  ;;  %v710_v34 = vmul.f32 %v1215_v40, %v1419_v43  ;;  %1238 = vpow2.f32 %v1007_v13  ;;  %v1557_v28 = vadd.f32 %v1384_v17, %v1465_v53 }
 0x10d   : > { %v1219_v55 = vpop.eup %1218  ;;  %884 = vst.msk [vmem:[%s1491_s25 + $0x4c] sm:$0xf] %vm864_vm1, %v1081_v33  ;;  %v1079_v56 = vpack.c.bf16 %v721_v45, %v721_v45  ;;  %v726_v38 = vmul.f32 %v1217_v48, %v1422_v46  ;;  %1240 = vpow2.f32 %v1023_v23  ;;  %v1561_v45 = vadd.f32 %v1467_v54, %v1384_v17 }
 0x10e   : > { %v1221_v61 = vpop.eup %1220  ;;  %866 = vst.msk [vmem:[%s1491_s25 + $0x4] sm:$0xf] %vm864_vm1, %v1063_v49  ;;  %v1068_v62 = vpack.c.bf16 %v710_v34, %v710_v34  ;;  %v708_v43 = vmul.f32 %v1219_v55, %v1425_v47  ;;  %1242 = vpow2.f32 %v1005_v36  ;;  %v1565_v44 = vadd.f32 %v1473_v59, %v1384_v17 }
 0x10f   : > { %v1223_v0 = vpop.eup %1222  ;;  %882 = vst.msk [vmem:[%s1491_s25 + $0x44] sm:$0xf] %vm864_vm1, %v1079_v56  ;;  %v1084_v2 = vpack.c.bf16 %v726_v38, %v726_v38  ;;  %v724_v46 = vmul.f32 %v1221_v61, %v1429_v51  ;;  %1244 = vpow2.f32 %v1021_v42  ;;  %v1008_v53 = vmul.f32 -1.442695, %v1553_v30 }
 0x110   : > { %v1225_v3 = vpop.eup %1224  ;;  %871 = vst.msk [vmem:[%s1491_s25 + $0x18] sm:$0xf] %vm864_vm1, %v1068_v62  ;;  %v1066_v4 = vpack.c.bf16 %v708_v43, %v708_v43  ;;  %v711_v6 = vmul.f32 %v1223_v0, %v1432_v52  ;;  %1246 = vpow2.f32 %v1010_v57  ;;  %v1570_v42 = vadd.f32 %v1384_v17, %v1475_v60 }
 0x111   : > { %v1227_v47 = vpop.eup %1226  ;;  %887 = vst.msk [vmem:[%s1491_s25 + $0x58] sm:$0xf] %vm864_vm1, %v1084_v2  ;;  %v1082_v7 = vpack.c.bf16 %v724_v46, %v724_v46  ;;  %v631_v8 = vadd.f32 1.0, %v1225_v3  ;;  %1248 = vpow2.f32 %v1026_v63  ;;  %v1024_v56 = vmul.f32 -1.442695, %v1557_v28 }
 0x112   : > { %v1229_v9 = vpop.eup %1228  ;;  %869 = vst.msk [vmem:[%s1491_s25 + $0x10] sm:$0xf] %vm864_vm1, %v1066_v4  ;;  %v1069_v51 = vpack.c.bf16 %v711_v6, %v711_v6  ;;  %v613_v12 = vadd.f32 1.0, %v1227_v47  ;;  %v1575_v38 = vadd.f32 %v1384_v17, %v1479_v1  ;;  %v1011_v61 = vmul.f32 -1.442695, %v1561_v45 }
 0x113   : > { %v1231_v10 = vpop.eup %1230  ;;  %885 = vst.msk [vmem:[%s1491_s25 + $0x50] sm:$0xf] %vm864_vm1, %v1082_v7  ;;  %1250 = vrcp.f32 %v631_v8  ;;  %v629_v13 = vadd.f32 1.0, %v1229_v9  ;;  %v1027_v43 = vmul.f32 -1.442695, %v1565_v44 }
 0x114   : > { %v1233_v52 = vpop.eup %1232  ;;  %872 = vst.msk [vmem:[%s1491_s25 + $0x1c] sm:$0xf] %vm864_vm1, %v1069_v51  ;;  %1252 = vrcp.f32 %v613_v12  ;;  %v618_v15 = vadd.f32 1.0, %v1231_v10  ;;  %v1009_v17 = vmul.f32 -1.442695, %v1570_v42 }
 0x115   : > { %v1235_v16 = vpop.eup %1234  ;;  %1254 = vrcp.f32 %v629_v13  ;;  %v634_v20 = vadd.f32 1.0, %v1233_v52  ;;  %v1025_v3 = vmul.f32 -1.442695, %v1575_v38 }
 0x116   : > { %v1237_v11 = vpop.eup %1236  ;;  %1256 = vrcp.f32 %v618_v15  ;;  %v616_v21 = vadd.f32 1.0, %v1235_v16 }
 0x117   : > { %v1239_v25 = vpop.eup %1238  ;;  %1258 = vrcp.f32 %v634_v20  ;;  %v632_v23 = vadd.f32 1.0, %v1237_v11 }
 0x118   : > { %v1241_v26 = vpop.eup %1240  ;;  %1260 = vrcp.f32 %v616_v21  ;;  %v619_v27 = vadd.f32 1.0, %v1239_v25 }
 0x119   : > { %v1243_v31 = vpop.eup %1242  ;;  %1262 = vrcp.f32 %v632_v23  ;;  %v635_v37 = vadd.f32 1.0, %v1241_v26 }
 0x11a   : > { %v1245_v40 = vpop.eup %1244  ;;  %1264 = vrcp.f32 %v619_v27  ;;  %v617_v33 = vadd.f32 1.0, %v1243_v31 }
 0x11b   : > { %v1247_v36 = vpop.eup %1246  ;;  %1266 = vrcp.f32 %v635_v37  ;;  %v633_v48 = vadd.f32 1.0, %v1245_v40 }
 0x11c   : > { %v1249_v49 = vpop.eup %1248  ;;  %1268 = vrcp.f32 %v617_v33  ;;  %v622_v34 = vadd.f32 1.0, %v1247_v36 }
 0x11d   : > { %v1251_v55 = vpop.eup %1250  ;;  %1270 = vrcp.f32 %v633_v48  ;;  %v638_v54 = vadd.f32 1.0, %v1249_v49 }
 0x11e   : > { %v1253_v59 = vpop.eup %1252  ;;  %v727_v57 = vmul.f32 %v1251_v55, %v1441_v18  ;;  %1272 = vrcp.f32 %v622_v34 }
 0x11f   : > { %v1255_v62 = vpop.eup %1254  ;;  %v709_v60 = vmul.f32 %v1253_v59, %v1444_v24  ;;  %1274 = vrcp.f32 %v638_v54 }
 0x120   : > { %v1257_v63 = vpop.eup %1256  ;;  %v1085_v0 = vpack.c.bf16 %v727_v57, %v727_v57  ;;  %v725_v2 = vmul.f32 %v1255_v62, %v1447_v29  ;;  %1276 = vpow2.f32 %v1008_v53 }
 0x121   : > { %v1259_v1 = vpop.eup %1258  ;;  %v1067_v18 = vpack.c.bf16 %v709_v60, %v709_v60  ;;  %v714_v46 = vmul.f32 %v1257_v63, %v1450_v32  ;;  %1278 = vpow2.f32 %v1024_v56 }
 0x122   : > { %v1261_v24 = vpop.eup %1260  ;;  %888 = vst.msk [vmem:[%s1491_s25 + $0x5c] sm:$0xf] %vm864_vm1, %v1085_v0  ;;  %v1083_v4 = vpack.c.bf16 %v725_v2, %v725_v2  ;;  %v730_v6 = vmul.f32 %v1259_v1, %v1453_v35  ;;  %1280 = vpow2.f32 %v1011_v61 }
 0x123   : > { %v1263_v29 = vpop.eup %1262  ;;  %870 = vst.msk [vmem:[%s1491_s25 + $0x14] sm:$0xf] %vm864_vm1, %v1067_v18  ;;  %v1072_v47 = vpack.c.bf16 %v714_v46, %v714_v46  ;;  %v712_v7 = vmul.f32 %v1261_v24, %v1457_v41  ;;  %1282 = vpow2.f32 %v1027_v43 }
 0x124   : > { %v1265_v32 = vpop.eup %1264  ;;  %886 = vst.msk [vmem:[%s1491_s25 + $0x54] sm:$0xf] %vm864_vm1, %v1083_v4  ;;  %v1088_v8 = vpack.c.bf16 %v730_v6, %v730_v6  ;;  %v728_v9 = vmul.f32 %v1263_v29, %v1463_v50  ;;  %1284 = vpow2.f32 %v1009_v17 }
 0x125   : > { %v1267_v51 = vpop.eup %1266  ;;  %875 = vst.msk [vmem:[%s1491_s25 + $0x28] sm:$0xf] %vm864_vm1, %v1072_v47  ;;  %v1070_v35 = vpack.c.bf16 %v712_v7, %v712_v7  ;;  %v715_v12 = vmul.f32 %v1265_v32, %v1471_v58  ;;  %1286 = vpow2.f32 %v1025_v3 }
 0x126   : > { %v1269_v10 = vpop.eup %1268  ;;  %891 = vst.msk [vmem:[%s1491_s25 + $0x68] sm:$0xf] %vm864_vm1, %v1088_v8  ;;  %v1086_v41 = vpack.c.bf16 %v728_v9, %v728_v9  ;;  %v731_v13 = vmul.f32 %v1267_v51, %v1484_v5 }
 0x127   : > { %v1271_v52 = vpop.eup %1270  ;;  %873 = vst.msk [vmem:[%s1491_s25 + $0x20] sm:$0xf] %vm864_vm1, %v1070_v35  ;;  %v1073_v50 = vpack.c.bf16 %v715_v12, %v715_v12  ;;  %v713_v15 = vmul.f32 %v1269_v10, %v1496_v19 }
 0x128   : > { %v1273_v16 = vpop.eup %1272  ;;  %889 = vst.msk [vmem:[%s1491_s25 + $0x60] sm:$0xf] %vm864_vm1, %v1086_v41  ;;  %v1089_v58 = vpack.c.bf16 %v731_v13, %v731_v13  ;;  %v729_v20 = vmul.f32 %v1271_v52, %v1503_v22 }
 0x129   : > { %v1275_v11 = vpop.eup %1274  ;;  %876 = vst.msk [vmem:[%s1491_s25 + $0x2c] sm:$0xf] %vm864_vm1, %v1073_v50  ;;  %v1071_v21 = vpack.c.bf16 %v713_v15, %v713_v15  ;;  %v718_v5 = vmul.f32 %v1273_v16, %v1513_v14 }
 0x12a   : > { %v1277_v25 = vpop.eup %1276  ;;  %892 = vst.msk [vmem:[%s1491_s25 + $0x6c] sm:$0xf] %vm864_vm1, %v1089_v58  ;;  %v1087_v23 = vpack.c.bf16 %v729_v20, %v729_v20  ;;  %v734_v19 = vmul.f32 %v1275_v11, %v1519_v39 }
 0x12b   : > { %v1279_v26 = vpop.eup %1278  ;;  %874 = vst.msk [vmem:[%s1491_s25 + $0x24] sm:$0xf] %vm864_vm1, %v1071_v21  ;;  %v1076_v27 = vpack.c.bf16 %v718_v5, %v718_v5  ;;  %v620_v31 = vadd.f32 1.0, %v1277_v25 }
 0x12c   : > { %v1281_v22 = vpop.eup %1280  ;;  %890 = vst.msk [vmem:[%s1491_s25 + $0x64] sm:$0xf] %vm864_vm1, %v1087_v23  ;;  %v1092_v37 = vpack.c.bf16 %v734_v19, %v734_v19  ;;  %v636_v40 = vadd.f32 1.0, %v1279_v26 }
 0x12d   : > { %v1283_v33 = vpop.eup %1282  ;;  %879 = vst.msk [vmem:[%s1491_s25 + $0x38] sm:$0xf] %vm864_vm1, %v1076_v27  ;;  %1288 = vrcp.f32 %v620_v31  ;;  %v623_v14 = vadd.f32 1.0, %v1281_v22 }
 0x12e   : > { %v1285_v36 = vpop.eup %1284  ;;  %895 = vst.msk [vmem:[%s1491_s25 + $0x78] sm:$0xf] %vm864_vm1, %v1092_v37  ;;  %1290 = vrcp.f32 %v636_v40  ;;  %v639_v39 = vadd.f32 1.0, %v1283_v33 }
 0x12f   : > { %v1287_v48 = vpop.eup %1286  ;;  %1292 = vrcp.f32 %v623_v14  ;;  %v621_v49 = vadd.f32 1.0, %v1285_v36 }
 0x130   : > { %1294 = vrcp.f32 %v639_v39  ;;  %v637_v34 = vadd.f32 1.0, %v1287_v48 }
 0x131   : > { %1296 = vrcp.f32 %v621_v49 }
 0x132   : > { %1298 = vrcp.f32 %v637_v34 }
 0x137   : > { %v1289_v53 = vpop.eup %1288 }
 0x138   : > { %v1291_v55 = vpop.eup %1290  ;;  %v716_v54 = vmul.f32 %v1289_v53, %v1553_v30 }
 0x139   : > { %v1293_v56 = vpop.eup %1292  ;;  %v732_v59 = vmul.f32 %v1291_v55, %v1557_v28 }
 0x13a   : > { %v1295_v57 = vpop.eup %1294  ;;  %v1074_v61 = vpack.c.bf16 %v716_v54, %v716_v54  ;;  %v719_v62 = vmul.f32 %v1293_v56, %v1561_v45 }
 0x13b   : > { %v1297_v60 = vpop.eup %1296  ;;  %v1090_v43 = vpack.c.bf16 %v732_v59, %v732_v59  ;;  %v735_v63 = vmul.f32 %v1295_v57, %v1565_v44 }
 0x13c   : > { %v1299_v0 = vpop.eup %1298  ;;  %877 = vst.msk [vmem:[%s1491_s25 + $0x30] sm:$0xf] %vm864_vm1, %v1074_v61  ;;  %v1077_v2 = vpack.c.bf16 %v719_v62, %v719_v62  ;;  %v717_v30 = vmul.f32 %v1297_v60, %v1570_v42 }
 0x13d   : > { %893 = vst.msk [vmem:[%s1491_s25 + $0x70] sm:$0xf] %vm864_vm1, %v1090_v43  ;;  %v1093_v28 = vpack.c.bf16 %v735_v63, %v735_v63  ;;  %v733_v17 = vmul.f32 %v1299_v0, %v1575_v38 }
 0x13e   : > { %880 = vst.msk [vmem:[%s1491_s25 + $0x3c] sm:$0xf] %vm864_vm1, %v1077_v2  ;;  %v1075_v1 = vpack.c.bf16 %v717_v30, %v717_v30 }
 0x13f   : > { %896 = vst.msk [vmem:[%s1491_s25 + $0x7c] sm:$0xf] %vm864_vm1, %v1093_v28  ;;  %v1091_v45 = vpack.c.bf16 %v733_v17, %v733_v17 }
 0x140   : > { %878 = vst.msk [vmem:[%s1491_s25 + $0x34] sm:$0xf] %vm864_vm1, %v1075_v1 }
 0x141   : > { %894 = vst.msk [vmem:[%s1491_s25 + $0x74] sm:$0xf] %vm864_vm1, %v1091_v45 }
 0x142 PF: > { %s13_s12 = sadd.s32 1, %s1306_s12  }
 0x143   : > { %p10_p4 = scmp.ge.s32.totalorder %s13_s12, 4  }
 0x145   :  { %12 = sbr.rel (!%p10_p4) target bundleno = 1 (0x1), region = 62 }

// kernel: forward.18
= control target key start
LH: loop header
LB: loop body
LE: loop exit
PB: predicated region body
PF: predicated region fallthrough
CT: control target
= control target key end

     0   :  { %s755_s15 = smov 0   ;;  %s757_s16 = smov 0   ;;  %s873_s0 = inlined_call_operand.vmem [shape: bf16[8,9,9,96], index: 0, kind: input, shape index: {}]   ;;  %s874_s1 = inlined_call_operand.vmem [shape: f32[9,1,1,96], index: 1, kind: input, shape index: {}]   ;;  %s875_s2 = inlined_call_operand.vmem [shape: f32[1,96], index: 2, kind: input, shape index: {}]   ;;  %s876_s3 = inlined_call_operand.vmem [shape: bf16[2,8,8,96], index: 3, kind: output, shape index: {0}]   ;;  %s877_s4 = inlined_call_operand.vmem [shape: f32[2,1,96], index: 4, kind: output, shape index: {1}]  }
   0x1   :  { %s759_s17 = smov 0   ;;  %s761_s18 = smov 0  }
   0x2   :  { %s763_s19 = smov 0  }
   0x3 LB: > { %s24_s20 = sadd.s32 1, %s719_s17  ;;  %s27_s21 = sadd.s32 1, %s723_s18  ;;  %s727_s19 = sphi %s763_s19, %s15_s19   ;;  %s723_s18 = sphi %s761_s18, %s881_s18   ;;  %s719_s17 = sphi %s759_s17, %s880_s17   ;;  %s715_s16 = sphi %s757_s16, %s879_s16   ;;  %s711_s15 = sphi %s755_s15, %s878_s15  }
   0x4   : > { %p25_p0 = scmp.ge.s32.totalorder %s24_s20, 4  ;;  %p595_p1 = scmp.ge.s32.totalorder %s727_s19, 1 }
   0x5   : > { %p181_p2 = scmp.lt.s32.totalorder %s727_s19, 9 }
   0x6   : > { %s883_s20 = smov (%p25_p0, %s24_s20), 0  ;;  %s885_s21 = smov (!%p25_p0, %s27_s21), %s723_s18 }
   0x7   : > { %p182_p3 = pnand %p595_p1, %p181_p2  ;;  %p29_p4 = scmp.ge.s32.totalorder %s885_s21, 2 }
   0x8   : > { %s596_s22 = sshll.u32 (!%p182_p3), %s715_s16, 2  ;;  %p223_p6 = scmp.lt.s32.totalorder (!%p182_p3), %s715_s16, 1  ;;  %v619_v0 = vld [vmem:[%s874_s1] ss:$0 sm:$0xff] (!%p182_p3)  ;;  %vm322_vm0 = vcmask (!%p182_p3), 1046528   ;;  %vm445_vm1 = vcmask (!%p182_p3), 781312  }
   0x9   : > { %s887_s21 = smov (%p29_p4, %s885_s21), 0  ;;  %185 = sbr.rel (%p182_p3) target bundleno = 98 (0x62), region = 32 }
   0xa   : > { %p216_p5 = scmp.lt.s32.totalorder (!%p182_p3), %s596_s22, 7  ;;  %s635_s24 = sshll.u32 (!%p182_p3), %s711_s15, 4  ;;  %v620_v1 = vld [vmem:[%s874_s1 + $0x1] ss:$0 sm:$0xff] (!%p182_p3)  ;;  %v621_v2 = vld [vmem:[%s874_s1 + $0x2] ss:$0 sm:$0xff] (!%p182_p3) }
   0xb   : > { %v622_v23 = vld [vmem:[%s874_s1 + $0x3] ss:$0 sm:$0xff] (!%p182_p3)  ;;  %v623_v32 = vld [vmem:[%s874_s1 + $0x4] ss:$0 sm:$0xff] (!%p182_p3)  ;;  %v624_v33 = vld [vmem:[%s874_s1 + $0x5] ss:$0 sm:$0xff] (!%p182_p3) }
   0xc   : > { %v625_v50 = vld [vmem:[%s874_s1 + $0x6] ss:$0 sm:$0xff] (!%p182_p3)  ;;  %v627_v55 = vld [vmem:[%s874_s1 + $0x8] ss:$0 sm:$0xff] (!%p182_p3)  ;;  %v626_v63 = vld [vmem:[%s874_s1 + $0x7] ss:$0 sm:$0xff] (!%p182_p3) }
   0xd   : > { %s598_s8 = sshll.u32 (!%p182_p3), %s711_s15, 1  ;;  %p631_p8 = scmp.ne.s32.totalorder (!%p182_p3), %s711_s15, 0 }
   0xe   : > { %p225_p7 = scmp.lt.s32.totalorder (!%p182_p3), %s598_s8, 7 }
  0x10   : > { %s889_s22 = smov (!%p216_p5, %s596_s22), 7  ;;  %s891_s16 = smov (!%p223_p6, %s715_s16), 1 }
  0x11   : > { %s639_s23 = smul.u32 72, %s889_s22  ;;  %s797_s30 = scalar_lea.vmem %s877_s4, %s891_s16  ;;  %vm452_vm2 = vcmask (!%p631_p8), 778240  }
  0x12   : > { %s893_s8 = smov (!%p225_p7, %s598_s8), 7  ;;  %s599_s9 = sshll.u32 %s891_s16, 3 }
  0x13   : > { %s220_s27 = scalar_lea.vmem %s873_s0, %s639_s23  ;;  %s228_s10 = sadd.s32 %s599_s9, %s893_s8 }
  0x14   : > { %s248_s7 = scalar_lea.vmem %s220_s27, %s635_s24  ;;  %s600_s11 = sshll.u32 %s228_s10, 2 }
  0x15   : > { %v249_v3 = vld [vmem:[%s248_s7] ss:$8 sps:$4 sm:$0xff]   ;;  %v250_v4 = vld [vmem:[%s248_s7 + $0x4] sm:$0x1]  ;;  %v808_v5 = vld [vmem:[%s248_s7 + $0xc] sm:$0x1]  ;;  %s230_s14 = scalar_lea.vmem %s876_s3, %s600_s11 }
  0x16   : > { %v810_v6 = vld [vmem:[%s248_s7 + $0x10] ss:$56 sps:$4 sm:$0xff]   ;;  %v812_v7 = vld [vmem:[%s248_s7 + $0x14] sm:$0x1]  ;;  %v255_v8 = vunpack.c.l.bf16 %v249_v3  ;;  %v257_v9 = vunpack.c.h.bf16 %v249_v3  ;;  %v256_v11 = vunpack.c.l.bf16 %v250_v4  ;;  %v258_v12 = vunpack.c.l.bf16 %v808_v5  ;;  %v614_v17 = vld [vmem:[%s248_s7 + $0x9c] sm:$0x1] }
  0x17   : > { %v814_v10 = vld [vmem:[%s248_s7 + $0x50] ss:$8 sps:$4 sm:$0xff]   ;;  %v267_v13 = vunpack.c.h.bf16 %v810_v6  ;;  %v612_v16 = vld [vmem:[%s248_s7 + $0x94] sm:$0x1]  ;;  %v259_v18 = vunpack.c.l.bf16 %v810_v6  ;;  %v260_v19 = vunpack.c.l.bf16 %v812_v7  ;;  %v280_v25 = vunpack.c.l.bf16 %v614_v17 }
  0x18   : > { %v268_v14 = vunpack.c.l.bf16 %v814_v10  ;;  %v611_v15 = vld [vmem:[%s248_s7 + $0x90] ss:$8 sps:$4 sm:$0xff]   ;;  %v278_v21 = vunpack.c.l.bf16 %v612_v16  ;;  %v294_v27 = vmul.f32 %v619_v0, %v255_v8  ;;  %v295_v28 = vmul.f32 %v619_v0, %v257_v9 }
  0x19   : > { %v277_v20 = vunpack.c.l.bf16 %v611_v15  ;;  %v617_v22 = vld [vmem:[%s248_s7 + $0xd8] ss:$8 sps:$4 sm:$0xff]   ;;  %v279_v24 = vunpack.c.h.bf16 %v611_v15  ;;  %v304_v29 = vmul.f32 %v620_v1, %v267_v13  ;;  %v314_v31 = vmul.f32 %v621_v2, %v255_v8 }
  0x1a   : > { %v286_v26 = vunpack.c.l.bf16 %v617_v22  ;;  %v305_v30 = vmul.f32 %v620_v1, %v268_v14  ;;  %v287_v34 = vunpack.c.h.bf16 %v617_v22  ;;  %v315_v35 = vmul.f32 %v621_v2, %v256_v11 }
  0x1b   : > { %v316_v36 = vmul.f32 %v621_v2, %v257_v9  ;;  %v317_v37 = vmul.f32 %v621_v2, %v258_v12  ;;  %v306_v38 = vadd.f32 %v304_v29, %v294_v27  ;;  %v323_v40 = vrot.slane %v314_v31, 1 }
  0x1c   : > { %v307_v39 = vadd.f32 %v305_v30, %v295_v28  ;;  %v339_v41 = vmul.f32 %v622_v23, %v277_v20  ;;  %v324_v42 = vrot.slane %v315_v35, 1  ;;  %v340_v45 = vmul.f32 %v622_v23, %v279_v24 }
  0x1d   : > { %v326_v43 = vrot.slane %v316_v36, 1  ;;  %v327_v44 = vrot.slane %v317_v37, 1  ;;  %v349_v46 = vmul.f32 %v623_v32, %v286_v26  ;;  %v359_v47 = vmul.f32 %v624_v33, %v277_v20 }
  0x1e   : > { %v360_v48 = vmul.f32 %v624_v33, %v278_v21  ;;  %v361_v49 = vmul.f32 %v624_v33, %v279_v24  ;;  %v325_v51 = vsel %vm322_vm0, %v323_v40, %v324_v42  ;;  %v350_v53 = vmul.f32 %v623_v32, %v287_v34 }
  0x1f   : > { %v328_v52 = vsel %vm322_vm0, %v326_v43, %v327_v44  ;;  %v362_v54 = vmul.f32 %v624_v33, %v280_v25  ;;  %v331_v56 = vadd.f32 %v325_v51, %v306_v38  ;;  %v367_v58 = vrot.slane %v359_v47, 1 }
  0x20   : > { %v332_v57 = vadd.f32 %v328_v52, %v307_v39  ;;  %v368_v59 = vrot.slane %v360_v48, 1  ;;  %v269_v60 = vunpack.c.h.bf16 %v814_v10  ;;  %v370_v61 = vrot.slane %v361_v49, 1 }
  0x21   : > { %v371_v62 = vrot.slane %v362_v54, 1  ;;  %v341_v0 = vadd.f32 %v339_v41, %v331_v56  ;;  %v383_v3 = vmul.f32 %v625_v50, %v257_v9  ;;  %v403_v5 = vmul.f32 %v627_v55, %v257_v9 }
  0x22   : > { %v342_v1 = vadd.f32 %v340_v45, %v332_v57  ;;  %v369_v2 = vsel %vm322_vm0, %v367_v58, %v368_v59  ;;  %v404_v6 = vmul.f32 %v627_v55, %v258_v12  ;;  %v405_v7 = vmul.f32 %v627_v55, %v259_v18 }
  0x23   : > { %v372_v4 = vsel %vm322_vm0, %v370_v61, %v371_v62  ;;  %v351_v8 = vadd.f32 %v349_v46, %v341_v0  ;;  %v384_v13 = vmul.f32 %v625_v50, %v259_v18  ;;  %v406_v10 = vmul.f32 %v627_v55, %v260_v19 }
  0x24   : > { %v352_v11 = vadd.f32 %v350_v53, %v342_v1  ;;  %v393_v15 = vmul.f32 %v626_v63, %v268_v14  ;;  %v411_v16 = vrot.slane %v403_v5, 1  ;;  %v412_v17 = vrot.slane %v404_v6, 1  ;;  %v628_v14 = vld [vmem:[%s875_s2] ss:$0 sm:$0xff] }
  0x25   : > { %v414_v20 = vrot.slane %v405_v7, 1  ;;  %v375_v21 = vadd.f32 %v369_v2, %v351_v8  ;;  %v394_v23 = vmul.f32 %v626_v63, %v269_v60  ;;  %v415_v24 = vrot.slane %v406_v10, 1 }
  0x26   : > { %v376_v22 = vadd.f32 %v372_v4, %v352_v11  ;;  %v413_v27 = vsel %vm322_vm0, %v411_v16, %v412_v17  ;;  %v729_v43 = vmov (!%p631_p8), 0.0  }
  0x27   : > { %v385_v25 = vadd.f32 %v383_v3, %v375_v21  ;;  %v416_v9 = vsel %vm322_vm0, %v414_v20, %v415_v24  ;;  %453 = vst.msk [vmem:[%s797_s30] sm:$0x1] (!%p631_p8), %vm452_vm2, %v729_v43 }
  0x28   : > { %v386_v26 = vadd.f32 %v384_v13, %v376_v22 }
  0x29   : > { %v395_v12 = vadd.f32 %v393_v15, %v385_v25 }
  0x2a   : > { %v396_v28 = vadd.f32 %v394_v23, %v386_v26 }
  0x2b   : > { %v419_v18 = vadd.f32 %v413_v27, %v395_v12 }
  0x2c   : > { %v420_v19 = vadd.f32 %v416_v9, %v396_v28 }
  0x2d   : > { %v427_v29 = vadd.f32 %v628_v14, %v419_v18 }
  0x2e   : > { %v428_v30 = vadd.f32 %v628_v14, %v420_v19 }
  0x2f   : > { %v629_v31 = vmul.f32 -1.442695, %v427_v29 }
  0x30   : > { %v630_v32 = vmul.f32 -1.442695, %v428_v30 }
  0x31   : > { %681 = vpow2.f32 %v629_v31 }
  0x32   : > { %683 = vpow2.f32 %v630_v32 }
  0x3b   : > { %v682_v33 = vpop.eup %681 }
  0x3c   : > { %v684_v34 = vpop.eup %683  ;;  %v435_v35 = vadd.f32 1.0, %v682_v33 }
  0x3d   : > { %v436_v36 = vadd.f32 1.0, %v684_v34 }
  0x3e   : > { %685 = vrcp.f32 %v435_v35 }
  0x3f   : > { %687 = vrcp.f32 %v436_v36 }
  0x48   : > { %v686_v37 = vpop.eup %685  ;;  %451 = sbr.rel (%p631_p8) target bundleno = 79 (0x4f), region = 36 }
  0x49   : > { %v688_v38 = vpop.eup %687  ;;  %v441_v39 = vmul.f32 %v686_v37, %v427_v29 }
  0x4a   : > { %v442_v40 = vmul.f32 %v688_v38, %v428_v30 }
  0x4b   : > { %v443_v41 = vpack.c.bf16 %v441_v39, %v441_v39 }
  0x4c   : > { %v444_v42 = vpack.c.bf16 %v442_v40, %v442_v40 }
  0x4d   : > { %446 = vst.msk [vmem:[%s230_s14] sm:$0xf] %vm445_vm1, %v443_v41 }
  0x4e   : > { %447 = vst.msk [vmem:[%s230_s14 + $0x4] sm:$0xf] %vm445_vm1, %v444_v42 }
  0x4f PF: > { %vm455_vm3 = vcmask 785408   ;;  %v454_v52 = vld [vmem:[%s797_s30] sm:$0x1]  ;;  %vm466_vm4 = vcmask 778240  }
  0x50   : > { %v456_v44 = vsel %vm455_vm3, %v441_v39, 0.0  ;;  %v457_v45 = vsel %vm455_vm3, %v442_v40, 0.0 }
  0x51   : > { %v458_v46 = vadd.f32 %v457_v45, %v456_v44 }
  0x53   : > { %v459_v47 = vrot.slane %v458_v46, 4 }
  0x55   : > { %v460_v48 = vadd.f32 %v459_v47, %v458_v46 }
  0x57   : > { %v461_v49 = vrot.slane %v460_v48, 2 }
  0x59   : > { %v462_v50 = vadd.f32 %v461_v49, %v460_v48 }
  0x5b   : > { %v463_v51 = vrot.slane %v462_v50, 1 }
  0x5d   : > { %v464_v53 = vadd.f32 %v463_v51, %v462_v50 }
  0x5f   : > { %v465_v54 = vadd.f32 %v464_v53, %v454_v52 }
  0x61   : > { %467 = vst.msk [vmem:[%s797_s30] sm:$0x1] %vm466_vm4, %v465_v54 }
  0x62 PF: > { %s15_s19 = sadd.s32 1, %s727_s19   ;;  %s878_s15 = smov %s719_s17 }
  0x63   : > { %p12_p9 = scmp.ge.s32.totalorder %s15_s19, 10   ;;  %s879_s16 = smov %s723_s18 }
  0x64   : > { %s880_s17 = smov %s883_s20  ;;  %s881_s18 = smov %s887_s21 }
  0x65   :  { %14 = sbr.rel (!%p12_p9) target bundleno = 3 (0x3), region = 82 }

// kernel: forward.19
= control target key start
LH: loop header
LB: loop body
LE: loop exit
PB: predicated region body
PF: predicated region fallthrough
CT: control target
= control target key end

     0   :  { %s1068_s27 = smov 0   ;;  %s1070_s28 = smov 0   ;;  %s1175_s0 = inlined_call_operand.vmem [shape: bf16[2,64,96], index: 0, kind: input, shape index: {}]   ;;  %s1176_s1 = inlined_call_operand.vmem [shape: f32[2,1,96], index: 1, kind: input, shape index: {}]   ;;  %s1177_s2 = inlined_call_operand.vmem [shape: bf16[96,4], index: 2, kind: input, shape index: {}]   ;;  %s1178_s3 = inlined_call_operand.vmem [shape: f32[1,4], index: 3, kind: input, shape index: {}]   ;;  %s1179_s4 = inlined_call_operand.vmem [shape: bf16[4,96], index: 4, kind: input, shape index: {}]   ;;  %s1180_s5 = inlined_call_operand.vmem [shape: f32[1,96], index: 5, kind: input, shape index: {}]   ;;  %s1181_s6 = inlined_call_operand.vmem [shape: bf16[96,24], index: 6, kind: input, shape index: {}]   ;;  %s1182_s7 = inlined_call_operand.vmem [shape: f32[1,24], index: 7, kind: input, shape index: {}]   ;;  %s1183_s8 = inlined_call_operand.vmem [shape: bf16[2,64,24], index: 8, kind: output, shape index: {}]  }
   0x1   :  { %s1072_s29 = smov 0  }
   0x2 LB: > { %s30_s30 = sadd.s32 1, %s1015_s28  ;;  %p825_p0 = scmp.ge.s32.totalorder %s1019_s29, 1  ;;  %s1019_s29 = sphi %s1072_s29, %s18_s29   ;;  %s1015_s28 = sphi %s1070_s28, %s1185_s28   ;;  %s1011_s27 = sphi %s1068_s27, %s1184_s27  }
   0x3   : > { %p32_p1 = scmp.ge.s32.totalorder %s30_s30, 2  ;;  %p291_p2 = scmp.lt.s32.totalorder %s1019_s29, 3 }
   0x5   : > { %s1187_s30 = smov (%p32_p1, %s30_s30), 0  ;;  %p292_p3 = pnand %p825_p0, %p291_p2 }
   0x6   : > { %v977_v0 = vld [vmem:[%s1177_s2] sm:$0xff] (!%p292_p3)   ;;  %v1021_v1 = vmov (!%p292_p3), 0.0   ;;  %v978_v2 = vld [vmem:[%s1177_s2 + $0x8] sm:$0xff] (!%p292_p3)   ;;  %vm1022_vm0 = vmmov (!%p292_p3), 0   ;;  %p337_p4 = scmp.lt.s32.totalorder (!%p292_p3), %s1011_s27, 1  ;;  %v979_v3 = vld [vmem:[%s1177_s2 + $0x10] sm:$0xff] (!%p292_p3)   ;;  %v536_v39 = vlaneseq (!%p292_p3) }
   0x7   : > { %295 = sbr.rel (%p292_p3) target bundleno = 750 (0x2ee), region = 52  ;;  %909 = vmatprep.subr.bf16.mxu0 (!%p292_p3), %v1021_v1  ;;  %921 = vmatprep.mubr.msk.bf16.mxu0 (!%p292_p3), %vm1022_vm0, %v1021_v1  ;;  %v980_v4 = vld [vmem:[%s1177_s2 + $0x18] sm:$0xff] (!%p292_p3)   ;;  %v981_v5 = vld [vmem:[%s1177_s2 + $0x20] sm:$0xff] (!%p292_p3)   ;;  %v982_v8 = vld [vmem:[%s1177_s2 + $0x28] sm:$0xff] (!%p292_p3)   ;;  %vm412_vm1 = vcmask (!%p292_p3), 785408   ;;  %vm470_vm2 = vcmask (!%p292_p3), 1041408  }
   0x8   : > { %910 = vmatpush3.bf16.msra.mxu0 (!%p292_p3), %v977_v0  ;;  %v464_v10 = vld [vmem:[%s1179_s4] sm:$0x3] (!%p292_p3)  ;;  %vm466_vm3 = vcmask (!%p292_p3), 31744   ;;  %v984_v25 = vld [vmem:[%s1181_s6 + $0x8] sm:$0xff] (!%p292_p3)   ;;  %v985_v26 = vld [vmem:[%s1181_s6 + $0x10] sm:$0xff] (!%p292_p3)   ;;  %v537_v40 = vshrl.u32 (!%p292_p3), %v536_v39, 7 }
   0x9   : > { %911 = vmatprep.subr.bf16.mxu0 (!%p292_p3), %v1021_v1  ;;  %v472_v11 = vsel (!%p292_p3), %vm470_vm2, %v464_v10, 0  ;;  %v375_v12 = vld [vmem:[%s1178_s3] sm:$0x1] (!%p292_p3)  ;;  %v986_v27 = vld [vmem:[%s1181_s6 + $0x18] sm:$0xff] (!%p292_p3)   ;;  %v988_v29 = vld [vmem:[%s1181_s6 + $0x28] sm:$0xff] (!%p292_p3)   ;;  %vm716_vm4 = vcmask (!%p292_p3), 191488  }
   0xa   : > { %v983_v24 = vld [vmem:[%s1181_s6] sm:$0xff] (!%p292_p3)   ;;  %v538_v43 = vsub.s32 (!%p292_p3), 0, %v537_v40 }
   0xb   : > { %931 = vmatprep.subr.bf16.mxu1 (!%p292_p3), %v983_v24  ;;  %v987_v28 = vld [vmem:[%s1181_s6 + $0x20] sm:$0xff] (!%p292_p3)  }
   0xc   : > { %912 = vmatpush3.bf16.msra.mxu0 (!%p292_p3), %v978_v2  ;;  %932 = vmatpush3.bf16.msra.mxu1 (!%p292_p3), %v983_v24  ;;  %v465_v30 = vld [vmem:[%s1180_s5] sm:$0x1] (!%p292_p3) }
   0xd   : > { %913 = vmatprep.subr.bf16.mxu0 (!%p292_p3), %v1021_v1  ;;  %933 = vmatprep.subr.bf16.mxu1 (!%p292_p3), %v984_v25 }
   0xe   : > { %s1189_s27 = smov (!%p337_p4, %s1011_s27), 1 }
   0xf   : > { %s348_s19 = scalar_lea.vmem %s1176_s1, %s1189_s27  ;;  %s861_s24 = sshll.u32 %s1189_s27, 5 }
  0x10   : > { %914 = vmatpush3.bf16.msra.mxu0 %v979_v3  ;;  %v360_v6 = vld [vmem:[%s348_s19] sm:$0x1]  ;;  %934 = vmatpush3.bf16.msra.mxu1 %v984_v25  ;;  %s344_s9 = scalar_lea.vmem %s1175_s0, %s861_s24  ;;  %s357_s14 = scalar_lea.vmem %s1183_s8, %s861_s24 }
  0x11   : > { %915 = vmatprep.subr.bf16.mxu0 %v1021_v1  ;;  %v361_v7 = vmul.f32 0.015625, %v360_v6  ;;  %935 = vmatprep.subr.bf16.mxu1 %v985_v26  ;;  %v872_v41 = vld [vmem:[%s344_s9] sm:$0xff]   ;;  %v887_v42 = vld [vmem:[%s344_s9 + $0x8] sm:$0xff]   ;;  %v888_v44 = vld [vmem:[%s344_s9 + $0x10] sm:$0xff]  }
  0x12   : > { %v873_v45 = vunpack.c.l.bf16 %v872_v41  ;;  %v874_v46 = vunpack.c.h.bf16 %v872_v41  ;;  %v877_v47 = vunpack.c.l.bf16 %v887_v42  ;;  %v878_v48 = vunpack.c.h.bf16 %v887_v42  ;;  %v889_v57 = vld [vmem:[%s344_s9 + $0x18] sm:$0xff]  }
  0x13   : > { %v362_v9 = vpack.c.bf16 %v361_v7, %v361_v7  ;;  %v881_v50 = vunpack.c.l.bf16 %v888_v44  ;;  %v882_v51 = vunpack.c.h.bf16 %v888_v44  ;;  %v885_v62 = vunpack.c.l.bf16 %v889_v57 }
  0x14   : > { %916 = vmatpush3.bf16.msra.mxu0 %v980_v4  ;;  %936 = vmatpush3.bf16.msra.mxu1 %v985_v26  ;;  %v886_v63 = vunpack.c.h.bf16 %v889_v57  ;;  %v840_v4 = vld [vmem:[%s1182_s7] ss:$0 sm:$0xff] }
  0x15   : > { %917 = vmatprep.subr.bf16.mxu0 %v1021_v1  ;;  %937 = vmatprep.subr.bf16.mxu1 %v986_v27 }
  0x18   : > { %918 = vmatpush3.bf16.msra.mxu0 %v981_v5  ;;  %938 = vmatpush3.bf16.msra.mxu1 %v986_v27 }
  0x19   : > { %919 = vmatprep.subr.bf16.mxu0 %v1021_v1  ;;  %939 = vmatprep.subr.bf16.mxu1 %v987_v28 }
  0x1c   : > { %920 = vmatpush3.bf16.msra.mxu0 %v982_v8  ;;  %940 = vmatpush3.bf16.msra.mxu1 %v987_v28 }
  0x1d   : > { %925 = vmatprep.subr.bf16.mxu0 %v1021_v1  ;;  %941 = vmatprep.subr.bf16.mxu1 %v988_v29 }
  0x1f   : > { %922 = vmatmul.mubr.msk.bf16.vlgmr.msra.gmra.mrb[0].mxu0 %vm412_vm1, %v362_v9 }
  0x20   : > { %927 = vmatprep.mubr.msk.bf16.mxu0 %vm1022_vm0, %v1021_v1  ;;  %926 = vmatpush3.bf16.msra.mxu0 %v472_v11 }
  0x21   : > { %942 = vmatpush3.bf16.msra.mxu1 %v988_v29 }
  0xf2   : > { %v450_v13 = vpop.f32.mrb[0].mxu0 }
  0xf3   : > { %v451_v14 = vadd.f32 %v450_v13, %v375_v12  ;;  %v923_v15 = vpop.f32.mrb[1].mxu0 }
  0xf4   : > { %v453_v16 = vpop.f32.mrb[2].mxu0 }
  0xf5   : > { %v837_v17 = vmul.f32 -1.442695, %v451_v14  ;;  %v924_v18 = vpop.f32.mrb[3].mxu0 }
  0xf7   : > { %989 = vpow2.f32 %v837_v17 }
 0x101   : > { %v990_v19 = vpop.eup %989 }
 0x102   : > { %v459_v20 = vadd.f32 1.0, %v990_v19 }
 0x104   : > { %991 = vrcp.f32 %v459_v20 }
 0x10e   : > { %v992_v21 = vpop.eup %991 }
 0x10f   : > { %v462_v22 = vmul.f32 %v992_v21, %v451_v14 }
 0x111   : > { %v463_v23 = vpack.c.bf16 %v462_v22, %v462_v22 }
 0x113   : > { %928 = vmatmul.mubr.msk.bf16.vlgmr.msra.gmra.mrb[4].mxu0 %vm466_vm3, %v463_v23 }
 0x1e6   : > { %v508_v31 = vpop.f32.mrb[4].mxu0 }
 0x1e7   : > { %v509_v32 = vadd.f32 %v508_v31, %v465_v30  ;;  %v929_v33 = vpop.f32.mrb[5].mxu0 }
 0x1e8   : > { %v511_v34 = vpop.f32.mrb[6].mxu0 }
 0x1e9   : > { %v839_v35 = vmul.f32 -1.442695, %v509_v32  ;;  %v930_v36 = vpop.f32.mrb[7].mxu0 }
 0x1eb   : > { %993 = vpow2.f32 %v839_v35 }
 0x1f5   : > { %v994_v37 = vpop.eup %993 }
 0x1f6   : > { %v517_v38 = vadd.f32 1.0, %v994_v37 }
 0x1f8   : > { %995 = vrcp.f32 %v517_v38 }
 0x202   : > { %v996_v49 = vpop.eup %995 }
 0x203   : > { %v539_v52 = vrot.slane %v996_v49, %v538_v43 }
 0x205   : > { %v540_v53 = vmul.f32 %v873_v45, %v539_v52  ;;  %v541_v54 = vmul.f32 %v874_v46, %v539_v52  ;;  %v542_v55 = vmul.f32 %v877_v47, %v539_v52  ;;  %v543_v56 = vmul.f32 %v878_v48, %v539_v52 }
 0x206   : > { %v544_v58 = vmul.f32 %v881_v50, %v539_v52  ;;  %v545_v59 = vmul.f32 %v882_v51, %v539_v52  ;;  %v546_v1 = vmul.f32 %v885_v62, %v539_v52  ;;  %v547_v2 = vmul.f32 %v886_v63, %v539_v52 }
 0x207   : > { %v548_v60 = vpack.c.bf16 %v541_v54, %v540_v53  ;;  %v549_v61 = vpack.c.bf16 %v543_v56, %v542_v55 }
 0x208   : > { %v550_v0 = vpack.c.bf16 %v545_v59, %v544_v58  ;;  %v551_v3 = vpack.c.bf16 %v547_v2, %v546_v1 }
 0x209   : > { %943 = vmatprep.mubr.msk.bf16.mxu1 %vm412_vm1, %v548_v60 }
 0x20a   : > { %944 = vmatmul.mubr.msk.bf16.vlgmr.msra.gmra.mrb[0].mxu1 %vm412_vm1, %v549_v61 }
 0x20b   : > { %947 = vmatprep.mubr.msk.bf16.mxu1 %vm412_vm1, %v550_v0 }
 0x212   : > { %948 = vmatmul.mubr.msk.bf16.gmra.mrb[4].mxu1 %vm412_vm1, %v551_v3 }
 0x2dd   : > { %v945_v5 = vpop.f32.mrb[0].mxu1 }
 0x2de   : > { %v662_v6 = vadd.f32 %v945_v5, %v840_v4  ;;  %v653_v7 = vpop.f32.mrb[1].mxu1 }
 0x2df   : > { %v654_v8 = vadd.f32 %v840_v4, %v653_v7  ;;  %v946_v9 = vpop.f32.mrb[2].mxu1 }
 0x2e0   : > { %v865_v10 = vpack.c.bf16 %v662_v6, %v662_v6  ;;  %v665_v11 = vadd.f32 %v946_v9, %v840_v4  ;;  %v656_v12 = vpop.f32.mrb[3].mxu1 }
 0x2e1   : > { %v863_v13 = vpack.c.bf16 %v654_v8, %v654_v8  ;;  %v657_v14 = vadd.f32 %v840_v4, %v656_v12 }
 0x2e2   : > { %719 = vst.msk [vmem:[%s357_s14 + $0x8] sm:$0xf] %vm716_vm4, %v865_v10  ;;  %v866_v15 = vpack.c.bf16 %v665_v11, %v665_v11 }
 0x2e3   : > { %717 = vst.msk [vmem:[%s357_s14] sm:$0xf] %vm716_vm4, %v863_v13  ;;  %v864_v16 = vpack.c.bf16 %v657_v14, %v657_v14 }
 0x2e4   : > { %720 = vst.msk [vmem:[%s357_s14 + $0xc] sm:$0xf] %vm716_vm4, %v866_v15 }
 0x2e5   : > { %718 = vst.msk [vmem:[%s357_s14 + $0x4] sm:$0xf] %vm716_vm4, %v864_v16  ;;  %v949_v17 = vpop.f32.mrb[4].mxu1 }
 0x2e6   : > { %v678_v18 = vadd.f32 %v949_v17, %v840_v4  ;;  %v669_v19 = vpop.f32.mrb[5].mxu1 }
 0x2e7   : > { %v670_v20 = vadd.f32 %v840_v4, %v669_v19  ;;  %v950_v21 = vpop.f32.mrb[6].mxu1 }
 0x2e8   : > { %v869_v22 = vpack.c.bf16 %v678_v18, %v678_v18  ;;  %v681_v23 = vadd.f32 %v950_v21, %v840_v4  ;;  %v672_v24 = vpop.f32.mrb[7].mxu1 }
 0x2e9   : > { %v867_v25 = vpack.c.bf16 %v670_v20, %v670_v20  ;;  %v673_v26 = vadd.f32 %v840_v4, %v672_v24 }
 0x2ea   : > { %723 = vst.msk [vmem:[%s357_s14 + $0x18] sm:$0xf] %vm716_vm4, %v869_v22  ;;  %v870_v27 = vpack.c.bf16 %v681_v23, %v681_v23 }
 0x2eb   : > { %721 = vst.msk [vmem:[%s357_s14 + $0x10] sm:$0xf] %vm716_vm4, %v867_v25  ;;  %v868_v28 = vpack.c.bf16 %v673_v26, %v673_v26 }
 0x2ec   : > { %724 = vst.msk [vmem:[%s357_s14 + $0x1c] sm:$0xf] %vm716_vm4, %v870_v27 }
 0x2ed   : > { %722 = vst.msk [vmem:[%s357_s14 + $0x14] sm:$0xf] %vm716_vm4, %v868_v28 }
 0x2ee PF: > { %s18_s29 = sadd.s32 1, %s1019_s29   ;;  %s1184_s27 = smov %s1015_s28 }
 0x2ef   : > { %p15_p5 = scmp.ge.s32.totalorder %s18_s29, 4   ;;  %s1185_s28 = smov %s1187_s30 }
 0x2f1   :  { %17 = sbr.rel (!%p15_p5) target bundleno = 2 (0x2), region = 85 }

// kernel: forward.20
= control target key start
LH: loop header
LB: loop body
LE: loop exit
PB: predicated region body
PF: predicated region fallthrough
CT: control target
= control target key end

     0   :  { %s729_s12 = smov 0   ;;  %s880_s0 = inlined_call_operand.vmem [shape: bf16[128,24], index: 0, kind: input, shape index: {}]   ;;  %s881_s1 = inlined_call_operand.vmem [shape: bf16[24,144], index: 1, kind: input, shape index: {}]   ;;  %s882_s2 = inlined_call_operand.vmem [shape: f32[1,144], index: 2, kind: input, shape index: {}]   ;;  %s883_s3 = inlined_call_operand.vmem [shape: bf16[128,144], index: 3, kind: output, shape index: {}]  }
   0x1 LB: > { %s556_s13 = sadd.s32 4294967295, %s706_s12   ;;  %p560_p0 = scmp.ge.s32.totalorder %s706_s12, 1  ;;  %s706_s12 = sphi %s729_s12, %s13_s12  }
   0x2   : > { %p138_p1 = scmp.lt.s32.totalorder %s706_s12, 3 }
   0x4   : > { %p139_p2 = pnand %p560_p0, %p138_p1 }
   0x5   : > { %v627_v0 = vld [vmem:[%s881_s1 + $0x4] ss:$8 sps:$4 sm:$0xff] (!%p139_p2)   ;;  %v629_v1 = vld [vmem:[%s881_s1] ss:$8 sps:$4 sm:$0xff] (!%p139_p2)   ;;  %v187_v2 = vld [vmem:[%s881_s1 + $0x10] sm:$0xff] (!%p139_p2)  ;;  %vm248_vm0 = vcmask (!%p139_p2), 1043456   ;;  %v190_v11 = vlaneseq (!%p139_p2) }
   0x6   : > { %142 = sbr.rel (%p139_p2) target bundleno = 289 (0x121), region = 32  ;;  %s561_s20 = sshll.u32 (!%p139_p2), %s556_s13, 3  ;;  %255 = vmatprep.subr.bf16.mxu0 (!%p139_p2), %v627_v0  ;;  %614 = vmatprep.subr.bf16.mxu1 (!%p139_p2), %v627_v0  ;;  %v573_v3 = vcombine.high (!%p139_p2), %v187_v2, %v187_v2  ;;  %v572_v4 = vcombine.low (!%p139_p2), %v187_v2, %v187_v2  ;;  %v708_v6 = vmov (!%p139_p2), 0   ;;  %vm235_vm1 = vcmask (!%p139_p2), 195584   ;;  %v188_v14 = vld [vmem:[%s882_s2] sm:$0x3] (!%p139_p2) }
   0x7   : > { %p164_p3 = scmp.lt.s32.totalorder (!%p139_p2), %s561_s20, 15  ;;  %256 = vmatpush1.bf16.msra.mxu0 (!%p139_p2), %v629_v1  ;;  %616 = vmatpush1.bf16.msra.mxu1 (!%p139_p2), %v629_v1  ;;  %v191_v12 = vshrl.u32 (!%p139_p2), %v190_v11, 7  ;;  %vm488_vm2 = vcmask (!%p139_p2), 130052  }
   0x8   : > { %574 = vmatprep.subr.msk.bf16.mxu0 (!%p139_p2), %vm248_vm0, %v573_v3  ;;  %615 = vmatprep.subr.msk.bf16.mxu1 (!%p139_p2), %vm248_vm0, %v573_v3  ;;  %v250_v5 = vsel (!%p139_p2), %vm248_vm0, %v572_v4, 0  ;;  %vm831_vm3 = vmor (!%p139_p2), %vm488_vm2, %vm248_vm0 }
   0x9   : > { %287 = vmatprep.mubr.bf16.mxu0 (!%p139_p2), %v708_v6  ;;  %307 = vmatprep.mubr.bf16.mxu1 (!%p139_p2), %v708_v6  ;;  %v192_v13 = vsub.s32 (!%p139_p2), 0, %v191_v12  ;;  %v196_v15 = vsub.s32 (!%p139_p2), 1, %v191_v12 }
   0xb   : > { %258 = vmatpush1.bf16.msra.mxu0 (!%p139_p2), %v250_v5  ;;  %617 = vmatpush1.bf16.msra.mxu1 (!%p139_p2), %v250_v5  ;;  %v758_v16 = vrot.slane (!%p139_p2), %v188_v14, %v192_v13  ;;  %v760_v17 = vrot.slane (!%p139_p2), %v188_v14, %v196_v15 }
   0xd   : > { %s887_s20 = smov (!%p164_p3, %s561_s20), 15 }
   0xe   : > { %s562_s21 = sshll.u32 %s887_s20, 2  ;;  %s605_s27 = sshll.u32 %s887_s20, 3 }
   0xf   : > { %s167_s24 = scalar_lea.vmem %s880_s0, %s562_s21  ;;  %s838_s30 = scalar_lea.vmem %s883_s3, %s605_s27 }
  0x10   : > { %v632_v7 = vld [vmem:[%s167_s24] sm:$0xff]   ;;  %v633_v8 = vld [vmem:[%s167_s24 + $0x10] sm:$0xff]   ;;  %v634_v9 = vld [vmem:[%s167_s24 + $0x8] sm:$0xff]  }
  0x11   : > { %575 = vmatmul.mubr.msk.bf16.vlgmr.msra.gmra.mrb[0].mxu0 %vm235_vm1, %v632_v7  ;;  %577 = vmatmul.mubr.msk.bf16.vlgmr.msra.gmra.mrb[0].mxu1 %vm235_vm1, %v633_v8  ;;  %v635_v10 = vld [vmem:[%s167_s24 + $0x18] sm:$0xff]  }
  0x12   : > { %297 = vmatprep.mubr.bf16.mxu0 %v708_v6  ;;  %317 = vmatprep.mubr.bf16.mxu1 %v708_v6 }
  0x19   : > { %576 = vmatmul.mubr.msk.bf16.gmra.mrb[4].mxu0 %vm235_vm1, %v634_v9  ;;  %578 = vmatmul.mubr.msk.bf16.gmra.mrb[4].mxu1 %vm235_vm1, %v635_v10 }
  0xe4   : > { %v289_v18 = vpop.f32.mrb[0].mxu0  ;;  %v309_v20 = vpop.f32.mrb[0].mxu1 }
  0xe5   : > { %v763_v19 = vadd.f32 %v289_v18, %v758_v16  ;;  %v291_v21 = vpop.f32.mrb[1].mxu0  ;;  %v766_v22 = vadd.f32 %v309_v20, %v758_v16  ;;  %v311_v24 = vpop.f32.mrb[1].mxu1 }
  0xe6   : > { %v769_v23 = vadd.f32 %v291_v21, %v760_v17  ;;  %v293_v25 = vpop.f32.mrb[2].mxu0  ;;  %v773_v27 = vadd.f32 %v311_v24, %v760_v17  ;;  %v313_v29 = vpop.f32.mrb[2].mxu1 }
  0xe7   : > { %v579_v26 = vmul.f32 -1.442695, %v763_v19  ;;  %v776_v28 = vadd.f32 %v293_v25, %v758_v16  ;;  %v295_v30 = vpop.f32.mrb[3].mxu0  ;;  %v587_v31 = vmul.f32 -1.442695, %v766_v22  ;;  %v781_v33 = vadd.f32 %v313_v29, %v758_v16  ;;  %v315_v35 = vpop.f32.mrb[3].mxu1 }
  0xe8   : > { %v580_v32 = vmul.f32 -1.442695, %v769_v23  ;;  %v784_v34 = vadd.f32 %v295_v30, %v760_v17  ;;  %v588_v36 = vmul.f32 -1.442695, %v773_v27  ;;  %v789_v38 = vadd.f32 %v315_v35, %v760_v17 }
  0xe9   : > { %636 = vpow2.f32 %v579_v26  ;;  %v581_v37 = vmul.f32 -1.442695, %v776_v28  ;;  %v589_v39 = vmul.f32 -1.442695, %v781_v33 }
  0xea   : > { %638 = vpow2.f32 %v587_v31  ;;  %v582_v40 = vmul.f32 -1.442695, %v784_v34  ;;  %v590_v41 = vmul.f32 -1.442695, %v789_v38 }
  0xeb   : > { %640 = vpow2.f32 %v580_v32 }
  0xec   : > { %642 = vpow2.f32 %v588_v36  ;;  %v299_v42 = vpop.f32.mrb[4].mxu0  ;;  %v319_v44 = vpop.f32.mrb[4].mxu1 }
  0xed   : > { %644 = vpow2.f32 %v581_v37  ;;  %v795_v43 = vadd.f32 %v299_v42, %v758_v16  ;;  %v301_v45 = vpop.f32.mrb[5].mxu0  ;;  %v798_v46 = vadd.f32 %v319_v44, %v758_v16  ;;  %v321_v48 = vpop.f32.mrb[5].mxu1 }
  0xee   : > { %646 = vpow2.f32 %v589_v39  ;;  %v801_v47 = vadd.f32 %v301_v45, %v760_v17  ;;  %v303_v49 = vpop.f32.mrb[6].mxu0  ;;  %v805_v51 = vadd.f32 %v321_v48, %v760_v17  ;;  %v323_v53 = vpop.f32.mrb[6].mxu1 }
  0xef   : > { %648 = vpow2.f32 %v582_v40  ;;  %v583_v50 = vmul.f32 -1.442695, %v795_v43  ;;  %v808_v52 = vadd.f32 %v303_v49, %v758_v16  ;;  %v305_v54 = vpop.f32.mrb[7].mxu0  ;;  %v591_v55 = vmul.f32 -1.442695, %v798_v46  ;;  %v325_v57 = vpop.f32.mrb[7].mxu1 }
  0xf0   : > { %650 = vpow2.f32 %v590_v41  ;;  %v584_v56 = vmul.f32 -1.442695, %v801_v47  ;;  %v592_v58 = vmul.f32 -1.442695, %v805_v51  ;;  %v815_v13 = vadd.f32 %v323_v53, %v758_v16 }
  0xf1   : > { %652 = vpow2.f32 %v583_v50  ;;  %v585_v59 = vmul.f32 -1.442695, %v808_v52  ;;  %v818_v18 = vadd.f32 %v305_v54, %v760_v17  ;;  %v821_v24 = vadd.f32 %v325_v57, %v760_v17 }
  0xf2   : > { %654 = vpow2.f32 %v591_v55  ;;  %v593_v30 = vmul.f32 -1.442695, %v815_v13 }
  0xf3   : > { %v637_v60 = vpop.eup %636  ;;  %656 = vpow2.f32 %v584_v56  ;;  %v586_v32 = vmul.f32 -1.442695, %v818_v18  ;;  %v594_v17 = vmul.f32 -1.442695, %v821_v24 }
  0xf4   : > { %v639_v61 = vpop.eup %638  ;;  %v376_v62 = vadd.f32 1.0, %v637_v60  ;;  %658 = vpow2.f32 %v592_v58 }
  0xf5   : > { %v641_v63 = vpop.eup %640  ;;  %v384_v0 = vadd.f32 1.0, %v639_v61  ;;  %660 = vpow2.f32 %v585_v59 }
  0xf6   : > { %v643_v1 = vpop.eup %642  ;;  %662 = vrcp.f32 %v376_v62  ;;  %v377_v2 = vadd.f32 1.0, %v641_v63 }
  0xf7   : > { %v645_v3 = vpop.eup %644  ;;  %664 = vrcp.f32 %v384_v0  ;;  %v385_v4 = vadd.f32 1.0, %v643_v1 }
  0xf8   : > { %v647_v5 = vpop.eup %646  ;;  %666 = vrcp.f32 %v377_v2  ;;  %v378_v6 = vadd.f32 1.0, %v645_v3 }
  0xf9   : > { %v649_v7 = vpop.eup %648  ;;  %668 = vrcp.f32 %v385_v4  ;;  %v386_v8 = vadd.f32 1.0, %v647_v5 }
  0xfa   : > { %v651_v9 = vpop.eup %650  ;;  %670 = vrcp.f32 %v378_v6  ;;  %v379_v10 = vadd.f32 1.0, %v649_v7 }
  0xfb   : > { %v653_v11 = vpop.eup %652  ;;  %672 = vrcp.f32 %v386_v8  ;;  %v387_v12 = vadd.f32 1.0, %v651_v9 }
  0xfc   : > { %v655_v14 = vpop.eup %654  ;;  %674 = vrcp.f32 %v379_v10  ;;  %v380_v15 = vadd.f32 1.0, %v653_v11 }
  0xfd   : > { %v657_v20 = vpop.eup %656  ;;  %676 = vrcp.f32 %v387_v12  ;;  %v388_v21 = vadd.f32 1.0, %v655_v14 }
  0xfe   : > { %v659_v25 = vpop.eup %658  ;;  %678 = vrcp.f32 %v380_v15  ;;  %v381_v26 = vadd.f32 1.0, %v657_v20 }
  0xff   : > { %v661_v29 = vpop.eup %660  ;;  %680 = vrcp.f32 %v388_v21  ;;  %v389_v16 = vadd.f32 1.0, %v659_v25 }
 0x100   : > { %v663_v31 = vpop.eup %662  ;;  %682 = vrcp.f32 %v381_v26  ;;  %v382_v58 = vadd.f32 1.0, %v661_v29 }
 0x101   : > { %v665_v35 = vpop.eup %664  ;;  %v424_v36 = vmul.f32 %v663_v31, %v763_v19  ;;  %684 = vrcp.f32 %v389_v16 }
 0x102   : > { %v667_v37 = vpop.eup %666  ;;  %v432_v39 = vmul.f32 %v665_v35, %v766_v22  ;;  %686 = vpow2.f32 %v593_v30 }
 0x103   : > { %v669_v40 = vpop.eup %668  ;;  %v425_v41 = vmul.f32 %v667_v37, %v769_v23  ;;  %688 = vpow2.f32 %v586_v32 }
 0x104   : > { %v671_v42 = vpop.eup %670  ;;  %v433_v19 = vmul.f32 %v669_v40, %v773_v27  ;;  %690 = vpow2.f32 %v594_v17 }
 0x105   : > { %v673_v22 = vpop.eup %672  ;;  %v606_v45 = vpack.c.bf16 %v425_v41, %v424_v36  ;;  %v426_v23 = vmul.f32 %v671_v42, %v776_v28  ;;  %692 = vrcp.f32 %v382_v58 }
 0x106   : > { %v675_v48 = vpop.eup %674  ;;  %v610_v49 = vpack.c.bf16 %v433_v19, %v432_v39  ;;  %v434_v50 = vmul.f32 %v673_v22, %v781_v33 }
 0x107   : > { %v677_v53 = vpop.eup %676  ;;  %490 = vst.msk [vmem:[%s838_s30] sm:$0xff] %vm831_vm3, %v606_v45  ;;  %v427_v54 = vmul.f32 %v675_v48, %v784_v34 }
 0x108   : > { %v679_v55 = vpop.eup %678  ;;  %494 = vst.msk [vmem:[%s838_s30 + $0x20] sm:$0xff] %vm831_vm3, %v610_v49  ;;  %v435_v27 = vmul.f32 %v677_v53, %v789_v38 }
 0x109   : > { %v681_v28 = vpop.eup %680  ;;  %v607_v56 = vpack.c.bf16 %v427_v54, %v426_v23  ;;  %v428_v57 = vmul.f32 %v679_v55, %v795_v43 }
 0x10a   : > { %v683_v33 = vpop.eup %682  ;;  %v611_v59 = vpack.c.bf16 %v435_v27, %v434_v50  ;;  %v436_v60 = vmul.f32 %v681_v28, %v798_v46 }
 0x10b   : > { %v685_v61 = vpop.eup %684  ;;  %491 = vst.msk [vmem:[%s838_s30 + $0x8] sm:$0xff] %vm831_vm3, %v607_v56  ;;  %v429_v34 = vmul.f32 %v683_v33, %v801_v47 }
 0x10c   : > { %495 = vst.msk [vmem:[%s838_s30 + $0x28] sm:$0xff] %vm831_vm3, %v611_v59  ;;  %v437_v38 = vmul.f32 %v685_v61, %v805_v51  ;;  %v687_v62 = vpop.eup %686 }
 0x10d   : > { %v608_v43 = vpack.c.bf16 %v429_v34, %v428_v57  ;;  %v689_v63 = vpop.eup %688  ;;  %v390_v1 = vadd.f32 1.0, %v687_v62 }
 0x10e   : > { %v612_v0 = vpack.c.bf16 %v437_v38, %v436_v60  ;;  %v691_v2 = vpop.eup %690  ;;  %v383_v46 = vadd.f32 1.0, %v689_v63 }
 0x10f   : > { %492 = vst.msk [vmem:[%s838_s30 + $0x10] sm:$0xff] %vm831_vm3, %v608_v43  ;;  %694 = vrcp.f32 %v390_v1  ;;  %v391_v47 = vadd.f32 1.0, %v691_v2  ;;  %v693_v51 = vpop.eup %692 }
 0x110   : > { %496 = vst.msk [vmem:[%s838_s30 + $0x30] sm:$0xff] %vm831_vm3, %v612_v0  ;;  %696 = vrcp.f32 %v383_v46  ;;  %v430_v4 = vmul.f32 %v693_v51, %v808_v52 }
 0x111   : > { %698 = vrcp.f32 %v391_v47 }
 0x119   : > { %v695_v3 = vpop.eup %694 }
 0x11a   : > { %v697_v5 = vpop.eup %696  ;;  %v438_v6 = vmul.f32 %v695_v3, %v815_v13 }
 0x11b   : > { %v699_v7 = vpop.eup %698  ;;  %v431_v8 = vmul.f32 %v697_v5, %v818_v18 }
 0x11c   : > { %v439_v9 = vmul.f32 %v699_v7, %v821_v24 }
 0x11d   : > { %v609_v10 = vpack.c.bf16 %v431_v8, %v430_v4 }
 0x11e   : > { %v613_v11 = vpack.c.bf16 %v439_v9, %v438_v6 }
 0x11f   : > { %493 = vst.msk [vmem:[%s838_s30 + $0x18] sm:$0xff] %vm831_vm3, %v609_v10 }
 0x120   : > { %497 = vst.msk [vmem:[%s838_s30 + $0x38] sm:$0xff] %vm831_vm3, %v613_v11 }
 0x121 PF: > { %s13_s12 = sadd.s32 1, %s706_s12  }
 0x122   : > { %p10_p4 = scmp.ge.s32.totalorder %s13_s12, 4  }
 0x124   :  { %12 = sbr.rel (!%p10_p4) target bundleno = 1 (0x1), region = 62 }

// kernel: forward.21
= control target key start
LH: loop header
LB: loop body
LE: loop exit
PB: predicated region body
PF: predicated region fallthrough
CT: control target
= control target key end

     0   :  { %s1336_s15 = smov 0   ;;  %s1338_s16 = smov 0   ;;  %s1815_s0 = inlined_call_operand.vmem [shape: bf16[2,10,10,144], index: 0, kind: input, shape index: {}]   ;;  %s1816_s1 = inlined_call_operand.vmem [shape: f32[9,1,1,144], index: 1, kind: input, shape index: {}]   ;;  %s1817_s2 = inlined_call_operand.vmem [shape: f32[1,144], index: 2, kind: input, shape index: {}]   ;;  %s1818_s3 = inlined_call_operand.vmem [shape: bf16[2,8,8,144], index: 3, kind: output, shape index: {0}]   ;;  %s1819_s4 = inlined_call_operand.vmem [shape: f32[2,1,144], index: 4, kind: output, shape index: {1}]  }
   0x1   :  { %s1340_s17 = smov 0   ;;  %s1342_s18 = smov 0  }
   0x2   :  { %s1344_s19 = smov 0  }
   0x3 LB: > { %s24_s20 = sadd.s32 1, %s1299_s17  ;;  %s27_s21 = sadd.s32 1, %s1303_s18  ;;  %s1307_s19 = sphi %s1344_s19, %s15_s19   ;;  %s1303_s18 = sphi %s1342_s18, %s1866_s18   ;;  %s1299_s17 = sphi %s1340_s17, %s1865_s17   ;;  %s1295_s16 = sphi %s1338_s16, %s1864_s16   ;;  %s1291_s15 = sphi %s1336_s15, %s1863_s15  }
   0x4   : > { %p25_p0 = scmp.ge.s32.totalorder %s24_s20, 2  ;;  %p1163_p1 = scmp.ge.s32.totalorder %s1307_s19, 1 }
   0x5   : > { %p179_p2 = scmp.lt.s32.totalorder %s1307_s19, 5 }
   0x6   : > { %s1868_s20 = smov (%p25_p0, %s24_s20), 0  ;;  %s1870_s21 = smov (!%p25_p0, %s27_s21), %s1303_s18 }
   0x7   : > { %p180_p3 = pnand %p1163_p1, %p179_p2  ;;  %p29_p4 = scmp.ge.s32.totalorder %s1870_s21, 2 }
   0x9   : > { %s1872_s21 = smov (%p29_p4, %s1870_s21), 0  ;;  %183 = sbr.rel (%p180_p3) target bundleno = 185 (0xb9), region = 32 }
  0x10   : > { %p214_p5 = scmp.lt.s32.totalorder %s1295_s16, 1  ;;  %v1820_v0 = vlaneseq  ;;  %v235_v2 = vld [vmem:[%s1816_s1] sm:$0x3]  ;;  %v236_v3 = vld [vmem:[%s1816_s1 + $0x2] sm:$0x3]  ;;  %s1189_s6 = sshll.u32 %s1291_s15, 6 }
  0x11   : > { %v237_v4 = vld [vmem:[%s1816_s1 + $0x4] sm:$0x3]  ;;  %v238_v5 = vld [vmem:[%s1816_s1 + $0x6] sm:$0x3]  ;;  %v239_v8 = vld [vmem:[%s1816_s1 + $0x8] sm:$0x3] }
  0x12   : > { %s1874_s16 = smov (!%p214_p5, %s1295_s16), 1  ;;  %v1371_v1 = vshrl.u32 %v1820_v0, 7  ;;  %v240_v9 = vld [vmem:[%s1816_s1 + $0xa] sm:$0x3]  ;;  %vm354_vm0 = vcmask 1046528   ;;  %vm438_vm1 = vcmask 1045504  }
  0x13   : > { %s1194_s24 = smul.u32 160, %s1874_s16  ;;  %s1169_s29 = sshll.u32 %s1874_s16, 1  ;;  %vm972_vm2 = vcmask 1043456   ;;  %vm973_vm3 = vcmask 130052  }
  0x14   : > { %1835 = vst [vmem:[#allocation2_spill] sm:$0xff] %v1371_v1  ;;  %v1389_v6 = vsub.s32 0, %v1371_v1  ;;  %v1392_v7 = vsub.s32 1, %v1371_v1  ;;  %s1406_s23 = scalar_lea.vmem %s1819_s4, %s1169_s29  ;;  %s1165_s7 = sshll.u32 %s1291_s15, 2  ;;  %vm1776_vm4 = vmor %vm973_vm3, %vm972_vm2 }
  0x15   : > { %s218_s9 = scalar_lea.vmem %s1815_s0, %s1194_s24  ;;  %p222_p6 = scmp.lt.s32.totalorder %s1165_s7, 7 }
  0x16   : > { %1836 = vst [vmem:[#allocation3_spill] sm:$0xff] %v1389_v6  ;;  %1837 = vst [vmem:[#allocation4_spill] sm:$0xff] %v1392_v7  ;;  %v288_v10 = vrot.slane %v235_v2, %v1389_v6  ;;  %v292_v11 = vrot.slane %v235_v2, %v1392_v7  ;;  %v1411_v12 = vrot.slane %v236_v3, %v1389_v6  ;;  %s247_s24 = scalar_lea.vmem %s218_s9, %s1189_s6  ;;  %s1167_s9 = sshll.u32 %s1874_s16, 4 }
  0x17   : > { %v1414_v13 = vrot.slane %v236_v3, %v1392_v7  ;;  %v1417_v14 = vrot.slane %v237_v4, %v1389_v6  ;;  %v1420_v15 = vrot.slane %v237_v4, %v1392_v7  ;;  %v1423_v16 = vrot.slane %v238_v5, %v1389_v6  ;;  %v248_v18 = vld [vmem:[%s247_s24] sm:$0xff]  ;;  %v1428_v19 = vld [vmem:[%s247_s24 + $0x8] sm:$0x11]  ;;  %v250_v20 = vld [vmem:[%s247_s24 + $0x10] sm:$0xff]  ;;  %s1876_s7 = smov (!%p222_p6, %s1165_s7), 7  ;;  %p1185_p7 = scmp.ne.s32.totalorder %s1291_s15, 0 }
  0x18   : > { %v1426_v17 = vrot.slane %v238_v5, %v1392_v7  ;;  %v1431_v21 = vrot.slane %v239_v8, %v1389_v6  ;;  %v1434_v22 = vrot.slane %v239_v8, %v1392_v7  ;;  %v1437_v23 = vrot.slane %v240_v9, %v1389_v6  ;;  %v251_v25 = vld [vmem:[%s247_s24 + $0x18] sm:$0x11]  ;;  %v252_v26 = vld [vmem:[%s247_s24 + $0x20] sm:$0xff]  ;;  %v253_v27 = vld [vmem:[%s247_s24 + $0x28] sm:$0x11]  ;;  %s1166_s8 = sshll.u32 %s1876_s7, 1 }
  0x19   : > { %v1440_v24 = vrot.slane %v240_v9, %v1392_v7  ;;  %v1442_v28 = vunpack.c.l.bf16 %v248_v18  ;;  %v1444_v29 = vunpack.c.h.bf16 %v248_v18  ;;  %v1822_v30 = vunpack.c.l.bf16 %v1428_v19  ;;  %v254_v32 = vld [vmem:[%s247_s24 + $0x30] sm:$0xff]  ;;  %v255_v33 = vld [vmem:[%s247_s24 + $0x38] sm:$0x11]  ;;  %v256_v34 = vld [vmem:[%s247_s24 + $0x40] sm:$0xff]  ;;  %s226_s10 = sadd.s32 %s1167_s9, %s1166_s8 }
  0x1a   : > { %1838 = vst [vmem:[#allocation5_spill] sm:$0xff] %v1437_v23  ;;  %v1821_v31 = vunpack.c.h.bf16 %v1428_v19  ;;  %v1448_v35 = vunpack.c.l.bf16 %v250_v20  ;;  %v1450_v36 = vunpack.c.h.bf16 %v250_v20  ;;  %v1452_v37 = vunpack.c.l.bf16 %v251_v25  ;;  %v257_v39 = vld [vmem:[%s247_s24 + $0x48] sm:$0x11]  ;;  %v258_v40 = vld [vmem:[%s247_s24 + $0x50] sm:$0xff]  ;;  %v1456_v41 = vld [vmem:[%s247_s24 + $0x58] sm:$0x11] }
  0x1b   : > { %1839 = vst [vmem:[#allocation6_spill] sm:$0xff] %v1440_v24  ;;  %v1454_v38 = vunpack.c.h.bf16 %v251_v25  ;;  %1840 = vst [vmem:[#allocation7_spill] sm:$0xff] %v1456_v41  ;;  %v1458_v42 = vunpack.c.l.bf16 %v252_v26  ;;  %v1460_v43 = vunpack.c.h.bf16 %v252_v26  ;;  %v1462_v44 = vunpack.c.l.bf16 %v253_v27  ;;  %s1168_s11 = sshll.u32 %s226_s10, 2 }
  0x1c   : > { %v1464_v45 = vunpack.c.h.bf16 %v253_v27  ;;  %v1466_v46 = vunpack.c.l.bf16 %v254_v32  ;;  %v1468_v47 = vunpack.c.h.bf16 %v254_v32  ;;  %v1470_v48 = vunpack.c.l.bf16 %v255_v33  ;;  %s228_s16 = scalar_lea.vmem %s1818_s3, %s1168_s11 }
  0x1d   : > { %v1472_v49 = vunpack.c.h.bf16 %v255_v33  ;;  %v1474_v50 = vunpack.c.l.bf16 %v256_v34  ;;  %v1476_v51 = vunpack.c.h.bf16 %v256_v34  ;;  %v1478_v52 = vunpack.c.l.bf16 %v257_v39 }
  0x1e   : > { %v1480_v53 = vunpack.c.h.bf16 %v257_v39  ;;  %v1482_v54 = vunpack.c.l.bf16 %v258_v40  ;;  %v1484_v55 = vunpack.c.h.bf16 %v258_v40  ;;  %v295_v58 = vmul.f32 %v288_v10, %v1442_v28 }
  0x1f   : > { %v296_v59 = vmul.f32 %v292_v11, %v1444_v29  ;;  %v297_v60 = vmul.f32 %v288_v10, %v1448_v35  ;;  %v298_v61 = vmul.f32 %v292_v11, %v1450_v36  ;;  %v299_v62 = vmul.f32 %v288_v10, %v1458_v42 }
  0x20   : > { %1841 = vst [vmem:[#allocation8_spill] sm:$0xff] %v1480_v53  ;;  %1842 = vst [vmem:[#allocation9_spill] sm:$0xff] %v1482_v54  ;;  %v300_v63 = vmul.f32 %v292_v11, %v1460_v43  ;;  %v301_v2 = vmul.f32 %v288_v10, %v1466_v46  ;;  %v302_v3 = vmul.f32 %v292_v11, %v1468_v47 }
  0x21   : > { %1843 = vst [vmem:[#allocation10_spill] sm:$0xff] %v1484_v55  ;;  %v322_v4 = vmul.f32 %v1411_v12, %v1442_v28  ;;  %v323_v5 = vmul.f32 %v1414_v13, %v1444_v29  ;;  %v324_v8 = vmul.f32 %v1411_v12, %v1822_v30  ;;  %v325_v9 = vmul.f32 %v1414_v13, %v1821_v31 }
  0x22   : > { %v326_v18 = vmul.f32 %v1411_v12, %v1448_v35  ;;  %v327_v10 = vmul.f32 %v1414_v13, %v1450_v36  ;;  %v328_v11 = vmul.f32 %v1411_v12, %v1452_v37  ;;  %v329_v20 = vmul.f32 %v1414_v13, %v1454_v38 }
  0x23   : > { %v330_v25 = vmul.f32 %v1411_v12, %v1458_v42  ;;  %v331_v26 = vmul.f32 %v1414_v13, %v1460_v43  ;;  %v332_v27 = vmul.f32 %v1411_v12, %v1462_v44  ;;  %v333_v32 = vmul.f32 %v1414_v13, %v1464_v45 }
  0x24   : > { %v334_v33 = vmul.f32 %v1411_v12, %v1466_v46  ;;  %v335_v34 = vmul.f32 %v1414_v13, %v1468_v47  ;;  %v336_v39 = vmul.f32 %v1411_v12, %v1470_v48  ;;  %v337_v40 = vmul.f32 %v1414_v13, %v1472_v49 }
  0x25   : > { %v355_v0 = vrot.slane %v322_v4, 1  ;;  %v356_v57 = vrot.slane %v324_v8, 1  ;;  %v358_v56 = vrot.slane %v323_v5, 1  ;;  %v359_v31 = vrot.slane %v325_v9, 1 }
  0x26   : > { %v361_v30 = vrot.slane %v326_v18, 1  ;;  %v362_v1 = vrot.slane %v328_v11, 1  ;;  %v364_v41 = vrot.slane %v327_v10, 1  ;;  %v365_v55 = vrot.slane %v329_v20, 1 }
  0x27   : > { %v357_v54 = vsel %vm354_vm0, %v355_v0, %v356_v57  ;;  %v360_v7 = vsel %vm354_vm0, %v358_v56, %v359_v31  ;;  %v367_v6 = vrot.slane %v330_v25, 1  ;;  %v368_v24 = vrot.slane %v332_v27, 1 }
  0x28   : > { %v363_v23 = vsel %vm354_vm0, %v361_v30, %v362_v1  ;;  %v366_v12 = vsel %vm354_vm0, %v364_v41, %v365_v55  ;;  %v370_v53 = vrot.slane %v331_v26, 1  ;;  %v371_v13 = vrot.slane %v333_v32, 1 }
  0x29   : > { %v369_v4 = vsel %vm354_vm0, %v367_v6, %v368_v24  ;;  %v373_v5 = vrot.slane %v334_v33, 1  ;;  %v374_v8 = vrot.slane %v336_v39, 1  ;;  %v376_v9 = vrot.slane %v335_v34, 1 }
  0x2a   : > { %v372_v18 = vsel %vm354_vm0, %v370_v53, %v371_v13  ;;  %v377_v10 = vrot.slane %v337_v40, 1  ;;  %v387_v0 = vadd.f32 %v357_v54, %v295_v58  ;;  %v388_v57 = vadd.f32 %v360_v7, %v296_v59 }
  0x2b   : > { %v375_v31 = vsel %vm354_vm0, %v373_v5, %v374_v8  ;;  %v389_v56 = vadd.f32 %v363_v23, %v297_v60  ;;  %v390_v11 = vadd.f32 %v366_v12, %v298_v61  ;;  %v391_v1 = vadd.f32 %v369_v4, %v299_v62 }
  0x2c   : > { %v378_v30 = vsel %vm354_vm0, %v376_v9, %v377_v10  ;;  %v392_v41 = vadd.f32 %v372_v18, %v300_v63  ;;  %v393_v55 = vadd.f32 %v375_v31, %v301_v2  ;;  %v406_v6 = vmul.f32 %v1417_v14, %v1442_v28 }
  0x2d   : > { %v394_v24 = vadd.f32 %v378_v30, %v302_v3  ;;  %v407_v20 = vmul.f32 %v1420_v15, %v1444_v29  ;;  %v1844_v53 = vunpack.c.l.bf16 %v1428_v19  ;;  %v1845_v54 = vunpack.c.h.bf16 %v1428_v19 }
  0x2e   : > { %v410_v58 = vmul.f32 %v1417_v14, %v1448_v35  ;;  %v411_v59 = vmul.f32 %v1420_v15, %v1450_v36  ;;  %v412_v28 = vmul.f32 %v1417_v14, %v1452_v37  ;;  %v413_v29 = vmul.f32 %v1420_v15, %v1454_v38 }
  0x2f   : > { %v408_v7 = vmul.f32 %v1417_v14, %v1844_v53  ;;  %v409_v23 = vmul.f32 %v1420_v15, %v1845_v54  ;;  %v414_v60 = vmul.f32 %v1417_v14, %v1458_v42  ;;  %v415_v19 = vmul.f32 %v1420_v15, %v1460_v43 }
  0x30   : > { %v416_v61 = vmul.f32 %v1417_v14, %v1462_v44  ;;  %v417_v62 = vmul.f32 %v1420_v15, %v1464_v45  ;;  %v418_v63 = vmul.f32 %v1417_v14, %v1466_v46  ;;  %v419_v2 = vmul.f32 %v1420_v15, %v1468_v47 }
  0x31   : > { %v420_v3 = vmul.f32 %v1417_v14, %v1470_v48  ;;  %v421_v25 = vmul.f32 %v1420_v15, %v1472_v49  ;;  %v439_v26 = vrot.slane %v406_v6, 2  ;;  %v440_v27 = vrot.slane %v408_v7, 2 }
  0x32   : > { %v442_v32 = vrot.slane %v407_v20, 2  ;;  %v443_v33 = vrot.slane %v409_v23, 2  ;;  %v445_v34 = vrot.slane %v410_v58, 2  ;;  %v446_v39 = vrot.slane %v412_v28, 2 }
  0x33   : > { %v448_v40 = vrot.slane %v411_v59, 2  ;;  %v449_v12 = vrot.slane %v413_v29, 2  ;;  %v441_v13 = vsel %vm438_vm1, %v439_v26, %v440_v27  ;;  %v451_v5 = vrot.slane %v414_v60, 2 }
  0x34   : > { %v444_v4 = vsel %vm438_vm1, %v442_v32, %v443_v33  ;;  %v452_v8 = vrot.slane %v416_v61, 2  ;;  %v447_v9 = vsel %vm438_vm1, %v445_v34, %v446_v39  ;;  %v454_v18 = vrot.slane %v415_v19, 2 }
  0x35   : > { %v450_v14 = vsel %vm438_vm1, %v448_v40, %v449_v12  ;;  %v455_v15 = vrot.slane %v417_v62, 2  ;;  %v457_v31 = vrot.slane %v418_v63, 2  ;;  %v458_v30 = vrot.slane %v420_v3, 2 }
  0x36   : > { %v453_v10 = vsel %vm438_vm1, %v451_v5, %v452_v8  ;;  %v460_v6 = vrot.slane %v419_v2, 2  ;;  %v461_v53 = vrot.slane %v421_v25, 2  ;;  %v471_v7 = vadd.f32 %v441_v13, %v387_v0 }
  0x37   : > { %v456_v20 = vsel %vm438_vm1, %v454_v18, %v455_v15  ;;  %v472_v54 = vadd.f32 %v444_v4, %v388_v57  ;;  %v459_v23 = vsel %vm438_vm1, %v457_v31, %v458_v30  ;;  %v473_v58 = vadd.f32 %v447_v9, %v389_v56 }
  0x38   : > { %v474_v59 = vadd.f32 %v450_v14, %v390_v11  ;;  %v475_v28 = vadd.f32 %v453_v10, %v391_v1  ;;  %v462_v29 = vsel %vm438_vm1, %v460_v6, %v461_v53  ;;  %v476_v60 = vadd.f32 %v456_v20, %v392_v41  ;;  %v1846_v10 = vld [vmem:[#allocation8_spill] sm:$0xff] }
  0x39   : > { %v477_v19 = vadd.f32 %v459_v23, %v393_v55  ;;  %v490_v61 = vmul.f32 %v1423_v16, %v1448_v35  ;;  %v478_v62 = vadd.f32 %v462_v29, %v394_v24  ;;  %v491_v63 = vmul.f32 %v1426_v17, %v1450_v36 }
  0x3a   : > { %v492_v0 = vmul.f32 %v1423_v16, %v1458_v42  ;;  %v493_v57 = vmul.f32 %v1426_v17, %v1460_v43  ;;  %v494_v56 = vmul.f32 %v1423_v16, %v1466_v46  ;;  %v495_v11 = vmul.f32 %v1426_v17, %v1468_v47 }
  0x3b   : > { %v496_v1 = vmul.f32 %v1423_v16, %v1474_v50  ;;  %v497_v41 = vmul.f32 %v1426_v17, %v1476_v51  ;;  %v498_v55 = vadd.f32 %v490_v61, %v471_v7  ;;  %v499_v24 = vadd.f32 %v491_v63, %v472_v54 }
  0x3c   : > { %v500_v2 = vadd.f32 %v492_v0, %v473_v58  ;;  %v501_v3 = vadd.f32 %v493_v57, %v474_v59  ;;  %v502_v25 = vadd.f32 %v494_v56, %v475_v28  ;;  %v503_v26 = vadd.f32 %v495_v11, %v476_v60 }
  0x3d   : > { %v504_v27 = vadd.f32 %v496_v1, %v477_v19  ;;  %v505_v32 = vadd.f32 %v497_v41, %v478_v62  ;;  %v517_v33 = vmul.f32 %v1431_v21, %v1448_v35  ;;  %v518_v34 = vmul.f32 %v1434_v22, %v1450_v36 }
  0x3e   : > { %v519_v16 = vmul.f32 %v1431_v21, %v1452_v37  ;;  %v520_v17 = vmul.f32 %v1434_v22, %v1454_v38  ;;  %v521_v39 = vmul.f32 %v1431_v21, %v1458_v42  ;;  %v522_v40 = vmul.f32 %v1434_v22, %v1460_v43 }
  0x3f   : > { %v523_v12 = vmul.f32 %v1431_v21, %v1462_v44  ;;  %v524_v13 = vmul.f32 %v1434_v22, %v1464_v45  ;;  %v525_v4 = vmul.f32 %v1431_v21, %v1466_v46  ;;  %v526_v5 = vmul.f32 %v1434_v22, %v1468_v47 }
  0x40   : > { %v527_v8 = vmul.f32 %v1431_v21, %v1470_v48  ;;  %v528_v9 = vmul.f32 %v1434_v22, %v1472_v49  ;;  %v529_v14 = vmul.f32 %v1431_v21, %v1474_v50  ;;  %v530_v18 = vmul.f32 %v1434_v22, %v1476_v51 }
  0x41   : > { %v531_v15 = vmul.f32 %v1431_v21, %v1478_v52  ;;  %v532_v31 = vmul.f32 %v1434_v22, %v1846_v10  ;;  %v549_v30 = vrot.slane %v517_v33, 1  ;;  %v550_v6 = vrot.slane %v519_v16, 1 }
  0x42   : > { %v552_v20 = vrot.slane %v518_v34, 1  ;;  %v553_v53 = vrot.slane %v520_v17, 1  ;;  %v555_v7 = vrot.slane %v521_v39, 1  ;;  %v556_v54 = vrot.slane %v523_v12, 1 }
  0x43   : > { %v558_v23 = vrot.slane %v522_v40, 1  ;;  %v559_v58 = vrot.slane %v524_v13, 1  ;;  %v551_v59 = vsel %vm354_vm0, %v549_v30, %v550_v6  ;;  %v561_v29 = vrot.slane %v525_v4, 1  ;;  %v1847_v13 = vld [vmem:[#allocation5_spill] sm:$0xff] }
  0x44   : > { %v554_v28 = vsel %vm354_vm0, %v552_v20, %v553_v53  ;;  %v562_v60 = vrot.slane %v527_v8, 1  ;;  %v557_v19 = vsel %vm354_vm0, %v555_v7, %v556_v54  ;;  %v564_v61 = vrot.slane %v526_v5, 1  ;;  %v1848_v8 = vld [vmem:[#allocation6_spill] sm:$0xff] }
  0x45   : > { %v560_v21 = vsel %vm354_vm0, %v558_v23, %v559_v58  ;;  %v565_v22 = vrot.slane %v528_v9, 1  ;;  %v567_v63 = vrot.slane %v529_v14, 1  ;;  %v568_v0 = vrot.slane %v531_v15, 1 }
  0x46   : > { %v563_v62 = vsel %vm354_vm0, %v561_v29, %v562_v60  ;;  %v570_v57 = vrot.slane %v530_v18, 1  ;;  %v571_v11 = vrot.slane %v532_v31, 1  ;;  %v581_v1 = vadd.f32 %v551_v59, %v498_v55 }
  0x47   : > { %v566_v56 = vsel %vm354_vm0, %v564_v61, %v565_v22  ;;  %v582_v41 = vadd.f32 %v554_v28, %v499_v24  ;;  %v569_v33 = vsel %vm354_vm0, %v567_v63, %v568_v0  ;;  %v583_v34 = vadd.f32 %v557_v19, %v500_v2  ;;  %v241_v61 = vld [vmem:[%s1816_s1 + $0xc] sm:$0x3] }
  0x48   : > { %v584_v16 = vadd.f32 %v560_v21, %v501_v3  ;;  %v585_v17 = vadd.f32 %v563_v62, %v502_v25  ;;  %v572_v39 = vsel %vm354_vm0, %v570_v57, %v571_v11  ;;  %v586_v40 = vadd.f32 %v566_v56, %v503_v26  ;;  %v242_v57 = vld [vmem:[%s1816_s1 + $0xe] sm:$0x3] }
  0x49   : > { %v587_v12 = vadd.f32 %v569_v33, %v504_v27  ;;  %v600_v4 = vmul.f32 %v1847_v13, %v1448_v35  ;;  %v588_v5 = vadd.f32 %v572_v39, %v505_v32  ;;  %v601_v9 = vmul.f32 %v1848_v8, %v1450_v36 }
  0x4a   : > { %v602_v55 = vmul.f32 %v1847_v13, %v1452_v37  ;;  %v603_v24 = vmul.f32 %v1848_v8, %v1454_v38  ;;  %v604_v2 = vmul.f32 %v1847_v13, %v1458_v42  ;;  %v605_v3 = vmul.f32 %v1848_v8, %v1460_v43 }
  0x4b   : > { %v606_v25 = vmul.f32 %v1847_v13, %v1462_v44  ;;  %v607_v35 = vmul.f32 %v1848_v8, %v1464_v45  ;;  %v608_v36 = vmul.f32 %v1847_v13, %v1466_v46  ;;  %v609_v37 = vmul.f32 %v1848_v8, %v1468_v47 }
  0x4c   : > { %v610_v38 = vmul.f32 %v1847_v13, %v1470_v48  ;;  %v611_v26 = vmul.f32 %v1848_v8, %v1472_v49  ;;  %v612_v27 = vmul.f32 %v1847_v13, %v1474_v50  ;;  %v613_v32 = vmul.f32 %v1848_v8, %v1476_v51 }
  0x4d   : > { %v614_v14 = vmul.f32 %v1847_v13, %v1478_v52  ;;  %v615_v18 = vmul.f32 %v1848_v8, %v1846_v10  ;;  %v632_v15 = vrot.slane %v600_v4, 2  ;;  %v633_v31 = vrot.slane %v602_v55, 2 }
  0x4e   : > { %v635_v30 = vrot.slane %v601_v9, 2  ;;  %v636_v6 = vrot.slane %v603_v24, 2  ;;  %v638_v20 = vrot.slane %v604_v2, 2  ;;  %v639_v53 = vrot.slane %v606_v25, 2 }
  0x4f   : > { %v641_v7 = vrot.slane %v605_v3, 2  ;;  %v642_v54 = vrot.slane %v607_v35, 2  ;;  %v634_v23 = vsel %vm438_vm1, %v632_v15, %v633_v31  ;;  %v644_v59 = vrot.slane %v608_v36, 2  ;;  %v1849_v3 = vld [vmem:[#allocation3_spill] sm:$0xff]  ;;  %v1850_v36 = vld [vmem:[#allocation4_spill] sm:$0xff] }
  0x50   : > { %v637_v58 = vsel %vm438_vm1, %v635_v30, %v636_v6  ;;  %v645_v28 = vrot.slane %v610_v38, 2  ;;  %v640_v29 = vsel %vm438_vm1, %v638_v20, %v639_v53  ;;  %v647_v19 = vrot.slane %v609_v37, 2 }
  0x51   : > { %v643_v60 = vsel %vm438_vm1, %v641_v7, %v642_v54  ;;  %v648_v21 = vrot.slane %v611_v26, 2  ;;  %v650_v62 = vrot.slane %v612_v27, 2  ;;  %v651_v63 = vrot.slane %v614_v14, 2  ;;  %v1852_v27 = vld [vmem:[#allocation10_spill] sm:$0xff] }
  0x52   : > { %v646_v22 = vsel %vm438_vm1, %v644_v59, %v645_v28  ;;  %v653_v0 = vrot.slane %v613_v32, 2  ;;  %v654_v11 = vrot.slane %v615_v18, 2  ;;  %v664_v33 = vadd.f32 %v634_v23, %v581_v1 }
  0x53   : > { %v649_v56 = vsel %vm438_vm1, %v647_v19, %v648_v21  ;;  %v665_v39 = vadd.f32 %v637_v58, %v582_v41  ;;  %v652_v13 = vsel %vm438_vm1, %v650_v62, %v651_v63  ;;  %v666_v4 = vadd.f32 %v640_v29, %v583_v34 }
  0x54   : > { %v667_v8 = vadd.f32 %v643_v60, %v584_v16  ;;  %v668_v9 = vadd.f32 %v646_v22, %v585_v17  ;;  %v655_v55 = vsel %vm438_vm1, %v653_v0, %v654_v11  ;;  %v669_v24 = vadd.f32 %v649_v56, %v586_v40  ;;  %v1851_v16 = vld [vmem:[#allocation9_spill] sm:$0xff]  ;;  %v1853_v0 = vld [vmem:[#allocation7_spill] sm:$0xff] }
  0x55   : > { %v670_v2 = vadd.f32 %v652_v13, %v587_v12  ;;  %v676_v25 = vrot.slane %v241_v61, %v1849_v3  ;;  %v671_v35 = vadd.f32 %v655_v55, %v588_v5  ;;  %v680_v37 = vrot.slane %v241_v61, %v1850_v36 }
  0x56   : > { %v703_v38 = vrot.slane %v242_v57, %v1849_v3  ;;  %v707_v26 = vrot.slane %v242_v57, %v1850_v36  ;;  %v1854_v57 = vunpack.c.l.bf16 %v1853_v0  ;;  %v1855_v11 = vunpack.c.h.bf16 %v1853_v0 }
  0x57   : > { %v683_v1 = vmul.f32 %v676_v25, %v1458_v42  ;;  %v685_v41 = vmul.f32 %v676_v25, %v1466_v46  ;;  %v687_v34 = vmul.f32 %v676_v25, %v1474_v50  ;;  %v689_v17 = vmul.f32 %v676_v25, %v1851_v16 }
  0x58   : > { %v684_v40 = vmul.f32 %v680_v37, %v1460_v43  ;;  %v686_v12 = vmul.f32 %v680_v37, %v1468_v47  ;;  %v688_v5 = vmul.f32 %v680_v37, %v1476_v51  ;;  %v690_v32 = vmul.f32 %v680_v37, %v1852_v27 }
  0x59   : > { %v691_v14 = vadd.f32 %v683_v1, %v664_v33  ;;  %v693_v18 = vadd.f32 %v685_v41, %v666_v4  ;;  %v695_v15 = vadd.f32 %v687_v34, %v668_v9  ;;  %v697_v31 = vadd.f32 %v689_v17, %v670_v2  ;;  %v243_v17 = vld [vmem:[%s1816_s1 + $0x10] sm:$0x3] }
  0x5a   : > { %v692_v30 = vadd.f32 %v684_v40, %v665_v39  ;;  %v694_v6 = vadd.f32 %v686_v12, %v667_v8  ;;  %v696_v20 = vadd.f32 %v688_v5, %v669_v24  ;;  %v698_v53 = vadd.f32 %v690_v32, %v671_v35 }
  0x5b   : > { %v710_v7 = vmul.f32 %v703_v38, %v1458_v42  ;;  %v711_v54 = vmul.f32 %v707_v26, %v1460_v43  ;;  %v712_v23 = vmul.f32 %v703_v38, %v1462_v44  ;;  %v713_v58 = vmul.f32 %v707_v26, %v1464_v45 }
  0x5c   : > { %v714_v59 = vmul.f32 %v703_v38, %v1466_v46  ;;  %v715_v28 = vmul.f32 %v707_v26, %v1468_v47  ;;  %v716_v29 = vmul.f32 %v703_v38, %v1470_v48  ;;  %v717_v60 = vmul.f32 %v707_v26, %v1472_v49 }
  0x5d   : > { %v718_v19 = vmul.f32 %v703_v38, %v1474_v50  ;;  %v719_v21 = vmul.f32 %v707_v26, %v1476_v51  ;;  %v720_v61 = vmul.f32 %v703_v38, %v1478_v52  ;;  %v721_v22 = vmul.f32 %v707_v26, %v1846_v10 }
  0x5e   : > { %v722_v62 = vmul.f32 %v703_v38, %v1851_v16  ;;  %v723_v63 = vmul.f32 %v707_v26, %v1852_v27  ;;  %v724_v56 = vmul.f32 %v703_v38, %v1854_v57  ;;  %v725_v33 = vmul.f32 %v707_v26, %v1855_v11 }
  0x5f   : > { %v742_v39 = vrot.slane %v710_v7, 1  ;;  %v743_v13 = vrot.slane %v712_v23, 1  ;;  %v745_v4 = vrot.slane %v711_v54, 1  ;;  %v746_v8 = vrot.slane %v713_v58, 1  ;;  %v244_v7 = vld [vmem:[%s1817_s2] sm:$0x3] }
  0x60   : > { %v748_v9 = vrot.slane %v714_v59, 1  ;;  %v749_v55 = vrot.slane %v716_v29, 1  ;;  %v751_v24 = vrot.slane %v715_v28, 1  ;;  %v752_v2 = vrot.slane %v717_v60, 1 }
  0x61   : > { %v744_v25 = vsel %vm354_vm0, %v742_v39, %v743_v13  ;;  %v747_v35 = vsel %vm354_vm0, %v745_v4, %v746_v8  ;;  %v754_v37 = vrot.slane %v718_v19, 1  ;;  %v755_v1 = vrot.slane %v720_v61, 1 }
  0x62   : > { %v750_v41 = vsel %vm354_vm0, %v748_v9, %v749_v55  ;;  %v753_v38 = vsel %vm354_vm0, %v751_v24, %v752_v2  ;;  %v757_v34 = vrot.slane %v719_v21, 1  ;;  %v758_v26 = vrot.slane %v721_v22, 1 }
  0x63   : > { %v756_v40 = vsel %vm354_vm0, %v754_v37, %v755_v1  ;;  %v760_v12 = vrot.slane %v722_v62, 1  ;;  %v761_v5 = vrot.slane %v724_v56, 1  ;;  %v763_v32 = vrot.slane %v723_v63, 1 }
  0x64   : > { %v759_v54 = vsel %vm354_vm0, %v757_v34, %v758_v26  ;;  %v764_v23 = vrot.slane %v725_v33, 1  ;;  %v774_v58 = vadd.f32 %v744_v25, %v691_v14  ;;  %v775_v59 = vadd.f32 %v747_v35, %v692_v30 }
  0x65   : > { %v762_v28 = vsel %vm354_vm0, %v760_v12, %v761_v5  ;;  %v776_v29 = vadd.f32 %v750_v41, %v693_v18  ;;  %v777_v60 = vadd.f32 %v753_v38, %v694_v6  ;;  %v778_v19 = vadd.f32 %v756_v40, %v695_v15 }
  0x66   : > { %v765_v21 = vsel %vm354_vm0, %v763_v32, %v764_v23  ;;  %v779_v61 = vadd.f32 %v759_v54, %v696_v20  ;;  %v780_v22 = vadd.f32 %v762_v28, %v697_v31  ;;  %v786_v62 = vrot.slane %v243_v17, %v1849_v3 }
  0x67   : > { %v781_v63 = vadd.f32 %v765_v21, %v698_v53  ;;  %v790_v57 = vrot.slane %v243_v17, %v1850_v36  ;;  %v869_v56 = vrot.slane %v244_v7, %v1849_v3  ;;  %v873_v11 = vrot.slane %v244_v7, %v1850_v36 }
  0x68   : > { %v793_v14 = vmul.f32 %v786_v62, %v1458_v42  ;;  %v795_v30 = vmul.f32 %v786_v62, %v1462_v44  ;;  %v797_v18 = vmul.f32 %v786_v62, %v1466_v46  ;;  %v799_v15 = vmul.f32 %v786_v62, %v1470_v48 }
  0x69   : > { %v794_v6 = vmul.f32 %v790_v57, %v1460_v43  ;;  %v796_v31 = vmul.f32 %v790_v57, %v1464_v45  ;;  %v798_v20 = vmul.f32 %v790_v57, %v1468_v47  ;;  %v800_v53 = vmul.f32 %v790_v57, %v1472_v49 }
  0x6a   : > { %v801_v3 = vmul.f32 %v786_v62, %v1474_v50  ;;  %v802_v36 = vmul.f32 %v790_v57, %v1476_v51  ;;  %v803_v42 = vmul.f32 %v786_v62, %v1478_v52  ;;  %v804_v44 = vmul.f32 %v790_v57, %v1846_v10 }
  0x6b   : > { %v805_v46 = vmul.f32 %v786_v62, %v1851_v16  ;;  %v806_v48 = vmul.f32 %v790_v57, %v1852_v27  ;;  %v1856_v43 = vunpack.c.l.bf16 %v1853_v0  ;;  %v1857_v45 = vunpack.c.h.bf16 %v1853_v0 }
  0x6c   : > { %v825_v39 = vrot.slane %v793_v14, 2  ;;  %v826_v49 = vrot.slane %v795_v30, 2  ;;  %v828_v13 = vrot.slane %v794_v6, 2  ;;  %v829_v50 = vrot.slane %v796_v31, 2 }
  0x6d   : > { %v807_v33 = vmul.f32 %v786_v62, %v1856_v43  ;;  %v808_v47 = vmul.f32 %v790_v57, %v1857_v45  ;;  %v831_v4 = vrot.slane %v797_v18, 2  ;;  %v832_v51 = vrot.slane %v799_v15, 2 }
  0x6e   : > { %v834_v8 = vrot.slane %v798_v20, 2  ;;  %v835_v52 = vrot.slane %v800_v53, 2  ;;  %v827_v10 = vsel %vm438_vm1, %v825_v39, %v826_v49  ;;  %v830_v16 = vsel %vm438_vm1, %v828_v13, %v829_v50 }
  0x6f   : > { %v837_v9 = vrot.slane %v801_v3, 2  ;;  %v838_v27 = vrot.slane %v803_v42, 2  ;;  %v833_v55 = vsel %vm438_vm1, %v831_v4, %v832_v51  ;;  %v840_v0 = vrot.slane %v802_v36, 2 }
  0x70   : > { %v836_v24 = vsel %vm438_vm1, %v834_v8, %v835_v52  ;;  %v841_v2 = vrot.slane %v804_v44, 2  ;;  %v843_v35 = vrot.slane %v805_v46, 2  ;;  %v844_v37 = vrot.slane %v807_v33, 2 }
  0x71   : > { %v839_v25 = vsel %vm438_vm1, %v837_v9, %v838_v27  ;;  %v846_v1 = vrot.slane %v806_v48, 2  ;;  %v847_v38 = vrot.slane %v808_v47, 2  ;;  %v857_v34 = vadd.f32 %v827_v10, %v774_v58 }
  0x72   : > { %v842_v41 = vsel %vm438_vm1, %v840_v0, %v841_v2  ;;  %v858_v26 = vadd.f32 %v830_v16, %v775_v59  ;;  %v845_v17 = vsel %vm438_vm1, %v843_v35, %v844_v37  ;;  %v859_v40 = vadd.f32 %v833_v55, %v776_v29 }
  0x73   : > { %v860_v12 = vadd.f32 %v836_v24, %v777_v60  ;;  %v861_v5 = vadd.f32 %v839_v25, %v778_v19  ;;  %v848_v32 = vsel %vm438_vm1, %v846_v1, %v847_v38  ;;  %v862_v7 = vadd.f32 %v842_v41, %v779_v61 }
  0x74   : > { %v863_v54 = vadd.f32 %v845_v17, %v780_v22  ;;  %v876_v23 = vadd.f32 %v869_v56, %v857_v34  ;;  %v864_v28 = vadd.f32 %v848_v32, %v781_v63  ;;  %v877_v21 = vadd.f32 %v873_v11, %v858_v26 }
  0x75   : > { %v878_v62 = vadd.f32 %v869_v56, %v859_v40  ;;  %v1756_v57 = vadd.f32 %v873_v11, %v860_v12  ;;  %v1758_v14 = vadd.f32 %v869_v56, %v861_v5  ;;  %v1760_v30 = vadd.f32 %v873_v11, %v862_v7 }
  0x76   : > { %v1762_v58 = vadd.f32 %v869_v56, %v863_v54  ;;  %v1173_v59 = vmul.f32 -1.442695, %v876_v23  ;;  %v1764_v29 = vadd.f32 %v873_v11, %v864_v28  ;;  %v1174_v60 = vmul.f32 -1.442695, %v877_v21 }
  0x77   : > { %v1175_v19 = vmul.f32 -1.442695, %v878_v62  ;;  %v1176_v61 = vmul.f32 -1.442695, %v1756_v57  ;;  %v1177_v22 = vmul.f32 -1.442695, %v1758_v14  ;;  %v1860_v38 = vlaneseq (!%p1185_p7) }
  0x78   : > { %1237 = vpow2.f32 %v1173_v59  ;;  %v1178_v63 = vmul.f32 -1.442695, %v1760_v30  ;;  %v1179_v18 = vmul.f32 -1.442695, %v1762_v58  ;;  %v1180_v56 = vmul.f32 -1.442695, %v1764_v29 }
  0x79   : > { %1239 = vpow2.f32 %v1174_v60  ;;  %vm985_vm5 = vcmp.lt.s32.totalorder (!%p1185_p7), %v1860_v38, 144  ;;  %v1309_v34 = vmov (!%p1185_p7), 0.0  }
  0x7a   : > { %1241 = vpow2.f32 %v1175_v19  ;;  %987 = vst.msk [vmem:[%s1406_s23] sm:$0x3] (!%p1185_p7), %vm985_vm5, %v1309_v34 }
  0x7b   : > { %1243 = vpow2.f32 %v1176_v61 }
  0x7c   : > { %1245 = vpow2.f32 %v1177_v22 }
  0x7d   : > { %1247 = vpow2.f32 %v1178_v63 }
  0x7e   : > { %1249 = vpow2.f32 %v1179_v18 }
  0x7f   : > { %1251 = vpow2.f32 %v1180_v56 }
  0x82   : > { %v1238_v11 = vpop.eup %1237 }
  0x83   : > { %v1240_v15 = vpop.eup %1239  ;;  %v908_v6 = vadd.f32 1.0, %v1238_v11 }
  0x84   : > { %v1242_v31 = vpop.eup %1241  ;;  %v909_v20 = vadd.f32 1.0, %v1240_v15 }
  0x85   : > { %v1244_v53 = vpop.eup %1243  ;;  %v910_v3 = vadd.f32 1.0, %v1242_v31  ;;  %1253 = vrcp.f32 %v908_v6 }
  0x86   : > { %v1246_v36 = vpop.eup %1245  ;;  %v911_v42 = vadd.f32 1.0, %v1244_v53  ;;  %1255 = vrcp.f32 %v909_v20 }
  0x87   : > { %v1248_v44 = vpop.eup %1247  ;;  %v912_v46 = vadd.f32 1.0, %v1246_v36  ;;  %1257 = vrcp.f32 %v910_v3 }
  0x88   : > { %v1250_v48 = vpop.eup %1249  ;;  %v913_v43 = vadd.f32 1.0, %v1248_v44  ;;  %1259 = vrcp.f32 %v911_v42 }
  0x89   : > { %v1252_v33 = vpop.eup %1251  ;;  %v914_v45 = vadd.f32 1.0, %v1250_v48  ;;  %1261 = vrcp.f32 %v912_v46 }
  0x8a   : > { %v915_v47 = vadd.f32 1.0, %v1252_v33  ;;  %1263 = vrcp.f32 %v913_v43 }
  0x8b   : > { %1265 = vrcp.f32 %v914_v45 }
  0x8c   : > { %1267 = vrcp.f32 %v915_v47 }
  0x8f   : > { %v1254_v39 = vpop.eup %1253 }
  0x90   : > { %v1256_v49 = vpop.eup %1255  ;;  %v932_v13 = vmul.f32 %v1254_v39, %v876_v23 }
  0x91   : > { %v1258_v50 = vpop.eup %1257  ;;  %v933_v4 = vmul.f32 %v1256_v49, %v877_v21 }
  0x92   : > { %v1260_v51 = vpop.eup %1259  ;;  %v934_v8 = vmul.f32 %v1258_v50, %v878_v62 }
  0x93   : > { %v1262_v10 = vpop.eup %1261  ;;  %v935_v16 = vmul.f32 %v1260_v51, %v1756_v57  ;;  %v1190_v9 = vpack.c.bf16 %v933_v4, %v932_v13 }
  0x94   : > { %v1264_v27 = vpop.eup %1263  ;;  %v936_v55 = vmul.f32 %v1262_v10, %v1758_v14 }
  0x95   : > { %v1266_v24 = vpop.eup %1265  ;;  %v937_v0 = vmul.f32 %v1264_v27, %v1760_v30  ;;  %v1191_v2 = vpack.c.bf16 %v935_v16, %v934_v8  ;;  %975 = vst.msk [vmem:[%s228_s16] sm:$0xff] %vm1776_vm4, %v1190_v9  ;;  %982 = sbr.rel (%p1185_p7) target bundleno = 156 (0x9c), region = 36 }
  0x96   : > { %v1268_v25 = vpop.eup %1267  ;;  %v938_v35 = vmul.f32 %v1266_v24, %v1762_v58 }
  0x97   : > { %v939_v37 = vmul.f32 %v1268_v25, %v1764_v29  ;;  %v1192_v1 = vpack.c.bf16 %v937_v0, %v936_v55  ;;  %976 = vst.msk [vmem:[%s228_s16 + $0x8] sm:$0xff] %vm1776_vm4, %v1191_v2 }
  0x99   : > { %v1193_v41 = vpack.c.bf16 %v939_v37, %v938_v35  ;;  %977 = vst.msk [vmem:[%s228_s16 + $0x10] sm:$0xff] %vm1776_vm4, %v1192_v1 }
  0x9b   : > { %978 = vst.msk [vmem:[%s228_s16 + $0x18] sm:$0xff] %vm1776_vm4, %v1193_v41 }
  0x9c PF: > { %v989_v26 = vadd.f32 %v934_v8, %v932_v13  ;;  %vm998_vm6 = vcmask 130048   ;;  %v1310_v58 = vmov 1966171168   ;;  %v1861_v11 = vld [vmem:[#allocation2_spill] sm:$0xff]  ;;  %v1862_v3 = vlaneseq }
  0x9d   : > { %v999_v17 = vsel %vm998_vm6, %v933_v4, 0.0  ;;  %v1000_v40 = vsel %vm998_vm6, %v935_v16, 0.0  ;;  %v1002_v12 = vsel %vm998_vm6, %v937_v0, 0.0  ;;  %v1004_v7 = vsel %vm998_vm6, %v939_v37, 0.0  ;;  %v988_v20 = vld [vmem:[%s1406_s23] sm:$0x3] }
  0x9e   : > { %v990_v5 = vadd.f32 %v989_v26, %v936_v55  ;;  %v1001_v32 = vadd.f32 %v1000_v40, %v999_v17  ;;  %v1016_v59 = vunpack.c.l.s4 %v1310_v58  ;;  %vm1033_vm7 = vcmp.lt.s32.totalorder %v1862_v3, 144 }
  0xa0   : > { %v991_v54 = vadd.f32 %v990_v5, %v938_v35  ;;  %v1003_v23 = vadd.f32 %v1002_v12, %v1001_v32  ;;  %v1017_v22 = vunpack.c.0.s8 %v1016_v59 }
  0xa2   : > { %v992_v28 = vrot.slane %v991_v54, 4  ;;  %v1005_v21 = vadd.f32 %v1004_v7, %v1003_v23  ;;  %v1020_v15 = vsub.s32 %v1017_v22, %v1861_v11 }
  0xa4   : > { %v993_v62 = vadd.f32 %v992_v28, %v991_v54  ;;  %v1006_v57 = vrot.slane %v1005_v21, 4 }
  0xa6   : > { %v994_v14 = vrot.slane %v993_v62, 2  ;;  %v1007_v30 = vadd.f32 %v1006_v57, %v1005_v21 }
  0xa8   : > { %v995_v29 = vadd.f32 %v994_v14, %v993_v62  ;;  %v1008_v60 = vrot.slane %v1007_v30, 2 }
  0xaa   : > { %v996_v19 = vrot.slane %v995_v29, 1  ;;  %v1009_v61 = vadd.f32 %v1008_v60, %v1007_v30 }
  0xac   : > { %v997_v63 = vadd.f32 %v996_v19, %v995_v29  ;;  %v1010_v18 = vrot.slane %v1009_v61, 1 }
  0xae   : > { %v1011_v56 = vadd.f32 %v1010_v18, %v1009_v61 }
  0xb0   : > { %v1014_v6 = vcombine.low %v997_v63, %v1011_v56 }
  0xb2   : > { %v1021_v31 = vrot.slane %v1014_v6, %v1020_v15 }
  0xb4   : > { %v1028_v53 = vrot.slane %v1021_v31, %v1020_v15 }
  0xb6   : > { %v1030_v36 = vadd.f32 %v1028_v53, %v988_v20 }
  0xb8   : > { %1035 = vst.msk [vmem:[%s1406_s23] sm:$0x3] %vm1033_vm7, %v1030_v36 }
  0xb9 PF: > { %s15_s19 = sadd.s32 1, %s1307_s19   ;;  %s1863_s15 = smov %s1299_s17 }
  0xba   : > { %p12_p8 = scmp.ge.s32.totalorder %s15_s19, 6   ;;  %s1864_s16 = smov %s1303_s18 }
  0xbb   : > { %s1865_s17 = smov %s1868_s20  ;;  %s1866_s18 = smov %s1872_s21 }
  0xbc   :  { %14 = sbr.rel (!%p12_p8) target bundleno = 3 (0x3), region = 79 }

// kernel: forward.22
= control target key start
LH: loop header
LB: loop body
LE: loop exit
PB: predicated region body
PF: predicated region fallthrough
CT: control target
= control target key end

     0   :  { %s1263_s30 = smov 0   ;;  %s1265_s10 = smov 0   ;;  %s1445_s0 = inlined_call_operand.vmem [shape: bf16[2,64,144], index: 0, kind: input, shape index: {}]   ;;  %s1446_s1 = inlined_call_operand.vmem [shape: f32[2,1,144], index: 1, kind: input, shape index: {}]   ;;  %s1447_s2 = inlined_call_operand.vmem [shape: bf16[144,6], index: 2, kind: input, shape index: {}]   ;;  %s1448_s3 = inlined_call_operand.vmem [shape: f32[1,6], index: 3, kind: input, shape index: {}]   ;;  %s1449_s4 = inlined_call_operand.vmem [shape: bf16[6,144], index: 4, kind: input, shape index: {}]   ;;  %s1450_s5 = inlined_call_operand.vmem [shape: f32[1,144], index: 5, kind: input, shape index: {}]   ;;  %s1451_s6 = inlined_call_operand.vmem [shape: bf16[144,24], index: 6, kind: input, shape index: {}]   ;;  %s1452_s7 = inlined_call_operand.vmem [shape: f32[1,24], index: 7, kind: input, shape index: {}]   ;;  %s1453_s8 = inlined_call_operand.vmem [shape: bf16[2,64,24], index: 8, kind: input, shape index: {}]   ;;  %s1454_s9 = inlined_call_operand.vmem [shape: bf16[2,64,24], index: 9, kind: output, shape index: {}]  }
   0x1   :  { %s1267_s11 = smov 0  }
   0x2 LB: > { %s31_s12 = sadd.s32 1, %s1206_s10  ;;  %p1052_p0 = scmp.ge.s32.totalorder %s1210_s11, 1  ;;  %s1210_s11 = sphi %s1267_s11, %s19_s11   ;;  %s1206_s10 = sphi %s1265_s10, %s1456_s10   ;;  %s1202_s30 = sphi %s1263_s30, %s1455_s30  }
   0x3   : > { %p33_p1 = scmp.ge.s32.totalorder %s31_s12, 2  ;;  %p335_p2 = scmp.lt.s32.totalorder %s1210_s11, 3 }
   0x5   : > { %s1458_s12 = smov (%p33_p1, %s31_s12), 0  ;;  %p336_p3 = pnand %p1052_p0, %p335_p2 }
   0x6   : > { %v1156_v0 = vld [vmem:[%s1447_s2] sm:$0xff] (!%p336_p3)   ;;  %v432_v1 = vlaneseq (!%p336_p3)  ;;  %v1212_v2 = vmov (!%p336_p3), 0   ;;  %p394_p4 = scmp.lt.s32.totalorder (!%p336_p3), %s1202_s30, 1  ;;  %v1157_v3 = vld [vmem:[%s1447_s2 + $0x8] sm:$0xff] (!%p336_p3)   ;;  %v1158_v5 = vld [vmem:[%s1447_s2 + $0x10] sm:$0xff] (!%p336_p3)   ;;  %vm517_vm0 = vcmask (!%p336_p3), 130048  }
   0x7   : > { %339 = sbr.rel (%p336_p3) target bundleno = 780 (0x30c), region = 56  ;;  %521 = vmatprep.subr.bf16.mxu0 (!%p336_p3), %v1212_v2  ;;  %798 = vmatprep.subr.bf16.mxu1 (!%p336_p3), %v1212_v2  ;;  %v1159_v7 = vld [vmem:[%s1447_s2 + $0x18] sm:$0xff] (!%p336_p3)   ;;  %v1160_v10 = vld [vmem:[%s1447_s2 + $0x20] sm:$0xff] (!%p336_p3)   ;;  %v1161_v13 = vld [vmem:[%s1447_s2 + $0x28] sm:$0xff] (!%p336_p3)   ;;  %vm591_vm1 = vcmask (!%p336_p3), 1042432   ;;  %vm587_vm2 = vcmask (!%p336_p3), 48128  }
   0x8   : > { %522 = vmatpush1.bf16.msra.mxu0 (!%p336_p3), %v1156_v0  ;;  %v1292_v4 = vshrl.u32 (!%p336_p3), %v432_v1, 7  ;;  %v1162_v14 = vld [vmem:[%s1447_s2 + $0x30] sm:$0xff] (!%p336_p3)   ;;  %v1163_v16 = vld [vmem:[%s1447_s2 + $0x38] sm:$0xff] (!%p336_p3)   ;;  %v1164_v18 = vld [vmem:[%s1447_s2 + $0x40] sm:$0xff] (!%p336_p3)   ;;  %vm919_vm3 = vcmask (!%p336_p3), 191488  }
   0x9   : > { %523 = vmatprep.subr.bf16.mxu0 (!%p336_p3), %v1212_v2  ;;  %v569_v20 = vld [vmem:[%s1449_s4] sm:$0x77] (!%p336_p3)  ;;  %v1168_v37 = vld [vmem:[%s1451_s6 + $0x8] sm:$0xff] (!%p336_p3)   ;;  %v1169_v38 = vld [vmem:[%s1451_s6 + $0x10] sm:$0xff] (!%p336_p3)  }
   0xa   : > { %v438_v6 = vsub.s32 (!%p336_p3), 1, %v1292_v4  ;;  %v1323_v15 = vsub.s32 (!%p336_p3), 0, %v1292_v4  ;;  %v1072_v21 = vcombine.high (!%p336_p3), %v569_v20, %v569_v20  ;;  %v1071_v22 = vcombine.low (!%p336_p3), %v569_v20, %v569_v20  ;;  %v462_v24 = vld [vmem:[%s1448_s3] sm:$0x1] (!%p336_p3)  ;;  %v1170_v39 = vld [vmem:[%s1451_s6 + $0x18] sm:$0xff] (!%p336_p3)   ;;  %v1172_v41 = vld [vmem:[%s1451_s6 + $0x28] sm:$0xff] (!%p336_p3)  }
   0xb   : > { %v1167_v36 = vld [vmem:[%s1451_s6] sm:$0xff] (!%p336_p3)   ;;  %v1173_v42 = vld [vmem:[%s1451_s6 + $0x30] sm:$0xff] (!%p336_p3)   ;;  %v1174_v43 = vld [vmem:[%s1451_s6 + $0x38] sm:$0xff] (!%p336_p3)  }
   0xc   : > { %524 = vmatpush1.bf16.msra.mxu0 (!%p336_p3), %v1157_v3  ;;  %v593_v23 = vsel (!%p336_p3), %vm591_vm1, %v1071_v22, 0  ;;  %799 = vmatpush1.bf16.msra.mxu1 (!%p336_p3), %v1167_v36  ;;  %v1171_v40 = vld [vmem:[%s1451_s6 + $0x20] sm:$0xff] (!%p336_p3)  }
   0xd   : > { %525 = vmatprep.subr.bf16.mxu0 (!%p336_p3), %v1212_v2  ;;  %800 = vmatprep.subr.bf16.mxu1 (!%p336_p3), %v1212_v2  ;;  %v1175_v44 = vld [vmem:[%s1451_s6 + $0x40] sm:$0xff] (!%p336_p3)  }
   0xe   : > { %s1460_s30 = smov (!%p394_p4, %s1202_s30), 1  ;;  %v570_v45 = vld [vmem:[%s1450_s5] sm:$0x3] }
   0xf   : > { %s1055_s19 = sshll.u32 %s1460_s30, 1  ;;  %v580_v46 = vrot.slane %v570_v45, %v1323_v15  ;;  %v584_v47 = vrot.slane %v570_v45, %v438_v6  ;;  %s1101_s25 = sshll.u32 %s1460_s30, 6 }
  0x10   : > { %s407_s22 = scalar_lea.vmem %s1446_s1, %s1055_s19  ;;  %526 = vmatpush1.bf16.msra.mxu0 %v1158_v5  ;;  %801 = vmatpush1.bf16.msra.mxu1 %v1168_v37  ;;  %s1386_s28 = scalar_lea.vmem %s1445_s0, %s1101_s25 }
  0x11   : > { %v429_v8 = vld [vmem:[%s407_s22] sm:$0x3]  ;;  %527 = vmatprep.subr.bf16.mxu0 %v1212_v2  ;;  %802 = vmatprep.subr.bf16.mxu1 %v1212_v2  ;;  %v652_v61 = vld [vmem:[%s1386_s28 + $0x8] sm:$0xff]  ;;  %v653_v62 = vld [vmem:[%s1386_s28 + $0x10] sm:$0xff]  ;;  %s1102_s29 = sshll.u32 %s1460_s30, 5 }
  0x12   : > { %v430_v9 = vmul.f32 0.015625, %v429_v8  ;;  %v651_v60 = vld [vmem:[%s1386_s28] sm:$0xff]  ;;  %v654_v63 = vld [vmem:[%s1386_s28 + $0x18] sm:$0xff]  ;;  %v661_v1 = vunpack.c.l.bf16 %v652_v61  ;;  %v662_v4 = vunpack.c.h.bf16 %v652_v61  ;;  %v664_v5 = vunpack.c.h.bf16 %v653_v62  ;;  %s1406_s15 = scalar_lea.vmem %s1453_s8, %s1102_s29  ;;  %s1415_s19 = scalar_lea.vmem %s1454_s9, %s1102_s29 }
  0x13   : > { %v659_v0 = vunpack.c.l.bf16 %v651_v60  ;;  %v660_v3 = vunpack.c.h.bf16 %v651_v60  ;;  %v665_v22 = vunpack.c.l.bf16 %v654_v63 }
  0x14   : > { %v439_v11 = vrot.slane %v430_v9, %v438_v6  ;;  %528 = vmatpush1.bf16.msra.mxu0 %v1159_v7  ;;  %v435_v17 = vrot.slane %v430_v9, %v1323_v15  ;;  %803 = vmatpush1.bf16.msra.mxu1 %v1169_v38  ;;  %v666_v6 = vunpack.c.h.bf16 %v654_v63 }
  0x15   : > { %529 = vmatprep.subr.bf16.mxu0 %v1212_v2  ;;  %804 = vmatprep.subr.bf16.mxu1 %v1212_v2 }
  0x16   : > { %v443_v12 = vpack.c.bf16 %v439_v11, %v439_v11  ;;  %v442_v19 = vpack.c.bf16 %v435_v17, %v435_v17  ;;  %v655_v17 = vld [vmem:[%s1386_s28 + $0x20] sm:$0xff] }
  0x18   : > { %1069 = vmatprep.mubr.msk.bf16.mxu0 %vm517_vm0, %v443_v12  ;;  %530 = vmatpush1.bf16.msra.mxu0 %v1160_v10 }
  0x19   : > { %531 = vmatprep.subr.bf16.mxu0 %v1212_v2  ;;  %805 = vmatpush1.bf16.msra.mxu1 %v1170_v39 }
  0x1a   : > { %806 = vmatprep.subr.bf16.mxu1 %v1212_v2 }
  0x1c   : > { %532 = vmatpush1.bf16.msra.mxu0 %v1161_v13 }
  0x1d   : > { %533 = vmatprep.subr.bf16.mxu0 %v1212_v2  ;;  %807 = vmatpush1.bf16.msra.mxu1 %v1171_v40 }
  0x1e   : > { %808 = vmatprep.subr.bf16.mxu1 %v1212_v2 }
  0x20   : > { %534 = vmatpush1.bf16.msra.mxu0 %v1162_v14 }
  0x21   : > { %535 = vmatprep.subr.bf16.mxu0 %v1212_v2  ;;  %809 = vmatpush1.bf16.msra.mxu1 %v1172_v41 }
  0x22   : > { %810 = vmatprep.subr.bf16.mxu1 %v1212_v2 }
  0x24   : > { %536 = vmatpush1.bf16.msra.mxu0 %v1163_v16 }
  0x25   : > { %537 = vmatprep.subr.bf16.mxu0 %v1212_v2  ;;  %811 = vmatpush1.bf16.msra.mxu1 %v1173_v42 }
  0x26   : > { %812 = vmatprep.subr.bf16.mxu1 %v1212_v2 }
  0x28   : > { %538 = vmatpush1.bf16.msra.mxu0 %v1164_v18  ;;  %v656_v18 = vld [vmem:[%s1386_s28 + $0x28] sm:$0xff] }
  0x29   : > { %1073 = vmatprep.subr.msk.bf16.mxu0 %vm591_vm1, %v1072_v21  ;;  %813 = vmatpush1.bf16.msra.mxu1 %v1174_v43  ;;  %v663_v21 = vunpack.c.l.bf16 %v653_v62 }
  0x2a   : > { %814 = vmatprep.subr.bf16.mxu1 %v1212_v2 }
  0x2b   : > { %554 = vmatmul.mubr.bf16.vlgmr.msra.gmra.mrb[0].mxu0 %v442_v19 }
  0x2c   : > { %630 = vmatprep.mubr.bf16.mxu0 %v1212_v2  ;;  %599 = vmatpush1.bf16.msra.mxu0 %v593_v23 }
  0x2d   : > { %815 = vmatpush1.bf16.msra.mxu1 %v1175_v44 }
  0xfe   : > { %v555_v25 = vpop.f32.mrb[0].mxu0 }
  0xff   : > { %v556_v26 = vadd.f32 %v555_v25, %v462_v24  ;;  %v557_v27 = vpop.f32.mrb[1].mxu0  ;;  %v668_v24 = vunpack.c.h.bf16 %v655_v17  ;;  %v670_v25 = vunpack.c.h.bf16 %v656_v18 }
 0x100   : > { %v558_v28 = vpop.f32.mrb[2].mxu0 }
 0x101   : > { %v1070_v29 = vmul.f32 -1.442695, %v556_v26  ;;  %v559_v30 = vpop.f32.mrb[3].mxu0 }
 0x102   : > { %v658_v30 = vld [vmem:[%s1386_s28 + $0x38] sm:$0xff] }
 0x103   : > { %1176 = vpow2.f32 %v1070_v29  ;;  %v657_v29 = vld [vmem:[%s1386_s28 + $0x30] sm:$0xff]  ;;  %v674_v36 = vunpack.c.h.bf16 %v658_v30  ;;  %v673_v43 = vunpack.c.l.bf16 %v658_v30 }
 0x104   : > { %v671_v42 = vunpack.c.l.bf16 %v657_v29 }
 0x10d   : > { %v1177_v31 = vpop.eup %1176 }
 0x10e   : > { %v564_v32 = vadd.f32 1.0, %v1177_v31 }
 0x110   : > { %1178 = vrcp.f32 %v564_v32  ;;  %v667_v32 = vunpack.c.l.bf16 %v655_v17 }
 0x11a   : > { %v1179_v33 = vpop.eup %1178 }
 0x11b   : > { %v567_v34 = vmul.f32 %v1179_v33, %v556_v26  ;;  %v669_v33 = vunpack.c.l.bf16 %v656_v18 }
 0x11d   : > { %v568_v35 = vpack.c.bf16 %v567_v34, %v567_v34 }
 0x11f   : > { %1074 = vmatmul.mubr.msk.bf16.vlgmr.msra.gmra.mrb[4].mxu0 %vm587_vm2, %v568_v35  ;;  %v672_v35 = vunpack.c.h.bf16 %v657_v29 }
 0x1f2   : > { %v632_v48 = vpop.f32.mrb[4].mxu0 }
 0x1f3   : > { %v633_v49 = vadd.f32 %v632_v48, %v580_v46  ;;  %v634_v50 = vpop.f32.mrb[5].mxu0  ;;  %v1113_v48 = vld [vmem:[%s1406_s15] sm:$0xff]  }
 0x1f4   : > { %v635_v51 = vadd.f32 %v634_v50, %v584_v47  ;;  %v636_v52 = vpop.f32.mrb[6].mxu0  ;;  %v1114_v50 = vunpack.c.l.bf16 %v1113_v48 }
 0x1f5   : > { %v1075_v53 = vmul.f32 -1.442695, %v633_v49  ;;  %v637_v54 = vpop.f32.mrb[7].mxu0  ;;  %v1077_v49 = vld [vmem:[%s1452_s7] ss:$0 sm:$0xff] }
 0x1f6   : > { %v1076_v55 = vmul.f32 -1.442695, %v635_v51  ;;  %v1115_v54 = vunpack.c.h.bf16 %v1113_v48 }
 0x1f7   : > { %1180 = vpow2.f32 %v1075_v53 }
 0x1f8   : > { %1182 = vpow2.f32 %v1076_v55 }
 0x201   : > { %v1181_v56 = vpop.eup %1180 }
 0x202   : > { %v1183_v57 = vpop.eup %1182  ;;  %v645_v58 = vadd.f32 1.0, %v1181_v56 }
 0x203   : > { %v646_v59 = vadd.f32 1.0, %v1183_v57 }
 0x204   : > { %1184 = vrcp.f32 %v645_v58 }
 0x205   : > { %1186 = vrcp.f32 %v646_v59  ;;  %v1128_v59 = vld [vmem:[%s1406_s15 + $0x8] sm:$0xff]  }
 0x206   : > { %v1118_v63 = vunpack.c.l.bf16 %v1128_v59 }
 0x20e   : > { %v1185_v2 = vpop.eup %1184 }
 0x20f   : > { %v1187_v7 = vpop.eup %1186  ;;  %v678_v8 = vrot.slane %v1185_v2, %v1323_v15 }
 0x210   : > { %v682_v9 = vrot.slane %v1187_v7, %v1323_v15 }
 0x211   : > { %v683_v10 = vmul.f32 %v678_v8, %v659_v0  ;;  %v685_v11 = vmul.f32 %v678_v8, %v661_v1  ;;  %v687_v15 = vmul.f32 %v678_v8, %v663_v21  ;;  %v689_v26 = vmul.f32 %v678_v8, %v665_v22  ;;  %v1130_v22 = vld [vmem:[%s1406_s15 + $0x18] sm:$0xff]  }
 0x212   : > { %v684_v12 = vmul.f32 %v682_v9, %v660_v3  ;;  %v686_v13 = vmul.f32 %v682_v9, %v662_v4  ;;  %v688_v14 = vmul.f32 %v682_v9, %v664_v5  ;;  %v690_v16 = vmul.f32 %v682_v9, %v666_v6 }
 0x213   : > { %v699_v20 = vpack.c.bf16 %v685_v11, %v683_v10  ;;  %v692_v27 = vmul.f32 %v682_v9, %v668_v24  ;;  %v694_v28 = vmul.f32 %v682_v9, %v670_v25  ;;  %v701_v31 = vpack.c.bf16 %v689_v26, %v687_v15 }
 0x214   : > { %v700_v19 = vpack.c.bf16 %v686_v13, %v684_v12  ;;  %v702_v23 = vpack.c.bf16 %v690_v16, %v688_v14  ;;  %v691_v37 = vmul.f32 %v678_v8, %v667_v32  ;;  %v693_v38 = vmul.f32 %v678_v8, %v669_v33 }
 0x215   : > { %v704_v34 = vpack.c.bf16 %v694_v28, %v692_v27  ;;  %v696_v39 = vmul.f32 %v682_v9, %v672_v35  ;;  %v698_v40 = vmul.f32 %v682_v9, %v674_v36  ;;  %v695_v45 = vmul.f32 %v678_v8, %v671_v42 }
 0x216   : > { %1087 = vmatprep.mubr.msk.bf16.mxu1 %vm517_vm0, %v700_v19  ;;  %v703_v41 = vpack.c.bf16 %v693_v38, %v691_v37  ;;  %v697_v46 = vmul.f32 %v678_v8, %v673_v43  ;;  %v1119_v3 = vunpack.c.h.bf16 %v1128_v59  ;;  %v1129_v8 = vld [vmem:[%s1406_s15 + $0x10] sm:$0xff]   ;;  %v1126_v15 = vunpack.c.l.bf16 %v1130_v22 }
 0x217   : > { %831 = vmatmul.mubr.bf16.vlgmr.msra.gmra.mrb[0].mxu1 %v699_v20  ;;  %v706_v44 = vpack.c.bf16 %v698_v40, %v696_v39  ;;  %v1122_v12 = vunpack.c.l.bf16 %v1129_v8  ;;  %v1123_v17 = vunpack.c.h.bf16 %v1129_v8  ;;  %v1127_v29 = vunpack.c.h.bf16 %v1130_v22 }
 0x218   : > { %1088 = vmatprep.mubr.msk.bf16.mxu1 %vm517_vm0, %v702_v23  ;;  %v705_v47 = vpack.c.bf16 %v697_v46, %v695_v45 }
 0x21f   : > { %839 = vmatmul.mubr.bf16.gmra.mrb[4].mxu1 %v701_v31 }
 0x220   : > { %1089 = vmatprep.mubr.msk.bf16.mxu1 %vm517_vm0, %v704_v34 }
 0x227   : > { %847 = vmatmul.mubr.bf16.gmra.mrb[8].mxu1 %v703_v41 }
 0x228   : > { %1090 = vmatprep.mubr.msk.bf16.mxu1 %vm517_vm0, %v706_v44 }
 0x22f   : > { %855 = vmatmul.mubr.bf16.gmra.mrb[12].mxu1 %v705_v47 }
 0x2ea   : > { %v832_v51 = vpop.f32.mrb[0].mxu1 }
 0x2eb   : > { %v833_v52 = vadd.f32 %v1077_v49, %v832_v51  ;;  %v834_v53 = vpop.f32.mrb[1].mxu1 }
 0x2ec   : > { %v835_v55 = vpop.f32.mrb[2].mxu1 }
 0x2ed   : > { %v879_v56 = vadd.f32 %v1114_v50, %v833_v52  ;;  %v836_v57 = vadd.f32 %v1077_v49, %v835_v55  ;;  %v837_v58 = vpop.f32.mrb[3].mxu1 }
 0x2ef   : > { %v1104_v60 = vpack.c.bf16 %v879_v56, %v879_v56  ;;  %v880_v61 = vadd.f32 %v1115_v54, %v836_v57 }
 0x2f1   : > { %920 = vst.msk [vmem:[%s1415_s19] sm:$0xf] %vm919_vm3, %v1104_v60  ;;  %v1105_v62 = vpack.c.bf16 %v880_v61, %v880_v61 }
 0x2f2   : > { %v840_v0 = vpop.f32.mrb[4].mxu1 }
 0x2f3   : > { %921 = vst.msk [vmem:[%s1415_s19 + $0x4] sm:$0xf] %vm919_vm3, %v1105_v62  ;;  %v841_v1 = vadd.f32 %v1077_v49, %v840_v0  ;;  %v842_v2 = vpop.f32.mrb[5].mxu1 }
 0x2f4   : > { %v843_v4 = vpop.f32.mrb[6].mxu1 }
 0x2f5   : > { %v881_v5 = vadd.f32 %v1118_v63, %v841_v1  ;;  %v844_v6 = vadd.f32 %v1077_v49, %v843_v4  ;;  %v845_v7 = vpop.f32.mrb[7].mxu1 }
 0x2f7   : > { %v1106_v9 = vpack.c.bf16 %v881_v5, %v881_v5  ;;  %v882_v10 = vadd.f32 %v1119_v3, %v844_v6 }
 0x2f9   : > { %922 = vst.msk [vmem:[%s1415_s19 + $0x8] sm:$0xf] %vm919_vm3, %v1106_v9  ;;  %v1107_v11 = vpack.c.bf16 %v882_v10, %v882_v10 }
 0x2fa   : > { %v848_v13 = vpop.f32.mrb[8].mxu1 }
 0x2fb   : > { %923 = vst.msk [vmem:[%s1415_s19 + $0xc] sm:$0xf] %vm919_vm3, %v1107_v11  ;;  %v849_v14 = vadd.f32 %v1077_v49, %v848_v13  ;;  %v850_v16 = vpop.f32.mrb[9].mxu1 }
 0x2fc   : > { %v851_v18 = vpop.f32.mrb[10].mxu1 }
 0x2fd   : > { %v883_v19 = vadd.f32 %v1122_v12, %v849_v14  ;;  %v852_v20 = vadd.f32 %v1077_v49, %v851_v18  ;;  %v853_v21 = vpop.f32.mrb[11].mxu1 }
 0x2ff   : > { %v1108_v23 = vpack.c.bf16 %v883_v19, %v883_v19  ;;  %v884_v24 = vadd.f32 %v1123_v17, %v852_v20 }
 0x301   : > { %924 = vst.msk [vmem:[%s1415_s19 + $0x10] sm:$0xf] %vm919_vm3, %v1108_v23  ;;  %v1109_v25 = vpack.c.bf16 %v884_v24, %v884_v24 }
 0x302   : > { %v856_v26 = vpop.f32.mrb[12].mxu1 }
 0x303   : > { %925 = vst.msk [vmem:[%s1415_s19 + $0x14] sm:$0xf] %vm919_vm3, %v1109_v25  ;;  %v857_v27 = vadd.f32 %v1077_v49, %v856_v26  ;;  %v858_v28 = vpop.f32.mrb[13].mxu1 }
 0x304   : > { %v859_v30 = vpop.f32.mrb[14].mxu1 }
 0x305   : > { %v885_v31 = vadd.f32 %v1126_v15, %v857_v27  ;;  %v860_v32 = vadd.f32 %v1077_v49, %v859_v30  ;;  %v861_v33 = vpop.f32.mrb[15].mxu1 }
 0x307   : > { %v1110_v34 = vpack.c.bf16 %v885_v31, %v885_v31  ;;  %v886_v35 = vadd.f32 %v1127_v29, %v860_v32 }
 0x309   : > { %926 = vst.msk [vmem:[%s1415_s19 + $0x18] sm:$0xf] %vm919_vm3, %v1110_v34  ;;  %v1111_v36 = vpack.c.bf16 %v886_v35, %v886_v35 }
 0x30b   : > { %927 = vst.msk [vmem:[%s1415_s19 + $0x1c] sm:$0xf] %vm919_vm3, %v1111_v36 }
 0x30c PF: > { %s19_s11 = sadd.s32 1, %s1210_s11   ;;  %s1455_s30 = smov %s1206_s10 }
 0x30d   : > { %p16_p5 = scmp.ge.s32.totalorder %s19_s11, 4   ;;  %s1456_s10 = smov %s1458_s12 }
 0x30f   :  { %18 = sbr.rel (!%p16_p5) target bundleno = 2 (0x2), region = 92 }

// kernel: forward.26
= control target key start
LH: loop header
LB: loop body
LE: loop exit
PB: predicated region body
PF: predicated region fallthrough
CT: control target
= control target key end

     0   :  { %s432_s12 = smov 0   ;;  %s464_s0 = inlined_call_operand.vmem [shape: bf16[32,40], index: 0, kind: input, shape index: {}]   ;;  %s465_s1 = inlined_call_operand.vmem [shape: bf16[40,128], index: 1, kind: input, shape index: {}]   ;;  %s466_s2 = inlined_call_operand.vmem [shape: f32[1,128], index: 2, kind: input, shape index: {}]   ;;  %s467_s3 = inlined_call_operand.vmem [shape: bf16[32,128], index: 3, kind: output, shape index: {}]  }
   0x1 LB: > { %s338_s13 = sadd.s32 4294967295, %s408_s12   ;;  %p342_p0 = scmp.ge.s32.totalorder %s408_s12, 1  ;;  %s408_s12 = sphi %s432_s12, %s13_s12  }
   0x2   : > { %p138_p1 = scmp.lt.s32.totalorder %s408_s12, 3 }
   0x4   : > { %p139_p2 = pnand %p342_p0, %p138_p1 }
   0x5   : > { %v390_v0 = vld [vmem:[%s465_s1] sm:$0xff] (!%p139_p2)   ;;  %v410_v1 = vmov (!%p139_p2), 0.0   ;;  %v391_v2 = vld [vmem:[%s465_s1 + $0x8] sm:$0xff] (!%p139_p2)   ;;  %s343_s18 = sshll.u32 (!%p139_p2), %s338_s13, 1  ;;  %v392_v3 = vld [vmem:[%s465_s1 + $0x10] ss:$0 sps:$4 sm:$0xff] (!%p139_p2)  }
   0x6   : > { %142 = sbr.rel (%p139_p2) target bundleno = 265 (0x109), region = 32  ;;  %370 = vmatprep.subr.bf16.mxu0 (!%p139_p2), %v410_v1  ;;  %vm411_vm0 = vmmov (!%p139_p2), 0   ;;  %p163_p3 = scmp.lt.s32.totalorder (!%p139_p2), %s343_s18, 3  ;;  %vm213_vm1 = vcmask (!%p139_p2), 1043456   ;;  %vm209_vm2 = vcmask (!%p139_p2), 326656  }
   0x7   : > { %371 = vmatpush3.bf16.msra.mxu0 (!%p139_p2), %v390_v0  ;;  %376 = vmatprep.mubr.msk.bf16.mxu0 (!%p139_p2), %vm411_vm0, %v410_v1  ;;  %v215_v4 = vsel (!%p139_p2), %vm213_vm1, %v392_v3, 0  ;;  %v347_v6 = vld [vmem:[%s466_s2] ss:$0 sm:$0xff] (!%p139_p2) }
   0x8   : > { %372 = vmatprep.subr.bf16.mxu0 (!%p139_p2), %v410_v1 }
   0xb   : > { %373 = vmatpush3.bf16.msra.mxu0 (!%p139_p2), %v391_v2 }
   0xc   : > { %374 = vmatprep.subr.bf16.mxu0 (!%p139_p2), %v410_v1 }
   0xd   : > { %s469_s18 = smov (!%p163_p3, %s343_s18), 3 }
   0xe   : > { %s344_s21 = sshll.u32 %s469_s18, 2 }
   0xf   : > { %s166_s24 = scalar_lea.vmem %s464_s0, %s344_s21  ;;  %375 = vmatpush3.bf16.msra.mxu0 %v215_v4  ;;  %s172_s29 = scalar_lea.vmem %s467_s3, %s344_s21 }
  0x10   : > { %v393_v5 = vld [vmem:[%s166_s24] sm:$0xff]  }
  0x12   : > { %377 = vmatmul.mubr.msk.bf16.vlgmr.msra.gmra.mrb[0].mxu0 %vm209_vm2, %v393_v5 }
  0xe5   : > { %v251_v7 = vpop.f32.mrb[0].mxu0 }
  0xe6   : > { %v252_v8 = vadd.f32 %v347_v6, %v251_v7  ;;  %v378_v9 = vpop.f32.mrb[1].mxu0 }
  0xe7   : > { %v254_v10 = vpop.f32.mrb[2].mxu0 }
  0xe8   : > { %v353_v11 = vmul.f32 -1.442695, %v252_v8  ;;  %v255_v12 = vadd.f32 %v347_v6, %v254_v10  ;;  %v379_v13 = vpop.f32.mrb[3].mxu0 }
  0xea   : > { %394 = vpow2.f32 %v353_v11  ;;  %v354_v14 = vmul.f32 -1.442695, %v255_v12 }
  0xec   : > { %396 = vpow2.f32 %v354_v14 }
  0xf4   : > { %v395_v15 = vpop.eup %394 }
  0xf5   : > { %v264_v16 = vadd.f32 1.0, %v395_v15 }
  0xf6   : > { %v397_v17 = vpop.eup %396 }
  0xf7   : > { %398 = vrcp.f32 %v264_v16  ;;  %v265_v18 = vadd.f32 1.0, %v397_v17 }
  0xf9   : > { %400 = vrcp.f32 %v265_v18 }
 0x101   : > { %v399_v19 = vpop.eup %398 }
 0x102   : > { %v270_v21 = vmul.f32 %v399_v19, %v252_v8 }
 0x103   : > { %v401_v20 = vpop.eup %400 }
 0x104   : > { %v271_v22 = vmul.f32 %v401_v20, %v255_v12 }
 0x106   : > { %v364_v23 = vpack.c.bf16 %v271_v22, %v270_v21 }
 0x108   : > { %365 = vst [vmem:[%s172_s29] sm:$0xff] %v364_v23  }
 0x109 PF: > { %s13_s12 = sadd.s32 1, %s408_s12  }
 0x10a   : > { %p10_p4 = scmp.ge.s32.totalorder %s13_s12, 4  }
 0x10c   :  { %12 = sbr.rel (!%p10_p4) target bundleno = 1 (0x1), region = 62 }

// kernel: forward.25
= control target key start
LH: loop header
LB: loop body
LE: loop exit
PB: predicated region body
PF: predicated region fallthrough
CT: control target
= control target key end

     0   :  { %s1017_s27 = smov 0   ;;  %s1019_s28 = smov 0   ;;  %s1159_s0 = inlined_call_operand.vmem [shape: bf16[2,16,144], index: 0, kind: input, shape index: {}]   ;;  %s1160_s1 = inlined_call_operand.vmem [shape: f32[2,1,144], index: 1, kind: input, shape index: {}]   ;;  %s1161_s2 = inlined_call_operand.vmem [shape: bf16[144,6], index: 2, kind: input, shape index: {}]   ;;  %s1162_s3 = inlined_call_operand.vmem [shape: f32[1,6], index: 3, kind: input, shape index: {}]   ;;  %s1163_s4 = inlined_call_operand.vmem [shape: bf16[6,144], index: 4, kind: input, shape index: {}]   ;;  %s1164_s5 = inlined_call_operand.vmem [shape: f32[1,144], index: 5, kind: input, shape index: {}]   ;;  %s1165_s6 = inlined_call_operand.vmem [shape: bf16[144,40], index: 6, kind: input, shape index: {}]   ;;  %s1166_s7 = inlined_call_operand.vmem [shape: f32[1,40], index: 7, kind: input, shape index: {}]   ;;  %s1167_s8 = inlined_call_operand.vmem [shape: bf16[2,16,40], index: 8, kind: output, shape index: {}]  }
   0x1   :  { %s1021_s29 = smov 0  }
   0x2 LB: > { %s30_s30 = sadd.s32 1, %s965_s28  ;;  %p848_p0 = scmp.ge.s32.totalorder %s969_s29, 1  ;;  %s969_s29 = sphi %s1021_s29, %s18_s29   ;;  %s965_s28 = sphi %s1019_s28, %s1169_s28   ;;  %s961_s27 = sphi %s1017_s27, %s1168_s27  }
   0x3   : > { %p32_p1 = scmp.ge.s32.totalorder %s30_s30, 2  ;;  %p293_p2 = scmp.lt.s32.totalorder %s969_s29, 3 }
   0x5   : > { %s1171_s30 = smov (%p32_p1, %s30_s30), 0  ;;  %p294_p3 = pnand %p848_p0, %p293_p2 }
   0x6   : > { %v915_v0 = vld [vmem:[%s1161_s2] sm:$0xff] (!%p294_p3)   ;;  %v369_v1 = vlaneseq (!%p294_p3)  ;;  %v971_v2 = vmov (!%p294_p3), 0   ;;  %p341_p4 = scmp.lt.s32.totalorder (!%p294_p3), %s961_s27, 1  ;;  %v916_v3 = vld [vmem:[%s1161_s2 + $0x8] sm:$0xff] (!%p294_p3)   ;;  %v917_v5 = vld [vmem:[%s1161_s2 + $0x10] sm:$0xff] (!%p294_p3)   ;;  %vm454_vm0 = vcmask (!%p294_p3), 130048  }
   0x7   : > { %297 = sbr.rel (%p294_p3) target bundleno = 754 (0x2f2), region = 52  ;;  %458 = vmatprep.subr.bf16.mxu0 (!%p294_p3), %v971_v2  ;;  %567 = vmatprep.mubr.bf16.mxu1 (!%p294_p3), %v971_v2  ;;  %v918_v7 = vld [vmem:[%s1161_s2 + $0x18] sm:$0xff] (!%p294_p3)   ;;  %v919_v10 = vld [vmem:[%s1161_s2 + $0x20] sm:$0xff] (!%p294_p3)   ;;  %v920_v13 = vld [vmem:[%s1161_s2 + $0x28] sm:$0xff] (!%p294_p3)   ;;  %vm528_vm1 = vcmask (!%p294_p3), 1042432   ;;  %vm524_vm2 = vcmask (!%p294_p3), 48128  }
   0x8   : > { %459 = vmatpush1.bf16.msra.mxu0 (!%p294_p3), %v915_v0  ;;  %v1046_v4 = vshrl.u32 (!%p294_p3), %v369_v1, 7  ;;  %v921_v14 = vld [vmem:[%s1161_s2 + $0x30] sm:$0xff] (!%p294_p3)   ;;  %v922_v16 = vld [vmem:[%s1161_s2 + $0x38] sm:$0xff] (!%p294_p3)   ;;  %v923_v18 = vld [vmem:[%s1161_s2 + $0x40] sm:$0xff] (!%p294_p3)   ;;  %vm739_vm3 = vcmask (!%p294_p3), 322560  }
   0x9   : > { %460 = vmatprep.subr.bf16.mxu0 (!%p294_p3), %v971_v2  ;;  %v506_v20 = vld [vmem:[%s1163_s4] sm:$0x77] (!%p294_p3)  ;;  %v927_v37 = vld [vmem:[%s1165_s6 + $0x8] sm:$0xff] (!%p294_p3)   ;;  %v928_v38 = vld [vmem:[%s1165_s6 + $0x10] sm:$0xff] (!%p294_p3)  }
   0xa   : > { %v375_v6 = vsub.s32 (!%p294_p3), 1, %v1046_v4  ;;  %v1077_v15 = vsub.s32 (!%p294_p3), 0, %v1046_v4  ;;  %v866_v21 = vcombine.high (!%p294_p3), %v506_v20, %v506_v20  ;;  %v865_v22 = vcombine.low (!%p294_p3), %v506_v20, %v506_v20  ;;  %v399_v24 = vld [vmem:[%s1162_s3] sm:$0x1] (!%p294_p3)  ;;  %v929_v39 = vld [vmem:[%s1165_s6 + $0x18] sm:$0xff] (!%p294_p3)   ;;  %v931_v41 = vld [vmem:[%s1165_s6 + $0x28] sm:$0xff] (!%p294_p3)  }
   0xb   : > { %v926_v36 = vld [vmem:[%s1165_s6] sm:$0xff] (!%p294_p3)   ;;  %v932_v42 = vld [vmem:[%s1165_s6 + $0x30] sm:$0xff] (!%p294_p3)   ;;  %v933_v43 = vld [vmem:[%s1165_s6 + $0x38] sm:$0xff] (!%p294_p3)  }
   0xc   : > { %461 = vmatpush1.bf16.msra.mxu0 (!%p294_p3), %v916_v3  ;;  %867 = vmatprep.subr.msk.bf16.mxu1 (!%p294_p3), %vm528_vm1, %v866_v21  ;;  %v530_v23 = vsel (!%p294_p3), %vm528_vm1, %v865_v22, 0  ;;  %v930_v40 = vld [vmem:[%s1165_s6 + $0x20] sm:$0xff] (!%p294_p3)  }
   0xd   : > { %462 = vmatprep.subr.bf16.mxu0 (!%p294_p3), %v971_v2  ;;  %536 = vmatpush1.bf16.msra.mxu1 (!%p294_p3), %v530_v23  ;;  %v934_v44 = vld [vmem:[%s1165_s6 + $0x40] sm:$0xff] (!%p294_p3)  }
   0xe   : > { %s1173_s27 = smov (!%p341_p4, %s961_s27), 1  ;;  %690 = vmatprep.subr.bf16.mxu1 %v971_v2  ;;  %v507_v45 = vld [vmem:[%s1164_s5] sm:$0x3] }
   0xf   : > { %s851_s13 = sshll.u32 %s1173_s27, 1  ;;  %v517_v46 = vrot.slane %v507_v45, %v1077_v15  ;;  %v521_v47 = vrot.slane %v507_v45, %v375_v6  ;;  %s886_s19 = sshll.u32 %s1173_s27, 4 }
  0x10   : > { %s354_s18 = scalar_lea.vmem %s1160_s1, %s851_s13  ;;  %463 = vmatpush1.bf16.msra.mxu0 %v917_v5  ;;  %s349_s22 = scalar_lea.vmem %s1159_s0, %s886_s19 }
  0x11   : > { %v366_v8 = vld [vmem:[%s354_s18] sm:$0x3]  ;;  %464 = vmatprep.subr.bf16.mxu0 %v971_v2  ;;  %v589_v61 = vld [vmem:[%s349_s22 + $0x8] sm:$0xff]  ;;  %s887_s25 = sshll.u32 %s1173_s27, 3 }
  0x12   : > { %v367_v9 = vmul.f32 0.0625, %v366_v8  ;;  %v588_v60 = vld [vmem:[%s349_s22] sm:$0xff]  ;;  %v592_v63 = vunpack.c.l.bf16 %v589_v61  ;;  %s363_s10 = scalar_lea.vmem %s1167_s8, %s887_s25 }
  0x13   : > { %v590_v62 = vunpack.c.l.bf16 %v588_v60  ;;  %v591_v1 = vunpack.c.h.bf16 %v588_v60 }
  0x14   : > { %v376_v11 = vrot.slane %v367_v9, %v375_v6  ;;  %465 = vmatpush1.bf16.msra.mxu0 %v918_v7  ;;  %v372_v17 = vrot.slane %v367_v9, %v1077_v15 }
  0x15   : > { %466 = vmatprep.subr.bf16.mxu0 %v971_v2 }
  0x16   : > { %v380_v12 = vpack.c.bf16 %v376_v11, %v376_v11  ;;  %v379_v19 = vpack.c.bf16 %v372_v17, %v372_v17 }
  0x18   : > { %863 = vmatprep.mubr.msk.bf16.mxu0 %vm454_vm0, %v380_v12  ;;  %467 = vmatpush1.bf16.msra.mxu0 %v919_v10  ;;  %v871_v12 = vld [vmem:[%s1166_s7] ss:$0 sm:$0xff] }
  0x19   : > { %468 = vmatprep.subr.bf16.mxu0 %v971_v2 }
  0x1c   : > { %469 = vmatpush1.bf16.msra.mxu0 %v920_v13 }
  0x1d   : > { %470 = vmatprep.subr.bf16.mxu0 %v971_v2 }
  0x20   : > { %471 = vmatpush1.bf16.msra.mxu0 %v921_v14 }
  0x21   : > { %472 = vmatprep.subr.bf16.mxu0 %v971_v2 }
  0x24   : > { %473 = vmatpush1.bf16.msra.mxu0 %v922_v16 }
  0x25   : > { %474 = vmatprep.subr.bf16.mxu0 %v971_v2 }
  0x28   : > { %475 = vmatpush1.bf16.msra.mxu0 %v923_v18 }
  0x2b   : > { %491 = vmatmul.mubr.bf16.vlgmr.msra.gmra.mrb[0].mxu0 %v379_v19 }
  0xfe   : > { %v492_v25 = vpop.f32.mrb[0].mxu0 }
  0xff   : > { %v493_v26 = vadd.f32 %v492_v25, %v399_v24  ;;  %v494_v27 = vpop.f32.mrb[1].mxu0 }
 0x100   : > { %v495_v28 = vpop.f32.mrb[2].mxu0 }
 0x101   : > { %v864_v29 = vmul.f32 -1.442695, %v493_v26  ;;  %v496_v30 = vpop.f32.mrb[3].mxu0 }
 0x103   : > { %935 = vpow2.f32 %v864_v29 }
 0x10d   : > { %v936_v31 = vpop.eup %935 }
 0x10e   : > { %v501_v32 = vadd.f32 1.0, %v936_v31 }
 0x110   : > { %937 = vrcp.f32 %v501_v32 }
 0x11a   : > { %v938_v33 = vpop.eup %937 }
 0x11b   : > { %v504_v34 = vmul.f32 %v938_v33, %v493_v26 }
 0x11d   : > { %v505_v35 = vpack.c.bf16 %v504_v34, %v504_v34 }
 0x11f   : > { %868 = vmatmul.mubr.msk.bf16.vlgmr.msra.gmra.mrb[0].mxu1 %vm524_vm2, %v505_v35 }
 0x120   : > { %691 = vmatpush1.bf16.msra.mxu1 %v926_v36 }
 0x121   : > { %692 = vmatprep.subr.bf16.mxu1 %v971_v2 }
 0x124   : > { %693 = vmatpush1.bf16.msra.mxu1 %v927_v37 }
 0x125   : > { %694 = vmatprep.subr.bf16.mxu1 %v971_v2 }
 0x128   : > { %695 = vmatpush1.bf16.msra.mxu1 %v928_v38 }
 0x129   : > { %696 = vmatprep.subr.bf16.mxu1 %v971_v2 }
 0x12c   : > { %697 = vmatpush1.bf16.msra.mxu1 %v929_v39 }
 0x12d   : > { %698 = vmatprep.subr.bf16.mxu1 %v971_v2 }
 0x130   : > { %699 = vmatpush1.bf16.msra.mxu1 %v930_v40 }
 0x131   : > { %700 = vmatprep.subr.bf16.mxu1 %v971_v2 }
 0x134   : > { %701 = vmatpush1.bf16.msra.mxu1 %v931_v41 }
 0x135   : > { %702 = vmatprep.subr.bf16.mxu1 %v971_v2 }
 0x138   : > { %703 = vmatpush1.bf16.msra.mxu1 %v932_v42 }
 0x139   : > { %704 = vmatprep.subr.bf16.mxu1 %v971_v2 }
 0x13c   : > { %705 = vmatpush1.bf16.msra.mxu1 %v933_v43 }
 0x13d   : > { %706 = vmatprep.subr.bf16.mxu1 %v971_v2  ;;  %v593_v2 = vunpack.c.h.bf16 %v589_v61 }
 0x140   : > { %707 = vmatpush1.bf16.msra.mxu1 %v934_v44 }
 0x1f2   : > { %v569_v48 = vpop.f32.mrb[0].mxu1 }
 0x1f3   : > { %v570_v49 = vadd.f32 %v569_v48, %v517_v46  ;;  %v571_v50 = vpop.f32.mrb[1].mxu1 }
 0x1f4   : > { %v572_v51 = vadd.f32 %v571_v50, %v521_v47  ;;  %v573_v52 = vpop.f32.mrb[2].mxu1 }
 0x1f5   : > { %v869_v53 = vmul.f32 -1.442695, %v570_v49  ;;  %v574_v54 = vpop.f32.mrb[3].mxu1 }
 0x1f6   : > { %v870_v55 = vmul.f32 -1.442695, %v572_v51 }
 0x1f7   : > { %939 = vpow2.f32 %v869_v53 }
 0x1f8   : > { %941 = vpow2.f32 %v870_v55 }
 0x201   : > { %v940_v56 = vpop.eup %939 }
 0x202   : > { %v942_v57 = vpop.eup %941  ;;  %v582_v58 = vadd.f32 1.0, %v940_v56 }
 0x203   : > { %v583_v59 = vadd.f32 1.0, %v942_v57 }
 0x204   : > { %943 = vrcp.f32 %v582_v58 }
 0x205   : > { %945 = vrcp.f32 %v583_v59 }
 0x20e   : > { %v944_v0 = vpop.eup %943 }
 0x20f   : > { %v946_v3 = vpop.eup %945  ;;  %v597_v4 = vrot.slane %v944_v0, %v1077_v15 }
 0x210   : > { %v601_v5 = vrot.slane %v946_v3, %v1077_v15 }
 0x211   : > { %v602_v6 = vmul.f32 %v597_v4, %v590_v62  ;;  %v604_v7 = vmul.f32 %v597_v4, %v592_v63 }
 0x212   : > { %v603_v8 = vmul.f32 %v601_v5, %v591_v1  ;;  %v605_v9 = vmul.f32 %v601_v5, %v593_v2 }
 0x213   : > { %v606_v11 = vpack.c.bf16 %v604_v7, %v602_v6 }
 0x214   : > { %v607_v10 = vpack.c.bf16 %v605_v9, %v603_v8 }
 0x216   : > { %881 = vmatprep.mubr.msk.bf16.mxu1 %vm454_vm0, %v607_v10 }
 0x217   : > { %723 = vmatmul.mubr.bf16.vlgmr.msra.gmra.mrb[4].mxu1 %v606_v11 }
 0x2ea   : > { %v724_v13 = vpop.f32.mrb[4].mxu1 }
 0x2eb   : > { %v725_v14 = vadd.f32 %v871_v12, %v724_v13  ;;  %v726_v16 = vpop.f32.mrb[5].mxu1 }
 0x2ec   : > { %v727_v15 = vpop.f32.mrb[6].mxu1 }
 0x2ed   : > { %v888_v17 = vpack.c.bf16 %v725_v14, %v725_v14  ;;  %v728_v18 = vadd.f32 %v871_v12, %v727_v15  ;;  %v729_v19 = vpop.f32.mrb[7].mxu1 }
 0x2ef   : > { %740 = vst.msk [vmem:[%s363_s10] sm:$0xf] %vm739_vm3, %v888_v17  ;;  %v889_v20 = vpack.c.bf16 %v728_v18, %v728_v18 }
 0x2f1   : > { %741 = vst.msk [vmem:[%s363_s10 + $0x4] sm:$0xf] %vm739_vm3, %v889_v20 }
 0x2f2 PF: > { %s18_s29 = sadd.s32 1, %s969_s29   ;;  %s1168_s27 = smov %s965_s28 }
 0x2f3   : > { %p15_p5 = scmp.ge.s32.totalorder %s18_s29, 4   ;;  %s1169_s28 = smov %s1171_s30 }
 0x2f5   :  { %17 = sbr.rel (!%p15_p5) target bundleno = 2 (0x2), region = 85 }

// kernel: forward.24
= control target key start
LH: loop header
LB: loop body
LE: loop exit
PB: predicated region body
PF: predicated region fallthrough
CT: control target
= control target key end

     0   :  { %s1411_s15 = smov 0   ;;  %s1413_s16 = smov 0   ;;  %s1894_s0 = inlined_call_operand.vmem [shape: bf16[8,6,6,144], index: 0, kind: input, shape index: {}]   ;;  %s1895_s1 = inlined_call_operand.vmem [shape: f32[25,1,1,144], index: 1, kind: input, shape index: {}]   ;;  %s1896_s2 = inlined_call_operand.vmem [shape: f32[1,144], index: 2, kind: input, shape index: {}]   ;;  %s1897_s3 = inlined_call_operand.vmem [shape: bf16[2,4,4,144], index: 3, kind: output, shape index: {0}]   ;;  %s1898_s4 = inlined_call_operand.vmem [shape: f32[2,1,144], index: 4, kind: output, shape index: {1}]  }
   0x1   :  { %s1415_s17 = smov 0   ;;  %s1417_s18 = smov 0  }
   0x2   :  { %s1419_s19 = smov 0  }
   0x3 LB: > { %s24_s20 = sadd.s32 1, %s1373_s17  ;;  %s27_s21 = sadd.s32 1, %s1377_s18  ;;  %s1381_s19 = sphi %s1419_s19, %s15_s19   ;;  %s1377_s18 = sphi %s1417_s18, %s1945_s18   ;;  %s1373_s17 = sphi %s1415_s17, %s1944_s17   ;;  %s1369_s16 = sphi %s1413_s16, %s1943_s16   ;;  %s1365_s15 = sphi %s1411_s15, %s1942_s15  }
   0x4   : > { %p25_p0 = scmp.ge.s32.totalorder %s24_s20, 2  ;;  %p1242_p1 = scmp.ge.s32.totalorder %s1381_s19, 1 }
   0x5   : > { %p181_p2 = scmp.lt.s32.totalorder %s1381_s19, 5 }
   0x6   : > { %s1947_s20 = smov (%p25_p0, %s24_s20), 0  ;;  %s1949_s21 = smov (!%p25_p0, %s27_s21), %s1377_s18 }
   0x7   : > { %p182_p3 = pnand %p1242_p1, %p181_p2  ;;  %p29_p4 = scmp.ge.s32.totalorder %s1949_s21, 2 }
   0x9   : > { %s1951_s21 = smov (%p29_p4, %s1949_s21), 0  ;;  %185 = sbr.rel (%p182_p3) target bundleno = 173 (0xad), region = 32 }
  0x10   : > { %s1243_s22 = sshll.u32 %s1369_s16, 2  ;;  %v1899_v0 = vlaneseq  ;;  %p225_p6 = scmp.lt.s32.totalorder %s1369_s16, 1  ;;  %v240_v1 = vld [vmem:[%s1895_s1] sm:$0x3]  ;;  %v241_v3 = vld [vmem:[%s1895_s1 + $0x2] sm:$0x3] }
  0x11   : > { %p218_p5 = scmp.lt.s32.totalorder %s1243_s22, 7  ;;  %v242_v4 = vld [vmem:[%s1895_s1 + $0x4] sm:$0x3]  ;;  %v243_v5 = vld [vmem:[%s1895_s1 + $0x6] sm:$0x3]  ;;  %s1279_s24 = sshll.u32 %s1365_s15, 4 }
  0x12   : > { %v1447_v2 = vshrl.u32 %v1899_v0, 7  ;;  %s1955_s16 = smov (!%p225_p6, %s1369_s16), 1  ;;  %v244_v7 = vld [vmem:[%s1895_s1 + $0x8] sm:$0x3]  ;;  %v245_v8 = vld [vmem:[%s1895_s1 + $0xa] sm:$0x3] }
  0x13   : > { %s1953_s22 = smov (!%p218_p5, %s1243_s22), 7  ;;  %v246_v10 = vld [vmem:[%s1895_s1 + $0xc] sm:$0x3]  ;;  %v247_v11 = vld [vmem:[%s1895_s1 + $0xe] sm:$0x3]  ;;  %s1249_s25 = sshll.u32 %s1955_s16, 1 }
  0x14   : > { %1911 = vst [vmem:[#allocation2_spill] sm:$0xff] %v1447_v2  ;;  %s1283_s5 = smul.u32 48, %s1953_s22  ;;  %v1459_v6 = vsub.s32 0, %v1447_v2  ;;  %v1470_v9 = vsub.s32 1, %v1447_v2  ;;  %v248_v16 = vld [vmem:[%s1895_s1 + $0x10] sm:$0x3]  ;;  %s1516_s6 = scalar_lea.vmem %s1898_s4, %s1249_s25 }
  0x15   : > { %v249_v17 = vld [vmem:[%s1895_s1 + $0x12] sm:$0x3]  ;;  %v250_v22 = vld [vmem:[%s1895_s1 + $0x14] sm:$0x3]  ;;  %v251_v23 = vld [vmem:[%s1895_s1 + $0x16] sm:$0x3] }
  0x16   : > { %1912 = vst [vmem:[#allocation3_spill] sm:$0xff] %v1470_v9  ;;  %s222_s12 = scalar_lea.vmem %s1894_s0, %s1283_s5  ;;  %v1483_v12 = vrot.slane %v240_v1, %v1459_v6  ;;  %v1486_v13 = vrot.slane %v241_v3, %v1459_v6  ;;  %v1489_v14 = vrot.slane %v242_v4, %v1459_v6  ;;  %v1492_v15 = vrot.slane %v243_v5, %v1459_v6  ;;  %s1245_s29 = sshll.u32 %s1365_s15, 1 }
  0x17   : > { %v1502_v18 = vrot.slane %v240_v1, %v1470_v9  ;;  %v1505_v19 = vrot.slane %v241_v3, %v1470_v9  ;;  %v1508_v20 = vrot.slane %v242_v4, %v1470_v9  ;;  %v1511_v21 = vrot.slane %v243_v5, %v1470_v9  ;;  %s1536_s11 = scalar_lea.vmem %s222_s12, %s1279_s24  ;;  %p227_p7 = scmp.lt.s32.totalorder %s1245_s29, 3 }
  0x18   : > { %v1525_v24 = vrot.slane %v244_v7, %v1459_v6  ;;  %v1528_v25 = vrot.slane %v244_v7, %v1470_v9  ;;  %v1531_v26 = vrot.slane %v245_v8, %v1459_v6  ;;  %v1534_v27 = vrot.slane %v245_v8, %v1470_v9  ;;  %v269_v36 = vld [vmem:[%s1536_s11] sm:$0x77]  ;;  %v270_v37 = vld [vmem:[%s1536_s11 + $0x8] sm:$0x77]  ;;  %v271_v38 = vld [vmem:[%s1536_s11 + $0x10] sm:$0x77] }
  0x19   : > { %v1539_v28 = vrot.slane %v246_v10, %v1459_v6  ;;  %v1542_v29 = vrot.slane %v246_v10, %v1470_v9  ;;  %v1545_v30 = vrot.slane %v247_v11, %v1459_v6  ;;  %v1548_v31 = vrot.slane %v247_v11, %v1470_v9  ;;  %v272_v43 = vld [vmem:[%s1536_s11 + $0x18] sm:$0x77]  ;;  %v1255_v48 = vld [vmem:[%s1536_s11 + $0x30] sm:$0x77]  ;;  %v1257_v54 = vld [vmem:[%s1536_s11 + $0x40] sm:$0x77] }
  0x1a   : > { %v1551_v32 = vrot.slane %v248_v16, %v1459_v6  ;;  %v1554_v33 = vrot.slane %v248_v16, %v1470_v9  ;;  %v1557_v34 = vrot.slane %v249_v17, %v1459_v6  ;;  %v1560_v35 = vrot.slane %v249_v17, %v1470_v9  ;;  %v1256_v49 = vld [vmem:[%s1536_s11 + $0x38] sm:$0x77]  ;;  %v1598_v55 = vld [vmem:[%s1536_s11 + $0x48] sm:$0x77]  ;;  %v1261_v56 = vld [vmem:[%s1536_s11 + $0x60] sm:$0x77] }
  0x1b   : > { %v1566_v39 = vrot.slane %v250_v22, %v1459_v6  ;;  %v1569_v40 = vrot.slane %v250_v22, %v1470_v9  ;;  %v1572_v41 = vrot.slane %v251_v23, %v1459_v6  ;;  %v1575_v42 = vrot.slane %v251_v23, %v1470_v9  ;;  %1915 = vst [vmem:[#allocation6_spill] sm:$0xff] %v1598_v55  ;;  %v1262_v61 = vld [vmem:[%s1536_s11 + $0x68] sm:$0x77]  ;;  %v1263_v62 = vld [vmem:[%s1536_s11 + $0x70] sm:$0x77]  ;;  %s1957_s29 = smov (!%p227_p7, %s1245_s29), 3 }
  0x1c   : > { %v1578_v44 = vunpack.c.l.bf16 %v269_v36  ;;  %v1580_v45 = vunpack.c.h.bf16 %v269_v36  ;;  %v1582_v46 = vunpack.c.l.bf16 %v270_v37  ;;  %v1584_v47 = vunpack.c.h.bf16 %v270_v37  ;;  %v1608_v63 = vld [vmem:[%s1536_s11 + $0x90] sm:$0x77]  ;;  %v1267_v7 = vld [vmem:[%s1536_s11 + $0x98] sm:$0x77]  ;;  %v1618_v8 = vld [vmem:[%s1536_s11 + $0xa0] sm:$0x77] }
  0x1d   : > { %v1588_v50 = vunpack.c.l.bf16 %v271_v38  ;;  %v1590_v51 = vunpack.c.h.bf16 %v271_v38  ;;  %v1592_v52 = vunpack.c.l.bf16 %v272_v43  ;;  %v1594_v53 = vunpack.c.h.bf16 %v272_v43  ;;  %1916 = vst [vmem:[#allocation7_spill] sm:$0xff] %v1618_v8  ;;  %s1246_s30 = sshll.u32 %s1957_s29, 1  ;;  %s1247_s5 = sshll.u32 %s1955_s16, 3 }
  0x1e   : > { %v288_v57 = vunpack.c.l.bf16 %v1255_v48  ;;  %v289_v58 = vunpack.c.h.bf16 %v1255_v48  ;;  %v1601_v59 = vunpack.c.l.bf16 %v1256_v49  ;;  %v1603_v60 = vunpack.c.h.bf16 %v1256_v49  ;;  %s231_s7 = sadd.s32 %s1247_s5, %s1246_s30  ;;  %p1275_p8 = scmp.ne.s32.totalorder %s1365_s15, 0 }
  0x1f   : > { %1913 = vst [vmem:[#allocation4_spill] sm:$0xff] %v1592_v52  ;;  %1914 = vst [vmem:[#allocation5_spill] sm:$0xff] %v1594_v53  ;;  %v1610_v1 = vunpack.c.l.bf16 %v1257_v54  ;;  %v1612_v3 = vunpack.c.h.bf16 %v1257_v54  ;;  %v1620_v10 = vunpack.c.l.bf16 %v1261_v56  ;;  %v1622_v11 = vunpack.c.h.bf16 %v1261_v56  ;;  %s1248_s8 = sshll.u32 %s231_s7, 1 }
  0x20   : > { %v1624_v16 = vunpack.c.l.bf16 %v1262_v61  ;;  %v1626_v17 = vunpack.c.h.bf16 %v1262_v61  ;;  %v1628_v22 = vunpack.c.l.bf16 %v1263_v62  ;;  %v1630_v23 = vunpack.c.h.bf16 %v1263_v62  ;;  %s233_s16 = scalar_lea.vmem %s1897_s3, %s1248_s8 }
  0x21   : > { %v1634_v38 = vunpack.c.l.bf16 %v1267_v7  ;;  %v1636_v43 = vunpack.c.h.bf16 %v1267_v7  ;;  %v331_v54 = vmul.f32 %v1483_v12, %v1578_v44  ;;  %v332_v56 = vmul.f32 %v1502_v18, %v1580_v45 }
  0x22   : > { %1917 = vst [vmem:[#allocation8_spill] sm:$0xff] %v1628_v22  ;;  %1918 = vst [vmem:[#allocation9_spill] sm:$0xff] %v1630_v23  ;;  %v333_v61 = vmul.f32 %v1483_v12, %v1582_v46  ;;  %v334_v62 = vmul.f32 %v1502_v18, %v1584_v47  ;;  %v350_v0 = vmul.f32 %v1486_v13, %v288_v57  ;;  %vm1044_vm0 = vcmask 1041408  }
  0x23   : > { %v351_v7 = vmul.f32 %v1505_v19, %v289_v58  ;;  %v352_v5 = vmul.f32 %v1486_v13, %v1601_v59  ;;  %v353_v4 = vmul.f32 %v1505_v19, %v1603_v60  ;;  %v369_v49 = vmul.f32 %v1489_v14, %v1578_v44 }
  0x24   : > { %v370_v48 = vmul.f32 %v1508_v20, %v1580_v45  ;;  %v371_v12 = vmul.f32 %v1489_v14, %v1582_v46  ;;  %v372_v18 = vmul.f32 %v1508_v20, %v1584_v47  ;;  %v354_v37 = vadd.f32 %v350_v0, %v331_v54 }
  0x25   : > { %v355_v36 = vadd.f32 %v351_v7, %v332_v56  ;;  %v356_v2 = vadd.f32 %v352_v5, %v333_v61  ;;  %v357_v55 = vadd.f32 %v353_v4, %v334_v62  ;;  %v377_v13 = vrot.slane %v369_v49, 1 }
  0x26   : > { %v378_v53 = vrot.slane %v370_v48, 1  ;;  %v379_v52 = vrot.slane %v371_v12, 1  ;;  %v380_v19 = vrot.slane %v372_v18, 1  ;;  %v400_v8 = vmul.f32 %v1492_v15, %v288_v57 }
  0x27   : > { %v401_v23 = vmul.f32 %v1511_v21, %v289_v58  ;;  %v402_v22 = vmul.f32 %v1492_v15, %v1601_v59  ;;  %v403_v14 = vmul.f32 %v1511_v21, %v1603_v60  ;;  %v385_v9 = vadd.f32 %v377_v13, %v354_v37 }
  0x28   : > { %v386_v20 = vadd.f32 %v378_v53, %v355_v36  ;;  %v387_v0 = vadd.f32 %v379_v52, %v356_v2  ;;  %v388_v54 = vadd.f32 %v380_v19, %v357_v55  ;;  %v408_v5 = vrot.slane %v400_v8, 1 }
  0x29   : > { %v409_v4 = vrot.slane %v401_v23, 1  ;;  %v410_v49 = vrot.slane %v402_v22, 1  ;;  %v411_v48 = vrot.slane %v403_v14, 1  ;;  %v431_v56 = vmul.f32 %v1525_v24, %v1578_v44 }
  0x2a   : > { %v432_v57 = vmul.f32 %v1528_v25, %v1580_v45  ;;  %v433_v15 = vmul.f32 %v1525_v24, %v1582_v46  ;;  %v434_v21 = vmul.f32 %v1528_v25, %v1584_v47  ;;  %v416_v58 = vadd.f32 %v408_v5, %v385_v9 }
  0x2b   : > { %v417_v53 = vadd.f32 %v409_v4, %v386_v20  ;;  %v418_v2 = vadd.f32 %v410_v49, %v387_v0  ;;  %v419_v52 = vadd.f32 %v411_v48, %v388_v54  ;;  %v439_v55 = vrot.slane %v431_v56, 2 }
  0x2c   : > { %v440_v8 = vrot.slane %v432_v57, 2  ;;  %v441_v22 = vrot.slane %v433_v15, 2  ;;  %v442_v23 = vrot.slane %v434_v21, 2  ;;  %v462_v44 = vmul.f32 %v1531_v26, %v1620_v10 }
  0x2d   : > { %v463_v45 = vmul.f32 %v1534_v27, %v1622_v11  ;;  %v464_v24 = vmul.f32 %v1531_v26, %v1624_v16  ;;  %v465_v25 = vmul.f32 %v1534_v27, %v1626_v17  ;;  %v447_v9 = vadd.f32 %v439_v55, %v416_v58 }
  0x2e   : > { %v448_v36 = vadd.f32 %v440_v8, %v417_v53  ;;  %v449_v37 = vadd.f32 %v441_v22, %v418_v2  ;;  %v450_v61 = vadd.f32 %v442_v23, %v419_v52  ;;  %v1919_v62 = vunpack.c.l.bf16 %v1608_v63 }
  0x2f   : > { %v1920_v12 = vunpack.c.h.bf16 %v1608_v63  ;;  %v483_v13 = vmul.f32 %v1539_v28, %v1634_v38  ;;  %v484_v26 = vmul.f32 %v1542_v29, %v1636_v43  ;;  %v466_v19 = vadd.f32 %v462_v44, %v447_v9 }
  0x30   : > { %v481_v7 = vmul.f32 %v1539_v28, %v1919_v62  ;;  %v467_v27 = vadd.f32 %v463_v45, %v448_v36  ;;  %v468_v14 = vadd.f32 %v464_v24, %v449_v37  ;;  %v469_v20 = vadd.f32 %v465_v25, %v450_v61 }
  0x31   : > { %v482_v18 = vmul.f32 %v1542_v29, %v1920_v12  ;;  %v500_v0 = vmul.f32 %v1545_v30, %v1620_v10  ;;  %v501_v54 = vmul.f32 %v1548_v31, %v1622_v11  ;;  %v502_v5 = vmul.f32 %v1545_v30, %v1624_v16 }
  0x32   : > { %v503_v4 = vmul.f32 %v1548_v31, %v1626_v17  ;;  %v485_v28 = vadd.f32 %v481_v7, %v466_v19  ;;  %v487_v48 = vadd.f32 %v483_v13, %v468_v14  ;;  %v488_v29 = vadd.f32 %v484_v26, %v469_v20  ;;  %v252_v26 = vld [vmem:[%s1895_s1 + $0x18] sm:$0x3]  ;;  %v253_v19 = vld [vmem:[%s1895_s1 + $0x1a] sm:$0x3] }
  0x33   : > { %v486_v49 = vadd.f32 %v482_v18, %v467_v27  ;;  %v508_v56 = vrot.slane %v500_v0, 1  ;;  %v509_v57 = vrot.slane %v501_v54, 1  ;;  %v510_v15 = vrot.slane %v502_v5, 1 }
  0x34   : > { %v511_v21 = vrot.slane %v503_v4, 1  ;;  %v1921_v58 = vmov %v1919_v62  ;;  %v1922_v2 = vmov %v1920_v12  ;;  %v533_v30 = vmul.f32 %v1551_v32, %v1634_v38 }
  0x35   : > { %v531_v53 = vmul.f32 %v1551_v32, %v1921_v58  ;;  %v532_v52 = vmul.f32 %v1554_v33, %v1922_v2  ;;  %v534_v31 = vmul.f32 %v1554_v33, %v1636_v43  ;;  %v516_v55 = vadd.f32 %v508_v56, %v485_v28  ;;  %v1923_v56 = vld [vmem:[#allocation3_spill] sm:$0xff] }
  0x36   : > { %v517_v8 = vadd.f32 %v509_v57, %v486_v49  ;;  %v518_v22 = vadd.f32 %v510_v15, %v487_v48  ;;  %v519_v23 = vadd.f32 %v511_v21, %v488_v29  ;;  %v541_v24 = vrot.slane %v533_v30, 1 }
  0x37   : > { %v539_v44 = vrot.slane %v531_v53, 1  ;;  %v540_v45 = vrot.slane %v532_v52, 1  ;;  %v542_v25 = vrot.slane %v534_v31, 1  ;;  %v562_v9 = vmul.f32 %v1557_v34, %v1620_v10 }
  0x38   : > { %v563_v63 = vmul.f32 %v1560_v35, %v1622_v11  ;;  %v564_v32 = vmul.f32 %v1557_v34, %v1624_v16  ;;  %v565_v33 = vmul.f32 %v1560_v35, %v1626_v17  ;;  %v549_v61 = vadd.f32 %v541_v24, %v518_v22 }
  0x39   : > { %v547_v36 = vadd.f32 %v539_v44, %v516_v55  ;;  %v548_v37 = vadd.f32 %v540_v45, %v517_v8  ;;  %v550_v62 = vadd.f32 %v542_v25, %v519_v23  ;;  %v570_v7 = vrot.slane %v562_v9, 2  ;;  %v254_v55 = vld [vmem:[%s1895_s1 + $0x1c] sm:$0x3]  ;;  %v255_v45 = vld [vmem:[%s1895_s1 + $0x1e] sm:$0x3] }
  0x3a   : > { %v571_v12 = vrot.slane %v563_v63, 2  ;;  %v572_v18 = vrot.slane %v564_v32, 2  ;;  %v573_v13 = vrot.slane %v565_v33, 2  ;;  %v593_v10 = vmul.f32 %v1566_v39, %v1582_v46 }
  0x3b   : > { %v594_v11 = vmul.f32 %v1569_v40, %v1584_v47  ;;  %v595_v34 = vmul.f32 %v1566_v39, %v1588_v50  ;;  %v596_v35 = vmul.f32 %v1569_v40, %v1590_v51  ;;  %v578_v27 = vadd.f32 %v570_v7, %v547_v36 }
  0x3c   : > { %v579_v14 = vadd.f32 %v571_v12, %v548_v37  ;;  %v580_v20 = vadd.f32 %v572_v18, %v549_v61  ;;  %v581_v0 = vadd.f32 %v573_v13, %v550_v62  ;;  %v612_v54 = vmul.f32 %v1572_v41, %v1601_v59 }
  0x3d   : > { %v613_v39 = vmul.f32 %v1575_v42, %v1603_v60  ;;  %v614_v40 = vmul.f32 %v1572_v41, %v1610_v1  ;;  %v615_v5 = vmul.f32 %v1575_v42, %v1612_v3  ;;  %v597_v4 = vadd.f32 %v593_v10, %v578_v27 }
  0x3e   : > { %v598_v28 = vadd.f32 %v594_v11, %v579_v14  ;;  %v599_v49 = vadd.f32 %v595_v34, %v580_v20  ;;  %v600_v48 = vadd.f32 %v596_v35, %v581_v0  ;;  %v624_v29 = vrot.slane %v252_v26, %v1459_v6 }
  0x3f   : > { %v628_v57 = vrot.slane %v252_v26, %v1923_v56  ;;  %v655_v15 = vrot.slane %v253_v19, %v1459_v6  ;;  %v659_v21 = vrot.slane %v253_v19, %v1923_v56  ;;  %v616_v58 = vadd.f32 %v612_v54, %v597_v4  ;;  %v256_v26 = vld [vmem:[%s1895_s1 + $0x20] sm:$0x3]  ;;  %v257_v19 = vld [vmem:[%s1895_s1 + $0x22] sm:$0x3]  ;;  %v1925_v4 = vld [vmem:[#allocation9_spill] sm:$0xff] }
  0x40   : > { %v617_v53 = vadd.f32 %v613_v39, %v598_v28  ;;  %v618_v2 = vadd.f32 %v614_v40, %v599_v49  ;;  %v619_v52 = vadd.f32 %v615_v5, %v600_v48  ;;  %v631_v41 = vmul.f32 %v624_v29, %v1582_v46  ;;  %v1924_v40 = vld [vmem:[#allocation8_spill] sm:$0xff] }
  0x41   : > { %v632_v42 = vmul.f32 %v628_v57, %v1584_v47  ;;  %v633_v30 = vmul.f32 %v624_v29, %v1588_v50  ;;  %v634_v31 = vmul.f32 %v628_v57, %v1590_v51  ;;  %v662_v8 = vmul.f32 %v655_v15, %v1601_v59 }
  0x42   : > { %v663_v22 = vmul.f32 %v659_v21, %v1603_v60  ;;  %v664_v23 = vmul.f32 %v655_v15, %v1610_v1  ;;  %v665_v44 = vmul.f32 %v659_v21, %v1612_v3  ;;  %v639_v24 = vrot.slane %v631_v41, 1 }
  0x43   : > { %v640_v25 = vrot.slane %v632_v42, 1  ;;  %v641_v9 = vrot.slane %v633_v30, 1  ;;  %v642_v63 = vrot.slane %v634_v31, 1  ;;  %v670_v32 = vrot.slane %v662_v8, 1  ;;  %v1926_v30 = vld [vmem:[#allocation7_spill] sm:$0xff] }
  0x44   : > { %v671_v33 = vrot.slane %v663_v22, 1  ;;  %v672_v36 = vrot.slane %v664_v23, 1  ;;  %v673_v37 = vrot.slane %v665_v44, 1  ;;  %v647_v61 = vadd.f32 %v639_v24, %v616_v58 }
  0x45   : > { %v648_v59 = vadd.f32 %v640_v25, %v617_v53  ;;  %v649_v62 = vadd.f32 %v641_v9, %v618_v2  ;;  %v650_v60 = vadd.f32 %v642_v63, %v619_v52  ;;  %v686_v7 = vrot.slane %v254_v55, %v1459_v6  ;;  %v258_v25 = vld [vmem:[%s1895_s1 + $0x24] sm:$0x3]  ;;  %v259_v9 = vld [vmem:[%s1895_s1 + $0x26] sm:$0x3] }
  0x46   : > { %v690_v12 = vrot.slane %v254_v55, %v1923_v56  ;;  %v717_v18 = vrot.slane %v255_v45, %v1459_v6  ;;  %v721_v13 = vrot.slane %v255_v45, %v1923_v56  ;;  %v678_v10 = vadd.f32 %v670_v32, %v647_v61 }
  0x47   : > { %v679_v11 = vadd.f32 %v671_v33, %v648_v59  ;;  %v680_v34 = vadd.f32 %v672_v36, %v649_v62  ;;  %v681_v35 = vadd.f32 %v673_v37, %v650_v60  ;;  %v693_v27 = vmul.f32 %v686_v7, %v1582_v46 }
  0x48   : > { %v694_v14 = vmul.f32 %v690_v12, %v1584_v47  ;;  %v695_v20 = vmul.f32 %v686_v7, %v1588_v50  ;;  %v696_v0 = vmul.f32 %v690_v12, %v1590_v51  ;;  %v724_v54 = vmul.f32 %v717_v18, %v1624_v16 }
  0x49   : > { %v725_v39 = vmul.f32 %v721_v13, %v1626_v17  ;;  %v726_v5 = vmul.f32 %v717_v18, %v1924_v40  ;;  %v727_v28 = vmul.f32 %v721_v13, %v1925_v4  ;;  %v701_v49 = vrot.slane %v693_v27, 2 }
  0x4a   : > { %v702_v48 = vrot.slane %v694_v14, 2  ;;  %v703_v29 = vrot.slane %v695_v20, 2  ;;  %v704_v57 = vrot.slane %v696_v0, 2  ;;  %v736_v46 = vrot.slane %v256_v26, %v1459_v6 }
  0x4b   : > { %v740_v47 = vrot.slane %v256_v26, %v1923_v56  ;;  %v755_v15 = vrot.slane %v257_v19, %v1459_v6  ;;  %v759_v21 = vrot.slane %v257_v19, %v1923_v56  ;;  %v709_v58 = vadd.f32 %v701_v49, %v678_v10 }
  0x4c   : > { %v710_v53 = vadd.f32 %v702_v48, %v679_v11  ;;  %v711_v2 = vadd.f32 %v703_v29, %v680_v34  ;;  %v712_v52 = vadd.f32 %v704_v57, %v681_v35  ;;  %v743_v41 = vmul.f32 %v736_v46, %v1634_v38 }
  0x4d   : > { %v744_v42 = vmul.f32 %v740_v47, %v1636_v43  ;;  %v1927_v31 = vunpack.c.l.bf16 %v1926_v30  ;;  %v1928_v8 = vunpack.c.h.bf16 %v1926_v30  ;;  %v728_v23 = vadd.f32 %v724_v54, %v709_v58 }
  0x4e   : > { %v729_v44 = vadd.f32 %v725_v39, %v710_v53  ;;  %v730_v45 = vadd.f32 %v726_v5, %v711_v2  ;;  %v731_v24 = vadd.f32 %v727_v28, %v712_v52  ;;  %v762_v63 = vmul.f32 %v755_v15, %v1624_v16  ;;  %v260_v28 = vld [vmem:[%s1895_s1 + $0x28] sm:$0x3] }
  0x4f   : > { %v745_v55 = vmul.f32 %v736_v46, %v1927_v31  ;;  %v746_v22 = vmul.f32 %v740_v47, %v1928_v8  ;;  %v763_v32 = vmul.f32 %v759_v21, %v1626_v17  ;;  %v764_v33 = vmul.f32 %v755_v15, %v1924_v40 }
  0x50   : > { %v765_v36 = vmul.f32 %v759_v21, %v1925_v4  ;;  %v747_v37 = vadd.f32 %v743_v41, %v728_v23  ;;  %v748_v61 = vadd.f32 %v744_v42, %v729_v44  ;;  %v770_v60 = vrot.slane %v762_v63, 1  ;;  %v262_v23 = vld [vmem:[%s1895_s1 + $0x2c] sm:$0x3]  ;;  %v263_v44 = vld [vmem:[%s1895_s1 + $0x2e] sm:$0x3]  ;;  %v1932_v63 = vld [vmem:[#allocation5_spill] sm:$0xff] }
  0x51   : > { %v749_v59 = vadd.f32 %v745_v55, %v730_v45  ;;  %v750_v62 = vadd.f32 %v746_v22, %v731_v24  ;;  %v771_v7 = vrot.slane %v763_v32, 1  ;;  %v772_v12 = vrot.slane %v764_v33, 1 }
  0x52   : > { %v773_v18 = vrot.slane %v765_v36, 1  ;;  %v786_v13 = vrot.slane %v258_v25, %v1459_v6  ;;  %v790_v10 = vrot.slane %v258_v25, %v1923_v56  ;;  %v817_v11 = vrot.slane %v259_v9, %v1459_v6  ;;  %v1931_v25 = vld [vmem:[#allocation4_spill] sm:$0xff] }
  0x53   : > { %v821_v34 = vrot.slane %v259_v9, %v1923_v56  ;;  %v778_v35 = vadd.f32 %v770_v60, %v747_v37  ;;  %v779_v26 = vadd.f32 %v771_v7, %v748_v61  ;;  %v780_v19 = vadd.f32 %v772_v12, %v749_v59  ;;  %v1933_v37 = vld [vmem:[#allocation6_spill] sm:$0xff] }
  0x54   : > { %v781_v27 = vadd.f32 %v773_v18, %v750_v62  ;;  %v793_v14 = vmul.f32 %v786_v13, %v1634_v38  ;;  %v794_v20 = vmul.f32 %v790_v10, %v1636_v43  ;;  %v1929_v0 = vmov %v1927_v31  ;;  %v261_v43 = vld [vmem:[%s1895_s1 + $0x2a] sm:$0x3] }
  0x55   : > { %v795_v54 = vmul.f32 %v786_v13, %v1929_v0  ;;  %v1930_v39 = vmov %v1928_v8  ;;  %v824_v49 = vmul.f32 %v817_v11, %v1624_v16  ;;  %v825_v48 = vmul.f32 %v821_v34, %v1626_v17 }
  0x56   : > { %v796_v5 = vmul.f32 %v790_v10, %v1930_v39  ;;  %v826_v29 = vmul.f32 %v817_v11, %v1924_v40  ;;  %v827_v38 = vmul.f32 %v821_v34, %v1925_v4  ;;  %v801_v57 = vrot.slane %v793_v14, 1 }
  0x57   : > { %v802_v46 = vrot.slane %v794_v20, 1  ;;  %v803_v47 = vrot.slane %v795_v54, 1  ;;  %v832_v21 = vrot.slane %v824_v49, 2  ;;  %v833_v58 = vrot.slane %v825_v48, 2 }
  0x58   : > { %v804_v15 = vrot.slane %v796_v5, 1  ;;  %v834_v53 = vrot.slane %v826_v29, 2  ;;  %v835_v2 = vrot.slane %v827_v38, 2  ;;  %v809_v52 = vadd.f32 %v801_v57, %v778_v35 }
  0x59   : > { %v810_v16 = vadd.f32 %v802_v46, %v779_v26  ;;  %v811_v41 = vadd.f32 %v803_v47, %v780_v19  ;;  %v848_v40 = vrot.slane %v260_v28, %v1459_v6  ;;  %v852_v4 = vrot.slane %v260_v28, %v1923_v56 }
  0x5a   : > { %v812_v17 = vadd.f32 %v804_v15, %v781_v27  ;;  %v867_v42 = vrot.slane %v261_v43, %v1459_v6  ;;  %v871_v30 = vrot.slane %v261_v43, %v1923_v56  ;;  %v840_v31 = vadd.f32 %v832_v21, %v809_v52  ;;  %v264_v43 = vld [vmem:[%s1895_s1 + $0x30] sm:$0x3] }
  0x5b   : > { %v841_v55 = vadd.f32 %v833_v58, %v810_v16  ;;  %v842_v8 = vadd.f32 %v834_v53, %v811_v41  ;;  %v855_v45 = vmul.f32 %v848_v40, %v1588_v50  ;;  %v856_v24 = vmul.f32 %v852_v4, %v1590_v51  ;;  %v265_v41 = vld [vmem:[%s1896_s2] sm:$0x3] }
  0x5c   : > { %v843_v22 = vadd.f32 %v835_v2, %v812_v17  ;;  %v857_v9 = vmul.f32 %v848_v40, %v1931_v25  ;;  %v858_v32 = vmul.f32 %v852_v4, %v1932_v63  ;;  %v874_v33 = vmul.f32 %v867_v42, %v1610_v1 }
  0x5d   : > { %v875_v36 = vmul.f32 %v871_v30, %v1612_v3  ;;  %v1934_v61 = vunpack.c.l.bf16 %v1933_v37  ;;  %v1935_v62 = vunpack.c.h.bf16 %v1933_v37  ;;  %v859_v7 = vadd.f32 %v855_v45, %v840_v31 }
  0x5e   : > { %v860_v12 = vadd.f32 %v856_v24, %v841_v55  ;;  %v861_v18 = vadd.f32 %v857_v9, %v842_v8  ;;  %v862_v13 = vadd.f32 %v858_v32, %v843_v22  ;;  %v886_v10 = vrot.slane %v262_v23, %v1459_v6 }
  0x5f   : > { %v876_v59 = vmul.f32 %v867_v42, %v1934_v61  ;;  %v877_v60 = vmul.f32 %v871_v30, %v1935_v62  ;;  %v890_v11 = vrot.slane %v262_v23, %v1923_v56  ;;  %v917_v34 = vrot.slane %v263_v44, %v1459_v6 }
  0x60   : > { %v921_v35 = vrot.slane %v263_v44, %v1923_v56  ;;  %v878_v26 = vadd.f32 %v874_v33, %v859_v7  ;;  %v879_v19 = vadd.f32 %v875_v36, %v860_v12  ;;  %v893_v20 = vmul.f32 %v886_v10, %v1588_v50 }
  0x61   : > { %v880_v27 = vadd.f32 %v876_v59, %v861_v18  ;;  %v881_v14 = vadd.f32 %v877_v60, %v862_v13  ;;  %v894_v0 = vmul.f32 %v890_v11, %v1590_v51  ;;  %v895_v54 = vmul.f32 %v886_v10, %v1931_v25 }
  0x62   : > { %v896_v39 = vmul.f32 %v890_v11, %v1932_v63  ;;  %v924_v5 = vmul.f32 %v917_v34, %v1610_v1  ;;  %v925_v28 = vmul.f32 %v921_v35, %v1612_v3  ;;  %v1936_v49 = vmov %v1934_v61 }
  0x63   : > { %v926_v48 = vmul.f32 %v917_v34, %v1936_v49  ;;  %v1937_v29 = vmov %v1935_v62  ;;  %v901_v57 = vrot.slane %v893_v20, 1  ;;  %v902_v46 = vrot.slane %v894_v0, 1 }
  0x64   : > { %v927_v38 = vmul.f32 %v921_v35, %v1937_v29  ;;  %v903_v47 = vrot.slane %v895_v54, 1  ;;  %v904_v15 = vrot.slane %v896_v39, 1  ;;  %v932_v21 = vrot.slane %v924_v5, 1  ;;  %v1938_v5 = vld [vmem:[#allocation2_spill] sm:$0xff] }
  0x65   : > { %v933_v58 = vrot.slane %v925_v28, 1  ;;  %v934_v53 = vrot.slane %v926_v48, 1  ;;  %v909_v2 = vadd.f32 %v901_v57, %v878_v26  ;;  %v910_v3 = vadd.f32 %v902_v46, %v879_v19 }
  0x66   : > { %v935_v1 = vrot.slane %v927_v38, 1  ;;  %v911_v52 = vadd.f32 %v903_v47, %v880_v27  ;;  %v912_v16 = vadd.f32 %v904_v15, %v881_v14  ;;  %v948_v17 = vrot.slane %v264_v43, %v1459_v6 }
  0x67   : > { %v952_v40 = vrot.slane %v264_v43, %v1923_v56  ;;  %v940_v4 = vadd.f32 %v932_v21, %v909_v2  ;;  %v941_v42 = vadd.f32 %v933_v58, %v910_v3  ;;  %v979_v44 = vrot.slane %v265_v41, %v1459_v6 }
  0x68   : > { %v942_v30 = vadd.f32 %v934_v53, %v911_v52  ;;  %v943_v31 = vadd.f32 %v935_v1, %v912_v16  ;;  %v955_v55 = vmul.f32 %v948_v17, %v1588_v50  ;;  %v957_v22 = vmul.f32 %v948_v17, %v1931_v25 }
  0x69   : > { %v956_v8 = vmul.f32 %v952_v40, %v1590_v51  ;;  %v958_v23 = vmul.f32 %v952_v40, %v1932_v63  ;;  %v983_v45 = vrot.slane %v265_v41, %v1923_v56  ;;  %v1383_v26 = vmov 1983009808  }
  0x6a   : > { %v963_v24 = vrot.slane %v955_v55, 2  ;;  %v965_v32 = vrot.slane %v957_v22, 2  ;;  %v1028_v19 = vunpack.c.l.s4 %v1383_v26  ;;  %vm1045_vm1 = vcmask 125954  }
  0x6b   : > { %v964_v9 = vrot.slane %v956_v8, 2  ;;  %v966_v33 = vrot.slane %v958_v23, 2  ;;  %vm1046_vm2 = vmor %vm1045_vm1, %vm1044_vm0  ;;  %v1939_v47 = vlaneseq (!%p1275_p8)  ;;  %v1384_v15 = vmov (!%p1275_p8), 0.0  }
  0x6c   : > { %v971_v36 = vadd.f32 %v963_v24, %v940_v4  ;;  %v973_v61 = vadd.f32 %v965_v32, %v942_v30  ;;  %v1029_v27 = vunpack.c.0.s8 %v1028_v19 }
  0x6d   : > { %v972_v37 = vadd.f32 %v964_v9, %v941_v42  ;;  %v974_v59 = vadd.f32 %v966_v33, %v943_v31  ;;  %vm1055_vm3 = vcmp.lt.s32.totalorder (!%p1275_p8), %v1939_v47, 144 }
  0x6e   : > { %v986_v50 = vadd.f32 %v979_v44, %v971_v36  ;;  %v988_v51 = vadd.f32 %v979_v44, %v973_v61  ;;  %v1032_v28 = vsub.s32 %v1029_v27, %v1938_v5  ;;  %1057 = vst.msk [vmem:[%s1516_s6] sm:$0x3] (!%p1275_p8), %vm1055_vm3, %v1384_v15 }
  0x6f   : > { %v987_v62 = vadd.f32 %v983_v45, %v972_v37  ;;  %v989_v60 = vadd.f32 %v983_v45, %v974_v59 }
  0x70   : > { %v1269_v25 = vmul.f32 -1.442695, %v986_v50  ;;  %v1271_v63 = vmul.f32 -1.442695, %v988_v51 }
  0x71   : > { %v1270_v7 = vmul.f32 -1.442695, %v987_v62  ;;  %v1272_v12 = vmul.f32 -1.442695, %v989_v60 }
  0x72   : > { %1327 = vpow2.f32 %v1269_v25 }
  0x73   : > { %1329 = vpow2.f32 %v1270_v7 }
  0x74   : > { %1331 = vpow2.f32 %v1271_v63 }
  0x75   : > { %1333 = vpow2.f32 %v1272_v12 }
  0x7c   : > { %v1328_v6 = vpop.eup %1327 }
  0x7d   : > { %v1330_v56 = vpop.eup %1329  ;;  %v1002_v18 = vadd.f32 1.0, %v1328_v6 }
  0x7e   : > { %v1332_v13 = vpop.eup %1331  ;;  %v1003_v10 = vadd.f32 1.0, %v1330_v56 }
  0x7f   : > { %v1334_v11 = vpop.eup %1333  ;;  %v1004_v34 = vadd.f32 1.0, %v1332_v13  ;;  %1335 = vrcp.f32 %v1002_v18 }
  0x80   : > { %v1005_v35 = vadd.f32 1.0, %v1334_v11  ;;  %1337 = vrcp.f32 %v1003_v10 }
  0x81   : > { %1339 = vrcp.f32 %v1004_v34 }
  0x82   : > { %1341 = vrcp.f32 %v1005_v35 }
  0x89   : > { %v1336_v14 = vpop.eup %1335 }
  0x8a   : > { %v1338_v20 = vpop.eup %1337  ;;  %v1014_v0 = vmul.f32 %v1336_v14, %v986_v50 }
  0x8b   : > { %v1340_v54 = vpop.eup %1339  ;;  %v1015_v39 = vmul.f32 %v1338_v20, %v987_v62 }
  0x8c   : > { %v1342_v49 = vpop.eup %1341  ;;  %v1016_v48 = vmul.f32 %v1340_v54, %v988_v51 }
  0x8d   : > { %v1017_v29 = vmul.f32 %v1342_v49, %v989_v60  ;;  %v1273_v38 = vpack.c.bf16 %v1015_v39, %v1014_v0  ;;  %1052 = sbr.rel (%p1275_p8) target bundleno = 148 (0x94), region = 36 }
  0x8f   : > { %v1033_v43 = vrot.slane %v1273_v38, %v1032_v28  ;;  %v1274_v57 = vpack.c.bf16 %v1017_v29, %v1016_v48 }
  0x91   : > { %v1041_v46 = vrot.slane %v1274_v57, %v1032_v28  ;;  %1047 = vst.msk [vmem:[%s233_s16] sm:$0xf] %vm1046_vm2, %v1033_v43 }
  0x93   : > { %1048 = vst.msk [vmem:[%s233_s16 + $0x4] sm:$0xf] %vm1046_vm2, %v1041_v46 }
  0x94 PF: > { %vm1059_vm4 = vcmask 1043456   ;;  %vm1069_vm5 = vcmask 125952   ;;  %v1385_v40 = vmov 1966171168   ;;  %v1940_v24 = vld [vmem:[#allocation2_spill] sm:$0xff]  ;;  %v1941_v61 = vlaneseq }
  0x95   : > { %v1060_v21 = vsel %vm1059_vm4, %v1014_v0, 0.0  ;;  %v1061_v58 = vsel %vm1059_vm4, %v1016_v48, 0.0  ;;  %v1070_v53 = vsel %vm1069_vm5, %v1015_v39, 0.0  ;;  %v1071_v1 = vsel %vm1069_vm5, %v1017_v29, 0.0  ;;  %v1058_v36 = vld [vmem:[%s1516_s6] sm:$0x3] }
  0x96   : > { %v1062_v2 = vadd.f32 %v1061_v58, %v1060_v21  ;;  %v1072_v3 = vadd.f32 %v1071_v1, %v1070_v53  ;;  %v1083_v4 = vunpack.c.l.s4 %v1385_v40  ;;  %vm1100_vm6 = vcmp.lt.s32.totalorder %v1941_v61, 144 }
  0x98   : > { %v1063_v52 = vrot.slane %v1062_v2, 4  ;;  %v1073_v16 = vrot.slane %v1072_v3, 4  ;;  %v1084_v8 = vunpack.c.0.s8 %v1083_v4 }
  0x9a   : > { %v1064_v41 = vadd.f32 %v1063_v52, %v1062_v2  ;;  %v1074_v17 = vadd.f32 %v1073_v16, %v1072_v3  ;;  %v1087_v9 = vsub.s32 %v1084_v8, %v1940_v24 }
  0x9c   : > { %v1065_v42 = vrot.slane %v1064_v41, 2  ;;  %v1075_v30 = vrot.slane %v1074_v17, 2 }
  0x9e   : > { %v1066_v31 = vadd.f32 %v1065_v42, %v1064_v41  ;;  %v1076_v55 = vadd.f32 %v1075_v30, %v1074_v17 }
  0xa0   : > { %v1067_v22 = vrot.slane %v1066_v31, 1  ;;  %v1077_v23 = vrot.slane %v1076_v55, 1 }
  0xa2   : > { %v1068_v44 = vadd.f32 %v1067_v22, %v1066_v31  ;;  %v1078_v45 = vadd.f32 %v1077_v23, %v1076_v55 }
  0xa4   : > { %v1081_v32 = vcombine.low %v1068_v44, %v1078_v45 }
  0xa6   : > { %v1088_v33 = vrot.slane %v1081_v32, %v1087_v9 }
  0xa8   : > { %v1095_v37 = vrot.slane %v1088_v33, %v1087_v9 }
  0xaa   : > { %v1097_v59 = vadd.f32 %v1095_v37, %v1058_v36 }
  0xac   : > { %1102 = vst.msk [vmem:[%s1516_s6] sm:$0x3] %vm1100_vm6, %v1097_v59 }
  0xad PF: > { %s15_s19 = sadd.s32 1, %s1381_s19   ;;  %s1942_s15 = smov %s1373_s17 }
  0xae   : > { %p12_p9 = scmp.ge.s32.totalorder %s15_s19, 6   ;;  %s1943_s16 = smov %s1377_s18 }
  0xaf   : > { %s1944_s17 = smov %s1947_s20  ;;  %s1945_s18 = smov %s1951_s21 }
  0xb0   :  { %14 = sbr.rel (!%p12_p9) target bundleno = 3 (0x3), region = 82 }

// kernel: forward.27
= control target key start
LH: loop header
LB: loop body
LE: loop exit
PB: predicated region body
PF: predicated region fallthrough
CT: control target
= control target key end

     0   :  { %8 = vsyncpa [#allocation3], 0  ;;  %s671_s0 = inlined_call_operand.vmem [shape: bf16[2,16,128], index: 0, kind: input, shape index: {}]   ;;  %s672_s1 = inlined_call_operand.vmem [shape: bf16[128,128], index: 1, kind: input, shape index: {}]   ;;  %s673_s2 = inlined_call_operand.vmem [shape: f32[1,128], index: 2, kind: input, shape index: {}]   ;;  %s674_s3 = inlined_call_operand.hbm [shape: f32[2,1,128], index: 3, kind: output, shape index: {}]  }
   0x1   :  { %10 = vsyncpa [#allocation3 + $0x1], 0  ;;  %s544_s12 = smov 0   ;;  %s546_s13 = smov 0  }
   0x2   :  { %s548_s14 = smov 0   ;;  %s550_s15 = smov 0  }
   0x3 LB: > { %s565_s16 = sadd.s32 4294967295, %s519_s15   ;;  %s357_s17 = sadd.s32 4294967294, %s519_s15   ;;  %s519_s15 = sphi %s550_s15, %s680_s15   ;;  %s515_s14 = sphi %s548_s14, %s679_s14   ;;  %s511_s13 = sphi %s546_s13, %s678_s13   ;;  %s507_s12 = sphi %s544_s12, %s677_s12  }
   0x4   : > { %s569_s18 = sadd.s32 1, %s519_s15   ;;  %s91_s19 = sadd.s32 1, %s515_s14 }
   0x5   : > { %s88_s20 = ssub.s32 %s519_s15, %s569_s18  ;;  %p101_p0 = scmp.ne.s32.totalorder %s515_s14, %s511_s13 }
   0x6   : > { %p89_p1 = scmp.eq.s32.totalorder %s88_s20, 0  ;;  %p102_p2 = scmp.eq.s32.totalorder %s565_s16, 1 }
   0x7   : > { %p107_p3 = scmp.ne.s32.totalorder %s511_s13, %s507_s12  ;;  %p108_p4 = scmp.eq.s32.totalorder %s357_s17, 1 }
   0x8   : > { %s580_s21 = scalar_select %p89_p1, %s515_s14, %s91_s19  }
   0x9   : > { %p582_p5 = por %p102_p2, %p101_p0  ;;  %p586_p6 = por %p108_p4, %p107_p3 }
   0xa   : > { %p360_p7 = scmp.ge.s32.totalorder %s519_s15, 1  ;;  %p140_p8 = scmp.lt.s32.totalorder %s519_s15, 3 }
   0xc   : > { %p141_p9 = pnand %p360_p7, %p140_p8 }
   0xd   : > { %v449_v0 = vld [vmem:[%s672_s1] sm:$0xff] (!%p141_p9)   ;;  %v521_v1 = vmov (!%p141_p9), 0.0   ;;  %v450_v2 = vld [vmem:[%s672_s1 + $0x8] sm:$0xff] (!%p141_p9)   ;;  %vm522_vm0 = vmmov (!%p141_p9), 0   ;;  %p163_p10 = scmp.lt.s32.totalorder (!%p141_p9), %s565_s16, 1  ;;  %v451_v3 = vld [vmem:[%s672_s1 + $0x10] sm:$0xff] (!%p141_p9)  }
   0xe   : > { %144 = sbr.rel (%p141_p9) target bundleno = 274 (0x112), region = 32  ;;  %388 = vmatprep.subr.bf16.mxu0 (!%p141_p9), %v521_v1  ;;  %404 = vmatprep.mubr.msk.bf16.mxu0 (!%p141_p9), %vm522_vm0, %v521_v1  ;;  %v452_v7 = vld [vmem:[%s672_s1 + $0x18] sm:$0xff] (!%p141_p9)   ;;  %v453_v10 = vld [vmem:[%s672_s1 + $0x20] sm:$0xff] (!%p141_p9)   ;;  %v454_v13 = vld [vmem:[%s672_s1 + $0x28] sm:$0xff] (!%p141_p9)   ;;  %s161_s27 = sand.u32 (!%p141_p9), 1, %s511_s13  }
   0xf   : > { %389 = vmatpush3.bf16.msra.mxu0 (!%p141_p9), %v449_v0  ;;  %v455_v16 = vld [vmem:[%s672_s1 + $0x30] sm:$0xff] (!%p141_p9)   ;;  %v456_v19 = vld [vmem:[%s672_s1 + $0x38] sm:$0xff] (!%p141_p9)   ;;  %v199_v21 = vld [vmem:[%s673_s2] sm:$0x1] (!%p141_p9)  ;;  %s371_s30 = sshll.u32 (!%p141_p9), %s565_s16, 4  ;;  %s290_s9 = scalar_lea.sflag (!%p141_p9), [#allocation3], %s161_s27 }
  0x10   : > { %390 = vmatprep.subr.bf16.mxu0 (!%p141_p9), %v521_v1  ;;  %s629_s8 = scalar_lea.hbm (!%p141_p9), %s674_s3, %s371_s30  ;;  %s523_s10 = smov (!%p141_p9), [#allocation2]  }
  0x11   : > { %s461_s11 = sshll.u32 (!%p141_p9), %s523_s10, 4  ;;  %s462_s11 = int_to_ptr.vmem [resolvable:$false] %s461_s11 }
  0x12   : > { %s463_s17 = scalar_lea.vmem (!%p141_p9), %s462_s11, 32 }
  0x13   : > { %391 = vmatpush3.bf16.msra.mxu0 (!%p141_p9), %v450_v2 }
  0x14   : > { %392 = vmatprep.subr.bf16.mxu0 (!%p141_p9), %v521_v1 }
  0x15   : > { %s164_s28 = scalar_select %p163_p10, %s565_s16, 1 }
  0x17   : > { %s374_s4 = sshll.u32 %s164_s28, 3  ;;  %393 = vmatpush3.bf16.msra.mxu0 %v451_v3 }
  0x18   : > { %s167_s7 = scalar_lea.vmem %s671_s0, %s374_s4  ;;  %394 = vmatprep.subr.bf16.mxu0 %v521_v1  ;;  %s162_s4 = scalar_lea.vmem [#allocation2], %s161_s27 }
  0x19   : > { %v376_v4 = vld [vmem:[%s167_s7] sm:$0xff]   ;;  %s302_s5 = sshll.u32 %s162_s4, 4  ;;  %s631_s5 = int_to_ptr.vmem [resolvable:$true] %s302_s5 }
  0x1a   : > { %v377_v5 = vunpack.c.l.bf16 %v376_v4  ;;  %v378_v6 = vunpack.c.h.bf16 %v376_v4  ;;  %s457_s16 = scalar_lea.vmem %s631_s5, 16  ;;  %p464_p0 = scmp.lt.s32.totalorder %s631_s5, %s462_s11 }
  0x1b   : > { %395 = vmatpush3.bf16.msra.mxu0 %v452_v7  ;;  %p458_p11 = scmp.ne.s32.totalorder %s631_s5, %s457_s16  ;;  %p465_p1 = scmp.lt.s32.totalorder %s463_s17, %s457_s16 }
  0x1c   : > { %v173_v8 = vadd.f32 %v378_v6, %v377_v5  ;;  %396 = vmatprep.subr.bf16.mxu0 %v521_v1 }
  0x1d   : > { %p459_p12 = pnand %p458_p11, %p582_p5  ;;  %p466_p2 = por %p465_p1, %p464_p0 }
  0x1e   : > { %v174_v9 = vrot.slane %v173_v8, 4 }
  0x1f   : > { %397 = vmatpush3.bf16.msra.mxu0 %v453_v10  ;;  %p460_p13 = pneg %p459_p12 }
  0x20   : > { %v175_v11 = vadd.f32 %v174_v9, %v173_v8  ;;  %398 = vmatprep.subr.bf16.mxu0 %v521_v1 }
  0x21   : > { %p467_p3 = pnand %p466_p2, %p460_p13 }
  0x22   : > { %v176_v12 = vrot.slane %v175_v11, 2 }
  0x23   : > { %399 = vmatpush3.bf16.msra.mxu0 %v454_v13 }
  0x24   : > { %v177_v14 = vadd.f32 %v176_v12, %v175_v11  ;;  %400 = vmatprep.subr.bf16.mxu0 %v521_v1 }
  0x26   : > { %v178_v15 = vrot.slane %v177_v14, 1 }
  0x27   : > { %401 = vmatpush3.bf16.msra.mxu0 %v455_v16 }
  0x28   : > { %v179_v17 = vadd.f32 %v178_v15, %v177_v14  ;;  %402 = vmatprep.subr.bf16.mxu0 %v521_v1 }
  0x2a   : > { %v181_v18 = vmul.f32 0.0625, %v179_v17 }
  0x2b   : > { %403 = vmatpush3.bf16.msra.mxu0 %v456_v19 }
  0x2c   : > { %v182_v20 = vpack.c.bf16 %v181_v18, %v181_v18 }
  0x2e   : > { %405 = vmatmul.mubr.bf16.vlgmr.msra.gmra.mrb[0].mxu0 %v182_v20 }
 0x101   : > { %v282_v22 = vpop.f32.mrb[0].mxu0 }
 0x102   : > { %v283_v23 = vadd.f32 %v282_v22, %v199_v21  ;;  %v406_v24 = vpop.f32.mrb[1].mxu0 }
 0x103   : > { %v285_v25 = vpop.f32.mrb[2].mxu0 }
 0x104   : > { %288 = vst [vmem:[%s162_s4] sm:$0x1] %v283_v23  ;;  %v407_v26 = vpop.f32.mrb[3].mxu0 }
 0x105   : > { %470 = shalt.err (!%p467_p3)
}
 0x106   : > { %s471_s19 = scalar_lea.hbm %s629_s8, 16  ;;  %s475_s25 = scalar_lea.hbm %s674_s3, 32 }
 0x107   : > { %p472_p4 = scmp.ne.s32.totalorder %s629_s8, %s471_s19  ;;  %p476_p9 = scmp.lt.u32.totalorder %s629_s8, %s674_s3 }
 0x108   : > { %p477_p10 = scmp.lt.u32.totalorder %s475_s25, %s471_s19  ;;  %p479_p12 = scmp.lt.u32.totalorder %s471_s19, %s629_s8 }
 0x109   : > { %p473_p7 = pnand %p472_p4, %p582_p5 }
 0x10a   : > { %p478_p11 = por %p477_p10, %p476_p9 }
 0x10b   : > { %p474_p8 = pneg %p473_p7 }
 0x10c   : > { %p480_p13 = por %p479_p12, %p478_p11 }
 0x10e   : > { %p481_p0 = pnand %p480_p13, %p474_p8 }
 0x110   : > { %484 = shalt.err (!%p481_p0)
}
 0x111   : > { %408 = dma.vmem_to_hbm [thread:$0]  (%p582_p5), %s631_s5, 16, %s629_s8, %s290_s9  }
 0x112 PF: > { %p414_p1 = scmp.ge.s32.totalorder %s519_s15, 2  ;;  %s314_s28 = sand.u32 1, %s507_s12  }
 0x113   : > { %s315_s29 = scalar_lea.sflag [#allocation3], %s314_s28 }
 0x114   : > { %p411_p2 = pnand %p414_p1, %p586_p6 }
 0x116   : > { %502 = dma.done.wait (!%p411_p2), %s315_s29, 16  }
 0x117   : > { %504 = vsyncadd (!%p411_p2), %s315_s29, 4294967280  ;;  %p13_p3 = scmp.ge.s32.totalorder %s569_s18, 4   ;;  %s677_s12 = smov %s511_s13 }
 0x118   : > { %s678_s13 = smov %s515_s14  ;;  %s679_s14 = smov %s580_s21 }
 0x119   : > { %s680_s15 = smov %s569_s18  ;;  %15 = sbr.rel (!%p13_p3) target bundleno = 3 (0x3), region = 67 }
 0x120   :  { %319 = vsyncpa [#allocation3], 1 }
 0x121   :  { %321 = vsyncpa [#allocation3 + $0x1], 1 }

</bundles_post_ra>
